<compile_context>
chip_gen: v7x
topology: tpu7x:2x2x1
jax: 0.10.0
libtpu: 0.0.40
codegen_flags: <defaults>
</compile_context>

<pallas_src>
import functools

import jax
import jax.numpy as jnp
from jax.experimental import pallas as pl
from jax.experimental.pallas import tpu as pltpu

# Keep the XLA reference matmuls in full f32 so the correctness check against
# the f32 Pallas kernel is tight.
jax.config.update("jax_default_matmul_precision", "highest")

KT = 25        # temporal conv kernel width  (Conv2d(1, 40, (1, 25)))
NF = 40        # shallownet channel count
POOL_K = 75    # AvgPool2d kernel (time)
POOL_S = 15    # AvgPool2d stride (time)
BN_EPS = 1e-5
LN_EPS = 1e-5


# ---------------------------------------------------------------------------
# math helpers (used both inside the kernel and in the pure-JAX reference)
# ---------------------------------------------------------------------------
def _elu(x):
    return jnp.where(x > 0, x, jnp.exp(jnp.minimum(x, 0.0)) - 1.0)


def _gelu(x):
    # TODO(synk): PyTorch nn.GELU defaults to the exact erf formulation; the
    # tanh approximation is used here for a guaranteed Mosaic lowering.
    c = jnp.float32(0.7978845608028654)  # sqrt(2/pi)
    return 0.5 * x * (1.0 + jnp.tanh(c * (x + 0.044715 * x * x * x)))


def _layernorm(x, gamma, beta):
    mu = jnp.mean(x, axis=-1, keepdims=True)
    var = jnp.mean((x - mu) ** 2, axis=-1, keepdims=True)
    return (x - mu) * jax.lax.rsqrt(var + LN_EPS) * gamma + beta


def _log_softmax_last(x):
    m = jnp.max(x, axis=-1, keepdims=True)
    s = x - m
    return s - jnp.log(jnp.sum(jnp.exp(s), axis=-1, keepdims=True))


# ---------------------------------------------------------------------------
# The fused kernel: one grid step == one batch element, everything in VMEM.
# ---------------------------------------------------------------------------
def _eeg_conformer_kernel(
        cols_ref, w_embed_ref, b_embed_ref, pool_t_ref, w_proj_ref, b_proj_ref,
        s_scaled_ref, s_t_ref,
        ln1_g_ref, ln1_b_ref, wq_ref, bq_ref, wk_ref, bk_ref, wv_ref, bv_ref,
        wo_ref, bo_ref, ln2_g_ref, ln2_b_ref, wff1_ref, bff1_ref, wff2_ref,
        bff2_ref, w_fc1_ref, b_fc1_ref, w_fc2_ref, b_fc2_ref, w_fc3_ref,
        b_fc3_ref, out_ref, *, depth, n_tok, emb):
    f32 = jnp.float32

    # ---- PatchEmbedding: temporal+spatial conv + BN folded into one matmul ----
    x = cols_ref[0]                                                   # (Wt, Cpad)
    h = jnp.dot(x, w_embed_ref[...], preferred_element_type=f32) + b_embed_ref[...]
    h = _elu(h)                                                       # (Wt, NF)
    # AvgPool over time as a (Wp, Wt) matmul -> tokens on rows, NF on lanes.
    h = jnp.dot(pool_t_ref[...], h, preferred_element_type=f32)      # (Ntok, NF)
    xs = jnp.dot(h, w_proj_ref[...], preferred_element_type=f32) + b_proj_ref[...]  # (Ntok, emb)

    s_scaled = s_scaled_ref[...]   # (emb, heads): head-sum matrix, / sqrt(emb)
    s_t = s_t_ref[...]             # (heads, emb): head-broadcast matrix

    # ---- Transformer encoder (unrolled over depth; intermediates stay in VMEM) ----
    for d in range(depth):
        hh = _layernorm(xs, ln1_g_ref[d], ln1_b_ref[d])
        q = jnp.dot(hh, wq_ref[d], preferred_element_type=f32) + bq_ref[d]
        k = jnp.dot(hh, wk_ref[d], preferred_element_type=f32) + bk_ref[d]
        v = jnp.dot(hh, wv_ref[d], preferred_element_type=f32) + bv_ref[d]

        # Multi-head attention, unrolled over key tokens (Ntok is tiny).  For
        # each key j the energies of ALL heads come from a single
        # (Ntok, emb)@(emb, heads) matmul via the head-sum matrix, avoiding
        # per-head (Ntok x d) MXU matmuls and head reshapes.
        # NOTE: EEGConformer scales logits by emb_size**-0.5 (folded into
        # s_scaled), not head_dim**-0.5 -- do not "fix" this.
        e_js = [jnp.dot(q * k[j:j + 1, :], s_scaled, preferred_element_type=f32)
                for j in range(n_tok)]                                # each (Ntok, heads)
        m = e_js[0]
        for j in range(1, n_tok):
            m = jnp.maximum(m, e_js[j])
        ex_js = [jnp.exp(e - m) for e in e_js]
        denom = ex_js[0]
        for j in range(1, n_tok):
            denom = denom + ex_js[j]
        inv_denom = 1.0 / denom
        ctx = jnp.zeros_like(q)
        for j in range(n_tok):
            att_j = ex_js[j] * inv_denom                              # (Ntok, heads)
            ctx = ctx + jnp.dot(att_j, s_t, preferred_element_type=f32) * v[j:j + 1, :]

        xs = jnp.dot(ctx, wo_ref[d], preferred_element_type=f32) + bo_ref[d] + xs

        hh = _layernorm(xs, ln2_g_ref[d], ln2_b_ref[d])
        hh = _gelu(jnp.dot(hh, wff1_ref[d], preferred_element_type=f32) + bff1_ref[d])
        xs = jnp.dot(hh, wff2_ref[d], preferred_element_type=f32) + bff2_ref[d] + xs

    # ---- Classification head (Flatten expressed as per-token matmul accumulation,
    #      so no lane-crossing reshape is needed inside the kernel) ----
    acc = b_fc1_ref[...]                                              # (1, 256)
    for p in range(n_tok):
        acc = acc + jnp.dot(xs[p:p + 1, :],
                            w_fc1_ref[p * emb:(p + 1) * emb, :],
                            preferred_element_type=f32)
    hc = _elu(acc)
    hc = _elu(jnp.dot(hc, w_fc2_ref[...], preferred_element_type=f32) + b_fc2_ref[...])
    logits = jnp.dot(hc, w_fc3_ref[...], preferred_element_type=f32) + b_fc3_ref[...]
    out_ref[0] = _log_softmax_last(logits)                            # (1, cls)


def _full_block_spec(arr):
    nd = arr.ndim
    return pl.BlockSpec(arr.shape, lambda b: (0,) * nd)


# ---------------------------------------------------------------------------
# Parameters: deterministic synthetic init (PyTorch-style fan-in uniform),
# with conv+BN folding, pooling matrix and head-sum matrices precomputed.
# Returns (params_for_kernel, raw_params_for_reference).
# ---------------------------------------------------------------------------
def init_params(key, nCh, nTime, cls, emb, depth, heads):
    assert emb % heads == 0
    Wt = nTime - KT + 1
    Wp = (Wt - POOL_K) // POOL_S + 1
    assert Wp >= 1, "nTime too small for the (1,75)/(1,15) average pool"
    # All pooling windows are full, so dividing by POOL_K matches nn.AvgPool2d.
    assert POOL_K + (Wp - 1) * POOL_S <= Wt
    head_dim = emb // heads

    keys = iter(jax.random.split(key, 16 + 12 * depth))

    def u(shape, fan_in):
        bound = 1.0 / (fan_in ** 0.5)
        return jax.random.uniform(next(keys), shape, jnp.float32, -bound, bound)

    # PatchEmbedding raw params (PyTorch-equivalent shapes)
    w_temporal = u((KT, NF), KT)              # Conv2d(1, 40, (1, 25))
    b_temporal = u((NF,), KT)
    w_spatial = u((NF, nCh, NF), NF * nCh)    # Conv2d(40, 40, (nCh, 1)): [f_in, c, f_out]
    b_spatial = u((NF,), NF * nCh)
    # BatchNorm2d(40), inference-mode running statistics
    gamma = jnp.ones((NF,), jnp.float32)
    beta = jnp.zeros((NF,), jnp.float32)
    rmean = 0.1 * jax.random.normal(next(keys), (NF,), jnp.float32)
    rvar = 1.0 + 0.1 * jax.random.uniform(next(keys), (NF,), jnp.float32)
    scale = gamma * jax.lax.rsqrt(rvar + BN_EPS)
    shift = beta - rmean * scale

    # Fold temporal conv o spatial conv o BatchNorm into a single affine:
    #   h[b,t,g] = sum_{c,k} x[b,c,t+k] * w_embed[c*KT+k, g] + b_embed[g]
    w_comb = jnp.einsum("kf,fcg->ckg", w_temporal, w_spatial).reshape(nCh * KT, NF)
    b_comb = jnp.einsum("f,fcg->g", b_temporal, w_spatial) + b_spatial
    w_embed = w_comb * scale[None, :]
    b_embed = (b_comb * scale + shift).reshape(1, NF)
    cpad = ((nCh * KT + 127) // 128) * 128
    w_embed = jnp.pad(w_embed, ((0, cpad - nCh * KT), (0, 0)))   # lane-aligned K

    # AvgPool2d((1,75),(1,15)) as a (Wp, Wt) matrix applied from the left.
    t_idx = jnp.arange(Wt)[None, :]
    p_idx = jnp.arange(Wp)[:, None]
    pool_t = ((t_idx >= p_idx * POOL_S) & (t_idx < p_idx * POOL_S + POOL_K))
    pool_t = pool_t.astype(jnp.float32) / float(POOL_K)

    # Conv2d(40, emb, (1,1)) projection
    w_proj = u((NF, emb), NF)
    b_proj = u((emb,), NF).reshape(1, emb)

    # Head-sum matrices: s_mat[e, h] = 1 iff lane e belongs to head h
    # (rearrange 'b n (h d) -> b h n d' => head h owns lanes [h*d, (h+1)*d)).
    e_ids = jnp.arange(emb)[:, None]
    h_ids = jnp.arange(heads)[None, :]
    s_mat = (e_ids // head_dim == h_ids).astype(jnp.float32)
    s_scaled = s_mat / (emb ** 0.5)   # EEGConformer divides energies by emb_size**0.5
    s_t = s_mat.T

    ff = 4 * emb

    def stack(fn):
        return jnp.stack([fn() for _ in range(depth)], axis=0)

    p = dict(
        w_embed=w_embed, b_embed=b_embed, pool_t=pool_t,
        w_proj=w_proj, b_proj=b_proj, s_scaled=s_scaled, s_t=s_t,
        ln1_g=jnp.ones((depth, 1, emb), jnp.float32),
        ln1_b=jnp.zeros((depth, 1, emb), jnp.float32),
        wq=stack(lambda: u((emb, emb), emb)), bq=stack(lambda: u((1, emb), emb)),
        wk=stack(lambda: u((emb, emb), emb)), bk=stack(lambda: u((1, emb), emb)),
        wv=stack(lambda: u((emb, emb), emb)), bv=stack(lambda: u((1, emb), emb)),
        wo=stack(lambda: u((emb, emb), emb)), bo=stack(lambda: u((1, emb), emb)),
        ln2_g=jnp.ones((depth, 1, emb), jnp.float32),
        ln2_b=jnp.zeros((depth, 1, emb), jnp.float32),
        w_ff1=stack(lambda: u((emb, ff), emb)), b_ff1=stack(lambda: u((1, ff), emb)),
        w_ff2=stack(lambda: u((ff, emb), ff)), b_ff2=stack(lambda: u((1, emb), ff)),
    )
    in_features = Wp * emb
    p["w_fc1"] = u((in_features, 256), in_features)
    p["b_fc1"] = u((256,), in_features).reshape(1, 256)
    p["w_fc2"] = u((256, 32), 256)
    p["b_fc2"] = u((32,), 256).reshape(1, 32)
    p["w_fc3"] = u((32, cls), 32)
    p["b_fc3"] = u((cls,), 32).reshape(1, cls)

    raw = dict(w_temporal=w_temporal, b_temporal=b_temporal,
               w_spatial=w_spatial, b_spatial=b_spatial,
               gamma=gamma, beta=beta, rmean=rmean, rvar=rvar)
    return p, raw


# ---------------------------------------------------------------------------
# Forward pass: one im2col in the wrapper, then a single fused pallas_call.
# ---------------------------------------------------------------------------
def eeg_conformer_forward(x_nchw, params):
    B, _, nCh, nTime = x_nchw.shape
    Wt = nTime - KT + 1
    Wp = (Wt - POOL_K) // POOL_S + 1
    cpad = params["w_embed"].shape[0]
    emb = params["w_proj"].shape[1]
    depth = params["wq"].shape[0]
    cls = params["w_fc3"].shape[1]

    # im2col for the fused temporal+spatial conv: cols[b, t, c*KT + k] = x[b,0,c,t+k]
    x2 = x_nchw[:, 0]                                        # (B, nCh, nTime)
    idx = jnp.arange(Wt)[:, None] + jnp.arange(KT)[None, :]  # (Wt, KT)
    patches = x2[:, :, idx]                                  # (B, nCh, Wt, KT)
    cols = patches.transpose(0, 2, 1, 3).reshape(B, Wt, nCh * KT)
    cols = jnp.pad(cols, ((0, 0), (0, 0), (0, cpad - nCh * KT)))

    operands = (
        cols, params["w_embed"], params["b_embed"], params["pool_t"],
        params["w_proj"], params["b_proj"], params["s_scaled"], params["s_t"],
        params["ln1_g"], params["ln1_b"], params["wq"], params["bq"],
        params["wk"], params["bk"], params["wv"], params["bv"],
        params["wo"], params["bo"], params["ln2_g"], params["ln2_b"],
        params["w_ff1"], params["b_ff1"], params["w_ff2"], params["b_ff2"],
        params["w_fc1"], params["b_fc1"], params["w_fc2"], params["b_fc2"],
        params["w_fc3"], params["b_fc3"])

    in_specs = [pl.BlockSpec((1, Wt, cpad), lambda b: (b, 0, 0))]
    # Weights: full-array blocks with constant block index -> DMA'd once, stay
    # resident in VMEM across all grid iterations.
    in_specs += [_full_block_spec(a) for a in operands[1:]]

    kernel = functools.partial(_eeg_conformer_kernel,
                               depth=depth, n_tok=Wp, emb=emb)

    out = pl.pallas_call(
        kernel,
        out_shape=jax.ShapeDtypeStruct((B, 1, cls), jnp.float32),
        grid=(B,),
        in_specs=in_specs,
        out_specs=pl.BlockSpec((1, 1, cls), lambda b: (b, 0, 0)),
        compiler_params=pltpu.CompilerParams(
            # batch axis is independent -> lets v7x shard it over its 2 TCs;
            # on v5e/v6e this is just a cheap sequential grid.
            dimension_semantics=("parallel",)),
    )(*operands)
    return out[:, 0, :]


# ---------------------------------------------------------------------------
# Pure-JAX reference mirroring the original PyTorch module structure (eval mode).
# ---------------------------------------------------------------------------
def reference_forward(x_nchw, params, raw, heads):
    B, _, nCh, nTime = x_nchw.shape
    Wt = nTime - KT + 1
    Wp = (Wt - POOL_K) // POOL_S + 1
    x2 = x_nchw[:, 0]                                         # (B, nCh, nTime)
    idx = jnp.arange(Wt)[:, None] + jnp.arange(KT)[None, :]
    patches = x2[:, :, idx]                                   # (B, nCh, Wt, KT)
    h = jnp.einsum("bctk,kf->bfct", patches, raw["w_temporal"]) \
        + raw["b_temporal"][None, :, None, None]              # Conv2d(1,40,(1,25))
    h = jnp.einsum("bfct,fcg->bgt", h, raw["w_spatial"]) \
        + raw["b_spatial"][None, :, None]                     # Conv2d(40,40,(nCh,1))
    scale = raw["gamma"] * jax.lax.rsqrt(raw["rvar"] + BN_EPS)
    shift = raw["beta"] - raw["rmean"] * scale
    h = h * scale[None, :, None] + shift[None, :, None]       # BatchNorm2d (eval)
    h = _elu(h)
    pidx = jnp.arange(Wp)[:, None] * POOL_S + jnp.arange(POOL_K)[None, :]
    h = jnp.mean(h[:, :, pidx], axis=-1)                      # AvgPool2d -> (B, NF, Wp)
    xs = jnp.einsum("bft,fe->bte", h, params["w_proj"]) + params["b_proj"]  # (B, Wp, emb)

    depth = params["wq"].shape[0]
    emb = xs.shape[-1]
    hd = emb // heads
    for d in range(depth):
        hh = _layernorm(xs, params["ln1_g"][d], params["ln1_b"][d])
        q = hh @ params["wq"][d] + params["bq"][d]
        k = hh @ params["wk"][d] + params["bk"][d]
        v = hh @ params["wv"][d] + params["bv"][d]
        qh = q.reshape(B, Wp, heads, hd).transpose(0, 2, 1, 3)
        kh = k.reshape(B, Wp, heads, hd).transpose(0, 2, 1, 3)
        vh = v.reshape(B, Wp, heads, hd).transpose(0, 2, 1, 3)
        energy = jnp.einsum("bhqd,bhkd->bhqk", qh, kh) / (emb ** 0.5)
        att = jax.nn.softmax(energy, axis=-1)
        ctx = jnp.einsum("bhqk,bhkd->bhqd", att, vh)
        ctx = ctx.transpose(0, 2, 1, 3).reshape(B, Wp, emb)
        xs = ctx @ params["wo"][d] + params["bo"][d] + xs
        hh = _layernorm(xs, params["ln2_g"][d], params["ln2_b"][d])
        hh = _gelu(hh @ params["w_ff1"][d] + params["b_ff1"][d])
        xs = hh @ params["w_ff2"][d] + params["b_ff2"][d] + xs

    flat = xs.reshape(B, Wp * emb)
    hc = _elu(flat @ params["w_fc1"] + params["b_fc1"])
    hc = _elu(hc @ params["w_fc2"] + params["b_fc2"])
    logits = hc @ params["w_fc3"] + params["b_fc3"]
    return jax.nn.log_softmax(logits, axis=-1)


if __name__ == "__main__":
    # Small shapes consistent with the module (nTime >= 99 so the (1,75)/(1,15)
    # average pool produces at least one token; emb divisible by num_heads).
    nCh, nTime, cls = 4, 128, 3
    emb, depth, heads = 40, 2, 10
    B = 2

    key = jax.random.PRNGKey(0)
    kx, kp = jax.random.split(key)
    x = jax.random.normal(kx, (B, 1, nCh, nTime), jnp.float32)   # NCHW like PyTorch
    params, raw = init_params(kp, nCh, nTime, cls, emb, depth, heads)

    fwd = jax.jit(eeg_conformer_forward)
    out = jax.block_until_ready(fwd(x, params))

    assert out.shape == (B, cls), out.shape
    assert bool(jnp.all(jnp.isfinite(out))), "non-finite output"
    # log-softmax rows must exponentiate to probability simplexes
    assert bool(jnp.allclose(jnp.sum(jnp.exp(out), axis=-1), 1.0, atol=1e-3)), "bad log-softmax"

    # Correctness against a pure-JAX implementation of the original module.
    ref = jax.block_until_ready(reference_forward(x, params, raw, heads))
    assert bool(jnp.allclose(out, ref, atol=2e-3, rtol=2e-3)), (
        "kernel/reference mismatch: max |diff| = "
        + str(float(jnp.max(jnp.abs(out - ref)))))

    print("KERNEL_OK")
</pallas_src>

<mosaic_0001>
module attributes {stable_mosaic.version = 11 : i64} {
  func.func @_eeg_conformer_kernel(%arg0: i32, %arg1: memref<1x104x128xf32, #tpu.memory_space<vmem>>, %arg2: memref<128x40xf32, #tpu.memory_space<vmem>>, %arg3: memref<1x40xf32, #tpu.memory_space<vmem>>, %arg4: memref<2x104xf32, #tpu.memory_space<vmem>>, %arg5: memref<40x40xf32, #tpu.memory_space<vmem>>, %arg6: memref<1x40xf32, #tpu.memory_space<vmem>>, %arg7: memref<40x10xf32, #tpu.memory_space<vmem>>, %arg8: memref<10x40xf32, #tpu.memory_space<vmem>>, %arg9: memref<2x1x40xf32, #tpu.memory_space<vmem>>, %arg10: memref<2x1x40xf32, #tpu.memory_space<vmem>>, %arg11: memref<2x40x40xf32, #tpu.memory_space<vmem>>, %arg12: memref<2x1x40xf32, #tpu.memory_space<vmem>>, %arg13: memref<2x40x40xf32, #tpu.memory_space<vmem>>, %arg14: memref<2x1x40xf32, #tpu.memory_space<vmem>>, %arg15: memref<2x40x40xf32, #tpu.memory_space<vmem>>, %arg16: memref<2x1x40xf32, #tpu.memory_space<vmem>>, %arg17: memref<2x40x40xf32, #tpu.memory_space<vmem>>, %arg18: memref<2x1x40xf32, #tpu.memory_space<vmem>>, %arg19: memref<2x1x40xf32, #tpu.memory_space<vmem>>, %arg20: memref<2x1x40xf32, #tpu.memory_space<vmem>>, %arg21: memref<2x40x160xf32, #tpu.memory_space<vmem>>, %arg22: memref<2x1x160xf32, #tpu.memory_space<vmem>>, %arg23: memref<2x160x40xf32, #tpu.memory_space<vmem>>, %arg24: memref<2x1x40xf32, #tpu.memory_space<vmem>>, %arg25: memref<80x256xf32, #tpu.memory_space<vmem>>, %arg26: memref<1x256xf32, #tpu.memory_space<vmem>>, %arg27: memref<256x32xf32, #tpu.memory_space<vmem>>, %arg28: memref<1x32xf32, #tpu.memory_space<vmem>>, %arg29: memref<32x3xf32, #tpu.memory_space<vmem>>, %arg30: memref<1x3xf32, #tpu.memory_space<vmem>>, %arg31: memref<1x1x3xf32, #tpu.memory_space<vmem>>) attributes {dimension_semantics = [#tpu.dimension_semantics<parallel>], iteration_bounds = array<i64: 2>, scalar_prefetch = 0 : i64, scratch_operands = 0 : i64, tpu.core_type = #tpu.core_type<tc>, window_params = [{transform_indices = @transform_0, window_bounds = array<i64: 1, 104, 128>}, {pipeline_mode = #tpu.pipeline_mode<synchronous>, transform_indices = @transform_1, window_bounds = array<i64: 128, 40>}, {pipeline_mode = #tpu.pipeline_mode<synchronous>, transform_indices = @transform_2, window_bounds = array<i64: 1, 40>}, {pipeline_mode = #tpu.pipeline_mode<synchronous>, transform_indices = @transform_3, window_bounds = array<i64: 2, 104>}, {pipeline_mode = #tpu.pipeline_mode<synchronous>, transform_indices = @transform_4, window_bounds = array<i64: 40, 40>}, {pipeline_mode = #tpu.pipeline_mode<synchronous>, transform_indices = @transform_5, window_bounds = array<i64: 1, 40>}, {pipeline_mode = #tpu.pipeline_mode<synchronous>, transform_indices = @transform_6, window_bounds = array<i64: 40, 10>}, {pipeline_mode = #tpu.pipeline_mode<synchronous>, transform_indices = @transform_7, window_bounds = array<i64: 10, 40>}, {pipeline_mode = #tpu.pipeline_mode<synchronous>, transform_indices = @transform_8, window_bounds = array<i64: 2, 1, 40>}, {pipeline_mode = #tpu.pipeline_mode<synchronous>, transform_indices = @transform_9, window_bounds = array<i64: 2, 1, 40>}, {pipeline_mode = #tpu.pipeline_mode<synchronous>, transform_indices = @transform_10, window_bounds = array<i64: 2, 40, 40>}, {pipeline_mode = #tpu.pipeline_mode<synchronous>, transform_indices = @transform_11, window_bounds = array<i64: 2, 1, 40>}, {pipeline_mode = #tpu.pipeline_mode<synchronous>, transform_indices = @transform_12, window_bounds = array<i64: 2, 40, 40>}, {pipeline_mode = #tpu.pipeline_mode<synchronous>, transform_indices = @transform_13, window_bounds = array<i64: 2, 1, 40>}, {pipeline_mode = #tpu.pipeline_mode<synchronous>, transform_indices = @transform_14, window_bounds = array<i64: 2, 40, 40>}, {pipeline_mode = #tpu.pipeline_mode<synchronous>, transform_indices = @transform_15, window_bounds = array<i64: 2, 1, 40>}, {pipeline_mode = #tpu.pipeline_mode<synchronous>, transform_indices = @transform_16, window_bounds = array<i64: 2, 40, 40>}, {pipeline_mode = #tpu.pipeline_mode<synchronous>, transform_indices = @transform_17, window_bounds = array<i64: 2, 1, 40>}, {pipeline_mode = #tpu.pipeline_mode<synchronous>, transform_indices = @transform_18, window_bounds = array<i64: 2, 1, 40>}, {pipeline_mode = #tpu.pipeline_mode<synchronous>, transform_indices = @transform_19, window_bounds = array<i64: 2, 1, 40>}, {pipeline_mode = #tpu.pipeline_mode<synchronous>, transform_indices = @transform_20, window_bounds = array<i64: 2, 40, 160>}, {pipeline_mode = #tpu.pipeline_mode<synchronous>, transform_indices = @transform_21, window_bounds = array<i64: 2, 1, 160>}, {pipeline_mode = #tpu.pipeline_mode<synchronous>, transform_indices = @transform_22, window_bounds = array<i64: 2, 160, 40>}, {pipeline_mode = #tpu.pipeline_mode<synchronous>, transform_indices = @transform_23, window_bounds = array<i64: 2, 1, 40>}, {pipeline_mode = #tpu.pipeline_mode<synchronous>, transform_indices = @transform_24, window_bounds = array<i64: 80, 256>}, {pipeline_mode = #tpu.pipeline_mode<synchronous>, transform_indices = @transform_25, window_bounds = array<i64: 1, 256>}, {pipeline_mode = #tpu.pipeline_mode<synchronous>, transform_indices = @transform_26, window_bounds = array<i64: 256, 32>}, {pipeline_mode = #tpu.pipeline_mode<synchronous>, transform_indices = @transform_27, window_bounds = array<i64: 1, 32>}, {pipeline_mode = #tpu.pipeline_mode<synchronous>, transform_indices = @transform_28, window_bounds = array<i64: 32, 3>}, {pipeline_mode = #tpu.pipeline_mode<synchronous>, transform_indices = @transform_29, window_bounds = array<i64: 1, 3>}, {transform_indices = @transform_30, window_bounds = array<i64: 1, 1, 3>}]} {
    %c0 = arith.constant 0 : index
    %c0_0 = arith.constant 0 : index
    %c0_1 = arith.constant 0 : index
    %0 = vector.load %arg1[%c0, %c0_0, %c0_1] : memref<1x104x128xf32, #tpu.memory_space<vmem>>, vector<1x104x128xf32>
    %1 = vector.shape_cast %0 : vector<1x104x128xf32> to vector<104x128xf32>
    %c0_2 = arith.constant 0 : index
    %c0_3 = arith.constant 0 : index
    %2 = vector.load %arg2[%c0_2, %c0_3] : memref<128x40xf32, #tpu.memory_space<vmem>>, vector<128x40xf32>
    %cst = arith.constant dense<0.000000e+00> : vector<104x40xf32>
    %3 = tpu.matmul %1, %2, %cst {dimension_numbers = #tpu.dot_dimension_numbers<[1], [0], [0], [1], [0, 0, 1, 1], [], []>, precision = #tpu.contract_precision<fp32>} : vector<104x128xf32>, vector<128x40xf32>, vector<104x40xf32> -> vector<104x40xf32>
    %c0_4 = arith.constant 0 : index
    %c0_5 = arith.constant 0 : index
    %4 = vector.load %arg3[%c0_4, %c0_5] : memref<1x40xf32, #tpu.memory_space<vmem>>, vector<1x40xf32>
    %5 = vector.broadcast %4 : vector<1x40xf32> to vector<104x40xf32>
    %6 = arith.addf %3, %5 : vector<104x40xf32>
    %cst_6 = arith.constant 0.000000e+00 : f32
    %7 = vector.broadcast %cst_6 : f32 to vector<104x40xf32>
    %8 = arith.cmpf ogt, %6, %7 : vector<104x40xf32>
    %cst_7 = arith.constant 0.000000e+00 : f32
    %9 = vector.broadcast %cst_7 : f32 to vector<104x40xf32>
    %10 = arith.minimumf %6, %9 : vector<104x40xf32>
    %11 = math.exp %10 : vector<104x40xf32>
    %cst_8 = arith.constant 1.000000e+00 : f32
    %12 = vector.broadcast %cst_8 : f32 to vector<104x40xf32>
    %13 = arith.subf %11, %12 : vector<104x40xf32>
    %14 = arith.select %8, %6, %13 : vector<104x40xi1>, vector<104x40xf32>
    %c0_9 = arith.constant 0 : index
    %c0_10 = arith.constant 0 : index
    %15 = vector.load %arg4[%c0_9, %c0_10] : memref<2x104xf32, #tpu.memory_space<vmem>>, vector<2x104xf32>
    %cst_11 = arith.constant dense<0.000000e+00> : vector<2x40xf32>
    %16 = tpu.matmul %15, %14, %cst_11 {dimension_numbers = #tpu.dot_dimension_numbers<[1], [0], [0], [1], [0, 0, 1, 1], [], []>, precision = #tpu.contract_precision<fp32>} : vector<2x104xf32>, vector<104x40xf32>, vector<2x40xf32> -> vector<2x40xf32>
    %c0_12 = arith.constant 0 : index
    %c0_13 = arith.constant 0 : index
    %17 = vector.load %arg5[%c0_12, %c0_13] : memref<40x40xf32, #tpu.memory_space<vmem>>, vector<40x40xf32>
    %cst_14 = arith.constant dense<0.000000e+00> : vector<2x40xf32>
    %18 = tpu.matmul %16, %17, %cst_14 {dimension_numbers = #tpu.dot_dimension_numbers<[1], [0], [0], [1], [0, 0, 1, 1], [], []>, precision = #tpu.contract_precision<fp32>} : vector<2x40xf32>, vector<40x40xf32>, vector<2x40xf32> -> vector<2x40xf32>
    %c0_15 = arith.constant 0 : index
    %c0_16 = arith.constant 0 : index
    %19 = vector.load %arg6[%c0_15, %c0_16] : memref<1x40xf32, #tpu.memory_space<vmem>>, vector<1x40xf32>
    %20 = vector.broadcast %19 : vector<1x40xf32> to vector<2x40xf32>
    %21 = arith.addf %18, %20 : vector<2x40xf32>
    %c0_17 = arith.constant 0 : index
    %c0_18 = arith.constant 0 : index
    %22 = vector.load %arg7[%c0_17, %c0_18] : memref<40x10xf32, #tpu.memory_space<vmem>>, vector<40x10xf32>
    %c0_19 = arith.constant 0 : index
    %c0_20 = arith.constant 0 : index
    %23 = vector.load %arg8[%c0_19, %c0_20] : memref<10x40xf32, #tpu.memory_space<vmem>>, vector<10x40xf32>
    %c0_21 = arith.constant 0 : index
    %c0_22 = arith.constant 0 : index
    %c0_23 = arith.constant 0 : index
    %24 = vector.load %arg9[%c0_21, %c0_22, %c0_23] : memref<2x1x40xf32, #tpu.memory_space<vmem>>, vector<1x1x40xf32>
    %25 = vector.shape_cast %24 : vector<1x1x40xf32> to vector<1x40xf32>
    %c0_24 = arith.constant 0 : index
    %c0_25 = arith.constant 0 : index
    %c0_26 = arith.constant 0 : index
    %26 = vector.load %arg10[%c0_24, %c0_25, %c0_26] : memref<2x1x40xf32, #tpu.memory_space<vmem>>, vector<1x1x40xf32>
    %27 = vector.shape_cast %26 : vector<1x1x40xf32> to vector<1x40xf32>
    %cst_27 = arith.constant dense<0.000000e+00> : vector<2xf32>
    %28 = vector.multi_reduction <add>, %21, %cst_27 [1] : vector<2x40xf32> to vector<2xf32>
    %29 = vector.shape_cast %28 : vector<2xf32> to vector<2x1xf32>
    %cst_28 = arith.constant 4.000000e+01 : f32
    %30 = vector.broadcast %cst_28 : f32 to vector<2x1xf32>
    %31 = arith.divf %29, %30 : vector<2x1xf32>
    %32 = vector.broadcast %31 : vector<2x1xf32> to vector<2x40xf32>
    %33 = arith.subf %21, %32 : vector<2x40xf32>
    %34 = arith.mulf %33, %33 : vector<2x40xf32>
    %cst_29 = arith.constant dense<0.000000e+00> : vector<2xf32>
    %35 = vector.multi_reduction <add>, %34, %cst_29 [1] : vector<2x40xf32> to vector<2xf32>
    %36 = vector.shape_cast %35 : vector<2xf32> to vector<2x1xf32>
    %cst_30 = arith.constant 4.000000e+01 : f32
    %37 = vector.broadcast %cst_30 : f32 to vector<2x1xf32>
    %38 = arith.divf %36, %37 : vector<2x1xf32>
    %39 = vector.broadcast %31 : vector<2x1xf32> to vector<2x40xf32>
    %40 = arith.subf %21, %39 : vector<2x40xf32>
    %cst_31 = arith.constant 9.99999974E-6 : f32
    %41 = vector.broadcast %cst_31 : f32 to vector<2x1xf32>
    %42 = arith.addf %38, %41 : vector<2x1xf32>
    %43 = math.rsqrt %42 : vector<2x1xf32>
    %44 = vector.broadcast %43 : vector<2x1xf32> to vector<2x40xf32>
    %45 = arith.mulf %40, %44 : vector<2x40xf32>
    %46 = vector.broadcast %25 : vector<1x40xf32> to vector<2x40xf32>
    %47 = arith.mulf %45, %46 : vector<2x40xf32>
    %48 = vector.broadcast %27 : vector<1x40xf32> to vector<2x40xf32>
    %49 = arith.addf %47, %48 : vector<2x40xf32>
    %c0_32 = arith.constant 0 : index
    %c0_33 = arith.constant 0 : index
    %c0_34 = arith.constant 0 : index
    %50 = vector.load %arg11[%c0_32, %c0_33, %c0_34] : memref<2x40x40xf32, #tpu.memory_space<vmem>>, vector<1x40x40xf32>
    %51 = vector.shape_cast %50 : vector<1x40x40xf32> to vector<40x40xf32>
    %cst_35 = arith.constant dense<0.000000e+00> : vector<2x40xf32>
    %52 = tpu.matmul %49, %51, %cst_35 {dimension_numbers = #tpu.dot_dimension_numbers<[1], [0], [0], [1], [0, 0, 1, 1], [], []>, precision = #tpu.contract_precision<fp32>} : vector<2x40xf32>, vector<40x40xf32>, vector<2x40xf32> -> vector<2x40xf32>
    %c0_36 = arith.constant 0 : index
    %c0_37 = arith.constant 0 : index
    %c0_38 = arith.constant 0 : index
    %53 = vector.load %arg12[%c0_36, %c0_37, %c0_38] : memref<2x1x40xf32, #tpu.memory_space<vmem>>, vector<1x1x40xf32>
    %54 = vector.shape_cast %53 : vector<1x1x40xf32> to vector<1x40xf32>
    %55 = vector.broadcast %54 : vector<1x40xf32> to vector<2x40xf32>
    %56 = arith.addf %52, %55 : vector<2x40xf32>
    %c0_39 = arith.constant 0 : index
    %c0_40 = arith.constant 0 : index
    %c0_41 = arith.constant 0 : index
    %57 = vector.load %arg13[%c0_39, %c0_40, %c0_41] : memref<2x40x40xf32, #tpu.memory_space<vmem>>, vector<1x40x40xf32>
    %58 = vector.shape_cast %57 : vector<1x40x40xf32> to vector<40x40xf32>
    %cst_42 = arith.constant dense<0.000000e+00> : vector<2x40xf32>
    %59 = tpu.matmul %49, %58, %cst_42 {dimension_numbers = #tpu.dot_dimension_numbers<[1], [0], [0], [1], [0, 0, 1, 1], [], []>, precision = #tpu.contract_precision<fp32>} : vector<2x40xf32>, vector<40x40xf32>, vector<2x40xf32> -> vector<2x40xf32>
    %c0_43 = arith.constant 0 : index
    %c0_44 = arith.constant 0 : index
    %c0_45 = arith.constant 0 : index
    %60 = vector.load %arg14[%c0_43, %c0_44, %c0_45] : memref<2x1x40xf32, #tpu.memory_space<vmem>>, vector<1x1x40xf32>
    %61 = vector.shape_cast %60 : vector<1x1x40xf32> to vector<1x40xf32>
    %62 = vector.broadcast %61 : vector<1x40xf32> to vector<2x40xf32>
    %63 = arith.addf %59, %62 : vector<2x40xf32>
    %c0_46 = arith.constant 0 : index
    %c0_47 = arith.constant 0 : index
    %c0_48 = arith.constant 0 : index
    %64 = vector.load %arg15[%c0_46, %c0_47, %c0_48] : memref<2x40x40xf32, #tpu.memory_space<vmem>>, vector<1x40x40xf32>
    %65 = vector.shape_cast %64 : vector<1x40x40xf32> to vector<40x40xf32>
    %cst_49 = arith.constant dense<0.000000e+00> : vector<2x40xf32>
    %66 = tpu.matmul %49, %65, %cst_49 {dimension_numbers = #tpu.dot_dimension_numbers<[1], [0], [0], [1], [0, 0, 1, 1], [], []>, precision = #tpu.contract_precision<fp32>} : vector<2x40xf32>, vector<40x40xf32>, vector<2x40xf32> -> vector<2x40xf32>
    %c0_50 = arith.constant 0 : index
    %c0_51 = arith.constant 0 : index
    %c0_52 = arith.constant 0 : index
    %67 = vector.load %arg16[%c0_50, %c0_51, %c0_52] : memref<2x1x40xf32, #tpu.memory_space<vmem>>, vector<1x1x40xf32>
    %68 = vector.shape_cast %67 : vector<1x1x40xf32> to vector<1x40xf32>
    %69 = vector.broadcast %68 : vector<1x40xf32> to vector<2x40xf32>
    %70 = arith.addf %66, %69 : vector<2x40xf32>
    %71 = vector.extract_strided_slice %63 {offsets = [0, 0], sizes = [1, 40], strides = [1, 1]} : vector<2x40xf32> to vector<1x40xf32>
    %72 = vector.broadcast %71 : vector<1x40xf32> to vector<2x40xf32>
    %73 = arith.mulf %56, %72 : vector<2x40xf32>
    %cst_53 = arith.constant dense<0.000000e+00> : vector<2x10xf32>
    %74 = tpu.matmul %73, %22, %cst_53 {dimension_numbers = #tpu.dot_dimension_numbers<[1], [0], [0], [1], [0, 0, 1, 1], [], []>, precision = #tpu.contract_precision<fp32>} : vector<2x40xf32>, vector<40x10xf32>, vector<2x10xf32> -> vector<2x10xf32>
    %75 = vector.extract_strided_slice %63 {offsets = [1, 0], sizes = [1, 40], strides = [1, 1]} : vector<2x40xf32> to vector<1x40xf32>
    %76 = vector.broadcast %75 : vector<1x40xf32> to vector<2x40xf32>
    %77 = arith.mulf %56, %76 : vector<2x40xf32>
    %cst_54 = arith.constant dense<0.000000e+00> : vector<2x10xf32>
    %78 = tpu.matmul %77, %22, %cst_54 {dimension_numbers = #tpu.dot_dimension_numbers<[1], [0], [0], [1], [0, 0, 1, 1], [], []>, precision = #tpu.contract_precision<fp32>} : vector<2x40xf32>, vector<40x10xf32>, vector<2x10xf32> -> vector<2x10xf32>
    %79 = arith.maximumf %74, %78 : vector<2x10xf32>
    %80 = arith.subf %74, %79 : vector<2x10xf32>
    %81 = math.exp %80 : vector<2x10xf32>
    %82 = arith.subf %78, %79 : vector<2x10xf32>
    %83 = math.exp %82 : vector<2x10xf32>
    %84 = arith.addf %81, %83 : vector<2x10xf32>
    %cst_55 = arith.constant 1.000000e+00 : f32
    %85 = vector.broadcast %cst_55 : f32 to vector<2x10xf32>
    %86 = arith.divf %85, %84 : vector<2x10xf32>
    %cst_56 = arith.constant 0.000000e+00 : f32
    %87 = vector.broadcast %cst_56 : f32 to vector<2x40xf32>
    %88 = arith.mulf %81, %86 : vector<2x10xf32>
    %cst_57 = arith.constant dense<0.000000e+00> : vector<2x40xf32>
    %89 = tpu.matmul %88, %23, %cst_57 {dimension_numbers = #tpu.dot_dimension_numbers<[1], [0], [0], [1], [0, 0, 1, 1], [], []>, precision = #tpu.contract_precision<fp32>} : vector<2x10xf32>, vector<10x40xf32>, vector<2x40xf32> -> vector<2x40xf32>
    %90 = vector.extract_strided_slice %70 {offsets = [0, 0], sizes = [1, 40], strides = [1, 1]} : vector<2x40xf32> to vector<1x40xf32>
    %91 = vector.broadcast %90 : vector<1x40xf32> to vector<2x40xf32>
    %92 = arith.mulf %89, %91 : vector<2x40xf32>
    %93 = arith.addf %87, %92 : vector<2x40xf32>
    %94 = arith.mulf %83, %86 : vector<2x10xf32>
    %cst_58 = arith.constant dense<0.000000e+00> : vector<2x40xf32>
    %95 = tpu.matmul %94, %23, %cst_58 {dimension_numbers = #tpu.dot_dimension_numbers<[1], [0], [0], [1], [0, 0, 1, 1], [], []>, precision = #tpu.contract_precision<fp32>} : vector<2x10xf32>, vector<10x40xf32>, vector<2x40xf32> -> vector<2x40xf32>
    %96 = vector.extract_strided_slice %70 {offsets = [1, 0], sizes = [1, 40], strides = [1, 1]} : vector<2x40xf32> to vector<1x40xf32>
    %97 = vector.broadcast %96 : vector<1x40xf32> to vector<2x40xf32>
    %98 = arith.mulf %95, %97 : vector<2x40xf32>
    %99 = arith.addf %93, %98 : vector<2x40xf32>
    %c0_59 = arith.constant 0 : index
    %c0_60 = arith.constant 0 : index
    %c0_61 = arith.constant 0 : index
    %100 = vector.load %arg17[%c0_59, %c0_60, %c0_61] : memref<2x40x40xf32, #tpu.memory_space<vmem>>, vector<1x40x40xf32>
    %101 = vector.shape_cast %100 : vector<1x40x40xf32> to vector<40x40xf32>
    %cst_62 = arith.constant dense<0.000000e+00> : vector<2x40xf32>
    %102 = tpu.matmul %99, %101, %cst_62 {dimension_numbers = #tpu.dot_dimension_numbers<[1], [0], [0], [1], [0, 0, 1, 1], [], []>, precision = #tpu.contract_precision<fp32>} : vector<2x40xf32>, vector<40x40xf32>, vector<2x40xf32> -> vector<2x40xf32>
    %c0_63 = arith.constant 0 : index
    %c0_64 = arith.constant 0 : index
    %c0_65 = arith.constant 0 : index
    %103 = vector.load %arg18[%c0_63, %c0_64, %c0_65] : memref<2x1x40xf32, #tpu.memory_space<vmem>>, vector<1x1x40xf32>
    %104 = vector.shape_cast %103 : vector<1x1x40xf32> to vector<1x40xf32>
    %105 = vector.broadcast %104 : vector<1x40xf32> to vector<2x40xf32>
    %106 = arith.addf %102, %105 : vector<2x40xf32>
    %107 = arith.addf %106, %21 : vector<2x40xf32>
    %c0_66 = arith.constant 0 : index
    %c0_67 = arith.constant 0 : index
    %c0_68 = arith.constant 0 : index
    %108 = vector.load %arg19[%c0_66, %c0_67, %c0_68] : memref<2x1x40xf32, #tpu.memory_space<vmem>>, vector<1x1x40xf32>
    %109 = vector.shape_cast %108 : vector<1x1x40xf32> to vector<1x40xf32>
    %c0_69 = arith.constant 0 : index
    %c0_70 = arith.constant 0 : index
    %c0_71 = arith.constant 0 : index
    %110 = vector.load %arg20[%c0_69, %c0_70, %c0_71] : memref<2x1x40xf32, #tpu.memory_space<vmem>>, vector<1x1x40xf32>
    %111 = vector.shape_cast %110 : vector<1x1x40xf32> to vector<1x40xf32>
    %cst_72 = arith.constant dense<0.000000e+00> : vector<2xf32>
    %112 = vector.multi_reduction <add>, %107, %cst_72 [1] : vector<2x40xf32> to vector<2xf32>
    %113 = vector.shape_cast %112 : vector<2xf32> to vector<2x1xf32>
    %cst_73 = arith.constant 4.000000e+01 : f32
    %114 = vector.broadcast %cst_73 : f32 to vector<2x1xf32>
    %115 = arith.divf %113, %114 : vector<2x1xf32>
    %116 = vector.broadcast %115 : vector<2x1xf32> to vector<2x40xf32>
    %117 = arith.subf %107, %116 : vector<2x40xf32>
    %118 = arith.mulf %117, %117 : vector<2x40xf32>
    %cst_74 = arith.constant dense<0.000000e+00> : vector<2xf32>
    %119 = vector.multi_reduction <add>, %118, %cst_74 [1] : vector<2x40xf32> to vector<2xf32>
    %120 = vector.shape_cast %119 : vector<2xf32> to vector<2x1xf32>
    %cst_75 = arith.constant 4.000000e+01 : f32
    %121 = vector.broadcast %cst_75 : f32 to vector<2x1xf32>
    %122 = arith.divf %120, %121 : vector<2x1xf32>
    %123 = vector.broadcast %115 : vector<2x1xf32> to vector<2x40xf32>
    %124 = arith.subf %107, %123 : vector<2x40xf32>
    %cst_76 = arith.constant 9.99999974E-6 : f32
    %125 = vector.broadcast %cst_76 : f32 to vector<2x1xf32>
    %126 = arith.addf %122, %125 : vector<2x1xf32>
    %127 = math.rsqrt %126 : vector<2x1xf32>
    %128 = vector.broadcast %127 : vector<2x1xf32> to vector<2x40xf32>
    %129 = arith.mulf %124, %128 : vector<2x40xf32>
    %130 = vector.broadcast %109 : vector<1x40xf32> to vector<2x40xf32>
    %131 = arith.mulf %129, %130 : vector<2x40xf32>
    %132 = vector.broadcast %111 : vector<1x40xf32> to vector<2x40xf32>
    %133 = arith.addf %131, %132 : vector<2x40xf32>
    %c0_77 = arith.constant 0 : index
    %c0_78 = arith.constant 0 : index
    %c0_79 = arith.constant 0 : index
    %134 = vector.load %arg21[%c0_77, %c0_78, %c0_79] : memref<2x40x160xf32, #tpu.memory_space<vmem>>, vector<1x40x160xf32>
    %135 = vector.shape_cast %134 : vector<1x40x160xf32> to vector<40x160xf32>
    %cst_80 = arith.constant dense<0.000000e+00> : vector<2x160xf32>
    %136 = tpu.matmul %133, %135, %cst_80 {dimension_numbers = #tpu.dot_dimension_numbers<[1], [0], [0], [1], [0, 0, 1, 1], [], []>, precision = #tpu.contract_precision<fp32>} : vector<2x40xf32>, vector<40x160xf32>, vector<2x160xf32> -> vector<2x160xf32>
    %c0_81 = arith.constant 0 : index
    %c0_82 = arith.constant 0 : index
    %c0_83 = arith.constant 0 : index
    %137 = vector.load %arg22[%c0_81, %c0_82, %c0_83] : memref<2x1x160xf32, #tpu.memory_space<vmem>>, vector<1x1x160xf32>
    %138 = vector.shape_cast %137 : vector<1x1x160xf32> to vector<1x160xf32>
    %139 = vector.broadcast %138 : vector<1x160xf32> to vector<2x160xf32>
    %140 = arith.addf %136, %139 : vector<2x160xf32>
    %cst_84 = arith.constant 5.000000e-01 : f32
    %141 = vector.broadcast %cst_84 : f32 to vector<2x160xf32>
    %142 = arith.mulf %141, %140 : vector<2x160xf32>
    %cst_85 = arith.constant 4.471500e-02 : f32
    %143 = vector.broadcast %cst_85 : f32 to vector<2x160xf32>
    %144 = arith.mulf %143, %140 : vector<2x160xf32>
    %145 = arith.mulf %144, %140 : vector<2x160xf32>
    %146 = arith.mulf %145, %140 : vector<2x160xf32>
    %147 = arith.addf %140, %146 : vector<2x160xf32>
    %cst_86 = arith.constant 0.797884583 : f32
    %148 = vector.broadcast %cst_86 : f32 to vector<2x160xf32>
    %149 = arith.mulf %148, %147 : vector<2x160xf32>
    %150 = math.tanh %149 : vector<2x160xf32>
    %cst_87 = arith.constant 1.000000e+00 : f32
    %151 = vector.broadcast %cst_87 : f32 to vector<2x160xf32>
    %152 = arith.addf %151, %150 : vector<2x160xf32>
    %153 = arith.mulf %142, %152 : vector<2x160xf32>
    %c0_88 = arith.constant 0 : index
    %c0_89 = arith.constant 0 : index
    %c0_90 = arith.constant 0 : index
    %154 = vector.load %arg23[%c0_88, %c0_89, %c0_90] : memref<2x160x40xf32, #tpu.memory_space<vmem>>, vector<1x160x40xf32>
    %155 = vector.shape_cast %154 : vector<1x160x40xf32> to vector<160x40xf32>
    %cst_91 = arith.constant dense<0.000000e+00> : vector<2x40xf32>
    %156 = tpu.matmul %153, %155, %cst_91 {dimension_numbers = #tpu.dot_dimension_numbers<[1], [0], [0], [1], [0, 0, 1, 1], [], []>, precision = #tpu.contract_precision<fp32>} : vector<2x160xf32>, vector<160x40xf32>, vector<2x40xf32> -> vector<2x40xf32>
    %c0_92 = arith.constant 0 : index
    %c0_93 = arith.constant 0 : index
    %c0_94 = arith.constant 0 : index
    %157 = vector.load %arg24[%c0_92, %c0_93, %c0_94] : memref<2x1x40xf32, #tpu.memory_space<vmem>>, vector<1x1x40xf32>
    %158 = vector.shape_cast %157 : vector<1x1x40xf32> to vector<1x40xf32>
    %159 = vector.broadcast %158 : vector<1x40xf32> to vector<2x40xf32>
    %160 = arith.addf %156, %159 : vector<2x40xf32>
    %161 = arith.addf %160, %107 : vector<2x40xf32>
    %c1 = arith.constant 1 : index
    %c0_95 = arith.constant 0 : index
    %c0_96 = arith.constant 0 : index
    %162 = vector.load %arg9[%c1, %c0_95, %c0_96] : memref<2x1x40xf32, #tpu.memory_space<vmem>>, vector<1x1x40xf32>
    %163 = vector.shape_cast %162 : vector<1x1x40xf32> to vector<1x40xf32>
    %c1_97 = arith.constant 1 : index
    %c0_98 = arith.constant 0 : index
    %c0_99 = arith.constant 0 : index
    %164 = vector.load %arg10[%c1_97, %c0_98, %c0_99] : memref<2x1x40xf32, #tpu.memory_space<vmem>>, vector<1x1x40xf32>
    %165 = vector.shape_cast %164 : vector<1x1x40xf32> to vector<1x40xf32>
    %cst_100 = arith.constant dense<0.000000e+00> : vector<2xf32>
    %166 = vector.multi_reduction <add>, %161, %cst_100 [1] : vector<2x40xf32> to vector<2xf32>
    %167 = vector.shape_cast %166 : vector<2xf32> to vector<2x1xf32>
    %cst_101 = arith.constant 4.000000e+01 : f32
    %168 = vector.broadcast %cst_101 : f32 to vector<2x1xf32>
    %169 = arith.divf %167, %168 : vector<2x1xf32>
    %170 = vector.broadcast %169 : vector<2x1xf32> to vector<2x40xf32>
    %171 = arith.subf %161, %170 : vector<2x40xf32>
    %172 = arith.mulf %171, %171 : vector<2x40xf32>
    %cst_102 = arith.constant dense<0.000000e+00> : vector<2xf32>
    %173 = vector.multi_reduction <add>, %172, %cst_102 [1] : vector<2x40xf32> to vector<2xf32>
    %174 = vector.shape_cast %173 : vector<2xf32> to vector<2x1xf32>
    %cst_103 = arith.constant 4.000000e+01 : f32
    %175 = vector.broadcast %cst_103 : f32 to vector<2x1xf32>
    %176 = arith.divf %174, %175 : vector<2x1xf32>
    %177 = vector.broadcast %169 : vector<2x1xf32> to vector<2x40xf32>
    %178 = arith.subf %161, %177 : vector<2x40xf32>
    %cst_104 = arith.constant 9.99999974E-6 : f32
    %179 = vector.broadcast %cst_104 : f32 to vector<2x1xf32>
    %180 = arith.addf %176, %179 : vector<2x1xf32>
    %181 = math.rsqrt %180 : vector<2x1xf32>
    %182 = vector.broadcast %181 : vector<2x1xf32> to vector<2x40xf32>
    %183 = arith.mulf %178, %182 : vector<2x40xf32>
    %184 = vector.broadcast %163 : vector<1x40xf32> to vector<2x40xf32>
    %185 = arith.mulf %183, %184 : vector<2x40xf32>
    %186 = vector.broadcast %165 : vector<1x40xf32> to vector<2x40xf32>
    %187 = arith.addf %185, %186 : vector<2x40xf32>
    %c1_105 = arith.constant 1 : index
    %c0_106 = arith.constant 0 : index
    %c0_107 = arith.constant 0 : index
    %188 = vector.load %arg11[%c1_105, %c0_106, %c0_107] : memref<2x40x40xf32, #tpu.memory_space<vmem>>, vector<1x40x40xf32>
    %189 = vector.shape_cast %188 : vector<1x40x40xf32> to vector<40x40xf32>
    %cst_108 = arith.constant dense<0.000000e+00> : vector<2x40xf32>
    %190 = tpu.matmul %187, %189, %cst_108 {dimension_numbers = #tpu.dot_dimension_numbers<[1], [0], [0], [1], [0, 0, 1, 1], [], []>, precision = #tpu.contract_precision<fp32>} : vector<2x40xf32>, vector<40x40xf32>, vector<2x40xf32> -> vector<2x40xf32>
    %c1_109 = arith.constant 1 : index
    %c0_110 = arith.constant 0 : index
    %c0_111 = arith.constant 0 : index
    %191 = vector.load %arg12[%c1_109, %c0_110, %c0_111] : memref<2x1x40xf32, #tpu.memory_space<vmem>>, vector<1x1x40xf32>
    %192 = vector.shape_cast %191 : vector<1x1x40xf32> to vector<1x40xf32>
    %193 = vector.broadcast %192 : vector<1x40xf32> to vector<2x40xf32>
    %194 = arith.addf %190, %193 : vector<2x40xf32>
    %c1_112 = arith.constant 1 : index
    %c0_113 = arith.constant 0 : index
    %c0_114 = arith.constant 0 : index
    %195 = vector.load %arg13[%c1_112, %c0_113, %c0_114] : memref<2x40x40xf32, #tpu.memory_space<vmem>>, vector<1x40x40xf32>
    %196 = vector.shape_cast %195 : vector<1x40x40xf32> to vector<40x40xf32>
    %cst_115 = arith.constant dense<0.000000e+00> : vector<2x40xf32>
    %197 = tpu.matmul %187, %196, %cst_115 {dimension_numbers = #tpu.dot_dimension_numbers<[1], [0], [0], [1], [0, 0, 1, 1], [], []>, precision = #tpu.contract_precision<fp32>} : vector<2x40xf32>, vector<40x40xf32>, vector<2x40xf32> -> vector<2x40xf32>
    %c1_116 = arith.constant 1 : index
    %c0_117 = arith.constant 0 : index
    %c0_118 = arith.constant 0 : index
    %198 = vector.load %arg14[%c1_116, %c0_117, %c0_118] : memref<2x1x40xf32, #tpu.memory_space<vmem>>, vector<1x1x40xf32>
    %199 = vector.shape_cast %198 : vector<1x1x40xf32> to vector<1x40xf32>
    %200 = vector.broadcast %199 : vector<1x40xf32> to vector<2x40xf32>
    %201 = arith.addf %197, %200 : vector<2x40xf32>
    %c1_119 = arith.constant 1 : index
    %c0_120 = arith.constant 0 : index
    %c0_121 = arith.constant 0 : index
    %202 = vector.load %arg15[%c1_119, %c0_120, %c0_121] : memref<2x40x40xf32, #tpu.memory_space<vmem>>, vector<1x40x40xf32>
    %203 = vector.shape_cast %202 : vector<1x40x40xf32> to vector<40x40xf32>
    %cst_122 = arith.constant dense<0.000000e+00> : vector<2x40xf32>
    %204 = tpu.matmul %187, %203, %cst_122 {dimension_numbers = #tpu.dot_dimension_numbers<[1], [0], [0], [1], [0, 0, 1, 1], [], []>, precision = #tpu.contract_precision<fp32>} : vector<2x40xf32>, vector<40x40xf32>, vector<2x40xf32> -> vector<2x40xf32>
    %c1_123 = arith.constant 1 : index
    %c0_124 = arith.constant 0 : index
    %c0_125 = arith.constant 0 : index
    %205 = vector.load %arg16[%c1_123, %c0_124, %c0_125] : memref<2x1x40xf32, #tpu.memory_space<vmem>>, vector<1x1x40xf32>
    %206 = vector.shape_cast %205 : vector<1x1x40xf32> to vector<1x40xf32>
    %207 = vector.broadcast %206 : vector<1x40xf32> to vector<2x40xf32>
    %208 = arith.addf %204, %207 : vector<2x40xf32>
    %209 = vector.extract_strided_slice %201 {offsets = [0, 0], sizes = [1, 40], strides = [1, 1]} : vector<2x40xf32> to vector<1x40xf32>
    %210 = vector.broadcast %209 : vector<1x40xf32> to vector<2x40xf32>
    %211 = arith.mulf %194, %210 : vector<2x40xf32>
    %cst_126 = arith.constant dense<0.000000e+00> : vector<2x10xf32>
    %212 = tpu.matmul %211, %22, %cst_126 {dimension_numbers = #tpu.dot_dimension_numbers<[1], [0], [0], [1], [0, 0, 1, 1], [], []>, precision = #tpu.contract_precision<fp32>} : vector<2x40xf32>, vector<40x10xf32>, vector<2x10xf32> -> vector<2x10xf32>
    %213 = vector.extract_strided_slice %201 {offsets = [1, 0], sizes = [1, 40], strides = [1, 1]} : vector<2x40xf32> to vector<1x40xf32>
    %214 = vector.broadcast %213 : vector<1x40xf32> to vector<2x40xf32>
    %215 = arith.mulf %194, %214 : vector<2x40xf32>
    %cst_127 = arith.constant dense<0.000000e+00> : vector<2x10xf32>
    %216 = tpu.matmul %215, %22, %cst_127 {dimension_numbers = #tpu.dot_dimension_numbers<[1], [0], [0], [1], [0, 0, 1, 1], [], []>, precision = #tpu.contract_precision<fp32>} : vector<2x40xf32>, vector<40x10xf32>, vector<2x10xf32> -> vector<2x10xf32>
    %217 = arith.maximumf %212, %216 : vector<2x10xf32>
    %218 = arith.subf %212, %217 : vector<2x10xf32>
    %219 = math.exp %218 : vector<2x10xf32>
    %220 = arith.subf %216, %217 : vector<2x10xf32>
    %221 = math.exp %220 : vector<2x10xf32>
    %222 = arith.addf %219, %221 : vector<2x10xf32>
    %cst_128 = arith.constant 1.000000e+00 : f32
    %223 = vector.broadcast %cst_128 : f32 to vector<2x10xf32>
    %224 = arith.divf %223, %222 : vector<2x10xf32>
    %cst_129 = arith.constant 0.000000e+00 : f32
    %225 = vector.broadcast %cst_129 : f32 to vector<2x40xf32>
    %226 = arith.mulf %219, %224 : vector<2x10xf32>
    %cst_130 = arith.constant dense<0.000000e+00> : vector<2x40xf32>
    %227 = tpu.matmul %226, %23, %cst_130 {dimension_numbers = #tpu.dot_dimension_numbers<[1], [0], [0], [1], [0, 0, 1, 1], [], []>, precision = #tpu.contract_precision<fp32>} : vector<2x10xf32>, vector<10x40xf32>, vector<2x40xf32> -> vector<2x40xf32>
    %228 = vector.extract_strided_slice %208 {offsets = [0, 0], sizes = [1, 40], strides = [1, 1]} : vector<2x40xf32> to vector<1x40xf32>
    %229 = vector.broadcast %228 : vector<1x40xf32> to vector<2x40xf32>
    %230 = arith.mulf %227, %229 : vector<2x40xf32>
    %231 = arith.addf %225, %230 : vector<2x40xf32>
    %232 = arith.mulf %221, %224 : vector<2x10xf32>
    %cst_131 = arith.constant dense<0.000000e+00> : vector<2x40xf32>
    %233 = tpu.matmul %232, %23, %cst_131 {dimension_numbers = #tpu.dot_dimension_numbers<[1], [0], [0], [1], [0, 0, 1, 1], [], []>, precision = #tpu.contract_precision<fp32>} : vector<2x10xf32>, vector<10x40xf32>, vector<2x40xf32> -> vector<2x40xf32>
    %234 = vector.extract_strided_slice %208 {offsets = [1, 0], sizes = [1, 40], strides = [1, 1]} : vector<2x40xf32> to vector<1x40xf32>
    %235 = vector.broadcast %234 : vector<1x40xf32> to vector<2x40xf32>
    %236 = arith.mulf %233, %235 : vector<2x40xf32>
    %237 = arith.addf %231, %236 : vector<2x40xf32>
    %c1_132 = arith.constant 1 : index
    %c0_133 = arith.constant 0 : index
    %c0_134 = arith.constant 0 : index
    %238 = vector.load %arg17[%c1_132, %c0_133, %c0_134] : memref<2x40x40xf32, #tpu.memory_space<vmem>>, vector<1x40x40xf32>
    %239 = vector.shape_cast %238 : vector<1x40x40xf32> to vector<40x40xf32>
    %cst_135 = arith.constant dense<0.000000e+00> : vector<2x40xf32>
    %240 = tpu.matmul %237, %239, %cst_135 {dimension_numbers = #tpu.dot_dimension_numbers<[1], [0], [0], [1], [0, 0, 1, 1], [], []>, precision = #tpu.contract_precision<fp32>} : vector<2x40xf32>, vector<40x40xf32>, vector<2x40xf32> -> vector<2x40xf32>
    %c1_136 = arith.constant 1 : index
    %c0_137 = arith.constant 0 : index
    %c0_138 = arith.constant 0 : index
    %241 = vector.load %arg18[%c1_136, %c0_137, %c0_138] : memref<2x1x40xf32, #tpu.memory_space<vmem>>, vector<1x1x40xf32>
    %242 = vector.shape_cast %241 : vector<1x1x40xf32> to vector<1x40xf32>
    %243 = vector.broadcast %242 : vector<1x40xf32> to vector<2x40xf32>
    %244 = arith.addf %240, %243 : vector<2x40xf32>
    %245 = arith.addf %244, %161 : vector<2x40xf32>
    %c1_139 = arith.constant 1 : index
    %c0_140 = arith.constant 0 : index
    %c0_141 = arith.constant 0 : index
    %246 = vector.load %arg19[%c1_139, %c0_140, %c0_141] : memref<2x1x40xf32, #tpu.memory_space<vmem>>, vector<1x1x40xf32>
    %247 = vector.shape_cast %246 : vector<1x1x40xf32> to vector<1x40xf32>
    %c1_142 = arith.constant 1 : index
    %c0_143 = arith.constant 0 : index
    %c0_144 = arith.constant 0 : index
    %248 = vector.load %arg20[%c1_142, %c0_143, %c0_144] : memref<2x1x40xf32, #tpu.memory_space<vmem>>, vector<1x1x40xf32>
    %249 = vector.shape_cast %248 : vector<1x1x40xf32> to vector<1x40xf32>
    %cst_145 = arith.constant dense<0.000000e+00> : vector<2xf32>
    %250 = vector.multi_reduction <add>, %245, %cst_145 [1] : vector<2x40xf32> to vector<2xf32>
    %251 = vector.shape_cast %250 : vector<2xf32> to vector<2x1xf32>
    %cst_146 = arith.constant 4.000000e+01 : f32
    %252 = vector.broadcast %cst_146 : f32 to vector<2x1xf32>
    %253 = arith.divf %251, %252 : vector<2x1xf32>
    %254 = vector.broadcast %253 : vector<2x1xf32> to vector<2x40xf32>
    %255 = arith.subf %245, %254 : vector<2x40xf32>
    %256 = arith.mulf %255, %255 : vector<2x40xf32>
    %cst_147 = arith.constant dense<0.000000e+00> : vector<2xf32>
    %257 = vector.multi_reduction <add>, %256, %cst_147 [1] : vector<2x40xf32> to vector<2xf32>
    %258 = vector.shape_cast %257 : vector<2xf32> to vector<2x1xf32>
    %cst_148 = arith.constant 4.000000e+01 : f32
    %259 = vector.broadcast %cst_148 : f32 to vector<2x1xf32>
    %260 = arith.divf %258, %259 : vector<2x1xf32>
    %261 = vector.broadcast %253 : vector<2x1xf32> to vector<2x40xf32>
    %262 = arith.subf %245, %261 : vector<2x40xf32>
    %cst_149 = arith.constant 9.99999974E-6 : f32
    %263 = vector.broadcast %cst_149 : f32 to vector<2x1xf32>
    %264 = arith.addf %260, %263 : vector<2x1xf32>
    %265 = math.rsqrt %264 : vector<2x1xf32>
    %266 = vector.broadcast %265 : vector<2x1xf32> to vector<2x40xf32>
    %267 = arith.mulf %262, %266 : vector<2x40xf32>
    %268 = vector.broadcast %247 : vector<1x40xf32> to vector<2x40xf32>
    %269 = arith.mulf %267, %268 : vector<2x40xf32>
    %270 = vector.broadcast %249 : vector<1x40xf32> to vector<2x40xf32>
    %271 = arith.addf %269, %270 : vector<2x40xf32>
    %c1_150 = arith.constant 1 : index
    %c0_151 = arith.constant 0 : index
    %c0_152 = arith.constant 0 : index
    %272 = vector.load %arg21[%c1_150, %c0_151, %c0_152] : memref<2x40x160xf32, #tpu.memory_space<vmem>>, vector<1x40x160xf32>
    %273 = vector.shape_cast %272 : vector<1x40x160xf32> to vector<40x160xf32>
    %cst_153 = arith.constant dense<0.000000e+00> : vector<2x160xf32>
    %274 = tpu.matmul %271, %273, %cst_153 {dimension_numbers = #tpu.dot_dimension_numbers<[1], [0], [0], [1], [0, 0, 1, 1], [], []>, precision = #tpu.contract_precision<fp32>} : vector<2x40xf32>, vector<40x160xf32>, vector<2x160xf32> -> vector<2x160xf32>
    %c1_154 = arith.constant 1 : index
    %c0_155 = arith.constant 0 : index
    %c0_156 = arith.constant 0 : index
    %275 = vector.load %arg22[%c1_154, %c0_155, %c0_156] : memref<2x1x160xf32, #tpu.memory_space<vmem>>, vector<1x1x160xf32>
    %276 = vector.shape_cast %275 : vector<1x1x160xf32> to vector<1x160xf32>
    %277 = vector.broadcast %276 : vector<1x160xf32> to vector<2x160xf32>
    %278 = arith.addf %274, %277 : vector<2x160xf32>
    %cst_157 = arith.constant 5.000000e-01 : f32
    %279 = vector.broadcast %cst_157 : f32 to vector<2x160xf32>
    %280 = arith.mulf %279, %278 : vector<2x160xf32>
    %cst_158 = arith.constant 4.471500e-02 : f32
    %281 = vector.broadcast %cst_158 : f32 to vector<2x160xf32>
    %282 = arith.mulf %281, %278 : vector<2x160xf32>
    %283 = arith.mulf %282, %278 : vector<2x160xf32>
    %284 = arith.mulf %283, %278 : vector<2x160xf32>
    %285 = arith.addf %278, %284 : vector<2x160xf32>
    %cst_159 = arith.constant 0.797884583 : f32
    %286 = vector.broadcast %cst_159 : f32 to vector<2x160xf32>
    %287 = arith.mulf %286, %285 : vector<2x160xf32>
    %288 = math.tanh %287 : vector<2x160xf32>
    %cst_160 = arith.constant 1.000000e+00 : f32
    %289 = vector.broadcast %cst_160 : f32 to vector<2x160xf32>
    %290 = arith.addf %289, %288 : vector<2x160xf32>
    %291 = arith.mulf %280, %290 : vector<2x160xf32>
    %c1_161 = arith.constant 1 : index
    %c0_162 = arith.constant 0 : index
    %c0_163 = arith.constant 0 : index
    %292 = vector.load %arg23[%c1_161, %c0_162, %c0_163] : memref<2x160x40xf32, #tpu.memory_space<vmem>>, vector<1x160x40xf32>
    %293 = vector.shape_cast %292 : vector<1x160x40xf32> to vector<160x40xf32>
    %cst_164 = arith.constant dense<0.000000e+00> : vector<2x40xf32>
    %294 = tpu.matmul %291, %293, %cst_164 {dimension_numbers = #tpu.dot_dimension_numbers<[1], [0], [0], [1], [0, 0, 1, 1], [], []>, precision = #tpu.contract_precision<fp32>} : vector<2x160xf32>, vector<160x40xf32>, vector<2x40xf32> -> vector<2x40xf32>
    %c1_165 = arith.constant 1 : index
    %c0_166 = arith.constant 0 : index
    %c0_167 = arith.constant 0 : index
    %295 = vector.load %arg24[%c1_165, %c0_166, %c0_167] : memref<2x1x40xf32, #tpu.memory_space<vmem>>, vector<1x1x40xf32>
    %296 = vector.shape_cast %295 : vector<1x1x40xf32> to vector<1x40xf32>
    %297 = vector.broadcast %296 : vector<1x40xf32> to vector<2x40xf32>
    %298 = arith.addf %294, %297 : vector<2x40xf32>
    %299 = arith.addf %298, %245 : vector<2x40xf32>
    %c0_168 = arith.constant 0 : index
    %c0_169 = arith.constant 0 : index
    %300 = vector.load %arg26[%c0_168, %c0_169] : memref<1x256xf32, #tpu.memory_space<vmem>>, vector<1x256xf32>
    %301 = vector.extract_strided_slice %299 {offsets = [0, 0], sizes = [1, 40], strides = [1, 1]} : vector<2x40xf32> to vector<1x40xf32>
    %c0_170 = arith.constant 0 : index
    %c0_171 = arith.constant 0 : index
    %302 = vector.load %arg25[%c0_170, %c0_171] : memref<80x256xf32, #tpu.memory_space<vmem>>, vector<40x256xf32>
    %cst_172 = arith.constant dense<0.000000e+00> : vector<1x256xf32>
    %303 = tpu.matmul %301, %302, %cst_172 {dimension_numbers = #tpu.dot_dimension_numbers<[1], [0], [0], [1], [0, 0, 1, 1], [], []>, precision = #tpu.contract_precision<fp32>} : vector<1x40xf32>, vector<40x256xf32>, vector<1x256xf32> -> vector<1x256xf32>
    %304 = arith.addf %300, %303 : vector<1x256xf32>
    %305 = vector.extract_strided_slice %299 {offsets = [1, 0], sizes = [1, 40], strides = [1, 1]} : vector<2x40xf32> to vector<1x40xf32>
    %c40 = arith.constant 40 : index
    %c0_173 = arith.constant 0 : index
    %306 = vector.load %arg25[%c40, %c0_173] : memref<80x256xf32, #tpu.memory_space<vmem>>, vector<40x256xf32>
    %cst_174 = arith.constant dense<0.000000e+00> : vector<1x256xf32>
    %307 = tpu.matmul %305, %306, %cst_174 {dimension_numbers = #tpu.dot_dimension_numbers<[1], [0], [0], [1], [0, 0, 1, 1], [], []>, precision = #tpu.contract_precision<fp32>} : vector<1x40xf32>, vector<40x256xf32>, vector<1x256xf32> -> vector<1x256xf32>
    %308 = arith.addf %304, %307 : vector<1x256xf32>
    %cst_175 = arith.constant 0.000000e+00 : f32
    %309 = vector.broadcast %cst_175 : f32 to vector<1x256xf32>
    %310 = arith.cmpf ogt, %308, %309 : vector<1x256xf32>
    %cst_176 = arith.constant 0.000000e+00 : f32
    %311 = vector.broadcast %cst_176 : f32 to vector<1x256xf32>
    %312 = arith.minimumf %308, %311 : vector<1x256xf32>
    %313 = math.exp %312 : vector<1x256xf32>
    %cst_177 = arith.constant 1.000000e+00 : f32
    %314 = vector.broadcast %cst_177 : f32 to vector<1x256xf32>
    %315 = arith.subf %313, %314 : vector<1x256xf32>
    %316 = arith.select %310, %308, %315 : vector<1x256xi1>, vector<1x256xf32>
    %c0_178 = arith.constant 0 : index
    %c0_179 = arith.constant 0 : index
    %317 = vector.load %arg27[%c0_178, %c0_179] : memref<256x32xf32, #tpu.memory_space<vmem>>, vector<256x32xf32>
    %cst_180 = arith.constant dense<0.000000e+00> : vector<1x32xf32>
    %318 = tpu.matmul %316, %317, %cst_180 {dimension_numbers = #tpu.dot_dimension_numbers<[1], [0], [0], [1], [0, 0, 1, 1], [], []>, precision = #tpu.contract_precision<fp32>} : vector<1x256xf32>, vector<256x32xf32>, vector<1x32xf32> -> vector<1x32xf32>
    %c0_181 = arith.constant 0 : index
    %c0_182 = arith.constant 0 : index
    %319 = vector.load %arg28[%c0_181, %c0_182] : memref<1x32xf32, #tpu.memory_space<vmem>>, vector<1x32xf32>
    %320 = arith.addf %318, %319 : vector<1x32xf32>
    %cst_183 = arith.constant 0.000000e+00 : f32
    %321 = vector.broadcast %cst_183 : f32 to vector<1x32xf32>
    %322 = arith.cmpf ogt, %320, %321 : vector<1x32xf32>
    %cst_184 = arith.constant 0.000000e+00 : f32
    %323 = vector.broadcast %cst_184 : f32 to vector<1x32xf32>
    %324 = arith.minimumf %320, %323 : vector<1x32xf32>
    %325 = math.exp %324 : vector<1x32xf32>
    %cst_185 = arith.constant 1.000000e+00 : f32
    %326 = vector.broadcast %cst_185 : f32 to vector<1x32xf32>
    %327 = arith.subf %325, %326 : vector<1x32xf32>
    %328 = arith.select %322, %320, %327 : vector<1x32xi1>, vector<1x32xf32>
    %c0_186 = arith.constant 0 : index
    %c0_187 = arith.constant 0 : index
    %329 = vector.load %arg29[%c0_186, %c0_187] : memref<32x3xf32, #tpu.memory_space<vmem>>, vector<32x3xf32>
    %cst_188 = arith.constant dense<0.000000e+00> : vector<1x3xf32>
    %330 = tpu.matmul %328, %329, %cst_188 {dimension_numbers = #tpu.dot_dimension_numbers<[1], [0], [0], [1], [0, 0, 1, 1], [], []>, precision = #tpu.contract_precision<fp32>} : vector<1x32xf32>, vector<32x3xf32>, vector<1x3xf32> -> vector<1x3xf32>
    %c0_189 = arith.constant 0 : index
    %c0_190 = arith.constant 0 : index
    %331 = vector.load %arg30[%c0_189, %c0_190] : memref<1x3xf32, #tpu.memory_space<vmem>>, vector<1x3xf32>
    %332 = arith.addf %330, %331 : vector<1x3xf32>
    %cst_191 = arith.constant dense<0xFF800000> : vector<1xf32>
    %333 = vector.multi_reduction <maximumf>, %332, %cst_191 [1] : vector<1x3xf32> to vector<1xf32>
    %334 = vector.shape_cast %333 : vector<1xf32> to vector<1x1xf32>
    %335 = vector.broadcast %334 : vector<1x1xf32> to vector<1x3xf32>
    %336 = arith.subf %332, %335 : vector<1x3xf32>
    %337 = math.exp %336 : vector<1x3xf32>
    %cst_192 = arith.constant dense<0.000000e+00> : vector<1xf32>
    %338 = vector.multi_reduction <add>, %337, %cst_192 [1] : vector<1x3xf32> to vector<1xf32>
    %339 = vector.shape_cast %338 : vector<1xf32> to vector<1x1xf32>
    %340 = math.log %339 : vector<1x1xf32>
    %341 = vector.broadcast %340 : vector<1x1xf32> to vector<1x3xf32>
    %342 = arith.subf %336, %341 : vector<1x3xf32>
    %c0_193 = arith.constant 0 : index
    %c0_194 = arith.constant 0 : index
    %c0_195 = arith.constant 0 : index
    %343 = vector.load %arg31[%c0_193, %c0_194, %c0_195] : memref<1x1x3xf32, #tpu.memory_space<vmem>>, vector<1x1x3xf32>
    %344 = vector.shape_cast %343 : vector<1x1x3xf32> to vector<1x3xf32>
    %345 = vector.shape_cast %342 : vector<1x3xf32> to vector<1x1x3xf32>
    tpu.vector_store %arg31[%c0_193, %c0_194, %c0_195], %345 {strides = array<i32>} : memref<1x1x3xf32, #tpu.memory_space<vmem>>, vector<1x1x3xf32>,
    return
  }
  func.func @transform_0(%arg0: i32) -> (i32, i32, i32) {
    %c0_i32 = arith.constant 0 : i32
    %c0_i32_0 = arith.constant 0 : i32
    %c0_i32_1 = arith.constant 0 : i32
    return %arg0, %c0_i32, %c0_i32_0 : i32, i32, i32
  }
  func.func @transform_1(%arg0: i32) -> (i32, i32) {
    %c0_i32 = arith.constant 0 : i32
    %c0_i32_0 = arith.constant 0 : i32
    %c0_i32_1 = arith.constant 0 : i32
    return %c0_i32, %c0_i32_0 : i32, i32
  }
  func.func @transform_2(%arg0: i32) -> (i32, i32) {
    %c0_i32 = arith.constant 0 : i32
    %c0_i32_0 = arith.constant 0 : i32
    %c0_i32_1 = arith.constant 0 : i32
    return %c0_i32, %c0_i32_0 : i32, i32
  }
  func.func @transform_3(%arg0: i32) -> (i32, i32) {
    %c0_i32 = arith.constant 0 : i32
    %c0_i32_0 = arith.constant 0 : i32
    %c0_i32_1 = arith.constant 0 : i32
    return %c0_i32, %c0_i32_0 : i32, i32
  }
  func.func @transform_4(%arg0: i32) -> (i32, i32) {
    %c0_i32 = arith.constant 0 : i32
    %c0_i32_0 = arith.constant 0 : i32
    %c0_i32_1 = arith.constant 0 : i32
    return %c0_i32, %c0_i32_0 : i32, i32
  }
  func.func @transform_5(%arg0: i32) -> (i32, i32) {
    %c0_i32 = arith.constant 0 : i32
    %c0_i32_0 = arith.constant 0 : i32
    %c0_i32_1 = arith.constant 0 : i32
    return %c0_i32, %c0_i32_0 : i32, i32
  }
  func.func @transform_6(%arg0: i32) -> (i32, i32) {
    %c0_i32 = arith.constant 0 : i32
    %c0_i32_0 = arith.constant 0 : i32
    %c0_i32_1 = arith.constant 0 : i32
    return %c0_i32, %c0_i32_0 : i32, i32
  }
  func.func @transform_7(%arg0: i32) -> (i32, i32) {
    %c0_i32 = arith.constant 0 : i32
    %c0_i32_0 = arith.constant 0 : i32
    %c0_i32_1 = arith.constant 0 : i32
    return %c0_i32, %c0_i32_0 : i32, i32
  }
  func.func @transform_8(%arg0: i32) -> (i32, i32, i32) {
    %c0_i32 = arith.constant 0 : i32
    %c0_i32_0 = arith.constant 0 : i32
    %c0_i32_1 = arith.constant 0 : i32
    %c0_i32_2 = arith.constant 0 : i32
    return %c0_i32, %c0_i32_0, %c0_i32_1 : i32, i32, i32
  }
  func.func @transform_9(%arg0: i32) -> (i32, i32, i32) {
    %c0_i32 = arith.constant 0 : i32
    %c0_i32_0 = arith.constant 0 : i32
    %c0_i32_1 = arith.constant 0 : i32
    %c0_i32_2 = arith.constant 0 : i32
    return %c0_i32, %c0_i32_0, %c0_i32_1 : i32, i32, i32
  }
  func.func @transform_10(%arg0: i32) -> (i32, i32, i32) {
    %c0_i32 = arith.constant 0 : i32
    %c0_i32_0 = arith.constant 0 : i32
    %c0_i32_1 = arith.constant 0 : i32
    %c0_i32_2 = arith.constant 0 : i32
    return %c0_i32, %c0_i32_0, %c0_i32_1 : i32, i32, i32
  }
  func.func @transform_11(%arg0: i32) -> (i32, i32, i32) {
    %c0_i32 = arith.constant 0 : i32
    %c0_i32_0 = arith.constant 0 : i32
    %c0_i32_1 = arith.constant 0 : i32
    %c0_i32_2 = arith.constant 0 : i32
    return %c0_i32, %c0_i32_0, %c0_i32_1 : i32, i32, i32
  }
  func.func @transform_12(%arg0: i32) -> (i32, i32, i32) {
    %c0_i32 = arith.constant 0 : i32
    %c0_i32_0 = arith.constant 0 : i32
    %c0_i32_1 = arith.constant 0 : i32
    %c0_i32_2 = arith.constant 0 : i32
    return %c0_i32, %c0_i32_0, %c0_i32_1 : i32, i32, i32
  }
  func.func @transform_13(%arg0: i32) -> (i32, i32, i32) {
    %c0_i32 = arith.constant 0 : i32
    %c0_i32_0 = arith.constant 0 : i32
    %c0_i32_1 = arith.constant 0 : i32
    %c0_i32_2 = arith.constant 0 : i32
    return %c0_i32, %c0_i32_0, %c0_i32_1 : i32, i32, i32
  }
  func.func @transform_14(%arg0: i32) -> (i32, i32, i32) {
    %c0_i32 = arith.constant 0 : i32
    %c0_i32_0 = arith.constant 0 : i32
    %c0_i32_1 = arith.constant 0 : i32
    %c0_i32_2 = arith.constant 0 : i32
    return %c0_i32, %c0_i32_0, %c0_i32_1 : i32, i32, i32
  }
  func.func @transform_15(%arg0: i32) -> (i32, i32, i32) {
    %c0_i32 = arith.constant 0 : i32
    %c0_i32_0 = arith.constant 0 : i32
    %c0_i32_1 = arith.constant 0 : i32
    %c0_i32_2 = arith.constant 0 : i32
    return %c0_i32, %c0_i32_0, %c0_i32_1 : i32, i32, i32
  }
  func.func @transform_16(%arg0: i32) -> (i32, i32, i32) {
    %c0_i32 = arith.constant 0 : i32
    %c0_i32_0 = arith.constant 0 : i32
    %c0_i32_1 = arith.constant 0 : i32
    %c0_i32_2 = arith.constant 0 : i32
    return %c0_i32, %c0_i32_0, %c0_i32_1 : i32, i32, i32
  }
  func.func @transform_17(%arg0: i32) -> (i32, i32, i32) {
    %c0_i32 = arith.constant 0 : i32
    %c0_i32_0 = arith.constant 0 : i32
    %c0_i32_1 = arith.constant 0 : i32
    %c0_i32_2 = arith.constant 0 : i32
    return %c0_i32, %c0_i32_0, %c0_i32_1 : i32, i32, i32
  }
  func.func @transform_18(%arg0: i32) -> (i32, i32, i32) {
    %c0_i32 = arith.constant 0 : i32
    %c0_i32_0 = arith.constant 0 : i32
    %c0_i32_1 = arith.constant 0 : i32
    %c0_i32_2 = arith.constant 0 : i32
    return %c0_i32, %c0_i32_0, %c0_i32_1 : i32, i32, i32
  }
  func.func @transform_19(%arg0: i32) -> (i32, i32, i32) {
    %c0_i32 = arith.constant 0 : i32
    %c0_i32_0 = arith.constant 0 : i32
    %c0_i32_1 = arith.constant 0 : i32
    %c0_i32_2 = arith.constant 0 : i32
    return %c0_i32, %c0_i32_0, %c0_i32_1 : i32, i32, i32
  }
  func.func @transform_20(%arg0: i32) -> (i32, i32, i32) {
    %c0_i32 = arith.constant 0 : i32
    %c0_i32_0 = arith.constant 0 : i32
    %c0_i32_1 = arith.constant 0 : i32
    %c0_i32_2 = arith.constant 0 : i32
    return %c0_i32, %c0_i32_0, %c0_i32_1 : i32, i32, i32
  }
  func.func @transform_21(%arg0: i32) -> (i32, i32, i32) {
    %c0_i32 = arith.constant 0 : i32
    %c0_i32_0 = arith.constant 0 : i32
    %c0_i32_1 = arith.constant 0 : i32
    %c0_i32_2 = arith.constant 0 : i32
    return %c0_i32, %c0_i32_0, %c0_i32_1 : i32, i32, i32
  }
  func.func @transform_22(%arg0: i32) -> (i32, i32, i32) {
    %c0_i32 = arith.constant 0 : i32
    %c0_i32_0 = arith.constant 0 : i32
    %c0_i32_1 = arith.constant 0 : i32
    %c0_i32_2 = arith.constant 0 : i32
    return %c0_i32, %c0_i32_0, %c0_i32_1 : i32, i32, i32
  }
  func.func @transform_23(%arg0: i32) -> (i32, i32, i32) {
    %c0_i32 = arith.constant 0 : i32
    %c0_i32_0 = arith.constant 0 : i32
    %c0_i32_1 = arith.constant 0 : i32
    %c0_i32_2 = arith.constant 0 : i32
    return %c0_i32, %c0_i32_0, %c0_i32_1 : i32, i32, i32
  }
  func.func @transform_24(%arg0: i32) -> (i32, i32) {
    %c0_i32 = arith.constant 0 : i32
    %c0_i32_0 = arith.constant 0 : i32
    %c0_i32_1 = arith.constant 0 : i32
    return %c0_i32, %c0_i32_0 : i32, i32
  }
  func.func @transform_25(%arg0: i32) -> (i32, i32) {
    %c0_i32 = arith.constant 0 : i32
    %c0_i32_0 = arith.constant 0 : i32
    %c0_i32_1 = arith.constant 0 : i32
    return %c0_i32, %c0_i32_0 : i32, i32
  }
  func.func @transform_26(%arg0: i32) -> (i32, i32) {
    %c0_i32 = arith.constant 0 : i32
    %c0_i32_0 = arith.constant 0 : i32
    %c0_i32_1 = arith.constant 0 : i32
    return %c0_i32, %c0_i32_0 : i32, i32
  }
  func.func @transform_27(%arg0: i32) -> (i32, i32) {
    %c0_i32 = arith.constant 0 : i32
    %c0_i32_0 = arith.constant 0 : i32
    %c0_i32_1 = arith.constant 0 : i32
    return %c0_i32, %c0_i32_0 : i32, i32
  }
  func.func @transform_28(%arg0: i32) -> (i32, i32) {
    %c0_i32 = arith.constant 0 : i32
    %c0_i32_0 = arith.constant 0 : i32
    %c0_i32_1 = arith.constant 0 : i32
    return %c0_i32, %c0_i32_0 : i32, i32
  }
  func.func @transform_29(%arg0: i32) -> (i32, i32) {
    %c0_i32 = arith.constant 0 : i32
    %c0_i32_0 = arith.constant 0 : i32
    %c0_i32_1 = arith.constant 0 : i32
    return %c0_i32, %c0_i32_0 : i32, i32
  }
  func.func @transform_30(%arg0: i32) -> (i32, i32, i32) {
    %c0_i32 = arith.constant 0 : i32
    %c0_i32_0 = arith.constant 0 : i32
    %c0_i32_1 = arith.constant 0 : i32
    return %arg0, %c0_i32, %c0_i32_0 : i32, i32, i32
  }
}

</mosaic_0001>

<bundles_post_ra>
// kernel: eeg_conformer_forward.1
= control target key start
LH: loop header
LB: loop body
LE: loop exit
PB: predicated region body
PF: predicated region fallthrough
CT: control target
= control target key end

     0   :  { %s22029_s6 = smov 1   ;;  %s22030_s10 = smov 2   ;;  %s26353_s0 = inlined_call_operand.smem [shape: u32[31], index: -1, kind: input, shape index: {}] }
   0x1   :  { %s22072_s5 = sld [smem:[%s26353_s0]]   ;;  %s22031_s14 = smov 3  }
   0x2   :  { %s22077_s9 = sld [smem:[%s26353_s0 + %s22029_s6]]   ;;  %s22032_s18 = smov 4  }
   0x3   :  { %s22082_s13 = sld [smem:[%s26353_s0 + %s22030_s10]]   ;;  %s22033_s22 = smov 5  }
   0x4   :  { %s22087_s17 = sld [smem:[%s26353_s0 + %s22031_s14]]   ;;  %s22034_s26 = smov 6  }
   0x5   :  { %s22092_s21 = sld [smem:[%s26353_s0 + %s22032_s18]]   ;;  %s22035_s30 = smov 7  }
   0x6   :  { %s22097_s25 = sld [smem:[%s26353_s0 + %s22033_s22]]   ;;  %s22036_s4 = smov 8  }
   0x7   :  { %26481 = sst [smem:[#allocation5_spill]] %s22072_s5  ;;  %s22037_s10 = smov 9  }
   0x8   :  { %26482 = sst [smem:[#allocation6_spill]] %s22077_s9  ;;  %s22038_s15 = smov 10  }
   0x9   :  { %26483 = sst [smem:[#allocation7_spill]] %s22082_s13  ;;  %s22039_s20 = smov 11  }
   0xa   :  { %26484 = sst [smem:[#allocation8_spill]] %s22087_s17  ;;  %s22041_s1 = smov 13  }
   0xb   :  { %26485 = sst [smem:[#allocation9_spill]] %s22092_s21  ;;  %s22042_s7 = smov 14  }
   0xc   :  { %s22102_s29 = sld [smem:[%s26353_s0 + %s22034_s26]]   ;;  %s22040_s26 = smov 12  }
   0xd   :  { %s22107_s3 = sld [smem:[%s26353_s0 + %s22035_s30]]   ;;  %s22044_s22 = smov 16  }
   0xe   :  { %s22112_s8 = sld [smem:[%s26353_s0 + %s22036_s4]]   ;;  %s22045_s28 = smov 17  }
   0xf   :  { %s22117_s14 = sld [smem:[%s26353_s0 + %s22037_s10]]  }
  0x10   :  { %s22122_s19 = sld [smem:[%s26353_s0 + %s22038_s15]]   ;;  %s22043_s15 = smov 15  }
  0x11   :  { %s22127_s24 = sld [smem:[%s26353_s0 + %s22039_s20]]  }
  0x12   :  { %s22132_s30 = sld [smem:[%s26353_s0 + %s22040_s26]]  }
  0x13   :  { %26486 = sst [smem:[#allocation10_spill]] %s22107_s3 }
  0x14   :  { %26487 = sst [smem:[#allocation11_spill]] %s22112_s8 }
  0x15   :  { %s22137_s6 = sld [smem:[%s26353_s0 + %s22041_s1]]  }
  0x16   :  { %s22142_s12 = sld [smem:[%s26353_s0 + %s22042_s7]]   ;;  %s22046_s7 = smov 18  }
  0x17   :  { %s22147_s20 = sld [smem:[%s26353_s0 + %s22043_s15]]   ;;  %s22047_s15 = smov 19  }
  0x18   :  { %s22152_s27 = sld [smem:[%s26353_s0 + %s22044_s22]]   ;;  %s22048_s22 = smov 20  }
  0x19   :  { %s22157_s4 = sld [smem:[%s26353_s0 + %s22045_s28]]   ;;  %s22049_s28 = smov 21  }
  0x1a   :  { %s22162_s3 = sld [smem:[%s26353_s0 + %s22046_s7]]   ;;  %s22050_s7 = smov 22  }
  0x1b   :  { %26488 = sst [smem:[#allocation12_spill]] %s22137_s6 }
  0x1c   :  { %26489 = sst [smem:[#allocation13_spill]] %s22142_s12 }
  0x1d   :  { %26490 = sst [smem:[#allocation14_spill]] %s22147_s20 }
  0x1e   :  { %26491 = sst [smem:[#allocation15_spill]] %s22152_s27 }
  0x1f   :  { %26492 = sst [smem:[#allocation16_spill]] %s22157_s4 }
  0x20   :  { %26493 = sst [smem:[#allocation17_spill]] %s22162_s3 }
  0x21   :  { %s22167_s20 = sld [smem:[%s26353_s0 + %s22047_s15]]   ;;  %s22051_s15 = smov 23  }
  0x22   :  { %s22172_s27 = sld [smem:[%s26353_s0 + %s22048_s22]]   ;;  %s22052_s22 = smov 24  }
  0x23   :  { %s22177_s4 = sld [smem:[%s26353_s0 + %s22049_s28]]   ;;  %s22053_s28 = smov 25  }
  0x24   :  { %s22182_s3 = sld [smem:[%s26353_s0 + %s22050_s7]]   ;;  %s22054_s7 = smov 26  }
  0x27   :  { %26494 = sst [smem:[#allocation18_spill]] %s22167_s20 }
  0x28   :  { %26495 = sst [smem:[#allocation19_spill]] %s22172_s27 }
  0x29   :  { %26496 = sst [smem:[#allocation20_spill]] %s22177_s4 }
  0x2a   :  { %26497 = sst [smem:[#allocation21_spill]] %s22182_s3 }
  0x2b   :  { %s22187_s20 = sld [smem:[%s26353_s0 + %s22051_s15]]   ;;  %s22055_s15 = smov 27  }
  0x2c   :  { %s22192_s27 = sld [smem:[%s26353_s0 + %s22052_s22]]   ;;  %s22056_s22 = smov 28  }
  0x2d   :  { %s22197_s4 = sld [smem:[%s26353_s0 + %s22053_s28]]   ;;  %s22057_s28 = smov 29  }
  0x2e   :  { %s22202_s3 = sld [smem:[%s26353_s0 + %s22054_s7]]   ;;  %s22058_s7 = smov 30  }
  0x31   :  { %26498 = sst [smem:[#allocation22_spill]] %s22187_s20 }
  0x32   :  { %26499 = sst [smem:[#allocation23_spill]] %s22192_s27 }
  0x33   :  { %26500 = sst [smem:[#allocation24_spill]] %s22197_s4 }
  0x34   :  { %26501 = sst [smem:[#allocation25_spill]] %s22202_s3 }
  0x35   :  { %s22207_s20 = sld [smem:[%s26353_s0 + %s22055_s15]]  }
  0x36   :  { %s22212_s27 = sld [smem:[%s26353_s0 + %s22056_s22]]  }
  0x37   :  { %s22217_s4 = sld [smem:[%s26353_s0 + %s22057_s28]]  }
  0x38   :  { %s22222_s3 = sld [smem:[%s26353_s0 + %s22058_s7]]  }
  0x3d   :  { %26502 = sst [smem:[#allocation26_spill]] %s22217_s4 }
  0x3e   :  { %66 = vsyncpa [#allocation3], 0 }
  0x3f   :  { %68 = vsyncpa [#allocation3 + $0x1], 0  ;;  %s22224_s15 = smov 0   ;;  %s22226_s16 = smov 0  }
  0x40   :  { %s22228_s18 = smov 0   ;;  %s22230_s22 = smov 0  }
  0x41 LB: > { %s26503_s12 = sld [smem:[#allocation13_spill]]  ;;  %s26504_s8 = sld [smem:[#allocation11_spill]]  ;;  %s22015_s15 = sphi %s22224_s15, %s26665_s15   ;;  %s22027_s22 = sphi %s22230_s22, %s26668_s22   ;;  %s22023_s18 = sphi %s22228_s18, %s26667_s18   ;;  %s22019_s16 = sphi %s22226_s16, %s26666_s16  }
  0x42   : > { %s26505_s6 = sld [smem:[#allocation12_spill]]  ;;  %s26506_s21 = sld [smem:[#allocation9_spill]] }
  0x43   : > { %s26507_s9 = sld [smem:[#allocation6_spill]]  ;;  %s22245_s0 = sadd.s32 4294967295, %s22027_s22  }
  0x44   : > { %s16905_s23 = sadd.s32 4294967294, %s22027_s22   ;;  %s22249_s26 = sadd.s32 1, %s22027_s22  }
  0x45   : > { %s716_s28 = sadd.s32 1, %s22023_s18  ;;  %s713_s1 = ssub.s32 %s22027_s22, %s22249_s26 }
  0x46   : > { %p726_p0 = scmp.ne.s32.totalorder %s22023_s18, %s22019_s16  ;;  %p714_p1 = scmp.eq.s32.totalorder %s713_s1, 0 }
  0x47   : > { %p727_p2 = scmp.eq.s32.totalorder %s22245_s0, 1  ;;  %p732_p3 = scmp.ne.s32.totalorder %s22019_s16, %s22015_s15 }
  0x48   : > { %p733_p4 = scmp.eq.s32.totalorder %s16905_s23, 1  ;;  %p16908_p7 = scmp.ge.s32.totalorder %s22027_s22, 1 }
  0x49   : > { %s22260_s2 = scalar_select %p714_p1, %s22023_s18, %s716_s28  }
  0x4a   : > { %p22262_p5 = por %p727_p2, %p726_p0  ;;  %p22266_p6 = por %p733_p4, %p732_p3 }
  0x4b   : > { %p846_p8 = scmp.lt.s32.totalorder %s22027_s22, 3 }
  0x4d   : > { %p847_p9 = pnand %p16908_p7, %p846_p8 }
  0x4f   : > { %850 = sbr.rel (%p847_p9) target bundleno = 7399 (0x1ce7), region = 140 }
  0x56   : > { %v941_v0 = vld [vmem:[%s26507_s9] sm:$0xff]  ;;  %v942_v1 = vld [vmem:[%s26507_s9 + $0x8] sm:$0xff]  ;;  %v943_v2 = vld [vmem:[%s26507_s9 + $0x10] sm:$0xff]  ;;  %v26398_v3 = vmov 0.0|0.0   ;;  %vm22060_vm0 = vmmov 0   ;;  %v26390_v8 = vmov 0.0  }
  0x57   : > { %19894 = vmatprep.subr.bf16.mxu0 %v26398_v3  ;;  %v965_v4 = vand.u32 4294901760, %v941_v0  ;;  %v968_v5 = vand.u32 4294901760, %v942_v1  ;;  %v944_v6 = vld [vmem:[%s26507_s9 + $0x18] sm:$0xff]  ;;  %v971_v7 = vand.u32 4294901760, %v943_v2  ;;  %18078 = vmatprep.mubr.msk.f32.mxu0 %vm22060_vm0, %v26390_v8  ;;  %v945_v10 = vld [vmem:[%s26507_s9 + $0x20] sm:$0xff]  ;;  %v22281_v11 = vld [vmem:[%s26507_s9 + $0x28] sm:$0xff] }
  0x58   : > { %v974_v9 = vand.u32 4294901760, %v944_v6  ;;  %20038 = vmatprep.subr.bf16.mxu1 %v26398_v3  ;;  %18498 = vmatprep.mubr.msk.f32.mxu1 %vm22060_vm0, %v26390_v8  ;;  %p923_p10 = scmp.lt.s32.totalorder %s22245_s0, 1  ;;  %s26510_s5 = sld [smem:[#allocation5_spill]]  ;;  %v977_v14 = vand.u32 4294901760, %v945_v10  ;;  %v980_v15 = vand.u32 4294901760, %v22281_v11  ;;  %v947_v16 = vld [vmem:[%s26507_s9 + $0x30] sm:$0xff] }
  0x59   : > { %v22286_v12 = vpack.c.bf16 %v968_v5, %v965_v4  ;;  %v22297_v17 = vld [vmem:[%s26507_s9 + $0x38] sm:$0xff]  ;;  %v983_v19 = vand.u32 4294901760, %v947_v16  ;;  %v22305_v21 = vld [vmem:[%s26507_s9 + $0x40] sm:$0xff]  ;;  %v22308_v22 = vld [vmem:[%s26507_s9 + $0x48] sm:$0xff]  ;;  %v22328_v29 = vsub.f32 %v941_v0, %v965_v4  ;;  %v22330_v30 = vsub.f32 %v942_v1, %v968_v5  ;;  %s26540_s13 = sld [smem:[#allocation7_spill]]  ;;  %s26541_s17 = sld [smem:[#allocation8_spill]] }
  0x5a   : > { %v22290_v13 = vpack.c.bf16 %v974_v9, %v971_v7  ;;  %s924_s11 = scalar_select %p923_p10, %s22245_s0, 1  ;;  %v22300_v18 = vpack.c.bf16 %v980_v15, %v977_v14  ;;  %v986_v20 = vand.u32 4294901760, %v22297_v17  ;;  %v989_v24 = vand.u32 4294901760, %v22305_v21  ;;  %v22323_v27 = vld [vmem:[%s26507_s9 + $0x50] sm:$0xff]  ;;  %v22326_v28 = vld [vmem:[%s26507_s9 + $0x58] sm:$0xff]  ;;  %v22344_v36 = vld [vmem:[%s26507_s9 + $0x60] sm:$0xff] }
  0x5b   : > { %19896 = vmatpush3.bf16.msra.mxu0 %v22286_v12  ;;  %v992_v25 = vand.u32 4294901760, %v22308_v22  ;;  %v995_v33 = vand.u32 4294901760, %v22323_v27  ;;  %v998_v34 = vand.u32 4294901760, %v22326_v28  ;;  %v22347_v37 = vld [vmem:[%s26507_s9 + $0x68] sm:$0xff]  ;;  %v26388_v38 = vand.u32 4294901760, %v22328_v29  ;;  %v22372_v48 = vld [vmem:[%s26507_s9 + $0x70] sm:$0xff] }
  0x5c   : > { %19897 = vmatprep.subr.bf16.mxu0 %v26398_v3  ;;  %s21829_s23 = smul.u32 104, %s924_s11  ;;  %v22316_v23 = vpack.c.bf16 %v986_v20, %v983_v19  ;;  %v26378_v39 = vand.u32 4294901760, %v22330_v30  ;;  %v22351_v40 = vsub.f32 %v943_v2, %v971_v7  ;;  %v22353_v41 = vsub.f32 %v944_v6, %v974_v9  ;;  %v22375_v49 = vld [vmem:[%s26507_s9 + $0x78] sm:$0xff]  ;;  %s26545_s1 = sld [smem:[#allocation14_spill]] }
  0x5d   : > { %v22337_v32 = vpack.c.bf16 %v992_v25, %v989_v24  ;;  %v22366_v45 = vpack.c.bf16 %v998_v34, %v995_v33  ;;  %v1001_v46 = vand.u32 4294901760, %v22344_v36  ;;  %v1004_v47 = vand.u32 4294901760, %v22347_v37  ;;  %s26549_s11 = sld [smem:[#allocation10_spill]]  ;;  %s26557_s9 = sld [smem:[#allocation17_spill]] }
  0x5e   : > { %s22311_s28 = scalar_lea.vmem %s26510_s5, %s21829_s23  ;;  %v22377_v50 = vsub.f32 %v945_v10, %v977_v14  ;;  %v1179_v51 = vsub.f32 %v22328_v29, %v26388_v38  ;;  %v1186_v52 = vsub.f32 %v22330_v30, %v26378_v39  ;;  %v26371_v57 = vand.u32 4294901760, %v22351_v40  ;;  %s26554_s23 = sld [smem:[#allocation15_spill]] }
  0x5f   : > { %19899 = vmatpush3.bf16.msra.mxu0 %v22290_v13  ;;  %v928_v26 = vld [vmem:[%s22311_s28] sm:$0xff]  ;;  %v929_v35 = vld [vmem:[%s22311_s28 + $0x8] sm:$0xff]  ;;  %v930_v44 = vld [vmem:[%s22311_s28 + $0x10] sm:$0xff]  ;;  %v26370_v58 = vand.u32 4294901760, %v22353_v41  ;;  %v22395_v59 = vsub.f32 %v22281_v11, %v980_v15  ;;  %v22402_v60 = vpack.c.bf16 %v1004_v47, %v1001_v46  ;;  %v1007_v61 = vand.u32 4294901760, %v22372_v48  ;;  %s26556_s5 = sld [smem:[#allocation19_spill]] }
  0x60   : > { %19900 = vmatprep.subr.bf16.mxu0 %v26398_v3  ;;  %v22332_v31 = vand.u32 4294901760, %v928_v26  ;;  %v22358_v43 = vand.u32 4294901760, %v929_v35  ;;  %v22385_v53 = vand.u32 4294901760, %v930_v44  ;;  %v931_v54 = vld [vmem:[%s22311_s28 + $0x18] sm:$0xff]  ;;  %v1010_v62 = vand.u32 4294901760, %v22375_v49  ;;  %v932_v10 = vld [vmem:[%s22311_s28 + $0x20] sm:$0xff] }
  0x61   : > { %v22407_v63 = vand.u32 4294901760, %v931_v54  ;;  %v22409_v0 = vsub.f32 %v947_v16, %v983_v19  ;;  %v1180_v1 = vand.u32 4294901760, %v1179_v51  ;;  %v1187_v2 = vand.u32 4294901760, %v1186_v52  ;;  %s26664_s4 = sld [smem:[#allocation26_spill]] }
  0x62   : > { %v22356_v42 = vsub.f32 %v928_v26, %v22332_v31  ;;  %v22390_v56 = vsub.f32 %v929_v35, %v22358_v43  ;;  %v22412_v4 = vsub.f32 %v930_v44, %v22385_v53  ;;  %v1193_v7 = vsub.f32 %v22351_v40, %v26371_v57 }
  0x63   : > { %19902 = vmatpush3.bf16.msra.mxu0 %v22300_v18  ;;  %v1200_v9 = vsub.f32 %v22353_v41, %v26370_v58  ;;  %v22428_v11 = vsub.f32 %v22297_v17, %v986_v20  ;;  %v22435_v14 = vpack.c.bf16 %v1010_v62, %v1007_v61  ;;  %v26369_v15 = vand.u32 4294901760, %v22377_v50 }
  0x64   : > { %19903 = vmatprep.subr.bf16.mxu0 %v26398_v3  ;;  %v26366_v55 = vand.u32 4294901760, %v22356_v42  ;;  %v26367_v6 = vand.u32 4294901760, %v22390_v56  ;;  %v26368_v16 = vand.u32 4294901760, %v22395_v59  ;;  %v22440_v19 = vsub.f32 %v22305_v21, %v989_v24 }
  0x65   : > { %v22444_v17 = vsub.f32 %v931_v54, %v22407_v63  ;;  %v22449_v20 = vsub.f32 %v22308_v22, %v992_v25  ;;  %v19919_v26 = vpack.c.bf16 %v1187_v2, %v1180_v1  ;;  %v26372_v35 = vand.u32 4294901760, %v22412_v4 }
  0x66   : > { %v1048_v5 = vsub.f32 %v22356_v42, %v26366_v55  ;;  %v22452_v44 = vand.u32 4294901760, %v932_v10  ;;  %v1058_v21 = vsub.f32 %v22390_v56, %v26367_v6  ;;  %v1194_v24 = vand.u32 4294901760, %v1193_v7  ;;  %v933_v55 = vld [vmem:[%s22311_s28 + $0x28] sm:$0xff] }
  0x67   : > { %19905 = vmatpush3.bf16.msra.mxu0 %v22316_v23  ;;  %v1201_v52 = vand.u32 4294901760, %v1200_v9  ;;  %v1207_v22 = vsub.f32 %v22377_v50, %v26369_v15  ;;  %v1214_v25 = vsub.f32 %v22395_v59, %v26368_v16  ;;  %v26377_v54 = vand.u32 4294901760, %v22409_v0  ;;  %v934_v15 = vld [vmem:[%s22311_s28 + $0x30] sm:$0xff] }
  0x68   : > { %19906 = vmatprep.subr.bf16.mxu0 %v26398_v3  ;;  %v1049_v51 = vand.u32 4294901760, %v1048_v5  ;;  %v26375_v1 = vand.u32 4294901760, %v22428_v11  ;;  %v22470_v2 = vsub.f32 %v22323_v27, %v995_v33  ;;  %v26373_v5 = vand.u32 4294901760, %v22444_v17 }
  0x69   : > { %v22477_v7 = vsub.f32 %v22326_v28, %v998_v34  ;;  %v1068_v9 = vsub.f32 %v22412_v4, %v26372_v35  ;;  %v22483_v6 = vsub.f32 %v932_v10, %v22452_v44  ;;  %v22485_v16 = vand.u32 4294901760, %v933_v55  ;;  %v935_v35 = vld [vmem:[%s22311_s28 + $0x38] sm:$0xff] }
  0x6a   : > { %v1059_v27 = vand.u32 4294901760, %v1058_v21  ;;  %v19922_v33 = vpack.c.bf16 %v1201_v52, %v1194_v24  ;;  %v26374_v58 = vand.u32 4294901760, %v22440_v19  ;;  %v26376_v57 = vand.u32 4294901760, %v22449_v20 }
  0x6b   : > { %19908 = vmatpush3.bf16.msra.mxu0 %v22337_v32  ;;  %v1208_v28 = vand.u32 4294901760, %v1207_v22  ;;  %v1215_v34 = vand.u32 4294901760, %v1214_v25  ;;  %v1221_v10 = vsub.f32 %v22409_v0, %v26377_v54  ;;  %v22501_v21 = vsub.f32 %v22344_v36, %v1001_v46 }
  0x6c   : > { %19909 = vmatprep.subr.bf16.mxu0 %v26398_v3  ;;  %v1069_v24 = vand.u32 4294901760, %v1068_v9  ;;  %v26384_v52 = vand.u32 4294901760, %v22483_v6  ;;  %v22509_v22 = vsub.f32 %v933_v55, %v22485_v16  ;;  %v22511_v25 = vand.u32 4294901760, %v934_v15 }
  0x6d   : > { %v1235_v36 = vsub.f32 %v22440_v19, %v26374_v58  ;;  %v1242_v46 = vsub.f32 %v22449_v20, %v26376_v57  ;;  %v26379_v9 = vand.u32 4294901760, %v22477_v7  ;;  %v22525_v55 = vsub.f32 %v22347_v37, %v1004_v47 }
  0x6e   : > { %v1222_v58 = vand.u32 4294901760, %v1221_v10  ;;  %v22532_v57 = vsub.f32 %v22372_v48, %v1007_v61  ;;  %v1088_v37 = vsub.f32 %v22483_v6, %v26384_v52  ;;  %v26380_v47 = vand.u32 4294901760, %v22509_v22  ;;  %v936_v10 = vld [vmem:[%s22311_s28 + $0x40] sm:$0xff] }
  0x6f   : > { %19911 = vmatpush3.bf16.msra.mxu0 %v22366_v45  ;;  %v22540_v39 = vsub.f32 %v934_v15, %v22511_v25  ;;  %v1256_v61 = vsub.f32 %v22477_v7, %v26379_v9  ;;  %vm2200_vm8 = vcmask 850944   ;;  %vm2818_vm15 = vcmask 326656  }
  0x70   : > { %19912 = vmatprep.subr.bf16.mxu0 %v26398_v3 }
  0x73   : > { %19914 = vmatpush3.bf16.msra.mxu0 %v22402_v60 }
  0x74   : > { %19915 = vmatprep.subr.bf16.mxu0 %v26398_v3 }
  0x77   : > { %19917 = vmatpush3.bf16.msra.mxu0 %v22435_v14 }
  0x78   : > { %19918 = vmatprep.subr.bf16.mxu0 %v26398_v3 }
  0x7a   : > { %18079 = vmatmul.mubr.f32.vlgmr.msra.gmra.mrb[0].mxu0 %v1049_v51  ;;  %v1228_v51 = vsub.f32 %v22428_v11, %v26375_v1 }
  0x7b   : > { %19920 = vmatpush3.bf16.msra.mxu0 %v19919_v26  ;;  %18081 = vmatprep.mubr.msk.f32.mxu0 %vm22060_vm0, %v26390_v8  ;;  %v1078_v26 = vsub.f32 %v22444_v17, %v26373_v5  ;;  %v26382_v5 = vand.u32 4294901760, %v22470_v2 }
  0x7c   : > { %19921 = vmatprep.subr.bf16.mxu0 %v26398_v3  ;;  %v1229_v1 = vand.u32 4294901760, %v1228_v51  ;;  %v22554_v51 = vsub.f32 %v22375_v49, %v1010_v62  ;;  %v26385_v49 = vand.u32 4294901760, %v22540_v39  ;;  %v22565_v62 = vand.u32 4294901760, %v936_v10 }
  0x7d   : > { %v1079_v54 = vand.u32 4294901760, %v1078_v26  ;;  %v1249_v48 = vsub.f32 %v22470_v2, %v26382_v5  ;;  %v26381_v26 = vand.u32 4294901760, %v22501_v21 }
  0x7e   : > { %18082 = vmatmul.mubr.f32.gmra.mrb[2].mxu0 %v1059_v27  ;;  %v19925_v27 = vpack.c.bf16 %v1215_v34, %v1208_v28  ;;  %v1236_v28 = vand.u32 4294901760, %v1235_v36  ;;  %v1243_v34 = vand.u32 4294901760, %v1242_v46  ;;  %v19928_v15 = vpack.c.bf16 %v1229_v1, %v1222_v58 }
  0x7f   : > { %18084 = vmatprep.mubr.msk.f32.mxu0 %vm22060_vm0, %v26390_v8  ;;  %19923 = vmatpush3.bf16.msra.mxu0 %v19922_v33  ;;  %v22542_v33 = vand.u32 4294901760, %v935_v35  ;;  %v1089_v36 = vand.u32 4294901760, %v1088_v37  ;;  %v1098_v46 = vsub.f32 %v22509_v22, %v26380_v47  ;;  %v1250_v58 = vand.u32 4294901760, %v1249_v48  ;;  %v937_v37 = vld [vmem:[%s22311_s28 + $0x48] sm:$0xff] }
  0x80   : > { %19924 = vmatprep.subr.bf16.mxu0 %v26398_v3  ;;  %v19931_v9 = vpack.c.bf16 %v1243_v34, %v1236_v28  ;;  %v1257_v1 = vand.u32 4294901760, %v1256_v61  ;;  %v1263_v47 = vsub.f32 %v22501_v21, %v26381_v26  ;;  %v26387_v28 = vand.u32 4294901760, %v22532_v57 }
  0x81   : > { %v1099_v34 = vand.u32 4294901760, %v1098_v46  ;;  %v22583_v48 = vsub.f32 %v936_v10, %v22565_v62  ;;  %v1108_v61 = vsub.f32 %v22540_v39, %v26385_v49  ;;  %v22589_v5 = vand.u32 4294901760, %v937_v37 }
  0x82   : > { %18085 = vmatmul.mubr.f32.gmra.mrb[4].mxu0 %v1069_v24  ;;  %v26383_v24 = vand.u32 4294901760, %v22525_v55  ;;  %v19934_v26 = vpack.c.bf16 %v1257_v1, %v1250_v58  ;;  %v1264_v46 = vand.u32 4294901760, %v1263_v47  ;;  %v1277_v10 = vsub.f32 %v22532_v57, %v26387_v28 }
  0x83   : > { %18087 = vmatprep.mubr.msk.f32.mxu0 %vm22060_vm0, %v26390_v8  ;;  %19926 = vmatpush3.bf16.msra.mxu0 %v19925_v27  ;;  %v22568_v27 = vsub.f32 %v935_v35, %v22542_v33  ;;  %v26386_v35 = vand.u32 4294901760, %v22554_v51  ;;  %v26392_v58 = vand.u32 4294901760, %v22583_v48  ;;  %v1109_v49 = vand.u32 4294901760, %v1108_v61 }
  0x84   : > { %19927 = vmatprep.subr.bf16.mxu0 %v26398_v3  ;;  %v22608_v47 = vsub.f32 %v937_v37, %v22589_v5  ;;  %v1278_v28 = vand.u32 4294901760, %v1277_v10 }
  0x86   : > { %18088 = vmatmul.mubr.f32.gmra.mrb[6].mxu0 %v1079_v54  ;;  %v1270_v54 = vsub.f32 %v22525_v55, %v26383_v24  ;;  %v938_v24 = vld [vmem:[%s22311_s28 + $0x50] sm:$0xff] }
  0x87   : > { %18090 = vmatprep.mubr.msk.f32.mxu0 %vm22060_vm0, %v26390_v8  ;;  %19929 = vmatpush3.bf16.msra.mxu0 %v19928_v15  ;;  %v26389_v15 = vand.u32 4294901760, %v22568_v27  ;;  %v22602_v1 = vand.u32 4294901760, %v938_v24 }
  0x88   : > { %19930 = vmatprep.subr.bf16.mxu0 %v26398_v3  ;;  %v1271_v52 = vand.u32 4294901760, %v1270_v54 }
  0x89   : > { %v22618_v61 = vsub.f32 %v938_v24, %v22602_v1 }
  0x8a   : > { %18091 = vmatmul.mubr.f32.gmra.mrb[8].mxu0 %v1089_v36  ;;  %v1284_v36 = vsub.f32 %v22554_v51, %v26386_v35  ;;  %v19937_v54 = vpack.c.bf16 %v1271_v52, %v1264_v46  ;;  %v939_v35 = vld [vmem:[%s22311_s28 + $0x58] sm:$0xff]  ;;  %v940_v46 = vld [vmem:[%s22311_s28 + $0x60] sm:$0xff]  ;;  %s26555_s28 = sld [smem:[#allocation16_spill]] }
  0x8b   : > { %18093 = vmatprep.mubr.msk.f32.mxu0 %vm22060_vm0, %v26390_v8  ;;  %19932 = vmatpush3.bf16.msra.mxu0 %v19931_v9  ;;  %v1118_v9 = vsub.f32 %v22568_v27, %v26389_v15  ;;  %v26395_v15 = vand.u32 4294901760, %v22608_v47 }
  0x8c   : > { %19933 = vmatprep.subr.bf16.mxu0 %v26398_v3  ;;  %v1285_v38 = vand.u32 4294901760, %v1284_v36  ;;  %v26393_v36 = vand.u32 4294901760, %v22618_v61 }
  0x8d   : > { %v1119_v37 = vand.u32 4294901760, %v1118_v9  ;;  %v1138_v24 = vsub.f32 %v22608_v47, %v26395_v15  ;;  %v22634_v9 = vand.u32 4294901760, %v940_v46 }
  0x8e   : > { %18094 = vmatmul.mubr.f32.gmra.mrb[10].mxu0 %v1099_v34  ;;  %v1128_v34 = vsub.f32 %v22583_v48, %v26392_v58  ;;  %v19940_v52 = vpack.c.bf16 %v1285_v38, %v1278_v28  ;;  %v26512_v58 = vand.u32 4294901760, %v22328_v29  ;;  %v26513_v38 = vand.u32 4294901760, %v22330_v30 }
  0x8f   : > { %18096 = vmatprep.mubr.msk.f32.mxu0 %vm22060_vm0, %v26390_v8  ;;  %19935 = vmatpush3.bf16.msra.mxu0 %v19934_v26  ;;  %v22621_v8 = vand.u32 4294901760, %v939_v35  ;;  %v26511_v26 = vmov 0.0  }
  0x90   : > { %19936 = vmatprep.subr.bf16.mxu0 %v26398_v3  ;;  %v1129_v10 = vand.u32 4294901760, %v1128_v34  ;;  %v22640_v28 = vpack.c.bf16 %v26513_v38, %v26512_v58  ;;  %v26515_v38 = vand.u32 4294901760, %v22353_v41 }
  0x92   : > { %18097 = vmatmul.mubr.f32.gmra.mrb[12].mxu0 %v1109_v49  ;;  %v22632_v49 = vsub.f32 %v939_v35, %v22621_v8  ;;  %v1148_v35 = vsub.f32 %v22618_v61, %v26393_v36 }
  0x93   : > { %18099 = vmatprep.mubr.msk.f32.mxu0 %vm22060_vm0, %v26511_v26  ;;  %19938 = vmatpush3.bf16.msra.mxu0 %v19937_v54  ;;  %v1139_v54 = vand.u32 4294901760, %v1138_v24  ;;  %v26514_v24 = vand.u32 4294901760, %v22351_v40 }
  0x94   : > { %19939 = vmatprep.subr.bf16.mxu0 %v26398_v3  ;;  %v26394_v34 = vand.u32 4294901760, %v22632_v49  ;;  %v1149_v58 = vand.u32 4294901760, %v1148_v35  ;;  %v26516_v35 = vand.u32 4294901760, %v22377_v50 }
  0x95   : > { %v22662_v36 = vpack.c.bf16 %v26515_v38, %v26514_v24 }
  0x96   : > { %18100 = vmatmul.mubr.f32.gmra.mrb[14].mxu0 %v1119_v37  ;;  %v22650_v37 = vsub.f32 %v940_v46, %v22634_v9 }
  0x97   : > { %18102 = vmatprep.mubr.msk.f32.mxu0 %vm22060_vm0, %v26511_v26  ;;  %19941 = vmatpush3.bf16.msra.mxu0 %v19940_v52  ;;  %v1158_v52 = vsub.f32 %v22632_v49, %v26394_v34  ;;  %v26517_v34 = vand.u32 4294901760, %v22395_v59 }
  0x98   : > { %19942 = vmatprep.subr.bf16.mxu0 %v26398_v3 }
  0x99   : > { %v1159_v46 = vand.u32 4294901760, %v1158_v52  ;;  %v22673_v15 = vpack.c.bf16 %v26517_v34, %v26516_v35  ;;  %v26519_v52 = vand.u32 4294901760, %v22428_v11  ;;  %v19943_v34 = vpack.c.bf16 %v22330_v30, %v22328_v29 }
  0x9a   : > { %18103 = vmatmul.mubr.f32.gmra.mrb[16].mxu0 %v1129_v10  ;;  %v1167_v10 = vand.u32 4294901760, %v22650_v37  ;;  %v26521_v35 = vand.u32 4294901760, %v22449_v20  ;;  %v19949_v29 = vpack.c.bf16 %v22395_v59, %v22377_v50  ;;  %v19952_v30 = vpack.c.bf16 %v22428_v11, %v22409_v0 }
  0x9b   : > { %18105 = vmatprep.mubr.msk.f32.mxu0 %vm22060_vm0, %v26511_v26  ;;  %v19961_v50 = vpack.c.bf16 %v22525_v55, %v22501_v21  ;;  %v19964_v59 = vpack.c.bf16 %v22554_v51, %v22532_v57  ;;  %v26523_v11 = vand.u32 4294901760, %v22390_v56 }
  0x9e   : > { %18106 = vmatmul.mubr.f32.gmra.mrb[18].mxu0 %v1139_v54  ;;  %v1168_v54 = vsub.f32 %v22650_v37, %v1167_v10 }
  0x9f   : > { %18108 = vmatprep.mubr.msk.f32.mxu0 %vm22060_vm0, %v26511_v26 }
  0xa0   : > { %v1169_v24 = vand.u32 4294901760, %v1168_v54  ;;  %v26520_v54 = vand.u32 4294901760, %v22440_v19 }
  0xa2   : > { %18109 = vmatmul.mubr.f32.gmra.mrb[20].mxu0 %v1149_v58  ;;  %v26518_v58 = vand.u32 4294901760, %v22409_v0  ;;  %v26522_v0 = vand.u32 4294901760, %v22356_v42 }
  0xa3   : > { %18111 = vmatprep.mubr.msk.f32.mxu0 %vm22060_vm0, %v26511_v26 }
  0xa4   : > { %v22683_v38 = vpack.c.bf16 %v26519_v52, %v26518_v58 }
  0xa6   : > { %18112 = vmatmul.mubr.f32.gmra.mrb[22].mxu0 %v1159_v46  ;;  %v19946_v46 = vpack.c.bf16 %v22353_v41, %v22351_v40  ;;  %v19955_v40 = vpack.c.bf16 %v22449_v20, %v22440_v19  ;;  %v19958_v41 = vpack.c.bf16 %v22477_v7, %v22470_v2  ;;  %v26527_v19 = vand.u32 4294901760, %v22470_v2 }
  0xa7   : > { %18114 = vmatprep.mubr.msk.f32.mxu0 %vm22060_vm0, %v26511_v26  ;;  %v26532_v2 = vand.u32 4294901760, %v22540_v39 }
  0xaa   : > { %18115 = vmatmul.mubr.f32.gmra.mrb[24].mxu0 %v1169_v24  ;;  %v22698_v24 = vpack.c.bf16 %v26521_v35, %v26520_v54 }
  0xab   : > { %18149 = vmatprep.mubr.msk.f32.mxu0 %vm22060_vm0, %v26511_v26 }
  0xae   : > { %18150 = vmatmul.mubr.f32.vlgmr.msra.gmra.mrb[0].mxu0 %v22332_v31 }
  0xaf   : > { %19944 = vmatpush3.bf16.msra.mxu0 %v19943_v34  ;;  %18152 = vmatprep.mubr.msk.f32.mxu0 %vm22060_vm0, %v26511_v26 }
  0xb0   : > { %19945 = vmatprep.subr.bf16.mxu0 %v26398_v3 }
  0xb2   : > { %18153 = vmatmul.mubr.f32.gmra.mrb[2].mxu0 %v22358_v43 }
  0xb3   : > { %18155 = vmatprep.mubr.msk.f32.mxu0 %vm22060_vm0, %v26511_v26  ;;  %19947 = vmatpush3.bf16.msra.mxu0 %v19946_v46 }
  0xb4   : > { %19948 = vmatprep.subr.bf16.mxu0 %v26398_v3 }
  0xb6   : > { %18156 = vmatmul.mubr.f32.gmra.mrb[4].mxu0 %v22385_v53 }
  0xb7   : > { %18158 = vmatprep.mubr.msk.f32.mxu0 %vm22060_vm0, %v26511_v26  ;;  %19950 = vmatpush3.bf16.msra.mxu0 %v19949_v29 }
  0xb8   : > { %19951 = vmatprep.subr.bf16.mxu0 %v26398_v3 }
  0xba   : > { %18159 = vmatmul.mubr.f32.gmra.mrb[6].mxu0 %v22407_v63 }
  0xbb   : > { %18161 = vmatprep.mubr.msk.f32.mxu0 %vm22060_vm0, %v26511_v26  ;;  %19953 = vmatpush3.bf16.msra.mxu0 %v19952_v30 }
  0xbc   : > { %19954 = vmatprep.subr.bf16.mxu0 %v26398_v3 }
  0xbe   : > { %18162 = vmatmul.mubr.f32.gmra.mrb[8].mxu0 %v22452_v44 }
  0xbf   : > { %18164 = vmatprep.mubr.msk.f32.mxu0 %vm22060_vm0, %v26511_v26  ;;  %19956 = vmatpush3.bf16.msra.mxu0 %v19955_v40 }
  0xc0   : > { %19957 = vmatprep.subr.bf16.mxu0 %v26398_v3 }
  0xc2   : > { %18165 = vmatmul.mubr.f32.gmra.mrb[10].mxu0 %v22485_v16 }
  0xc3   : > { %18167 = vmatprep.mubr.msk.f32.mxu0 %vm22060_vm0, %v26511_v26  ;;  %19959 = vmatpush3.bf16.msra.mxu0 %v19958_v41 }
  0xc4   : > { %19960 = vmatprep.subr.bf16.mxu0 %v26398_v3 }
  0xc6   : > { %18168 = vmatmul.mubr.f32.gmra.mrb[12].mxu0 %v22511_v25 }
  0xc7   : > { %18170 = vmatprep.mubr.msk.f32.mxu0 %vm22060_vm0, %v26511_v26  ;;  %19962 = vmatpush3.bf16.msra.mxu0 %v19961_v50 }
  0xc8   : > { %19963 = vmatprep.subr.bf16.mxu0 %v26398_v3 }
  0xca   : > { %18171 = vmatmul.mubr.f32.gmra.mrb[14].mxu0 %v22542_v33 }
  0xcb   : > { %18173 = vmatprep.mubr.msk.f32.mxu0 %vm22060_vm0, %v26511_v26  ;;  %19965 = vmatpush3.bf16.msra.mxu0 %v19964_v59 }
  0xcc   : > { %19966 = vmatprep.subr.bf16.mxu0 %v26398_v3 }
  0xce   : > { %18174 = vmatmul.mubr.f32.gmra.mrb[16].mxu0 %v22565_v62 }
  0xcf   : > { %18176 = vmatprep.mubr.msk.f32.mxu0 %vm22060_vm0, %v26511_v26 }
  0xd2   : > { %18177 = vmatmul.mubr.f32.gmra.mrb[18].mxu0 %v22589_v5 }
  0xd3   : > { %18179 = vmatprep.mubr.msk.f32.mxu0 %vm22060_vm0, %v26511_v26 }
  0xd6   : > { %18180 = vmatmul.mubr.f32.gmra.mrb[20].mxu0 %v22602_v1 }
  0xd7   : > { %18182 = vmatprep.mubr.msk.f32.mxu0 %vm22060_vm0, %v26511_v26 }
  0xda   : > { %18183 = vmatmul.mubr.f32.gmra.mrb[22].mxu0 %v22621_v8 }
  0xdb   : > { %18185 = vmatprep.mubr.msk.f32.mxu0 %vm22060_vm0, %v26511_v26 }
  0xde   : > { %18186 = vmatmul.mubr.f32.gmra.mrb[24].mxu0 %v22634_v9 }
  0xdf   : > { %18220 = vmatprep.mubr.msk.f32.mxu0 %vm22060_vm0, %v26511_v26 }
  0xe2   : > { %18221 = vmatmul.mubr.f32.vlgmr.msra.gmra.mrb[0].mxu0 %v22356_v42  ;;  %v26524_v42 = vand.u32 4294901760, %v22412_v4 }
  0xe3   : > { %19968 = vmatpush3.bf16.msra.mxu0 %v22286_v12  ;;  %18223 = vmatprep.mubr.msk.f32.mxu0 %vm22060_vm0, %v26511_v26 }
  0xe4   : > { %19969 = vmatprep.subr.bf16.mxu0 %v26398_v3 }
  0xe6   : > { %18224 = vmatmul.mubr.f32.gmra.mrb[2].mxu0 %v22390_v56  ;;  %v26525_v56 = vand.u32 4294901760, %v22444_v17 }
  0xe7   : > { %18226 = vmatprep.mubr.msk.f32.mxu0 %vm22060_vm0, %v26511_v26  ;;  %19971 = vmatpush3.bf16.msra.mxu0 %v22290_v13 }
  0xe8   : > { %19972 = vmatprep.subr.bf16.mxu0 %v26398_v3 }
  0xea   : > { %18227 = vmatmul.mubr.f32.gmra.mrb[4].mxu0 %v22412_v4  ;;  %v26526_v4 = vand.u32 4294901760, %v22483_v6 }
  0xeb   : > { %18229 = vmatprep.mubr.msk.f32.mxu0 %vm22060_vm0, %v26511_v26  ;;  %19974 = vmatpush3.bf16.msra.mxu0 %v22300_v18 }
  0xec   : > { %19975 = vmatprep.subr.bf16.mxu0 %v26398_v3 }
  0xee   : > { %18230 = vmatmul.mubr.f32.gmra.mrb[6].mxu0 %v22444_v17  ;;  %v26528_v17 = vand.u32 4294901760, %v22477_v7  ;;  %v26533_v7 = vand.u32 4294901760, %v22532_v57  ;;  %v26537_v57 = vand.u32 4294901760, %v22608_v47 }
  0xef   : > { %18232 = vmatprep.mubr.msk.f32.mxu0 %vm22060_vm0, %v26511_v26  ;;  %19977 = vmatpush3.bf16.msra.mxu0 %v22316_v23 }
  0xf0   : > { %19978 = vmatprep.subr.bf16.mxu0 %v26398_v3  ;;  %v20006_v20 = vpack.c.bf16 %v26528_v17, %v26527_v19 }
  0xf2   : > { %18233 = vmatmul.mubr.f32.gmra.mrb[8].mxu0 %v22483_v6  ;;  %v26530_v6 = vand.u32 4294901760, %v22501_v21  ;;  %v26535_v21 = vand.u32 4294901760, %v22568_v27 }
  0xf3   : > { %18235 = vmatprep.mubr.msk.f32.mxu0 %vm22060_vm0, %v26511_v26  ;;  %19980 = vmatpush3.bf16.msra.mxu0 %v22337_v32 }
  0xf4   : > { %19981 = vmatprep.subr.bf16.mxu0 %v26398_v3 }
  0xf6   : > { %18236 = vmatmul.mubr.f32.gmra.mrb[10].mxu0 %v22509_v22 }
  0xf7   : > { %18238 = vmatprep.mubr.msk.f32.mxu0 %vm22060_vm0, %v26511_v26  ;;  %19983 = vmatpush3.bf16.msra.mxu0 %v22366_v45 }
  0xf8   : > { %19984 = vmatprep.subr.bf16.mxu0 %v26398_v3 }
  0xfa   : > { %18239 = vmatmul.mubr.f32.gmra.mrb[12].mxu0 %v22540_v39  ;;  %v26536_v39 = vand.u32 4294901760, %v22583_v48 }
  0xfb   : > { %18241 = vmatprep.mubr.msk.f32.mxu0 %vm22060_vm0, %v26511_v26  ;;  %19986 = vmatpush3.bf16.msra.mxu0 %v22402_v60 }
  0xfc   : > { %19987 = vmatprep.subr.bf16.mxu0 %v26398_v3 }
  0xfe   : > { %18242 = vmatmul.mubr.f32.gmra.mrb[14].mxu0 %v22568_v27 }
  0xff   : > { %18244 = vmatprep.mubr.msk.f32.mxu0 %vm22060_vm0, %v26511_v26  ;;  %19989 = vmatpush3.bf16.msra.mxu0 %v22435_v14 }
 0x100   : > { %19990 = vmatprep.subr.bf16.mxu0 %v26398_v3 }
 0x102   : > { %18245 = vmatmul.mubr.f32.gmra.mrb[16].mxu0 %v22583_v48 }
 0x103   : > { %18247 = vmatprep.mubr.msk.f32.mxu0 %vm22060_vm0, %v26511_v26 }
 0x106   : > { %18248 = vmatmul.mubr.f32.gmra.mrb[18].mxu0 %v22608_v47 }
 0x107   : > { %18250 = vmatprep.mubr.msk.f32.mxu0 %vm22060_vm0, %v26511_v26 }
 0x10a   : > { %18251 = vmatmul.mubr.f32.gmra.mrb[20].mxu0 %v22618_v61 }
 0x10b   : > { %18253 = vmatprep.mubr.msk.f32.mxu0 %vm22060_vm0, %v26511_v26 }
 0x10e   : > { %18254 = vmatmul.mubr.f32.gmra.mrb[22].mxu0 %v22632_v49 }
 0x10f   : > { %18256 = vmatprep.mubr.msk.f32.mxu0 %vm22060_vm0, %v26511_v26 }
 0x112   : > { %18257 = vmatmul.mubr.f32.gmra.mrb[24].mxu0 %v22650_v37 }
 0x113   : > { %18291 = vmatprep.mubr.msk.f32.mxu0 %vm22060_vm0, %v26511_v26 }
 0x116   : > { %18292 = vmatmul.mubr.f32.vlgmr.msra.gmra.mrb[0].mxu0 %v26522_v0 }
 0x117   : > { %19992 = vmatpush3.bf16.msra.mxu0 %v22640_v28  ;;  %18294 = vmatprep.mubr.msk.f32.mxu0 %vm22060_vm0, %v26511_v26 }
 0x118   : > { %19993 = vmatprep.subr.bf16.mxu0 %v26398_v3 }
 0x11a   : > { %18295 = vmatmul.mubr.f32.gmra.mrb[2].mxu0 %v26523_v11 }
 0x11b   : > { %18297 = vmatprep.mubr.msk.f32.mxu0 %vm22060_vm0, %v26511_v26  ;;  %19995 = vmatpush3.bf16.msra.mxu0 %v22662_v36  ;;  %v26531_v36 = vand.u32 4294901760, %v22525_v55  ;;  %v26538_v55 = vand.u32 4294901760, %v22618_v61 }
 0x11c   : > { %19996 = vmatprep.subr.bf16.mxu0 %v26398_v3 }
 0x11d   : > { %v20009_v28 = vpack.c.bf16 %v26531_v36, %v26530_v6 }
 0x11e   : > { %18298 = vmatmul.mubr.f32.gmra.mrb[4].mxu0 %v26524_v42 }
 0x11f   : > { %18300 = vmatprep.mubr.msk.f32.mxu0 %vm22060_vm0, %v26511_v26  ;;  %19998 = vmatpush3.bf16.msra.mxu0 %v22673_v15  ;;  %v26529_v15 = vand.u32 4294901760, %v22509_v22  ;;  %v26534_v22 = vand.u32 4294901760, %v22554_v51  ;;  %v26539_v51 = vand.u32 4294901760, %v22632_v49 }
 0x120   : > { %19999 = vmatprep.subr.bf16.mxu0 %v26398_v3 }
 0x121   : > { %v20012_v58 = vpack.c.bf16 %v26534_v22, %v26533_v7 }
 0x122   : > { %18301 = vmatmul.mubr.f32.gmra.mrb[6].mxu0 %v26525_v56 }
 0x123   : > { %18303 = vmatprep.mubr.msk.f32.mxu0 %vm22060_vm0, %v26511_v26  ;;  %20001 = vmatpush3.bf16.msra.mxu0 %v22683_v38 }
 0x124   : > { %20002 = vmatprep.subr.bf16.mxu0 %v26398_v3 }
 0x126   : > { %18304 = vmatmul.mubr.f32.gmra.mrb[8].mxu0 %v26526_v4 }
 0x127   : > { %18306 = vmatprep.mubr.msk.f32.mxu0 %vm22060_vm0, %v26511_v26  ;;  %20004 = vmatpush3.bf16.msra.mxu0 %v22698_v24 }
 0x128   : > { %20005 = vmatprep.subr.bf16.mxu0 %v26398_v3 }
 0x12a   : > { %18307 = vmatmul.mubr.f32.gmra.mrb[10].mxu0 %v26529_v15 }
 0x12b   : > { %18309 = vmatprep.mubr.msk.f32.mxu0 %vm22060_vm0, %v26511_v26  ;;  %20007 = vmatpush3.bf16.msra.mxu0 %v20006_v20 }
 0x12c   : > { %20008 = vmatprep.subr.bf16.mxu0 %v26398_v3 }
 0x12e   : > { %18310 = vmatmul.mubr.f32.gmra.mrb[12].mxu0 %v26532_v2 }
 0x12f   : > { %18312 = vmatprep.mubr.msk.f32.mxu0 %vm22060_vm0, %v26511_v26  ;;  %20010 = vmatpush3.bf16.msra.mxu0 %v20009_v28 }
 0x130   : > { %20011 = vmatprep.subr.bf16.mxu0 %v26398_v3 }
 0x132   : > { %18313 = vmatmul.mubr.f32.gmra.mrb[14].mxu0 %v26535_v21 }
 0x133   : > { %18315 = vmatprep.mubr.msk.f32.mxu0 %vm22060_vm0, %v26511_v26  ;;  %20013 = vmatpush3.bf16.msra.mxu0 %v20012_v58 }
 0x134   : > { %20014 = vmatprep.subr.bf16.mxu0 %v26398_v3 }
 0x136   : > { %18316 = vmatmul.mubr.f32.gmra.mrb[16].mxu0 %v26536_v39 }
 0x137   : > { %18318 = vmatprep.mubr.msk.f32.mxu0 %vm22060_vm0, %v26511_v26 }
 0x13a   : > { %18319 = vmatmul.mubr.f32.gmra.mrb[18].mxu0 %v26537_v57 }
 0x13b   : > { %18321 = vmatprep.mubr.msk.f32.mxu0 %vm22060_vm0, %v26511_v26 }
 0x13e   : > { %18322 = vmatmul.mubr.f32.gmra.mrb[20].mxu0 %v26538_v55 }
 0x13f   : > { %18324 = vmatprep.mubr.msk.f32.mxu0 %vm22060_vm0, %v26511_v26 }
 0x142   : > { %18325 = vmatmul.mubr.f32.gmra.mrb[22].mxu0 %v26539_v51 }
 0x143   : > { %18327 = vmatprep.mubr.msk.f32.mxu0 %vm22060_vm0, %v26511_v26 }
 0x146   : > { %18328 = vmatmul.mubr.f32.gmra.mrb[24].mxu0 %v1167_v10 }
 0x147   : > { %18362 = vmatprep.mubr.msk.f32.mxu0 %vm22060_vm0, %v26511_v26 }
 0x14a   : > { %18363 = vmatmul.mubr.f32.vlgmr.msra.gmra.mrb[0].mxu0 %v22332_v31 }
 0x14b   : > { %20016 = vmatpush3.bf16.msra.mxu0 %v22286_v12  ;;  %18365 = vmatprep.mubr.msk.f32.mxu0 %vm22060_vm0, %v26511_v26  ;;  %v22983_v12 = vld [vmem:[%s26540_s13] ss:$0 sm:$0xff]  ;;  %s26559_s13 = sld [smem:[#allocation21_spill]] }
 0x14c   : > { %20017 = vmatprep.subr.bf16.mxu0 %v26398_v3 }
 0x14e   : > { %18366 = vmatmul.mubr.f32.gmra.mrb[2].mxu0 %v22358_v43 }
 0x14f   : > { %18368 = vmatprep.mubr.msk.f32.mxu0 %vm22060_vm0, %v26511_v26  ;;  %20019 = vmatpush3.bf16.msra.mxu0 %v22290_v13 }
 0x150   : > { %20020 = vmatprep.subr.bf16.mxu0 %v26398_v3 }
 0x152   : > { %18369 = vmatmul.mubr.f32.gmra.mrb[4].mxu0 %v22385_v53 }
 0x153   : > { %18371 = vmatprep.mubr.msk.f32.mxu0 %vm22060_vm0, %v26511_v26  ;;  %20022 = vmatpush3.bf16.msra.mxu0 %v22300_v18 }
 0x154   : > { %20023 = vmatprep.subr.bf16.mxu0 %v26398_v3 }
 0x156   : > { %18372 = vmatmul.mubr.f32.gmra.mrb[6].mxu0 %v22407_v63 }
 0x157   : > { %18374 = vmatprep.mubr.msk.f32.mxu0 %vm22060_vm0, %v26511_v26  ;;  %20025 = vmatpush3.bf16.msra.mxu0 %v22316_v23 }
 0x158   : > { %20026 = vmatprep.subr.bf16.mxu0 %v26398_v3 }
 0x15a   : > { %18375 = vmatmul.mubr.f32.gmra.mrb[8].mxu0 %v22452_v44 }
 0x15b   : > { %18377 = vmatprep.mubr.msk.f32.mxu0 %vm22060_vm0, %v26511_v26  ;;  %20028 = vmatpush3.bf16.msra.mxu0 %v22337_v32 }
 0x15c   : > { %20029 = vmatprep.subr.bf16.mxu0 %v26398_v3 }
 0x15e   : > { %18378 = vmatmul.mubr.f32.gmra.mrb[10].mxu0 %v22485_v16 }
 0x15f   : > { %18380 = vmatprep.mubr.msk.f32.mxu0 %vm22060_vm0, %v26511_v26  ;;  %20031 = vmatpush3.bf16.msra.mxu0 %v22366_v45 }
 0x160   : > { %20032 = vmatprep.subr.bf16.mxu0 %v26398_v3 }
 0x162   : > { %18381 = vmatmul.mubr.f32.gmra.mrb[12].mxu0 %v22511_v25 }
 0x163   : > { %18383 = vmatprep.mubr.msk.f32.mxu0 %vm22060_vm0, %v26511_v26  ;;  %20034 = vmatpush3.bf16.msra.mxu0 %v22402_v60 }
 0x164   : > { %20035 = vmatprep.subr.bf16.mxu0 %v26398_v3 }
 0x166   : > { %18384 = vmatmul.mubr.f32.gmra.mrb[14].mxu0 %v22542_v33 }
 0x167   : > { %18386 = vmatprep.mubr.msk.f32.mxu0 %vm22060_vm0, %v26511_v26  ;;  %20037 = vmatpush3.bf16.msra.mxu0 %v22435_v14 }
 0x168   : > { %20260 = vmatprep.subr.bf16.mxu0 %v26398_v3 }
 0x16a   : > { %18387 = vmatmul.mubr.f32.gmra.mrb[16].mxu0 %v22565_v62 }
 0x16b   : > { %18389 = vmatprep.mubr.msk.f32.mxu0 %vm22060_vm0, %v26511_v26 }
 0x16e   : > { %18390 = vmatmul.mubr.f32.gmra.mrb[18].mxu0 %v22589_v5 }
 0x16f   : > { %18392 = vmatprep.mubr.msk.f32.mxu0 %vm22060_vm0, %v26511_v26 }
 0x172   : > { %18393 = vmatmul.mubr.f32.gmra.mrb[20].mxu0 %v22602_v1 }
 0x173   : > { %18395 = vmatprep.mubr.msk.f32.mxu0 %vm22060_vm0, %v26511_v26 }
 0x176   : > { %18396 = vmatmul.mubr.f32.gmra.mrb[22].mxu0 %v22621_v8 }
 0x177   : > { %18398 = vmatprep.mubr.msk.f32.mxu0 %vm22060_vm0, %v26511_v26 }
 0x17a   : > { %18399 = vmatmul.mubr.f32.gmra.mrb[24].mxu0 %v22634_v9 }
 0x17b   : > { %18433 = vmatprep.mubr.msk.f32.mxu0 %vm22060_vm0, %v26511_v26 }
 0x17e   : > { %18434 = vmatmul.mubr.f32.vlgmr.msra.gmra.mrb[0].mxu0 %v22332_v31 }
 0x17f   : > { %18436 = vmatprep.mubr.msk.f32.mxu0 %vm22060_vm0, %v26511_v26 }
 0x182   : > { %18437 = vmatmul.mubr.f32.gmra.mrb[2].mxu0 %v22358_v43 }
 0x183   : > { %18439 = vmatprep.mubr.msk.f32.mxu0 %vm22060_vm0, %v26511_v26 }
 0x186   : > { %18440 = vmatmul.mubr.f32.gmra.mrb[4].mxu0 %v22385_v53 }
 0x187   : > { %18442 = vmatprep.mubr.msk.f32.mxu0 %vm22060_vm0, %v26511_v26 }
 0x18a   : > { %18443 = vmatmul.mubr.f32.gmra.mrb[6].mxu0 %v22407_v63 }
 0x18b   : > { %18445 = vmatprep.mubr.msk.f32.mxu0 %vm22060_vm0, %v26511_v26 }
 0x18e   : > { %18446 = vmatmul.mubr.f32.gmra.mrb[8].mxu0 %v22452_v44 }
 0x18f   : > { %18448 = vmatprep.mubr.msk.f32.mxu0 %vm22060_vm0, %v26511_v26 }
 0x192   : > { %18449 = vmatmul.mubr.f32.gmra.mrb[10].mxu0 %v22485_v16 }
 0x193   : > { %18451 = vmatprep.mubr.msk.f32.mxu0 %vm22060_vm0, %v26511_v26 }
 0x196   : > { %18452 = vmatmul.mubr.f32.gmra.mrb[12].mxu0 %v22511_v25 }
 0x197   : > { %18454 = vmatprep.mubr.msk.f32.mxu0 %vm22060_vm0, %v26511_v26 }
 0x19a   : > { %18455 = vmatmul.mubr.f32.gmra.mrb[14].mxu0 %v22542_v33 }
 0x19b   : > { %18457 = vmatprep.mubr.msk.f32.mxu0 %vm22060_vm0, %v26511_v26 }
 0x19e   : > { %18458 = vmatmul.mubr.f32.gmra.mrb[16].mxu0 %v22565_v62 }
 0x19f   : > { %18460 = vmatprep.mubr.msk.f32.mxu0 %vm22060_vm0, %v26511_v26 }
 0x1a2   : > { %18461 = vmatmul.mubr.f32.gmra.mrb[18].mxu0 %v22589_v5 }
 0x1a3   : > { %18463 = vmatprep.mubr.msk.f32.mxu0 %vm22060_vm0, %v26511_v26 }
 0x1a6   : > { %18464 = vmatmul.mubr.f32.gmra.mrb[20].mxu0 %v22602_v1 }
 0x1a7   : > { %18466 = vmatprep.mubr.msk.f32.mxu0 %vm22060_vm0, %v26511_v26 }
 0x1aa   : > { %18467 = vmatmul.mubr.f32.gmra.mrb[22].mxu0 %v22621_v8 }
 0x1ab   : > { %18469 = vmatprep.mubr.msk.f32.mxu0 %vm22060_vm0, %v26511_v26 }
 0x1ae   : > { %18470 = vmatmul.mubr.f32.gmra.mrb[24].mxu0 %v22634_v9 }
 0x1af   : > { %18903 = vmatprep.mubr.msk.f32.mxu0 %vm22060_vm0, %v26511_v26 }
 0x251   : > { %v2045_v13 = vpop.f32.mrb[0].mxu0 }
 0x252   : > { %v21466_v18 = vadd.f32 %v22983_v12, %v2045_v13  ;;  %v18435_v23 = vpop.f32.mrb[1].mxu0 }
 0x254   : > { %v2134_v31 = vmin.f32 %v21466_v18, 0.0  ;;  %vm2121_vm1 = vcmp.gt.f32.partialorder %v21466_v18, 0.0 }
 0x255   : > { %v2051_v32 = vpop.f32.mrb[2].mxu0 }
 0x256   : > { %v2147_v43 = vmul.f32 1.442695, %v2134_v31  ;;  %v21467_v45 = vadd.f32 %v22983_v12, %v2051_v32  ;;  %v18438_v8 = vpop.f32.mrb[3].mxu0 }
 0x258   : > { %21903 = vpow2.f32 %v2147_v43  ;;  %v2135_v53 = vmin.f32 %v21467_v45, 0.0  ;;  %vm2122_vm2 = vcmp.gt.f32.partialorder %v21467_v45, 0.0 }
 0x259   : > { %v2057_v60 = vpop.f32.mrb[4].mxu0 }
 0x25a   : > { %v2149_v63 = vmul.f32 1.442695, %v2135_v53  ;;  %v21468_v14 = vadd.f32 %v22983_v12, %v2057_v60  ;;  %v18441_v16 = vpop.f32.mrb[5].mxu0 }
 0x25c   : > { %21905 = vpow2.f32 %v2149_v63  ;;  %v2136_v44 = vmin.f32 %v21468_v14, 0.0  ;;  %vm2123_vm3 = vcmp.gt.f32.partialorder %v21468_v14, 0.0 }
 0x25d   : > { %v2063_v5 = vpop.f32.mrb[6].mxu0 }
 0x25e   : > { %v2151_v25 = vmul.f32 1.442695, %v2136_v44  ;;  %v21469_v33 = vadd.f32 %v22983_v12, %v2063_v5  ;;  %v18444_v62 = vpop.f32.mrb[7].mxu0 }
 0x260   : > { %21907 = vpow2.f32 %v2151_v25  ;;  %v2137_v27 = vmin.f32 %v21469_v33, 0.0  ;;  %vm2124_vm4 = vcmp.gt.f32.partialorder %v21469_v33, 0.0 }
 0x261   : > { %v2069_v48 = vpop.f32.mrb[8].mxu0 }
 0x262   : > { %v21904_v1 = vpop.eup %21903  ;;  %v2153_v47 = vmul.f32 1.442695, %v2137_v27  ;;  %v22990_v61 = vadd.f32 %v22983_v12, %v2069_v48  ;;  %v18447_v49 = vpop.f32.mrb[9].mxu0 }
 0x263   : > { %v16911_v9 = vadd.f32 -1.0, %v21904_v1 }
 0x264   : > { %21909 = vpow2.f32 %v2153_v47  ;;  %v2138_v37 = vmin.f32 %v22990_v61, 0.0  ;;  %vm2125_vm5 = vcmp.gt.f32.partialorder %v22990_v61, 0.0 }
 0x265   : > { %v2186_v10 = vsel %vm2121_vm1, %v21466_v18, %v16911_v9  ;;  %v2075_v52 = vpop.f32.mrb[10].mxu0  ;;  %vm3329_vm1 = vcmask 320512  }
 0x266   : > { %v21906_v38 = vpop.eup %21905  ;;  %v2205_v34 = vand.u32 4294901760, %v2186_v10  ;;  %v2155_v46 = vmul.f32 1.442695, %v2138_v37  ;;  %v22994_v54 = vadd.f32 %v22983_v12, %v2075_v52  ;;  %v18450_v35 = vpop.f32.mrb[11].mxu0 }
 0x267   : > { %v16912_v24 = vadd.f32 -1.0, %v21906_v38 }
 0x268   : > { %v22996_v29 = vsub.f32 %v2186_v10, %v2205_v34  ;;  %21911 = vpow2.f32 %v2155_v46  ;;  %v2139_v30 = vmin.f32 %v22994_v54, 0.0  ;;  %vm2126_vm6 = vcmp.gt.f32.partialorder %v22994_v54, 0.0 }
 0x269   : > { %v2187_v40 = vsel %vm2122_vm2, %v21467_v45, %v16912_v24  ;;  %v2081_v41 = vpop.f32.mrb[12].mxu0  ;;  %vm5918_vm2 = vcmask 1041408  }
 0x26a   : > { %v21908_v50 = vpop.eup %21907  ;;  %v2208_v59 = vand.u32 4294901760, %v2187_v40  ;;  %v2157_v0 = vmul.f32 1.442695, %v2139_v30  ;;  %v23000_v11 = vadd.f32 %v22983_v12, %v2081_v41  ;;  %v18453_v42 = vpop.f32.mrb[13].mxu0  ;;  %v2295_v56 = vand.u32 4294901760, %v22996_v29 }
 0x26b   : > { %v16913_v4 = vadd.f32 -1.0, %v21908_v50 }
 0x26c   : > { %v23003_v19 = vsub.f32 %v2187_v40, %v2208_v59  ;;  %21913 = vpow2.f32 %v2157_v0  ;;  %v2140_v17 = vmin.f32 %v23000_v11, 0.0  ;;  %v23006_v6 = vpack.c.bf16 %v2208_v59, %v2205_v34 }
 0x26d   : > { %v2188_v20 = vsel %vm2123_vm3, %v21468_v14, %v16913_v4  ;;  %v2087_v15 = vpop.f32.mrb[14].mxu0  ;;  %v2296_v39 = vsub.f32 %v22996_v29, %v2295_v56  ;;  %vm2127_vm7 = vcmp.gt.f32.partialorder %v23000_v11, 0.0  ;;  %vm5914_vm3 = vcmask 80896  }
 0x26e   : > { %v21910_v36 = vpop.eup %21909  ;;  %v2302_v28 = vand.u32 4294901760, %v23003_v19  ;;  %v2211_v2 = vand.u32 4294901760, %v2188_v20  ;;  %v2159_v7 = vmul.f32 1.442695, %v2140_v17  ;;  %v23010_v22 = vadd.f32 %v22983_v12, %v2087_v15  ;;  %v18456_v58 = vpop.f32.mrb[15].mxu0  ;;  %20040 = vmatpush3.bf16.msra.mxu1 %v23006_v6 }
 0x26f   : > { %v16914_v21 = vadd.f32 -1.0, %v21910_v36  ;;  %v20075_v57 = vpack.c.bf16 %v23003_v19, %v22996_v29  ;;  %20041 = vmatprep.subr.bf16.mxu1 %v26398_v3  ;;  %v2297_v14 = vand.u32 4294901760, %v2296_v39  ;;  %v2806_v29 = vld [vmem:[%s26506_s21] sm:$0xff] }
 0x270   : > { %v23016_v55 = vsub.f32 %v2188_v20, %v2211_v2  ;;  %21915 = vpow2.f32 %v2159_v7  ;;  %v2141_v51 = vmin.f32 %v23010_v22, 0.0  ;;  %v2303_v23 = vsub.f32 %v23003_v19, %v2302_v28  ;;  %v2807_v19 = vld [vmem:[%s26506_s21 + $0x8] sm:$0xff] }
 0x271   : > { %v2189_v13 = vsel %vm2124_vm4, %v21469_v33, %v16914_v21  ;;  %v2093_v18 = vpop.f32.mrb[16].mxu0  ;;  %v23021_v31 = vpack.c.bf16 %v2302_v28, %v2295_v56  ;;  %vm2128_vm9 = vcmp.gt.f32.partialorder %v23010_v22, 0.0  ;;  %vm8038_vm4 = vcmask 261120  }
 0x272   : > { %v21912_v32 = vpop.eup %21911  ;;  %v2214_v43 = vand.u32 4294901760, %v2189_v13  ;;  %v2161_v45 = vmul.f32 1.442695, %v2141_v51  ;;  %v23024_v8 = vadd.f32 %v22983_v12, %v2093_v18  ;;  %v18459_v53 = vpop.f32.mrb[17].mxu0  ;;  %v2309_v60 = vand.u32 4294901760, %v23016_v55 }
 0x273   : > { %v16915_v63 = vadd.f32 -1.0, %v21912_v32  ;;  %v2304_v16 = vand.u32 4294901760, %v2303_v23 }
 0x274   : > { %v23027_v44 = vsub.f32 %v2189_v13, %v2214_v43  ;;  %21917 = vpow2.f32 %v2161_v45  ;;  %v2142_v5 = vmin.f32 %v23024_v8, 0.0  ;;  %v23032_v62 = vpack.c.bf16 %v2214_v43, %v2211_v2  ;;  %v2199_v45 = vld [vmem:[%s26541_s17] sm:$0x3]  ;;  %s26560_s17 = sld [smem:[#allocation20_spill]] }
 0x275   : > { %v2190_v25 = vsel %vm2125_vm5, %v22990_v61, %v16915_v63  ;;  %v2099_v33 = vpop.f32.mrb[18].mxu0  ;;  %v23034_v27 = vpack.c.bf16 %v2304_v16, %v2297_v14  ;;  %v2310_v52 = vsub.f32 %v23016_v55, %v2309_v60  ;;  %vm2129_vm10 = vcmp.gt.f32.partialorder %v23024_v8, 0.0 }
 0x276   : > { %v21914_v48 = vpop.eup %21913  ;;  %v2316_v1 = vand.u32 4294901760, %v23027_v44  ;;  %v2217_v47 = vand.u32 4294901760, %v2190_v25  ;;  %v2163_v49 = vmul.f32 1.442695, %v2142_v5  ;;  %v23038_v9 = vadd.f32 %v22983_v12, %v2099_v33  ;;  %v18462_v37 = vpop.f32.mrb[19].mxu0  ;;  %20043 = vmatpush3.bf16.msra.mxu1 %v23032_v62 }
 0x277   : > { %v16916_v10 = vadd.f32 -1.0, %v21914_v48  ;;  %v20078_v61 = vpack.c.bf16 %v23027_v44, %v23016_v55  ;;  %20044 = vmatprep.subr.bf16.mxu1 %v26398_v3  ;;  %v2311_v4 = vand.u32 4294901760, %v2310_v52 }
 0x278   : > { %v23044_v38 = vsub.f32 %v2190_v25, %v2217_v47  ;;  %21919 = vpow2.f32 %v2163_v49  ;;  %v2143_v34 = vmin.f32 %v23038_v9, 0.0  ;;  %v2317_v24 = vsub.f32 %v23027_v44, %v2316_v1  ;;  %v2809_v44 = vld [vmem:[%s26506_s21 + $0x18] sm:$0xff] }
 0x279   : > { %v2191_v46 = vsel %vm2126_vm6, %v22994_v54, %v16916_v10  ;;  %v2105_v35 = vpop.f32.mrb[20].mxu0  ;;  %v23051_v30 = vpack.c.bf16 %v2316_v1, %v2309_v60  ;;  %v2202_v49 = vsel %vm2200_vm8, %v2199_v45, 0  ;;  %vm2130_vm11 = vcmp.gt.f32.partialorder %v23038_v9, 0.0 }
 0x27a   : > { %v21916_v40 = vpop.eup %21915  ;;  %v2220_v41 = vand.u32 4294901760, %v2191_v46  ;;  %v2165_v50 = vmul.f32 1.442695, %v2143_v34  ;;  %v23054_v59 = vadd.f32 %v22983_v12, %v2105_v35  ;;  %v18465_v0 = vpop.f32.mrb[21].mxu0  ;;  %v2323_v42 = vand.u32 4294901760, %v23044_v38 }
 0x27b   : > { %v16917_v56 = vadd.f32 -1.0, %v21916_v40  ;;  %v2318_v17 = vand.u32 4294901760, %v2317_v24 }
 0x27c   : > { %v23057_v20 = vsub.f32 %v2191_v46, %v2220_v41  ;;  %21921 = vpow2.f32 %v2165_v50  ;;  %v2144_v54 = vmin.f32 %v23054_v59, 0.0  ;;  %v23062_v28 = vpack.c.bf16 %v2220_v41, %v2217_v47 }
 0x27d   : > { %v2192_v15 = vsel %vm2127_vm7, %v23000_v11, %v16917_v56  ;;  %v2111_v36 = vpop.f32.mrb[22].mxu0  ;;  %v23064_v2 = vpack.c.bf16 %v2318_v17, %v2311_v4  ;;  %v2324_v11 = vsub.f32 %v23044_v38, %v2323_v42  ;;  %vm2131_vm12 = vcmp.gt.f32.partialorder %v23054_v59, 0.0 }
 0x27e   : > { %v21918_v7 = vpop.eup %21917  ;;  %v2330_v58 = vand.u32 4294901760, %v23057_v20  ;;  %v2223_v21 = vand.u32 4294901760, %v2192_v15  ;;  %v2167_v39 = vmul.f32 1.442695, %v2144_v54  ;;  %v23068_v51 = vadd.f32 %v22983_v12, %v2111_v36  ;;  %v18468_v13 = vpop.f32.mrb[23].mxu0  ;;  %20046 = vmatpush3.bf16.msra.mxu1 %v23062_v28 }
 0x27f   : > { %v16918_v18 = vadd.f32 -1.0, %v21918_v7  ;;  %v20081_v23 = vpack.c.bf16 %v23057_v20, %v23044_v38  ;;  %20047 = vmatprep.subr.bf16.mxu1 %v26398_v3  ;;  %v2325_v37 = vand.u32 4294901760, %v2324_v11  ;;  %vm16793_vm7 = vcmask 16384  }
 0x280   : > { %v23074_v32 = vsub.f32 %v2192_v15, %v2223_v21  ;;  %21923 = vpow2.f32 %v2167_v39  ;;  %v2145_v43 = vmin.f32 %v23068_v51, 0.0  ;;  %v2331_v63 = vsub.f32 %v23057_v20, %v2330_v58 }
 0x281   : > { %v2193_v53 = vsel %vm2128_vm9, %v23010_v22, %v16918_v18  ;;  %v2117_v60 = vpop.f32.mrb[24].mxu0  ;;  %v23082_v14 = vpack.c.bf16 %v2330_v58, %v2323_v42  ;;  %vm2132_vm13 = vcmp.gt.f32.partialorder %v23068_v51, 0.0 }
 0x282   : > { %v21920_v16 = vpop.eup %21919  ;;  %v2337_v5 = vand.u32 4294901760, %v23074_v32  ;;  %v2226_v25 = vand.u32 4294901760, %v2193_v53  ;;  %v2169_v33 = vmul.f32 1.442695, %v2145_v43  ;;  %v23086_v48 = vadd.f32 %v22983_v12, %v2117_v60  ;;  %v18471_v1 = vpop.f32.mrb[25].mxu0 }
 0x283   : > { %v16919_v47 = vadd.f32 -1.0, %v21920_v16  ;;  %v2332_v10 = vand.u32 4294901760, %v2331_v63 }
 0x284   : > { %v23089_v22 = vsub.f32 %v2193_v53, %v2226_v25  ;;  %21925 = vpow2.f32 %v2169_v33  ;;  %v2146_v52 = vmin.f32 %v23086_v48, 0.0  ;;  %v23094_v46 = vpack.c.bf16 %v2226_v25, %v2223_v21 }
 0x285   : > { %v2194_v34 = vsel %vm2129_vm10, %v23024_v8, %v16919_v47  ;;  %v23096_v35 = vpack.c.bf16 %v2332_v10, %v2325_v37  ;;  %v2338_v12 = vsub.f32 %v23074_v32, %v2337_v5  ;;  %v23104_v8 = vand.u32 4294901760, %v2202_v49 }
 0x286   : > { %v21922_v24 = vpop.eup %21921  ;;  %v2344_v40 = vand.u32 4294901760, %v23089_v22  ;;  %v2229_v41 = vand.u32 4294901760, %v2194_v34  ;;  %v2171_v50 = vmul.f32 1.442695, %v2146_v52  ;;  %v20084_v0 = vpack.c.bf16 %v23089_v22, %v23074_v32  ;;  %20049 = vmatpush3.bf16.msra.mxu1 %v23094_v46 }
 0x287   : > { %v16920_v42 = vadd.f32 -1.0, %v21922_v24  ;;  %20050 = vmatprep.subr.bf16.mxu1 %v26398_v3  ;;  %v2339_v58 = vand.u32 4294901760, %v2338_v12  ;;  %v23115_v13 = vsub.f32 %v2202_v49, %v23104_v8  ;;  %vm2133_vm14 = vcmp.gt.f32.partialorder %v23086_v48, 0.0 }
 0x288   : > { %v23106_v56 = vsub.f32 %v2194_v34, %v2229_v41  ;;  %21927 = vpow2.f32 %v2171_v50  ;;  %v2345_v4 = vsub.f32 %v23089_v22, %v2344_v40  ;;  %v23110_v17 = vpack.c.bf16 %v2344_v40, %v2337_v5 }
 0x289   : > { %v2195_v54 = vsel %vm2130_vm11, %v23038_v9, %v16920_v42  ;;  %v2284_v25 = vand.u32 4294901760, %v23115_v13 }
 0x28a   : > { %v21924_v15 = vpop.eup %21923  ;;  %v2351_v36 = vand.u32 4294901760, %v23106_v56  ;;  %v2232_v7 = vand.u32 4294901760, %v2195_v54  ;;  %v2346_v21 = vand.u32 4294901760, %v2345_v4 }
 0x28b   : > { %v16921_v39 = vadd.f32 -1.0, %v21924_v15  ;;  %v2285_v24 = vsub.f32 %v23115_v13, %v2284_v25 }
 0x28c   : > { %v23117_v18 = vsub.f32 %v2195_v54, %v2232_v7  ;;  %v23120_v11 = vpack.c.bf16 %v2232_v7, %v2229_v41  ;;  %v20066_v43 = vpack.c.bf16 %v2346_v21, %v2339_v58  ;;  %v2352_v63 = vsub.f32 %v23106_v56, %v2351_v36 }
 0x28d   : > { %v2196_v45 = vsel %vm2131_vm12, %v23054_v59, %v16921_v39  ;;  %v2286_v15 = vand.u32 4294901760, %v2285_v24 }
 0x28e   : > { %v21926_v9 = vpop.eup %21925  ;;  %v2358_v53 = vand.u32 4294901760, %v23117_v18  ;;  %v2235_v60 = vand.u32 4294901760, %v2196_v45  ;;  %20052 = vmatpush3.bf16.msra.mxu1 %v23120_v11  ;;  %v20087_v16 = vpack.c.bf16 %v23117_v18, %v23106_v56  ;;  %v2353_v52 = vand.u32 4294901760, %v2352_v63 }
 0x28f   : > { %v16922_v5 = vadd.f32 -1.0, %v21926_v9  ;;  %20053 = vmatprep.subr.bf16.mxu1 %v26398_v3 }
 0x290   : > { %v23130_v33 = vsub.f32 %v2196_v45, %v2235_v60  ;;  %v2359_v59 = vsub.f32 %v23117_v18, %v2358_v53  ;;  %v23134_v1 = vpack.c.bf16 %v2358_v53, %v2351_v36 }
 0x291   : > { %v2197_v47 = vsel %vm2132_vm13, %v23068_v51, %v16922_v5 }
 0x292   : > { %v21928_v49 = vpop.eup %21927  ;;  %v2365_v37 = vand.u32 4294901760, %v23130_v33  ;;  %v2238_v10 = vand.u32 4294901760, %v2197_v47  ;;  %v2360_v34 = vand.u32 4294901760, %v2359_v59 }
 0x293   : > { %v16923_v12 = vadd.f32 -1.0, %v21928_v49 }
 0x294   : > { %v2371_v40 = vsub.f32 %v2197_v47, %v2238_v10  ;;  %v23142_v41 = vpack.c.bf16 %v2238_v10, %v2235_v60  ;;  %v20069_v50 = vpack.c.bf16 %v2360_v34, %v2353_v52  ;;  %v2366_v4 = vsub.f32 %v23130_v33, %v2365_v37 }
 0x295   : > { %v2198_v42 = vsel %vm2133_vm14, %v23086_v48, %v16923_v12 }
 0x296   : > { %v2372_v51 = vand.u32 4294901760, %v2371_v40  ;;  %20055 = vmatpush3.bf16.msra.mxu1 %v23142_v41  ;;  %v20090_v54 = vpack.c.bf16 %v2371_v40, %v23130_v33  ;;  %v23149_v36 = vand.u32 4294901760, %v2198_v42  ;;  %v2367_v21 = vand.u32 4294901760, %v2366_v4 }
 0x297   : > { %18496 = vmatprep.subr.mxu1 %v26511_v26 }
 0x298   : > { %v2373_v7 = vsub.f32 %v2371_v40, %v2372_v51  ;;  %v23151_v58 = vpack.c.bf16 %v2372_v51, %v2365_v37  ;;  %v2378_v45 = vsub.f32 %v2198_v42, %v23149_v36 }
 0x29a   : > { %18497 = vmatpush3.msra.mxu1 %v23149_v36  ;;  %v2374_v39 = vand.u32 4294901760, %v2373_v7 }
 0x29b   : > { %20056 = vmatprep.subr.bf16.mxu1 %v26398_v3  ;;  %18499 = vmatmul.mubr.f32.vlgmr.msra.gmra.mrb[0].mxu1 %v2286_v15 }
 0x29c   : > { %20058 = vmatpush3.bf16.msra.mxu1 %v23034_v27  ;;  %v20072_v48 = vpack.c.bf16 %v2374_v39, %v2367_v21  ;;  %18527 = vmatprep.mubr.msk.f32.mxu1 %vm22060_vm0, %v26511_v26  ;;  %v2379_v27 = vand.u32 4294901760, %v2378_v45  ;;  %v23311_v39 = vld [vmem:[%s26503_s12] sm:$0xff] }
 0x29d   : > { %20059 = vmatprep.subr.bf16.mxu1 %v26398_v3 }
 0x29e   : > { %v2380_v9 = vsub.f32 %v2378_v45, %v2379_v27 }
 0x2a0   : > { %20061 = vmatpush3.bf16.msra.mxu1 %v23064_v2  ;;  %v2381_v2 = vand.u32 4294901760, %v2380_v9 }
 0x2a1   : > { %20062 = vmatprep.subr.bf16.mxu1 %v26398_v3 }
 0x2a4   : > { %20064 = vmatpush3.bf16.msra.mxu1 %v23096_v35  ;;  %v2810_v35 = vld [vmem:[%s26506_s21 + $0x20] sm:$0xff] }
 0x2a5   : > { %20065 = vmatprep.subr.bf16.mxu1 %v26398_v3 }
 0x2a8   : > { %20067 = vmatpush3.bf16.msra.mxu1 %v20066_v43 }
 0x2a9   : > { %20068 = vmatprep.subr.bf16.mxu1 %v26398_v3 }
 0x2ac   : > { %20070 = vmatpush3.bf16.msra.mxu1 %v20069_v50  ;;  %v16924_v50 = vld [vmem:[%s22097_s25] ss:$0 sm:$0xff] }
 0x2ad   : > { %20071 = vmatprep.subr.bf16.mxu1 %v26398_v3 }
 0x2b0   : > { %20073 = vmatpush3.bf16.msra.mxu1 %v20072_v48  ;;  %v23314_v48 = vld [vmem:[%s26503_s12 + $0x8] sm:$0xff] }
 0x2b1   : > { %18525 = vmatprep.subr.mxu1 %v26511_v26 }
 0x2b4   : > { %18526 = vmatpush3.msra.mxu1 %v2381_v2 }
 0x2b5   : > { %20074 = vmatprep.subr.bf16.mxu1 %v26398_v3  ;;  %18528 = vmatmul.mubr.f32.vlgmr.msra.gmra.mrb[0].mxu1 %v23104_v8 }
 0x2b6   : > { %20076 = vmatpush3.bf16.msra.mxu1 %v20075_v57  ;;  %18556 = vmatprep.mubr.msk.f32.mxu1 %vm22060_vm0, %v26511_v26  ;;  %v2826_v57 = vand.u32 4294901760, %v2807_v19 }
 0x2b7   : > { %20077 = vmatprep.subr.bf16.mxu1 %v26398_v3 }
 0x2ba   : > { %20079 = vmatpush3.bf16.msra.mxu1 %v20078_v61  ;;  %v2911_v61 = vsub.f32 %v2807_v19, %v2826_v57  ;;  %v23332_v19 = vld [vmem:[%s26503_s12 + $0x18] sm:$0xff] }
 0x2bb   : > { %20080 = vmatprep.subr.bf16.mxu1 %v26398_v3 }
 0x2be   : > { %20082 = vmatpush3.bf16.msra.mxu1 %v20081_v23  ;;  %v2912_v23 = vand.u32 4294901760, %v2911_v61 }
 0x2bf   : > { %20083 = vmatprep.subr.bf16.mxu1 %v26398_v3 }
 0x2c2   : > { %20085 = vmatpush3.bf16.msra.mxu1 %v20084_v0  ;;  %v23260_v0 = vand.u32 4294901760, %v2810_v35 }
 0x2c3   : > { %20086 = vmatprep.subr.bf16.mxu1 %v26398_v3 }
 0x2c4   : > { %v2932_v10 = vsub.f32 %v2810_v35, %v23260_v0 }
 0x2c6   : > { %20088 = vmatpush3.bf16.msra.mxu1 %v20087_v16  ;;  %v2933_v12 = vand.u32 4294901760, %v2932_v10 }
 0x2c7   : > { %20089 = vmatprep.subr.bf16.mxu1 %v26398_v3 }
 0x2c8   : > { %v2934_v40 = vsub.f32 %v2932_v10, %v2933_v12 }
 0x2ca   : > { %20091 = vmatpush3.bf16.msra.mxu1 %v20090_v54 }
 0x2cb   : > { %18554 = vmatprep.subr.mxu1 %v26511_v26 }
 0x2ce   : > { %18555 = vmatpush3.msra.mxu1 %v2378_v45  ;;  %v4394_v45 = vand.u32 4294901760, %v23311_v39 }
 0x2cf   : > { %20092 = vmatprep.subr.bf16.mxu1 %v26398_v3  ;;  %18557 = vmatmul.mubr.f32.vlgmr.msra.gmra.mrb[0].mxu1 %v23115_v13 }
 0x2d0   : > { %20094 = vmatpush3.bf16.msra.mxu1 %v23006_v6  ;;  %18585 = vmatprep.mubr.msk.f32.mxu1 %vm22060_vm0, %v26511_v26  ;;  %v23321_v9 = vsub.f32 %v23311_v39, %v4394_v45 }
 0x2d1   : > { %20095 = vmatprep.subr.bf16.mxu1 %v26398_v3 }
 0x2d4   : > { %20097 = vmatpush3.bf16.msra.mxu1 %v23032_v62 }
 0x2d5   : > { %20098 = vmatprep.subr.bf16.mxu1 %v26398_v3 }
 0x2d8   : > { %20100 = vmatpush3.bf16.msra.mxu1 %v23062_v28 }
 0x2d9   : > { %20101 = vmatprep.subr.bf16.mxu1 %v26398_v3 }
 0x2dc   : > { %20103 = vmatpush3.bf16.msra.mxu1 %v23094_v46 }
 0x2dd   : > { %20104 = vmatprep.subr.bf16.mxu1 %v26398_v3 }
 0x2e0   : > { %20106 = vmatpush3.bf16.msra.mxu1 %v23120_v11 }
 0x2e1   : > { %20107 = vmatprep.subr.bf16.mxu1 %v26398_v3 }
 0x2e4   : > { %20109 = vmatpush3.bf16.msra.mxu1 %v23142_v41 }
 0x2e5   : > { %18583 = vmatprep.subr.mxu1 %v26511_v26 }
 0x2e8   : > { %18584 = vmatpush3.msra.mxu1 %v23149_v36 }
 0x2e9   : > { %20110 = vmatprep.subr.bf16.mxu1 %v26398_v3  ;;  %18586 = vmatmul.mubr.f32.vlgmr.msra.gmra.mrb[0].mxu1 %v2284_v25 }
 0x2ea   : > { %20112 = vmatpush3.bf16.msra.mxu1 %v23021_v31  ;;  %18614 = vmatprep.mubr.msk.f32.mxu1 %vm22060_vm0, %v26511_v26  ;;  %v2808_v31 = vld [vmem:[%s26506_s21 + $0x10] sm:$0xff]  ;;  %s26562_s21 = sld [smem:[#allocation22_spill]] }
 0x2eb   : > { %20113 = vmatprep.subr.bf16.mxu1 %v26398_v3  ;;  %v2829_v38 = vand.u32 4294901760, %v2808_v31 }
 0x2ed   : > { %v2918_v32 = vsub.f32 %v2808_v31, %v2829_v38  ;;  %v4403_v31 = vand.u32 4294901760, %v23332_v19 }
 0x2ee   : > { %20115 = vmatpush3.bf16.msra.mxu1 %v23051_v30  ;;  %v2832_v30 = vand.u32 4294901760, %v2809_v44 }
 0x2ef   : > { %20116 = vmatprep.subr.bf16.mxu1 %v26398_v3 }
 0x2f0   : > { %v23255_v20 = vpack.c.bf16 %v2832_v30, %v2829_v38  ;;  %v23352_v38 = vsub.f32 %v23332_v19, %v4403_v31 }
 0x2f2   : > { %20118 = vmatpush3.bf16.msra.mxu1 %v23082_v14  ;;  %v2925_v14 = vsub.f32 %v2809_v44, %v2832_v30 }
 0x2f3   : > { %20119 = vmatprep.subr.bf16.mxu1 %v26398_v3 }
 0x2f4   : > { %v2926_v13 = vand.u32 4294901760, %v2925_v14  ;;  %v20162_v5 = vpack.c.bf16 %v2925_v14, %v2918_v32 }
 0x2f6   : > { %20121 = vmatpush3.bf16.msra.mxu1 %v23110_v17  ;;  %v2919_v17 = vand.u32 4294901760, %v2918_v32  ;;  %v2927_v43 = vsub.f32 %v2925_v14, %v2926_v13 }
 0x2f7   : > { %20122 = vmatprep.subr.bf16.mxu1 %v26398_v3 }
 0x2f8   : > { %v2928_v60 = vand.u32 4294901760, %v2927_v43  ;;  %v20174_v33 = vpack.c.bf16 %v2926_v13, %v2919_v17 }
 0x2fa   : > { %20124 = vmatpush3.bf16.msra.mxu1 %v23134_v1 }
 0x2fb   : > { %20125 = vmatprep.subr.bf16.mxu1 %v26398_v3 }
 0x2fe   : > { %20127 = vmatpush3.bf16.msra.mxu1 %v23151_v58 }
 0x2ff   : > { %18612 = vmatprep.subr.mxu1 %v26511_v26 }
 0x302   : > { %18613 = vmatpush3.msra.mxu1 %v2379_v27  ;;  %v4397_v27 = vand.u32 4294901760, %v23314_v48 }
 0x303   : > { %20128 = vmatprep.subr.bf16.mxu1 %v26398_v3  ;;  %18615 = vmatmul.mubr.f32.vlgmr.msra.gmra.mrb[0].mxu1 %v23104_v8 }
 0x304   : > { %20130 = vmatpush3.bf16.msra.mxu1 %v23006_v6  ;;  %18643 = vmatprep.mubr.msk.f32.mxu1 %vm22060_vm0, %v26511_v26  ;;  %v2823_v6 = vand.u32 4294901760, %v2806_v29  ;;  %v23326_v2 = vsub.f32 %v23314_v48, %v4397_v27 }
 0x305   : > { %20131 = vmatprep.subr.bf16.mxu1 %v26398_v3 }
 0x306   : > { %v23249_v55 = vpack.c.bf16 %v2826_v57, %v2823_v6  ;;  %v4483_v57 = vand.u32 4294901760, %v23326_v2 }
 0x308   : > { %20133 = vmatpush3.bf16.msra.mxu1 %v23032_v62  ;;  %v2904_v62 = vsub.f32 %v2806_v29, %v2823_v6  ;;  %v23329_v29 = vld [vmem:[%s26503_s12 + $0x10] sm:$0xff]  ;;  %v4476_v6 = vand.u32 4294901760, %v23321_v9 }
 0x309   : > { %20134 = vmatprep.subr.bf16.mxu1 %v26398_v3 }
 0x30a   : > { %v20159_v16 = vpack.c.bf16 %v2911_v61, %v2904_v62  ;;  %v4477_v44 = vsub.f32 %v23321_v9, %v4476_v6  ;;  %v20279_v39 = vpack.c.bf16 %v4483_v57, %v4476_v6 }
 0x30c   : > { %20136 = vmatpush3.bf16.msra.mxu1 %v23062_v28  ;;  %v2905_v28 = vand.u32 4294901760, %v2904_v62  ;;  %v4478_v30 = vand.u32 4294901760, %v4477_v44 }
 0x30d   : > { %20137 = vmatprep.subr.bf16.mxu1 %v26398_v3 }
 0x30e   : > { %v2906_v22 = vsub.f32 %v2904_v62, %v2905_v28  ;;  %v20171_v25 = vpack.c.bf16 %v2912_v23, %v2905_v28  ;;  %v4484_v62 = vsub.f32 %v23326_v2, %v4483_v57 }
 0x310   : > { %20139 = vmatpush3.bf16.msra.mxu1 %v23094_v46  ;;  %v2913_v46 = vsub.f32 %v2911_v61, %v2912_v23  ;;  %v4497_v23 = vand.u32 4294901760, %v23352_v38 }
 0x311   : > { %20140 = vmatprep.subr.bf16.mxu1 %v26398_v3 }
 0x312   : > { %v2914_v56 = vand.u32 4294901760, %v2913_v46  ;;  %v4498_v46 = vsub.f32 %v23352_v38, %v4497_v23 }
 0x314   : > { %20142 = vmatpush3.bf16.msra.mxu1 %v23120_v11  ;;  %v2920_v11 = vsub.f32 %v2918_v32, %v2919_v17  ;;  %v4385_v32 = vld [vmem:[%s26503_s12 + $0x20] sm:$0xff] }
 0x315   : > { %20143 = vmatprep.subr.bf16.mxu1 %v26398_v3  ;;  %v23361_v35 = vand.u32 4294901760, %v4385_v32 }
 0x316   : > { %v2921_v53 = vand.u32 4294901760, %v2920_v11  ;;  %v3359_v11 = vld [vmem:[%s22122_s19 + $0x8] sm:$0xff] }
 0x318   : > { %20145 = vmatpush3.bf16.msra.mxu1 %v23142_v41  ;;  %v20156_v63 = vpack.c.bf16 %v2928_v60, %v2921_v53  ;;  %v2935_v41 = vand.u32 4294901760, %v2934_v40  ;;  %v3377_v53 = vand.u32 4294901760, %v3359_v11 }
 0x319   : > { %18641 = vmatprep.subr.mxu1 %v26511_v26 }
 0x31c   : > { %18642 = vmatpush3.msra.mxu1 %v23149_v36 }
 0x31d   : > { %18644 = vmatmul.mubr.f32.vlgmr.msra.gmra.mrb[0].mxu1 %v23104_v8  ;;  %20146 = vmatprep.subr.bf16.mxu1 %v26398_v3  ;;  %v2907_v8 = vand.u32 4294901760, %v2906_v22 }
 0x31e   : > { %18656 = vmatprep.mubr.msk.f32.mxu1 %vm22060_vm0, %v26511_v26  ;;  %20148 = vmatpush3.bf16.msra.mxu1 %v23249_v55 }
 0x31f   : > { %20149 = vmatprep.subr.bf16.mxu1 %v26398_v3  ;;  %v20153_v18 = vpack.c.bf16 %v2914_v56, %v2907_v8  ;;  %v4499_v8 = vand.u32 4294901760, %v4498_v46  ;;  %v23364_v56 = vsub.f32 %v4385_v32, %v23361_v35  ;;  %v16925_v46 = vld [vmem:[%s26504_s8] ss:$0 sm:$0xff] }
 0x321   : > { %v4504_v13 = vand.u32 4294901760, %v23364_v56 }
 0x322   : > { %20151 = vmatpush3.bf16.msra.mxu1 %v23255_v20 }
 0x323   : > { %18654 = vmatprep.subr.mxu1 %v26511_v26  ;;  %v4505_v60 = vsub.f32 %v23364_v56, %v4504_v13 }
 0x326   : > { %18655 = vmatpush3.msra.mxu1 %v23260_v0 }
 0x327   : > { %20152 = vmatprep.subr.bf16.mxu1 %v26398_v3 }
 0x3f0   : > { %v2802_v59 = vpop.f32.mrb[0].mxu1 }
 0x3f1   : > { %v2820_v1 = vsel %vm2818_vm15, %v2802_v59, 0  ;;  %v18645_v47 = vpop.f32.mrb[1].mxu1  ;;  %v3360_v59 = vld [vmem:[%s22122_s19 + $0x10] sm:$0xff] }
 0x3f2   : > { %v2892_v49 = vand.u32 4294901760, %v2820_v1  ;;  %v3380_v47 = vand.u32 4294901760, %v3360_v59 }
 0x3f4   : > { %v2893_v37 = vsub.f32 %v2820_v1, %v2892_v49  ;;  %v3361_v1 = vld [vmem:[%s22122_s19 + $0x18] sm:$0xff] }
 0x3f6   : > { %v2894_v52 = vand.u32 4294901760, %v2893_v37 }
 0x3f8   : > { %v2895_v34 = vsub.f32 %v2893_v37, %v2894_v52 }
 0x3fa   : > { %v2896_v24 = vand.u32 4294901760, %v2895_v34 }
 0x3fc   : > { %18657 = vmatmul.mubr.f32.vlgmr.msra.gmra.mrb[2].mxu1 %v2896_v24 }
 0x3fd   : > { %20154 = vmatpush3.bf16.msra.mxu1 %v20153_v18  ;;  %18669 = vmatprep.mubr.msk.f32.mxu1 %vm22060_vm0, %v26511_v26  ;;  %v3358_v18 = vld [vmem:[%s22122_s19] sm:$0xff] }
 0x3fe   : > { %20155 = vmatprep.subr.bf16.mxu1 %v26398_v3  ;;  %v3374_v43 = vand.u32 4294901760, %v3358_v18 }
 0x401   : > { %20157 = vmatpush3.bf16.msra.mxu1 %v20156_v63  ;;  %v23374_v63 = vpack.c.bf16 %v3377_v53, %v3374_v43 }
 0x402   : > { %18667 = vmatprep.subr.mxu1 %v26511_v26 }
 0x405   : > { %18668 = vmatpush3.msra.mxu1 %v2935_v41  ;;  %v3362_v41 = vld [vmem:[%s22122_s19 + $0x20] sm:$0xff] }
 0x406   : > { %18670 = vmatmul.mubr.f32.vlgmr.msra.gmra.mrb[2].mxu1 %v2892_v49  ;;  %20158 = vmatprep.subr.bf16.mxu1 %v26398_v3 }
 0x407   : > { %20160 = vmatpush3.bf16.msra.mxu1 %v20159_v16  ;;  %18682 = vmatprep.mubr.msk.f32.mxu1 %vm22060_vm0, %v26511_v26  ;;  %v4506_v16 = vand.u32 4294901760, %v4505_v60 }
 0x408   : > { %20161 = vmatprep.subr.bf16.mxu1 %v26398_v3 }
 0x40b   : > { %20163 = vmatpush3.bf16.msra.mxu1 %v20162_v5  ;;  %v23377_v5 = vsub.f32 %v3358_v18, %v3374_v43 }
 0x40c   : > { %18680 = vmatprep.subr.mxu1 %v26511_v26 }
 0x40d   : > { %v3456_v34 = vand.u32 4294901760, %v23377_v5 }
 0x40f   : > { %18681 = vmatpush3.msra.mxu1 %v2932_v10  ;;  %v23389_v10 = vsub.f32 %v3360_v59, %v3380_v47  ;;  %v3457_v40 = vsub.f32 %v23377_v5, %v3456_v34 }
 0x410   : > { %18683 = vmatmul.mubr.f32.vlgmr.msra.gmra.mrb[2].mxu1 %v2893_v37  ;;  %20164 = vmatprep.subr.bf16.mxu1 %v26398_v3 }
 0x411   : > { %20166 = vmatpush3.bf16.msra.mxu1 %v23249_v55  ;;  %18695 = vmatprep.mubr.msk.f32.mxu1 %vm22060_vm0, %v26511_v26 }
 0x412   : > { %20167 = vmatprep.subr.bf16.mxu1 %v26398_v3 }
 0x415   : > { %20169 = vmatpush3.bf16.msra.mxu1 %v23255_v20 }
 0x416   : > { %18693 = vmatprep.subr.mxu1 %v26511_v26 }
 0x419   : > { %18694 = vmatpush3.msra.mxu1 %v23260_v0 }
 0x41a   : > { %18696 = vmatmul.mubr.f32.vlgmr.msra.gmra.mrb[2].mxu1 %v2894_v52  ;;  %20170 = vmatprep.subr.bf16.mxu1 %v26398_v3 }
 0x41b   : > { %20172 = vmatpush3.bf16.msra.mxu1 %v20171_v25  ;;  %18708 = vmatprep.mubr.msk.f32.mxu1 %vm22060_vm0, %v26511_v26  ;;  %v23379_v25 = vsub.f32 %v3359_v11, %v3377_v53 }
 0x41c   : > { %20173 = vmatprep.subr.bf16.mxu1 %v26398_v3 }
 0x41d   : > { %v3463_v24 = vand.u32 4294901760, %v23379_v25 }
 0x41f   : > { %20175 = vmatpush3.bf16.msra.mxu1 %v20174_v33  ;;  %v20267_v33 = vpack.c.bf16 %v23326_v2, %v23321_v9  ;;  %v16926_v2 = vld [vmem:[%s22117_s14] ss:$0 sm:$0xff] }
 0x420   : > { %18706 = vmatprep.subr.mxu1 %v26511_v26 }
 0x423   : > { %18707 = vmatpush3.msra.mxu1 %v2933_v12 }
 0x424   : > { %18709 = vmatmul.mubr.f32.vlgmr.msra.gmra.mrb[2].mxu1 %v2892_v49  ;;  %20176 = vmatprep.subr.bf16.mxu1 %v26398_v3 }
 0x425   : > { %20178 = vmatpush3.bf16.msra.mxu1 %v23249_v55  ;;  %18721 = vmatprep.mubr.msk.f32.mxu1 %vm22060_vm0, %v26511_v26  ;;  %v4400_v55 = vand.u32 4294901760, %v23329_v29 }
 0x426   : > { %20179 = vmatprep.subr.bf16.mxu1 %v26398_v3 }
 0x427   : > { %v23347_v61 = vsub.f32 %v23329_v29, %v4400_v55  ;;  %v23420_v32 = vpack.c.bf16 %v4403_v31, %v4400_v55 }
 0x429   : > { %20181 = vmatpush3.bf16.msra.mxu1 %v23255_v20  ;;  %v4485_v20 = vand.u32 4294901760, %v4484_v62  ;;  %v4490_v28 = vand.u32 4294901760, %v23347_v61  ;;  %v20270_v12 = vpack.c.bf16 %v23352_v38, %v23347_v61  ;;  %v23414_v62 = vpack.c.bf16 %v4397_v27, %v4394_v45 }
 0x42a   : > { %18719 = vmatprep.subr.mxu1 %v26511_v26  ;;  %v23432_v27 = vpack.c.bf16 %v3463_v24, %v3456_v34  ;;  %v3875_v34 = vld [vmem:[%s22132_s30 + $0x20] sm:$0xff] }
 0x42b   : > { %v20261_v14 = vpack.c.bf16 %v4485_v20, %v4478_v30  ;;  %v4491_v22 = vsub.f32 %v23347_v61, %v4490_v28  ;;  %v20282_v45 = vpack.c.bf16 %v4497_v23, %v4490_v28 }
 0x42d   : > { %18720 = vmatpush3.msra.mxu1 %v23260_v0  ;;  %20262 = vmatpush3.bf16.msra.mxu0 %v20261_v14  ;;  %v4492_v0 = vand.u32 4294901760, %v4491_v22  ;;  %v20195_v14 = vpack.c.bf16 %v23379_v25, %v23377_v5  ;;  %v3873_v5 = vld [vmem:[%s22132_s30 + $0x10] sm:$0xff] }
 0x42e   : > { %18722 = vmatmul.mubr.f32.vlgmr.msra.gmra.mrb[2].mxu1 %v2892_v49  ;;  %20182 = vmatprep.subr.bf16.mxu1 %v26398_v3  ;;  %v3383_v49 = vand.u32 4294901760, %v3361_v1  ;;  %v3890_v59 = vand.u32 4294901760, %v3873_v5 }
 0x42f   : > { %18734 = vmatprep.mubr.msk.f32.mxu1 %vm22060_vm0, %v26511_v26  ;;  %20263 = vmatprep.subr.bf16.mxu0 %v26398_v3  ;;  %v20264_v17 = vpack.c.bf16 %v4499_v8, %v4492_v0 }
 0x430   : > { %20184 = vmatpush3.bf16.msra.mxu1 %v23374_v63  ;;  %v23387_v37 = vpack.c.bf16 %v3383_v49, %v3380_v47  ;;  %v23391_v52 = vsub.f32 %v3361_v1, %v3383_v49  ;;  %v23542_v49 = vsub.f32 %v3873_v5, %v3890_v59 }
 0x431   : > { %20265 = vmatpush3.bf16.msra.mxu0 %v20264_v17  ;;  %20185 = vmatprep.subr.bf16.mxu1 %v26398_v3 }
 0x432   : > { %18901 = vmatprep.subr.mxu0 %v26511_v26  ;;  %v20198_v48 = vpack.c.bf16 %v23391_v52, %v23389_v10 }
 0x434   : > { %20187 = vmatpush3.bf16.msra.mxu1 %v23387_v37 }
 0x435   : > { %18902 = vmatpush3.msra.mxu0 %v4506_v16  ;;  %18732 = vmatprep.subr.mxu1 %v26511_v26 }
 0x436   : > { %20266 = vmatprep.subr.bf16.mxu0 %v26398_v3 }
 0x501   : > { %v3316_v42 = vpop.f32.mrb[2].mxu1 }
 0x502   : > { %v23300_v51 = vadd.f32 %v16924_v50, %v3316_v42  ;;  %v18723_v4 = vpop.f32.mrb[3].mxu1  ;;  %v3464_v50 = vsub.f32 %v23379_v25, %v3463_v24  ;;  %v23402_v42 = vand.u32 4294901760, %v3362_v41  ;;  %v3874_v25 = vld [vmem:[%s22132_s30 + $0x18] sm:$0xff] }
 0x503   : > { %v3458_v4 = vand.u32 4294901760, %v3457_v40  ;;  %v3893_v1 = vand.u32 4294901760, %v3874_v25  ;;  %v3980_v40 = vand.u32 4294901760, %v23542_v49 }
 0x504   : > { %v3330_v54 = vsel %vm3329_vm1, %v23300_v51, 0.0  ;;  %18733 = vmatpush3.msra.mxu1 %v23402_v42  ;;  %v23447_v28 = vsub.f32 %v3362_v41, %v23402_v42 }
 0x505   : > { %3331 = vadd.xlane.f32.xlu0 %v3330_v54  ;;  %v3470_v54 = vand.u32 4294901760, %v23389_v10  ;;  %20188 = vmatprep.subr.bf16.mxu1 %v26398_v3  ;;  %v20222_v41 = vpack.c.bf16 %v3893_v1, %v3890_v59 }
 0x506   : > { %v3484_v17 = vand.u32 4294901760, %v23447_v28 }
 0x508   : > { %v3485_v11 = vsub.f32 %v23447_v28, %v3484_v17 }
 0x50a   : > { %v3486_v43 = vand.u32 4294901760, %v3485_v11 }
 0x592   : > { %v3332_v15 = vpop.xlane.xlu0 %3331 }
 0x593   : > { %v3334_v36 = vmul.f32 0.025, %v3332_v15  ;;  %v3477_v15 = vand.u32 4294901760, %v23391_v52 }
 0x595   : > { %v23305_v7 = vsub.f32 %v23300_v51, %v3334_v36  ;;  %v3465_v36 = vand.u32 4294901760, %v3464_v50  ;;  %v23434_v29 = vpack.c.bf16 %v3477_v15, %v3470_v54  ;;  %v3896_v50 = vand.u32 4294901760, %v3875_v34 }
 0x597   : > { %v3336_v58 = vmul.f32 %v23305_v7, %v23305_v7  ;;  %v20189_v44 = vpack.c.bf16 %v3465_v36, %v3458_v4  ;;  %v3993_v4 = vsub.f32 %v3875_v34, %v3896_v50  ;;  %v4891_v34 = vlaneseq }
 0x599   : > { %v3337_v21 = vsel %vm3329_vm1, %v3336_v58, 0.0  ;;  %v3471_v58 = vsub.f32 %v23389_v10, %v3470_v54  ;;  %v23544_v10 = vsub.f32 %v3874_v25, %v3893_v1 }
 0x59a   : > { %3338 = vadd.xlane.f32.xlu0 %v3337_v21  ;;  %v3478_v21 = vsub.f32 %v23391_v52, %v3477_v15  ;;  %v3981_v15 = vsub.f32 %v23542_v49, %v3980_v40 }
 0x59b   : > { %v3472_v38 = vand.u32 4294901760, %v3471_v58 }
 0x59c   : > { %v3479_v30 = vand.u32 4294901760, %v3478_v21  ;;  %v3982_v21 = vand.u32 4294901760, %v3981_v15 }
 0x59e   : > { %v20192_v20 = vpack.c.bf16 %v3479_v30, %v3472_v38  ;;  %v3994_v38 = vand.u32 4294901760, %v3993_v4 }
 0x627   : > { %v3339_v19 = vpop.xlane.xlu0 %3338 }
 0x628   : > { %v3340_v55 = vmul.f32 0.025, %v3339_v19 }
 0x62a   : > { %v3341_v31 = vadd.f32 1e-05, %v3340_v55 }
 0x62c   : > { %21929 = vrsqrt.f32 %v3341_v31 }
 0x636   : > { %v21930_v22 = vpop.eup %21929 }
 0x637   : > { %v3343_v9 = vmul.f32 %v21930_v22, %v23305_v7  ;;  %v3322_v22 = vld [vmem:[%s22102_s29 + $0x10] sm:$0xff] }
 0x639   : > { %v3350_v6 = vmul.f32 %v16925_v46, %v3343_v9  ;;  %v3323_v46 = vld [vmem:[%s22102_s29 + $0x18] sm:$0xff] }
 0x63b   : > { %v3357_v57 = vadd.f32 %v16926_v2, %v3350_v6 }
 0x63d   : > { %v3371_v0 = vsel %vm2818_vm15, %v3357_v57, 0 }
 0x63e   : > { %v23440_v8 = vand.u32 4294901760, %v3371_v0 }
 0x640   : > { %v23443_v61 = vsub.f32 %v3371_v0, %v23440_v8  ;;  %18904 = vmatmul.mubr.f32.vlgmr.msra.gmra.mrb[26].mxu0 %v23440_v8 }
 0x641   : > { %20268 = vmatpush3.bf16.msra.mxu0 %v20267_v33  ;;  %18916 = vmatprep.mubr.msk.f32.mxu0 %vm22060_vm0, %v26511_v26 }
 0x642   : > { %20269 = vmatprep.subr.bf16.mxu0 %v26398_v3  ;;  %v23453_v7 = vand.u32 4294901760, %v23443_v61 }
 0x644   : > { %v3446_v23 = vsub.f32 %v23443_v61, %v23453_v7 }
 0x645   : > { %20271 = vmatpush3.bf16.msra.mxu0 %v20270_v12 }
 0x646   : > { %18914 = vmatprep.subr.mxu0 %v26511_v26  ;;  %v23459_v18 = vand.u32 4294901760, %v3446_v23 }
 0x648   : > { %18735 = vmatmul.mubr.f32.vlgmr.msra.gmra.mrb[4].mxu1 %v23459_v18 }
 0x649   : > { %20190 = vmatpush3.bf16.msra.mxu1 %v20189_v44  ;;  %18915 = vmatpush3.msra.mxu0 %v23364_v56  ;;  %v3871_v56 = vld [vmem:[%s22132_s30] sm:$0xff] }
 0x64a   : > { %18917 = vmatmul.mubr.f32.vlgmr.msra.gmra.mrb[26].mxu0 %v23443_v61  ;;  %20272 = vmatprep.subr.bf16.mxu0 %v26398_v3  ;;  %v3884_v53 = vand.u32 4294901760, %v3871_v56 }
 0x64b   : > { %20274 = vmatpush3.bf16.msra.mxu0 %v23414_v62  ;;  %20191 = vmatprep.subr.bf16.mxu1 %v26398_v3 }
 0x64c   : > { %20275 = vmatprep.subr.bf16.mxu0 %v26398_v3  ;;  %18747 = vmatprep.mubr.msk.f32.mxu1 %vm22060_vm0, %v26511_v26  ;;  %v23530_v16 = vsub.f32 %v3871_v56, %v3884_v53 }
 0x64d   : > { %20193 = vmatpush3.bf16.msra.mxu1 %v20192_v20  ;;  %18929 = vmatprep.mubr.msk.f32.mxu0 %vm22060_vm0, %v26511_v26  ;;  %v3995_v20 = vsub.f32 %v3993_v4, %v3994_v38 }
 0x64e   : > { %18745 = vmatprep.subr.mxu1 %v26511_v26  ;;  %v3966_v47 = vand.u32 4294901760, %v23530_v16 }
 0x64f   : > { %20277 = vmatpush3.bf16.msra.mxu0 %v23420_v32 }
 0x650   : > { %18927 = vmatprep.subr.mxu0 %v26511_v26  ;;  %v3967_v12 = vsub.f32 %v23530_v16, %v3966_v47 }
 0x651   : > { %18746 = vmatpush3.msra.mxu1 %v3486_v43 }
 0x652   : > { %18748 = vmatmul.mubr.f32.vlgmr.msra.gmra.mrb[4].mxu1 %v23440_v8  ;;  %20194 = vmatprep.subr.bf16.mxu1 %v26398_v3 }
 0x653   : > { %20196 = vmatpush3.bf16.msra.mxu1 %v20195_v14  ;;  %18928 = vmatpush3.msra.mxu0 %v23361_v35  ;;  %v3996_v14 = vand.u32 4294901760, %v3995_v20 }
 0x654   : > { %18930 = vmatmul.mubr.f32.vlgmr.msra.gmra.mrb[26].mxu0 %v23453_v7  ;;  %20278 = vmatprep.subr.bf16.mxu0 %v26398_v3 }
 0x655   : > { %20280 = vmatpush3.bf16.msra.mxu0 %v20279_v39  ;;  %20197 = vmatprep.subr.bf16.mxu1 %v26398_v3 }
 0x656   : > { %20281 = vmatprep.subr.bf16.mxu0 %v26398_v3  ;;  %18760 = vmatprep.mubr.msk.f32.mxu1 %vm22060_vm0, %v26511_v26 }
 0x657   : > { %20199 = vmatpush3.bf16.msra.mxu1 %v20198_v48  ;;  %18942 = vmatprep.mubr.msk.f32.mxu0 %vm22060_vm0, %v26511_v26  ;;  %v20234_v48 = vpack.c.bf16 %v23544_v10, %v23542_v49 }
 0x658   : > { %18758 = vmatprep.subr.mxu1 %v26511_v26 }
 0x659   : > { %20283 = vmatpush3.bf16.msra.mxu0 %v20282_v45 }
 0x65a   : > { %18940 = vmatprep.subr.mxu0 %v26511_v26 }
 0x65b   : > { %18759 = vmatpush3.msra.mxu1 %v23447_v28  ;;  %v3324_v28 = vld [vmem:[%s22102_s29 + $0x20] sm:$0xff] }
 0x65c   : > { %18761 = vmatmul.mubr.f32.vlgmr.msra.gmra.mrb[4].mxu1 %v23443_v61  ;;  %20200 = vmatprep.subr.bf16.mxu1 %v26398_v3 }
 0x65d   : > { %20202 = vmatpush3.bf16.msra.mxu1 %v23374_v63  ;;  %18941 = vmatpush3.msra.mxu0 %v4504_v13  ;;  %v3872_v13 = vld [vmem:[%s22132_s30 + $0x8] sm:$0xff] }
 0x65e   : > { %18943 = vmatmul.mubr.f32.vlgmr.msra.gmra.mrb[26].mxu0 %v23440_v8  ;;  %20284 = vmatprep.subr.bf16.mxu0 %v26398_v3  ;;  %v3887_v60 = vand.u32 4294901760, %v3872_v13 }
 0x65f   : > { %20286 = vmatpush3.bf16.msra.mxu0 %v23414_v62  ;;  %20203 = vmatprep.subr.bf16.mxu1 %v26398_v3 }
 0x660   : > { %20287 = vmatprep.subr.bf16.mxu0 %v26398_v3  ;;  %18773 = vmatprep.mubr.msk.f32.mxu1 %vm22060_vm0, %v26511_v26  ;;  %v23537_v33 = vsub.f32 %v3872_v13, %v3887_v60 }
 0x661   : > { %20205 = vmatpush3.bf16.msra.mxu1 %v23387_v37  ;;  %18955 = vmatprep.mubr.msk.f32.mxu0 %vm22060_vm0, %v26511_v26 }
 0x662   : > { %18771 = vmatprep.subr.mxu1 %v26511_v26  ;;  %v3973_v52 = vand.u32 4294901760, %v23537_v33  ;;  %v20231_v39 = vpack.c.bf16 %v23537_v33, %v23530_v16 }
 0x663   : > { %20289 = vmatpush3.bf16.msra.mxu0 %v23420_v32 }
 0x664   : > { %18953 = vmatprep.subr.mxu0 %v26511_v26  ;;  %v3974_v24 = vsub.f32 %v23537_v33, %v3973_v52  ;;  %v20243_v45 = vpack.c.bf16 %v3973_v52, %v3966_v47 }
 0x665   : > { %18772 = vmatpush3.msra.mxu1 %v23402_v42 }
 0x666   : > { %18774 = vmatmul.mubr.f32.vlgmr.msra.gmra.mrb[4].mxu1 %v23453_v7  ;;  %20206 = vmatprep.subr.bf16.mxu1 %v26398_v3  ;;  %v3975_v54 = vand.u32 4294901760, %v3974_v24  ;;  %v16928_v24 = vld [vmem:[%s26505_s6] ss:$0 sm:$0xff] }
 0x667   : > { %20208 = vmatpush3.bf16.msra.mxu1 %v23432_v27  ;;  %18954 = vmatpush3.msra.mxu0 %v23361_v35 }
 0x668   : > { %18956 = vmatmul.mubr.f32.vlgmr.msra.gmra.mrb[26].mxu0 %v23440_v8  ;;  %20209 = vmatprep.subr.bf16.mxu1 %v26398_v3 }
 0x669   : > { %18786 = vmatprep.mubr.msk.f32.mxu1 %vm22060_vm0, %v26511_v26  ;;  %20326 = vmatprep.subr.bf16.mxu0 %v26398_v3 }
 0x66a   : > { %19046 = vmatprep.mubr.msk.f32.mxu0 %vm22060_vm0, %v26511_v26 }
 0x66b   : > { %20211 = vmatpush3.bf16.msra.mxu1 %v23434_v29  ;;  %v3320_v29 = vld [vmem:[%s22102_s29] sm:$0xff] }
 0x66c   : > { %18784 = vmatprep.subr.mxu1 %v26511_v26  ;;  %v4900_v19 = vand.u32 4294901760, %v3320_v29 }
 0x66e   : > { %v4981_v9 = vsub.f32 %v3320_v29, %v4900_v19 }
 0x66f   : > { %18785 = vmatpush3.msra.mxu1 %v3484_v17  ;;  %v23631_v17 = vand.u32 4294901760, %v3324_v28 }
 0x670   : > { %18787 = vmatmul.mubr.f32.vlgmr.msra.gmra.mrb[4].mxu1 %v23440_v8  ;;  %20212 = vmatprep.subr.bf16.mxu1 %v26398_v3  ;;  %v4982_v57 = vand.u32 4294901760, %v4981_v9 }
 0x671   : > { %20214 = vmatpush3.bf16.msra.mxu1 %v23374_v63  ;;  %18799 = vmatprep.mubr.msk.f32.mxu1 %vm22060_vm0, %v26511_v26  ;;  %v23548_v63 = vpack.c.bf16 %v3887_v60, %v3884_v53 }
 0x672   : > { %20215 = vmatprep.subr.bf16.mxu1 %v26398_v3 }
 0x675   : > { %20217 = vmatpush3.bf16.msra.mxu1 %v23387_v37  ;;  %v3987_v37 = vand.u32 4294901760, %v23544_v10 }
 0x676   : > { %18797 = vmatprep.subr.mxu1 %v26511_v26 }
 0x677   : > { %v3988_v36 = vsub.f32 %v23544_v10, %v3987_v37  ;;  %v20246_v27 = vpack.c.bf16 %v3987_v37, %v3980_v40 }
 0x679   : > { %18798 = vmatpush3.msra.mxu1 %v23402_v42  ;;  %v3968_v42 = vand.u32 4294901760, %v3967_v12  ;;  %v3989_v44 = vand.u32 4294901760, %v3988_v36  ;;  %v23649_v12 = vshrl.u32 %v4891_v34, 7 }
 0x67a   : > { %18800 = vmatmul.mubr.f32.vlgmr.msra.gmra.mrb[4].mxu1 %v23440_v8  ;;  %20218 = vmatprep.subr.bf16.mxu1 %v26398_v3 }
 0x67b   : > { %20220 = vmatpush3.bf16.msra.mxu1 %v23548_v63  ;;  %18812 = vmatprep.mubr.msk.f32.mxu1 %vm22060_vm0, %v26511_v26  ;;  %v20225_v58 = vpack.c.bf16 %v3975_v54, %v3968_v42  ;;  %v20228_v30 = vpack.c.bf16 %v3989_v44, %v3982_v21  ;;  %26544 = vst [vmem:[#allocation29_spill] sm:$0xff] %v23649_v12  ;;  %v23653_v40 = vsub.s32 0, %v23649_v12  ;;  %v23656_v37 = vsub.s32 1, %v23649_v12 }
 0x67c   : > { %20221 = vmatprep.subr.bf16.mxu1 %v26398_v3 }
 0x67d   : > { %26546 = vst [vmem:[#allocation30_spill] sm:$0xff] %v23653_v40  ;;  %26547 = vst [vmem:[#allocation31_spill] sm:$0xff] %v23656_v37 }
 0x67f   : > { %20223 = vmatpush3.bf16.msra.mxu1 %v20222_v41 }
 0x680   : > { %18810 = vmatprep.subr.mxu1 %v26511_v26 }
 0x683   : > { %18811 = vmatpush3.msra.mxu1 %v3896_v50 }
 0x684   : > { %18813 = vmatmul.mubr.f32.vlgmr.msra.gmra.mrb[6].mxu1 %v23459_v18  ;;  %20224 = vmatprep.subr.bf16.mxu1 %v26398_v3 }
 0x685   : > { %20226 = vmatpush3.bf16.msra.mxu1 %v20225_v58  ;;  %18825 = vmatprep.mubr.msk.f32.mxu1 %vm22060_vm0, %v26511_v26 }
 0x686   : > { %20227 = vmatprep.subr.bf16.mxu1 %v26398_v3 }
 0x689   : > { %20229 = vmatpush3.bf16.msra.mxu1 %v20228_v30 }
 0x68a   : > { %18823 = vmatprep.subr.mxu1 %v26511_v26 }
 0x68d   : > { %18824 = vmatpush3.msra.mxu1 %v3996_v14  ;;  %v16929_v14 = vld [vmem:[%s26545_s1] ss:$0 sm:$0xff] }
 0x68e   : > { %18826 = vmatmul.mubr.f32.vlgmr.msra.gmra.mrb[6].mxu1 %v23440_v8  ;;  %20230 = vmatprep.subr.bf16.mxu1 %v26398_v3 }
 0x68f   : > { %20232 = vmatpush3.bf16.msra.mxu1 %v20231_v39  ;;  %18838 = vmatprep.mubr.msk.f32.mxu1 %vm22060_vm0, %v26511_v26 }
 0x690   : > { %20233 = vmatprep.subr.bf16.mxu1 %v26398_v3 }
 0x693   : > { %20235 = vmatpush3.bf16.msra.mxu1 %v20234_v48 }
 0x694   : > { %18836 = vmatprep.subr.mxu1 %v26511_v26 }
 0x697   : > { %18837 = vmatpush3.msra.mxu1 %v3993_v4 }
 0x698   : > { %18839 = vmatmul.mubr.f32.vlgmr.msra.gmra.mrb[6].mxu1 %v23443_v61  ;;  %20236 = vmatprep.subr.bf16.mxu1 %v26398_v3 }
 0x699   : > { %20238 = vmatpush3.bf16.msra.mxu1 %v23548_v63  ;;  %18851 = vmatprep.mubr.msk.f32.mxu1 %vm22060_vm0, %v26511_v26 }
 0x69a   : > { %20239 = vmatprep.subr.bf16.mxu1 %v26398_v3 }
 0x69d   : > { %20241 = vmatpush3.bf16.msra.mxu1 %v20222_v41 }
 0x69e   : > { %18849 = vmatprep.subr.mxu1 %v26511_v26 }
 0x6a1   : > { %18850 = vmatpush3.msra.mxu1 %v3896_v50 }
 0x6a2   : > { %18852 = vmatmul.mubr.f32.vlgmr.msra.gmra.mrb[6].mxu1 %v23453_v7  ;;  %20242 = vmatprep.subr.bf16.mxu1 %v26398_v3 }
 0x6a3   : > { %20244 = vmatpush3.bf16.msra.mxu1 %v20243_v45  ;;  %18864 = vmatprep.mubr.msk.f32.mxu1 %vm22060_vm0, %v26511_v26 }
 0x6a4   : > { %20245 = vmatprep.subr.bf16.mxu1 %v26398_v3 }
 0x6a7   : > { %20247 = vmatpush3.bf16.msra.mxu1 %v20246_v27 }
 0x6a8   : > { %18862 = vmatprep.subr.mxu1 %v26511_v26 }
 0x6ab   : > { %18863 = vmatpush3.msra.mxu1 %v3994_v38 }
 0x6ac   : > { %18865 = vmatmul.mubr.f32.vlgmr.msra.gmra.mrb[6].mxu1 %v23440_v8  ;;  %20248 = vmatprep.subr.bf16.mxu1 %v26398_v3 }
 0x6ad   : > { %20250 = vmatpush3.bf16.msra.mxu1 %v23548_v63  ;;  %18877 = vmatprep.mubr.msk.f32.mxu1 %vm22060_vm0, %v26511_v26 }
 0x6ae   : > { %20251 = vmatprep.subr.bf16.mxu1 %v26398_v3 }
 0x6b1   : > { %20253 = vmatpush3.bf16.msra.mxu1 %v20222_v41  ;;  %v16927_v41 = vld [vmem:[%s22127_s24] ss:$0 sm:$0xff] }
 0x6b2   : > { %18875 = vmatprep.subr.mxu1 %v26511_v26 }
 0x6b5   : > { %18876 = vmatpush3.msra.mxu1 %v3896_v50 }
 0x6b6   : > { %18878 = vmatmul.mubr.f32.vlgmr.msra.gmra.mrb[6].mxu1 %v23440_v8  ;;  %20254 = vmatprep.subr.bf16.mxu1 %v26398_v3  ;;  %v4983_v8 = vsub.f32 %v4981_v9, %v4982_v57 }
 0x6b7   : > { %20256 = vmatpush3.bf16.msra.mxu1 %v23414_v62  ;;  %18890 = vmatprep.mubr.msk.f32.mxu1 %vm22060_vm0, %v26511_v26  ;;  %v3321_v62 = vld [vmem:[%s22102_s29 + $0x8] sm:$0xff] }
 0x6b8   : > { %20257 = vmatprep.subr.bf16.mxu1 %v26398_v3  ;;  %v4903_v55 = vand.u32 4294901760, %v3321_v62 }
 0x6ba   : > { %v23616_v31 = vpack.c.bf16 %v4903_v55, %v4900_v19  ;;  %v4988_v2 = vsub.f32 %v3321_v62, %v4903_v55  ;;  %v23673_v62 = vsub.f32 %v3324_v28, %v23631_v17 }
 0x6bb   : > { %20259 = vmatpush3.bf16.msra.mxu1 %v23420_v32  ;;  %v4909_v32 = vand.u32 4294901760, %v3323_v46 }
 0x6bc   : > { %18888 = vmatprep.subr.mxu1 %v26511_v26  ;;  %20328 = vmatpush3.bf16.msra.mxu0 %v23616_v31  ;;  %v4989_v0 = vand.u32 4294901760, %v4988_v2  ;;  %v23641_v33 = vpack.c.bf16 %v4988_v2, %v4981_v9 }
 0x6bd   : > { %20329 = vmatprep.subr.bf16.mxu0 %v26398_v3  ;;  %v5002_v23 = vsub.f32 %v3323_v46, %v4909_v32 }
 0x6be   : > { %v4990_v61 = vsub.f32 %v4988_v2, %v4989_v0  ;;  %v23645_v47 = vpack.c.bf16 %v4989_v0, %v4982_v57 }
 0x6bf   : > { %18889 = vmatpush3.msra.mxu1 %v23361_v35  ;;  %v4906_v35 = vand.u32 4294901760, %v3322_v22  ;;  %v5003_v56 = vand.u32 4294901760, %v5002_v23 }
 0x6c0   : > { %18891 = vmatmul.mubr.f32.vlgmr.msra.gmra.mrb[8].mxu1 %v23459_v18  ;;  %20290 = vmatprep.subr.bf16.mxu1 %v26398_v3  ;;  %v4984_v18 = vand.u32 4294901760, %v4983_v8  ;;  %v4991_v11 = vand.u32 4294901760, %v4990_v61  ;;  %26542 = vst [vmem:[#allocation27_spill] sm:$0xff] %v23645_v47  ;;  %v3325_v8 = vld [vmem:[%s26549_s11] sm:$0xff]  ;;  %v3326_v61 = vld [vmem:[%s26549_s11 + $0x8] sm:$0x3] }
 0x6c1   : > { %18968 = vmatprep.mubr.msk.f32.mxu1 %vm22060_vm0, %v26511_v26  ;;  %20292 = vmatpush3.bf16.msra.mxu1 %v23616_v31  ;;  %v23624_v6 = vpack.c.bf16 %v4909_v32, %v4906_v35  ;;  %v4995_v7 = vsub.f32 %v3322_v22, %v4906_v35  ;;  %v5004_v60 = vsub.f32 %v5002_v23, %v5003_v56  ;;  %v23680_v32 = vand.u32 4294901760, %v23673_v62  ;;  %s26558_s11 = sld [smem:[#allocation18_spill]] }
 0x6c2   : > { %20293 = vmatprep.subr.bf16.mxu1 %v26398_v3  ;;  %v23635_v13 = vpack.c.bf16 %v4991_v11, %v4984_v18  ;;  %v5920_v28 = vsel %vm5918_vm2, %v3326_v61, 0 }
 0x6c3   : > { %20331 = vmatpush3.bf16.msra.mxu0 %v23624_v6  ;;  %v4996_v43 = vand.u32 4294901760, %v4995_v7  ;;  %v5005_v5 = vand.u32 4294901760, %v5004_v60  ;;  %v23643_v59 = vpack.c.bf16 %v5002_v23, %v4995_v7  ;;  %26548 = vst [vmem:[#allocation32_spill] sm:$0xff] %v23680_v32  ;;  %v5011_v57 = vsub.f32 %v23673_v62, %v23680_v32 }
 0x6c4   : > { %19044 = vmatprep.subr.mxu0 %v26511_v26  ;;  %v5926_v23 = vand.u32 4294901760, %v5920_v28 }
 0x6c5   : > { %20295 = vmatpush3.bf16.msra.mxu1 %v23624_v6  ;;  %v4997_v53 = vsub.f32 %v4995_v7, %v4996_v43  ;;  %v23647_v10 = vpack.c.bf16 %v5003_v56, %v4996_v43  ;;  %v23694_v0 = vand.u32 4294901760, %v5011_v57  ;;  %v5923_v7 = vand.u32 4294901760, %v3325_v8  ;;  %v6856_v57 = vld [vmem:[%s26554_s23] sm:$0xff] }
 0x6c6   : > { %18966 = vmatprep.subr.mxu1 %v26511_v26  ;;  %v6008_v43 = vsub.f32 %v5920_v28, %v5926_v23  ;;  %v6872_v61 = vand.u32 4294901760, %v6856_v57 }
 0x6c7   : > { %19045 = vmatpush3.msra.mxu0 %v23631_v17  ;;  %v4998_v16 = vand.u32 4294901760, %v4997_v53  ;;  %26543 = vst [vmem:[#allocation28_spill] sm:$0xff] %v23647_v10  ;;  %v23779_v18 = vpack.c.bf16 %v5926_v23, %v5923_v7  ;;  %v6001_v11 = vsub.f32 %v3325_v8, %v5923_v7  ;;  %v6857_v8 = vld [vmem:[%s26554_s23 + $0x8] sm:$0xff] }
 0x6c8   : > { %20332 = vmatprep.subr.bf16.mxu0 %v26398_v3  ;;  %v6009_v53 = vand.u32 4294901760, %v6008_v43  ;;  %v6875_v28 = vand.u32 4294901760, %v6857_v8  ;;  %v23839_v7 = vsub.f32 %v6856_v57, %v6872_v61 }
 0x6c9   : > { %18967 = vmatpush3.msra.mxu1 %v23631_v17  ;;  %v23639_v25 = vpack.c.bf16 %v5005_v5, %v4998_v16  ;;  %26550 = vst [vmem:[#allocation33_spill] sm:$0xff] %v23779_v18  ;;  %v6002_v56 = vand.u32 4294901760, %v6001_v11 }
 0x6ca   : > { %20296 = vmatprep.subr.bf16.mxu1 %v26398_v3  ;;  %v6010_v16 = vsub.f32 %v6008_v43, %v6009_v53  ;;  %v23841_v23 = vsub.f32 %v6857_v8, %v6875_v28 }
 0x6cb   : > { %v6003_v60 = vsub.f32 %v6001_v11, %v6002_v56 }
 0x6cd   : > { %v6004_v5 = vand.u32 4294901760, %v6003_v60 }
 0x73b   : > { %v4887_v1 = vpop.f32.mrb[26].mxu0 }
 0x73c   : > { %v18957_v49 = vpop.f32.mrb[27].mxu0 }
 0x74d   : > { %v3867_v52 = vpop.f32.mrb[4].mxu1 }
 0x74e   : > { %v18801_v63 = vpop.f32.mrb[5].mxu1  ;;  %v21480_v54 = vadd.f32 %v16927_v41, %v3867_v52  ;;  %v23785_v52 = vpack.c.bf16 %v6008_v43, %v6001_v11  ;;  %v6954_v11 = vand.u32 4294901760, %v23839_v7  ;;  %v6961_v43 = vand.u32 4294901760, %v23841_v23 }
 0x74f   : > { %v23787_v63 = vpack.c.bf16 %v6009_v53, %v6002_v56 }
 0x750   : > { %26552 = vst [vmem:[#allocation35_spill] sm:$0xff] %v23785_v52  ;;  %v6955_v56 = vsub.f32 %v23839_v7, %v6954_v11  ;;  %v6962_v53 = vsub.f32 %v23841_v23, %v6961_v43 }
 0x751   : > { %26553 = vst [vmem:[#allocation36_spill] sm:$0xff] %v23787_v63 }
 0x752   : > { %v6956_v60 = vand.u32 4294901760, %v6955_v56 }
 0x789   : > { %v4377_v50 = vpop.f32.mrb[6].mxu1 }
 0x78a   : > { %v21481_v42 = vadd.f32 %v16928_v24, %v4377_v50  ;;  %v18879_v4 = vpop.f32.mrb[7].mxu1 }
 0x78c   : > { %v4894_v15 = vrot.slane %v21481_v42, %v23653_v40  ;;  %v5400_v36 = vrot.slane %v21481_v42, %v23656_v37 }
 0x78e   : > { %v4895_v58 = vmul.f32 %v21480_v54, %v4894_v15  ;;  %v5401_v21 = vmul.f32 %v21480_v54, %v5400_v36 }
 0x790   : > { %v4897_v44 = vsel %vm2818_vm15, %v4895_v58, 0  ;;  %v5403_v38 = vsel %vm2818_vm15, %v5401_v21, 0 }
 0x791   : > { %v23663_v30 = vand.u32 4294901760, %v4897_v44  ;;  %v23665_v20 = vand.u32 4294901760, %v5403_v38 }
 0x793   : > { %v4970_v39 = vsub.f32 %v4897_v44, %v23663_v30  ;;  %v23670_v48 = vsub.f32 %v5403_v38, %v23665_v20  ;;  %v4469_v45 = vpop.f32.mrb[8].mxu1 }
 0x794   : > { %v4470_v27 = vadd.f32 %v16929_v14, %v4469_v45  ;;  %v18892_v29 = vpop.f32.mrb[9].mxu1 }
 0x795   : > { %v4971_v19 = vand.u32 4294901760, %v4970_v39  ;;  %v5477_v55 = vand.u32 4294901760, %v23670_v48 }
 0x796   : > { %v23676_v22 = vadd.f32 %v4887_v1, %v4470_v27  ;;  %v6011_v1 = vand.u32 4294901760, %v6010_v16  ;;  %v6963_v16 = vand.u32 4294901760, %v6962_v53 }
 0x797   : > { %v4972_v46 = vsub.f32 %v4970_v39, %v4971_v19  ;;  %v5478_v35 = vsub.f32 %v23670_v48, %v5477_v55 }
 0x798   : > { %v23783_v49 = vpack.c.bf16 %v6011_v1, %v6004_v5  ;;  %v20405_v5 = vpack.c.bf16 %v6963_v16, %v6956_v60  ;;  %v6858_v1 = vld [vmem:[%s26554_s23 + $0x10] sm:$0xff]  ;;  %v6853_v8 = vrot.slane %v23676_v22, %v23656_v37 }
 0x799   : > { %v4973_v9 = vand.u32 4294901760, %v4972_v46  ;;  %v5479_v2 = vand.u32 4294901760, %v5478_v35 }
 0x79a   : > { %26551 = vst [vmem:[#allocation34_spill] sm:$0xff] %v23783_v49 }
 0x79b   : > { %18969 = vmatmul.mubr.f32.vlgmr.msra.gmra.mrb[10].mxu1 %v4973_v9  ;;  %19047 = vmatmul.mubr.f32.vlgmr.msra.gmra.mrb[28].mxu0 %v5479_v2 }
 0x79c   : > { %20298 = vmatpush3.bf16.msra.mxu1 %v23635_v13  ;;  %20334 = vmatpush3.bf16.msra.mxu0 %v23635_v13 }
 0x79d   : > { %20299 = vmatprep.subr.bf16.mxu1 %v26398_v3  ;;  %20335 = vmatprep.subr.bf16.mxu0 %v26398_v3 }
 0x79e   : > { %18981 = vmatprep.mubr.msk.f32.mxu1 %vm22060_vm0, %v26511_v26  ;;  %19059 = vmatprep.mubr.msk.f32.mxu0 %vm22060_vm0, %v26511_v26 }
 0x7a0   : > { %20301 = vmatpush3.bf16.msra.mxu1 %v23639_v25  ;;  %20337 = vmatpush3.bf16.msra.mxu0 %v23639_v25 }
 0x7a1   : > { %18979 = vmatprep.subr.mxu1 %v26511_v26  ;;  %19057 = vmatprep.subr.mxu0 %v26511_v26 }
 0x7a4   : > { %18980 = vmatpush3.msra.mxu1 %v23694_v0  ;;  %19058 = vmatpush3.msra.mxu0 %v23694_v0 }
 0x7a5   : > { %18982 = vmatmul.mubr.f32.vlgmr.msra.gmra.mrb[10].mxu1 %v23663_v30  ;;  %20302 = vmatprep.subr.bf16.mxu1 %v26398_v3 }
 0x7a6   : > { %19060 = vmatmul.mubr.f32.vlgmr.msra.gmra.mrb[28].mxu0 %v23665_v20  ;;  %20338 = vmatprep.subr.bf16.mxu0 %v26398_v3 }
 0x7a7   : > { %20304 = vmatpush3.bf16.msra.mxu1 %v23641_v33  ;;  %20340 = vmatpush3.bf16.msra.mxu0 %v23641_v33 }
 0x7a8   : > { %20305 = vmatprep.subr.bf16.mxu1 %v26398_v3  ;;  %20341 = vmatprep.subr.bf16.mxu0 %v26398_v3 }
 0x7a9   : > { %18994 = vmatprep.mubr.msk.f32.mxu1 %vm22060_vm0, %v26511_v26  ;;  %19072 = vmatprep.mubr.msk.f32.mxu0 %vm22060_vm0, %v26511_v26 }
 0x7ab   : > { %20307 = vmatpush3.bf16.msra.mxu1 %v23643_v59  ;;  %20343 = vmatpush3.bf16.msra.mxu0 %v23643_v59 }
 0x7ac   : > { %18992 = vmatprep.subr.mxu1 %v26511_v26  ;;  %19070 = vmatprep.subr.mxu0 %v26511_v26 }
 0x7af   : > { %18993 = vmatpush3.msra.mxu1 %v23673_v62  ;;  %19071 = vmatpush3.msra.mxu0 %v23673_v62 }
 0x7b0   : > { %18995 = vmatmul.mubr.f32.vlgmr.msra.gmra.mrb[10].mxu1 %v4970_v39  ;;  %20308 = vmatprep.subr.bf16.mxu1 %v26398_v3 }
 0x7b1   : > { %19073 = vmatmul.mubr.f32.vlgmr.msra.gmra.mrb[28].mxu0 %v23670_v48  ;;  %20344 = vmatprep.subr.bf16.mxu0 %v26398_v3 }
 0x7b2   : > { %20310 = vmatpush3.bf16.msra.mxu1 %v23616_v31  ;;  %20346 = vmatpush3.bf16.msra.mxu0 %v23616_v31 }
 0x7b3   : > { %20311 = vmatprep.subr.bf16.mxu1 %v26398_v3  ;;  %20347 = vmatprep.subr.bf16.mxu0 %v26398_v3 }
 0x7b4   : > { %19007 = vmatprep.mubr.msk.f32.mxu1 %vm22060_vm0, %v26511_v26  ;;  %19085 = vmatprep.mubr.msk.f32.mxu0 %vm22060_vm0, %v26511_v26 }
 0x7b6   : > { %20313 = vmatpush3.bf16.msra.mxu1 %v23624_v6  ;;  %20349 = vmatpush3.bf16.msra.mxu0 %v23624_v6 }
 0x7b7   : > { %19005 = vmatprep.subr.mxu1 %v26511_v26  ;;  %19083 = vmatprep.subr.mxu0 %v26511_v26 }
 0x7ba   : > { %19006 = vmatpush3.msra.mxu1 %v23631_v17  ;;  %19084 = vmatpush3.msra.mxu0 %v23631_v17 }
 0x7bb   : > { %19008 = vmatmul.mubr.f32.vlgmr.msra.gmra.mrb[10].mxu1 %v4971_v19  ;;  %20314 = vmatprep.subr.bf16.mxu1 %v26398_v3 }
 0x7bc   : > { %19086 = vmatmul.mubr.f32.vlgmr.msra.gmra.mrb[28].mxu0 %v5477_v55  ;;  %20350 = vmatprep.subr.bf16.mxu0 %v26398_v3 }
 0x7bd   : > { %20316 = vmatpush3.bf16.msra.mxu1 %v23645_v47  ;;  %20352 = vmatpush3.bf16.msra.mxu0 %v23645_v47 }
 0x7be   : > { %20317 = vmatprep.subr.bf16.mxu1 %v26398_v3  ;;  %20353 = vmatprep.subr.bf16.mxu0 %v26398_v3 }
 0x7bf   : > { %19020 = vmatprep.mubr.msk.f32.mxu1 %vm22060_vm0, %v26511_v26  ;;  %19098 = vmatprep.mubr.msk.f32.mxu0 %vm22060_vm0, %v26511_v26 }
 0x7c1   : > { %20319 = vmatpush3.bf16.msra.mxu1 %v23647_v10  ;;  %20355 = vmatpush3.bf16.msra.mxu0 %v23647_v10 }
 0x7c2   : > { %19018 = vmatprep.subr.mxu1 %v26511_v26  ;;  %19096 = vmatprep.subr.mxu0 %v26511_v26 }
 0x7c5   : > { %19019 = vmatpush3.msra.mxu1 %v23680_v32  ;;  %19097 = vmatpush3.msra.mxu0 %v23680_v32 }
 0x7c6   : > { %19021 = vmatmul.mubr.f32.vlgmr.msra.gmra.mrb[10].mxu1 %v23663_v30  ;;  %20320 = vmatprep.subr.bf16.mxu1 %v26398_v3 }
 0x7c7   : > { %19099 = vmatmul.mubr.f32.vlgmr.msra.gmra.mrb[28].mxu0 %v23665_v20  ;;  %20356 = vmatprep.subr.bf16.mxu0 %v26398_v3 }
 0x7c8   : > { %20322 = vmatpush3.bf16.msra.mxu1 %v23616_v31  ;;  %20358 = vmatpush3.bf16.msra.mxu0 %v23616_v31 }
 0x7c9   : > { %20323 = vmatprep.subr.bf16.mxu1 %v26398_v3  ;;  %20359 = vmatprep.subr.bf16.mxu0 %v26398_v3 }
 0x7ca   : > { %19033 = vmatprep.mubr.msk.f32.mxu1 %vm22060_vm0, %v26511_v26  ;;  %19111 = vmatprep.mubr.msk.f32.mxu0 %vm22060_vm0, %v26511_v26 }
 0x7cc   : > { %20325 = vmatpush3.bf16.msra.mxu1 %v23624_v6  ;;  %20361 = vmatpush3.bf16.msra.mxu0 %v23624_v6 }
 0x7cd   : > { %19031 = vmatprep.subr.mxu1 %v26511_v26  ;;  %19109 = vmatprep.subr.mxu0 %v26511_v26 }
 0x7d0   : > { %19032 = vmatpush3.msra.mxu1 %v23631_v17  ;;  %19110 = vmatpush3.msra.mxu0 %v23631_v17 }
 0x7d1   : > { %19034 = vmatmul.mubr.f32.vlgmr.msra.gmra.mrb[10].mxu1 %v23663_v30  ;;  %19112 = vmatmul.mubr.f32.vlgmr.msra.gmra.mrb[28].mxu0 %v23665_v20 }
 0x7d2   : > { %20362 = vmatprep.subr.bf16.mxu1 %v26398_v3  ;;  %19118 = vmatprep.mubr.msk.f32.mxu1 %vm22060_vm0, %v26511_v26 }
 0x7d3   : > { %20404 = vmatprep.subr.bf16.mxu0 %v26398_v3  ;;  %19221 = vmatprep.mubr.msk.f32.mxu0 %vm22060_vm0, %v26511_v26 }
 0x7d4   : > { %20364 = vmatpush3.bf16.msra.mxu1 %v23779_v18  ;;  %20406 = vmatpush3.bf16.msra.mxu0 %v20405_v5 }
 0x7d5   : > { %20365 = vmatprep.subr.bf16.mxu1 %v26398_v3  ;;  %20407 = vmatprep.subr.bf16.mxu0 %v26398_v3 }
 0x8a4   : > { %v5393_v34 = vpop.f32.mrb[10].mxu1  ;;  %v5899_v24 = vpop.f32.mrb[28].mxu0 }
 0x8a5   : > { %v5903_v41 = vmax.f32 %v5393_v34, %v5899_v24  ;;  %v19035_v50 = vpop.f32.mrb[11].mxu1  ;;  %v19113_v42 = vpop.f32.mrb[29].mxu0 }
 0x8a7   : > { %v5904_v4 = vsub.f32 %v5393_v34, %v5903_v41  ;;  %v5907_v54 = vsub.f32 %v5899_v24, %v5903_v41  ;;  %v6859_v34 = vld [vmem:[%s26554_s23 + $0x18] sm:$0xff]  ;;  %v6878_v24 = vand.u32 4294901760, %v6858_v1 }
 0x8a8   : > { %v6881_v41 = vand.u32 4294901760, %v6859_v34 }
 0x8a9   : > { %v5905_v15 = vmul.f32 1.442695, %v5904_v4  ;;  %v5908_v36 = vmul.f32 1.442695, %v5907_v54  ;;  %v6967_v50 = vsub.f32 %v6858_v1, %v6878_v24  ;;  %v16930_v1 = vld [vmem:[%s26555_s28] ss:$0 sm:$0xff] }
 0x8aa   : > { %v6974_v42 = vsub.f32 %v6859_v34, %v6881_v41 }
 0x8ab   : > { %21931 = vpow2.f32 %v5905_v15  ;;  %v6968_v4 = vand.u32 4294901760, %v6967_v50  ;;  %v6860_v15 = vld [vmem:[%s26554_s23 + $0x20] sm:$0xff] }
 0x8ac   : > { %21933 = vpow2.f32 %v5908_v36  ;;  %v6975_v54 = vand.u32 4294901760, %v6974_v42 }
 0x8ad   : > { %v6969_v36 = vsub.f32 %v6967_v50, %v6968_v4 }
 0x8b5   : > { %v21932_v58 = vpop.eup %21931 }
 0x8b6   : > { %v21934_v21 = vpop.eup %21933 }
 0x8b7   : > { %v5910_v44 = vadd.f32 %v21934_v21, %v21932_v58 }
 0x8b9   : > { %21935 = vrcp.f32 %v5910_v44  ;;  %v6970_v44 = vand.u32 4294901760, %v6969_v36 }
 0x8c3   : > { %v21936_v38 = vpop.eup %21935 }
 0x8c4   : > { %v6387_v30 = vmul.f32 %v21936_v38, %v21934_v21  ;;  %v5913_v20 = vmul.f32 %v21936_v38, %v21932_v58  ;;  %v6976_v58 = vsub.f32 %v6974_v42, %v6975_v54  ;;  %v6884_v21 = vand.u32 4294901760, %v6860_v15 }
 0x8c6   : > { %v5916_v14 = vsel %vm5914_vm3, %v5913_v20, 0  ;;  %v6389_v19 = vsel %vm5914_vm3, %v6387_v30, 0  ;;  %v6977_v38 = vand.u32 4294901760, %v6976_v58  ;;  %v23851_v30 = vsub.f32 %v6860_v15, %v6884_v21 }
 0x8c7   : > { %v5989_v39 = vand.u32 4294901760, %v5916_v14  ;;  %v6458_v55 = vand.u32 4294901760, %v6389_v19 }
 0x8c8   : > { %v20408_v20 = vpack.c.bf16 %v6977_v38, %v6970_v44 }
 0x8c9   : > { %v5990_v48 = vsub.f32 %v5916_v14, %v5989_v39  ;;  %v6459_v46 = vsub.f32 %v6389_v19, %v6458_v55  ;;  %v6982_v14 = vand.u32 4294901760, %v23851_v30  ;;  %v20414_v19 = vpack.c.bf16 %v6974_v42, %v6967_v50 }
 0x8ca   : > { %20409 = vmatpush3.bf16.msra.mxu0 %v20408_v20 }
 0x8cb   : > { %v5991_v45 = vand.u32 4294901760, %v5990_v48  ;;  %v6460_v35 = vand.u32 4294901760, %v6459_v46  ;;  %19219 = vmatprep.subr.mxu0 %v26511_v26 }
 0x8cd   : > { %v5992_v27 = vsub.f32 %v5990_v48, %v5991_v45  ;;  %v6461_v9 = vsub.f32 %v6459_v46, %v6460_v35 }
 0x8cf   : > { %v5993_v29 = vand.u32 4294901760, %v5992_v27  ;;  %v6462_v2 = vand.u32 4294901760, %v6461_v9  ;;  %v20402_v27 = vpack.c.bf16 %v6881_v41, %v6878_v24 }
 0x8d1   : > { %19119 = vmatmul.mubr.f32.vlgmr.msra.gmra.mrb[12].mxu1 %v5993_v29  ;;  %v20411_v29 = vpack.c.bf16 %v23841_v23, %v23839_v7 }
 0x8d2   : > { %20367 = vmatpush3.bf16.msra.mxu1 %v23783_v49  ;;  %19125 = vmatprep.mubr.msk.f32.mxu1 %vm22060_vm0, %v26511_v26 }
 0x8d3   : > { %20368 = vmatprep.subr.bf16.mxu1 %v26398_v3 }
 0x8d9   : > { %19126 = vmatmul.mubr.f32.vlgmr.msra.gmra.mrb[12].mxu1 %v5989_v39 }
 0x8da   : > { %20370 = vmatpush3.bf16.msra.mxu1 %v23785_v52  ;;  %19132 = vmatprep.mubr.msk.f32.mxu1 %vm22060_vm0, %v26511_v26 }
 0x8db   : > { %20371 = vmatprep.subr.bf16.mxu1 %v26398_v3 }
 0x8e1   : > { %19133 = vmatmul.mubr.f32.vlgmr.msra.gmra.mrb[12].mxu1 %v5990_v48  ;;  %v20399_v48 = vpack.c.bf16 %v6875_v28, %v6872_v61 }
 0x8e2   : > { %20373 = vmatpush3.bf16.msra.mxu1 %v23779_v18  ;;  %19139 = vmatprep.mubr.msk.f32.mxu1 %vm22060_vm0, %v26511_v26 }
 0x8e3   : > { %20374 = vmatprep.subr.bf16.mxu1 %v26398_v3 }
 0x8e9   : > { %19140 = vmatmul.mubr.f32.vlgmr.msra.gmra.mrb[12].mxu1 %v5991_v45 }
 0x8ea   : > { %20376 = vmatpush3.bf16.msra.mxu1 %v23787_v63  ;;  %19146 = vmatprep.mubr.msk.f32.mxu1 %vm22060_vm0, %v26511_v26 }
 0x8eb   : > { %20377 = vmatprep.subr.bf16.mxu1 %v26398_v3 }
 0x8f1   : > { %19147 = vmatmul.mubr.f32.vlgmr.msra.gmra.mrb[12].mxu1 %v5989_v39 }
 0x8f2   : > { %20379 = vmatpush3.bf16.msra.mxu1 %v23779_v18  ;;  %19153 = vmatprep.mubr.msk.f32.mxu1 %vm22060_vm0, %v26511_v26 }
 0x8f3   : > { %20380 = vmatprep.subr.bf16.mxu1 %v26398_v3 }
 0x8f9   : > { %19154 = vmatmul.mubr.f32.vlgmr.msra.gmra.mrb[12].mxu1 %v5989_v39  ;;  %v6983_v39 = vsub.f32 %v23851_v30, %v6982_v14 }
 0x8fa   : > { %20382 = vmatpush3.bf16.msra.mxu1 %v23779_v18  ;;  %19160 = vmatprep.mubr.msk.f32.mxu1 %vm22060_vm0, %v26511_v26 }
 0x8fb   : > { %20383 = vmatprep.subr.bf16.mxu1 %v26398_v3  ;;  %v6984_v45 = vand.u32 4294901760, %v6983_v39 }
 0x8fd   : > { %19161 = vmatmul.mubr.f32.vlgmr.msra.gmra.mrb[14].mxu1 %v6462_v2  ;;  %19220 = vmatpush3.msra.mxu0 %v6984_v45 }
 0x8fe   : > { %20385 = vmatpush3.bf16.msra.mxu1 %v23783_v49  ;;  %19167 = vmatprep.mubr.msk.f32.mxu1 %vm22060_vm0, %v26511_v26 }
 0x8ff   : > { %20386 = vmatprep.subr.bf16.mxu1 %v26398_v3  ;;  %20416 = vmatprep.subr.bf16.mxu0 %v26398_v3 }
 0x905   : > { %19168 = vmatmul.mubr.f32.vlgmr.msra.gmra.mrb[14].mxu1 %v6458_v55 }
 0x906   : > { %20388 = vmatpush3.bf16.msra.mxu1 %v23785_v52  ;;  %19174 = vmatprep.mubr.msk.f32.mxu1 %vm22060_vm0, %v26511_v26 }
 0x907   : > { %20389 = vmatprep.subr.bf16.mxu1 %v26398_v3 }
 0x90d   : > { %19175 = vmatmul.mubr.f32.vlgmr.msra.gmra.mrb[14].mxu1 %v6459_v46  ;;  %v20426_v46 = vpack.c.bf16 %v6975_v54, %v6968_v4 }
 0x90e   : > { %20391 = vmatpush3.bf16.msra.mxu1 %v23779_v18  ;;  %19181 = vmatprep.mubr.msk.f32.mxu1 %vm22060_vm0, %v26511_v26 }
 0x90f   : > { %20392 = vmatprep.subr.bf16.mxu1 %v26398_v3 }
 0x915   : > { %19182 = vmatmul.mubr.f32.vlgmr.msra.gmra.mrb[14].mxu1 %v6460_v35  ;;  %v6384_v35 = vrot.slane %v23676_v22, %v23653_v40 }
 0x916   : > { %20394 = vmatpush3.bf16.msra.mxu1 %v23787_v63  ;;  %19188 = vmatprep.mubr.msk.f32.mxu1 %vm22060_vm0, %v26511_v26 }
 0x917   : > { %20395 = vmatprep.subr.bf16.mxu1 %v26398_v3 }
 0x91d   : > { %19189 = vmatmul.mubr.f32.vlgmr.msra.gmra.mrb[14].mxu1 %v6458_v55 }
 0x91e   : > { %20397 = vmatpush3.bf16.msra.mxu1 %v23779_v18  ;;  %19195 = vmatprep.mubr.msk.f32.mxu1 %vm22060_vm0, %v26511_v26 }
 0x91f   : > { %20398 = vmatprep.subr.bf16.mxu1 %v26398_v3 }
 0x925   : > { %19196 = vmatmul.mubr.f32.vlgmr.msra.gmra.mrb[14].mxu1 %v6458_v55  ;;  %v20423_v55 = vpack.c.bf16 %v6961_v43, %v6954_v11 }
 0x926   : > { %19208 = vmatprep.mubr.msk.f32.mxu1 %vm22060_vm0, %v26511_v26  ;;  %20400 = vmatpush3.bf16.msra.mxu1 %v20399_v48 }
 0x927   : > { %20401 = vmatprep.subr.bf16.mxu1 %v26398_v3 }
 0x92a   : > { %20403 = vmatpush3.bf16.msra.mxu1 %v20402_v27 }
 0x92b   : > { %19206 = vmatprep.subr.mxu1 %v26511_v26 }
 0x92e   : > { %19207 = vmatpush3.msra.mxu1 %v6884_v21 }
 0x92f   : > { %20410 = vmatprep.subr.bf16.mxu1 %v26398_v3 }
 0x9cc   : > { %v6377_v9 = vpop.f32.mrb[12].mxu1 }
 0x9cd   : > { %v6385_v2 = vmul.f32 %v6384_v35, %v6377_v9  ;;  %v19155_v57 = vpop.f32.mrb[13].mxu1 }
 0x9ce   : > { %v7401_v57 = vld [vmem:[%s26556_s5 + $0x10] sm:$0xff] }
 0x9f8   : > { %v6846_v61 = vpop.f32.mrb[14].mxu1 }
 0x9f9   : > { %v6854_v28 = vmul.f32 %v6853_v8, %v6846_v61  ;;  %v19197_v56 = vpop.f32.mrb[15].mxu1  ;;  %v7404_v8 = vld [vmem:[%s26556_s5 + $0x28] sm:$0xff] }
 0x9fa   : > { %v7406_v56 = vld [vmem:[%s26556_s5 + $0x38] sm:$0xff] }
 0x9fb   : > { %v6855_v53 = vadd.f32 %v6854_v28, %v6385_v2  ;;  %v7399_v2 = vld [vmem:[%s26556_s5] sm:$0xff]  ;;  %v7430_v28 = vand.u32 4294901760, %v7401_v57 }
 0x9fc   : > { %v7426_v61 = vand.u32 4294901760, %v7399_v2 }
 0x9fd   : > { %v6869_v7 = vsel %vm2818_vm15, %v6855_v53, 0  ;;  %v7432_v53 = vand.u32 4294901760, %v7404_v8 }
 0x9fe   : > { %v6941_v23 = vand.u32 4294901760, %v6869_v7 }
 0xa00   : > { %v6942_v60 = vsub.f32 %v6869_v7, %v6941_v23  ;;  %19222 = vmatmul.mubr.f32.vlgmr.msra.gmra.mrb[30].mxu0 %v6941_v23  ;;  %v7403_v7 = vld [vmem:[%s26556_s5 + $0x20] sm:$0xff] }
 0xa01   : > { %20418 = vmatpush3.bf16.msra.mxu0 %v20399_v48  ;;  %19247 = vmatprep.mubr.msk.f32.mxu0 %vm22060_vm0, %v26511_v26 }
 0xa02   : > { %20419 = vmatprep.subr.bf16.mxu0 %v26398_v3  ;;  %v6943_v11 = vand.u32 4294901760, %v6942_v60 }
 0xa04   : > { %v6944_v43 = vsub.f32 %v6942_v60, %v6943_v11 }
 0xa05   : > { %20421 = vmatpush3.bf16.msra.mxu0 %v20402_v27 }
 0xa06   : > { %19245 = vmatprep.subr.mxu0 %v26511_v26  ;;  %v6945_v22 = vand.u32 4294901760, %v6944_v43 }
 0xa08   : > { %19209 = vmatmul.mubr.f32.vlgmr.msra.gmra.mrb[16].mxu1 %v6945_v22  ;;  %v7436_v22 = vand.u32 4294901760, %v7406_v56 }
 0xa09   : > { %20412 = vmatpush3.bf16.msra.mxu1 %v20411_v29  ;;  %19246 = vmatpush3.msra.mxu0 %v6884_v21 }
 0xa0a   : > { %19248 = vmatmul.mubr.f32.vlgmr.msra.gmra.mrb[32].mxu0 %v6943_v11  ;;  %20428 = vmatprep.subr.bf16.mxu0 %v26398_v3 }
 0xa0b   : > { %20430 = vmatpush3.bf16.msra.mxu0 %v20399_v48  ;;  %20413 = vmatprep.subr.bf16.mxu1 %v26398_v3 }
 0xa0c   : > { %20431 = vmatprep.subr.bf16.mxu0 %v26398_v3  ;;  %19234 = vmatprep.mubr.msk.f32.mxu1 %vm22060_vm0, %v26511_v26 }
 0xa0d   : > { %20415 = vmatpush3.bf16.msra.mxu1 %v20414_v19  ;;  %19273 = vmatprep.mubr.msk.f32.mxu0 %vm22060_vm0, %v26511_v26 }
 0xa0e   : > { %19232 = vmatprep.subr.mxu1 %v26511_v26 }
 0xa0f   : > { %20433 = vmatpush3.bf16.msra.mxu0 %v20402_v27 }
 0xa10   : > { %19271 = vmatprep.subr.mxu0 %v26511_v26 }
 0xa11   : > { %19233 = vmatpush3.msra.mxu1 %v23851_v30 }
 0xa12   : > { %19235 = vmatmul.mubr.f32.vlgmr.msra.gmra.mrb[18].mxu1 %v6942_v60  ;;  %20422 = vmatprep.subr.bf16.mxu1 %v26398_v3 }
 0xa13   : > { %20424 = vmatpush3.bf16.msra.mxu1 %v20423_v55  ;;  %19272 = vmatpush3.msra.mxu0 %v6884_v21 }
 0xa14   : > { %19274 = vmatmul.mubr.f32.vlgmr.msra.gmra.mrb[34].mxu0 %v6941_v23  ;;  %20425 = vmatprep.subr.bf16.mxu1 %v26398_v3 }
 0xa15   : > { %19260 = vmatprep.mubr.msk.f32.mxu1 %vm22060_vm0, %v26511_v26  ;;  %20482 = vmatprep.subr.bf16.mxu0 %v26398_v3 }
 0xa17   : > { %20427 = vmatpush3.bf16.msra.mxu1 %v20426_v46  ;;  %v7402_v46 = vld [vmem:[%s26556_s5 + $0x18] sm:$0xff] }
 0xa18   : > { %19258 = vmatprep.subr.mxu1 %v26511_v26  ;;  %v7428_v9 = vand.u32 4294901760, %v7402_v46 }
 0xa1a   : > { %v23916_v43 = vsub.f32 %v7402_v46, %v7428_v9 }
 0xa1b   : > { %19259 = vmatpush3.msra.mxu1 %v6982_v14 }
 0xa1c   : > { %19261 = vmatmul.mubr.f32.vlgmr.msra.gmra.mrb[20].mxu1 %v6941_v23  ;;  %v7405_v23 = vld [vmem:[%s26556_s5 + $0x30] sm:$0xff] }
 0xa1d   : > { %7498 = vmatprep.mubr.f32.mxu1 %v26511_v26 }
 0xad3   : > { %v7043_v16 = vpop.f32.mrb[30].mxu0 }
 0xad4   : > { %v19223_v5 = vpop.f32.mrb[31].mxu0 }
 0xad5   : > { %v23920_v5 = vsub.f32 %v7399_v2, %v7426_v61 }
 0xadb   : > { %v6947_v34 = vpop.f32.mrb[16].mxu1 }
 0xadc   : > { %v6948_v24 = vadd.f32 %v16930_v1, %v6947_v34  ;;  %v19210_v41 = vpop.f32.mrb[17].mxu1  ;;  %v23922_v1 = vsub.f32 %v7401_v57, %v7430_v28  ;;  %v23924_v34 = vsub.f32 %v7404_v8, %v7432_v53 }
 0xadd   : > { %v7203_v50 = vpop.f32.mrb[32].mxu0  ;;  %v23930_v41 = vpack.c.bf16 %v7436_v22, %v7432_v53 }
 0xade   : > { %v19249_v42 = vpop.f32.mrb[33].mxu0  ;;  %v7044_v4 = vadd.f32 %v7043_v16, %v6948_v24  ;;  %v23918_v16 = vpack.c.bf16 %v7430_v28, %v7426_v61  ;;  %v23927_v24 = vld [vmem:[%s26556_s5 + $0x48] sm:$0xff] }
 0xadf   : > { %v7434_v42 = vand.u32 4294901760, %v7403_v7 }
 0xae5   : > { %v7125_v54 = vpop.f32.mrb[18].mxu1 }
 0xae6   : > { %v7126_v15 = vadd.f32 %v7125_v54, %v7044_v4  ;;  %v19236_v36 = vpop.f32.mrb[19].mxu1  ;;  %v7438_v4 = vand.u32 4294901760, %v7405_v23 }
 0xae7   : > { %v7365_v58 = vpop.f32.mrb[34].mxu0 }
 0xae8   : > { %v19275_v21 = vpop.f32.mrb[35].mxu0  ;;  %v7204_v44 = vadd.f32 %v7203_v50, %v7126_v15  ;;  %v23932_v50 = vsub.f32 %v7406_v56, %v7436_v22  ;;  %v7524_v15 = vand.u32 4294901760, %v23916_v43  ;;  %v23938_v36 = vpack.c.bf16 %v7438_v4, %v7434_v42 }
 0xae9   : > { %v23942_v21 = vsub.f32 %v7405_v23, %v7438_v4 }
 0xaea   : > { %v7548_v2 = vand.u32 4294901760, %v23932_v50 }
 0xaeb   : > { %v7554_v61 = vand.u32 4294901760, %v23942_v21 }
 0xaec   : > { %v7549_v56 = vsub.f32 %v23932_v50, %v7548_v2 }
 0xaed   : > { %v7555_v23 = vsub.f32 %v23942_v21, %v7554_v61 }
 0xaef   : > { %v7289_v38 = vpop.f32.mrb[20].mxu1 }
 0xaf0   : > { %v7290_v30 = vadd.f32 %v7289_v38, %v7204_v44  ;;  %v19262_v20 = vpop.f32.mrb[21].mxu1  ;;  %v23945_v44 = vand.u32 4294901760, %v23927_v24  ;;  %v7407_v38 = vld [vmem:[%s26556_s5 + $0x40] sm:$0xff] }
 0xaf1   : > { %v7525_v20 = vsub.f32 %v23916_v43, %v7524_v15 }
 0xaf2   : > { %v7366_v14 = vadd.f32 %v7365_v58, %v7290_v30  ;;  %v23940_v58 = vsub.f32 %v7403_v7, %v7434_v42  ;;  %v7550_v42 = vand.u32 4294901760, %v7549_v56 }
 0xaf4   : > { %v23894_v39 = vadd.f32 %v23300_v51, %v7366_v14  ;;  %v7400_v51 = vld [vmem:[%s26556_s5 + $0x8] sm:$0xff]  ;;  %v7518_v14 = vand.u32 4294901760, %v23920_v5  ;;  %v7542_v8 = vand.u32 4294901760, %v23940_v58 }
 0xaf5   : > { %v7424_v35 = vand.u32 4294901760, %v7400_v51 }
 0xaf6   : > { %v7372_v48 = vsel %vm3329_vm1, %v23894_v39, 0.0  ;;  %v7543_v7 = vsub.f32 %v23940_v58, %v7542_v8  ;;  %v20472_v56 = vpack.c.bf16 %v7554_v61, %v7542_v8 }
 0xaf7   : > { %7373 = vadd.xlane.f32.xlu1 %v7372_v48  ;;  %v23912_v60 = vpack.c.bf16 %v7428_v9, %v7424_v35  ;;  %v23914_v11 = vsub.f32 %v7400_v51, %v7424_v35  ;;  %v7530_v48 = vand.u32 4294901760, %v23922_v1  ;;  %v7536_v9 = vand.u32 4294901760, %v23924_v34 }
 0xaf8   : > { %v7544_v4 = vand.u32 4294901760, %v7543_v7 }
 0xaf9   : > { %20435 = vmatprep.subr.bf16.mxu1 %v23912_v60  ;;  %v7512_v54 = vand.u32 4294901760, %v23914_v11  ;;  %v7531_v51 = vsub.f32 %v23922_v1, %v7530_v48  ;;  %v7537_v28 = vsub.f32 %v23924_v34, %v7536_v9 }
 0xafa   : > { %20437 = vmatpush1.bf16.msra.mxu1 %v23918_v16 }
 0xafb   : > { %20439 = vmatprep.subr.bf16.mxu1 %v23930_v41  ;;  %v7513_v30 = vsub.f32 %v23914_v11, %v7512_v54  ;;  %v7532_v57 = vand.u32 4294901760, %v7531_v51  ;;  %v7538_v22 = vand.u32 4294901760, %v7537_v28  ;;  %v20454_v51 = vpack.c.bf16 %v23932_v50, %v23924_v34 }
 0xafc   : > { %v20470_v28 = vpack.c.bf16 %v7548_v2, %v7536_v9 }
 0xafe   : > { %20441 = vmatpush1.bf16.msra.mxu1 %v23938_v36 }
 0xaff   : > { %7441 = vmatprep.subr.mxu1 %v23945_v44 }
 0xb84   : > { %v7374_v45 = vpop.xlane.xlu1 %7373 }
 0xb85   : > { %v7375_v27 = vmul.f32 0.025, %v7374_v45  ;;  %v23953_v45 = vand.u32 4294901760, %v7407_v38 }
 0xb87   : > { %v23899_v29 = vsub.f32 %v23894_v39, %v7375_v27  ;;  %v7514_v27 = vand.u32 4294901760, %v7513_v30  ;;  %7443 = vmatpush1.msra.mxu1 %v23953_v45  ;;  %v7556_v30 = vand.u32 4294901760, %v7555_v23 }
 0xb89   : > { %v7377_v19 = vmul.f32 %v23899_v29, %v23899_v29 }
 0xb8b   : > { %v7378_v55 = vsel %vm3329_vm1, %v7377_v19, 0.0  ;;  %v7526_v19 = vand.u32 4294901760, %v7525_v20  ;;  %v20446_v20 = vpack.c.bf16 %v7550_v42, %v7538_v22 }
 0xb8c   : > { %7379 = vadd.xlane.f32.xlu1 %v7378_v55  ;;  %v7519_v55 = vsub.f32 %v23920_v5, %v7518_v14 }
 0xb8d   : > { %v20442_v46 = vpack.c.bf16 %v7526_v19, %v7514_v27  ;;  %v20448_v27 = vpack.c.bf16 %v7556_v30, %v7544_v4  ;;  %v20450_v19 = vpack.c.bf16 %v23916_v43, %v23914_v11  ;;  %v16931_v4 = vld [vmem:[%s26557_s9] ss:$0 sm:$0xff] }
 0xb8e   : > { %v7520_v35 = vand.u32 4294901760, %v7519_v55  ;;  %v20452_v55 = vpack.c.bf16 %v23922_v1, %v23920_v5  ;;  %v16932_v43 = vld [vmem:[%s26558_s11] ss:$0 sm:$0xff] }
 0xb8f   : > { %20443 = vmatprep.subr.bf16.mxu1 %v20442_v46  ;;  %v20456_v46 = vpack.c.bf16 %v23942_v21, %v23940_v58  ;;  %v7565_v58 = vsub.f32 %v7407_v38, %v23953_v45  ;;  %v8012_v38 = vld [vmem:[%s26559_s13 + $0x8] sm:$0xff] }
 0xb90   : > { %v20444_v53 = vpack.c.bf16 %v7532_v57, %v7520_v35  ;;  %v20466_v35 = vpack.c.bf16 %v7524_v15, %v7512_v54  ;;  %v20468_v57 = vpack.c.bf16 %v7530_v48, %v7518_v14  ;;  %v7559_v54 = vsub.f32 %v23927_v24, %v23945_v44  ;;  %v8011_v24 = vld [vmem:[%s26559_s13] sm:$0xff] }
 0xb91   : > { %v7566_v9 = vand.u32 4294901760, %v7565_v58 }
 0xb92   : > { %v7560_v14 = vand.u32 4294901760, %v7559_v54 }
 0xb93   : > { %v7567_v8 = vsub.f32 %v7565_v58, %v7566_v9 }
 0xb95   : > { %v7568_v30 = vand.u32 4294901760, %v7567_v8 }
 0xc19   : > { %v7380_v7 = vpop.xlane.xlu1 %7379 }
 0xc1a   : > { %v7381_v23 = vmul.f32 0.025, %v7380_v7 }
 0xc1c   : > { %v7382_v22 = vadd.f32 1e-05, %v7381_v23 }
 0xc1e   : > { %21937 = vrsqrt.f32 %v7382_v22  ;;  %v8017_v22 = vld [vmem:[%s26559_s13 + $0x30] sm:$0xff] }
 0xc28   : > { %v21938_v42 = vpop.eup %21937 }
 0xc29   : > { %v7384_v11 = vmul.f32 %v21938_v42, %v23899_v29  ;;  %v7561_v29 = vsub.f32 %v7559_v54, %v7560_v14  ;;  %v8018_v42 = vld [vmem:[%s26559_s13 + $0x38] sm:$0xff] }
 0xc2b   : > { %v7391_v5 = vmul.f32 %v16931_v4, %v7384_v11  ;;  %v7562_v61 = vand.u32 4294901760, %v7561_v29  ;;  %v8061_v11 = vand.u32 4294901760, %v8017_v22  ;;  %v8022_v29 = vld [vmem:[%s26559_s13 + $0x58] sm:$0xff] }
 0xc2d   : > { %v7398_v1 = vadd.f32 %v16932_v43, %v7391_v5  ;;  %v8064_v43 = vand.u32 4294901760, %v8018_v42 }
 0xc2f   : > { %v7422_v34 = vsel %vm2818_vm15, %v7398_v1, 0  ;;  %v24040_v1 = vsub.f32 %v8017_v22, %v8061_v11  ;;  %v8028_v22 = vld [vmem:[%s26559_s13 + $0x88] sm:$0xff] }
 0xc30   : > { %v23979_v50 = vand.u32 4294901760, %v7422_v34 }
 0xc32   : > { %v7500_v15 = vsub.f32 %v7422_v34, %v23979_v50  ;;  %v24042_v34 = vsub.f32 %v8018_v42, %v8064_v43 }
 0xc34   : > { %v7501_v21 = vand.u32 4294901760, %v7500_v15 }
 0xc36   : > { %v7502_v48 = vsub.f32 %v7500_v15, %v7501_v21 }
 0xc38   : > { %v7503_v2 = vand.u32 4294901760, %v7502_v48 }
 0xc3a   : > { %7504 = vmatmul.mubr.f32.vlgmr.msra.gmra.mrb[22].mxu1 %v7503_v2  ;;  %v8021_v2 = vld [vmem:[%s26559_s13 + $0x50] sm:$0xff] }
 0xc3b   : > { %20445 = vmatpush1.bf16.msra.mxu1 %v20444_v53  ;;  %7624 = vmatprep.mubr.f32.mxu1 %v26511_v26  ;;  %v8043_v53 = vand.u32 4294901760, %v8011_v24 }
 0xc3c   : > { %20447 = vmatprep.subr.bf16.mxu1 %v20446_v20  ;;  %v8046_v20 = vand.u32 4294901760, %v8012_v38 }
 0xc3f   : > { %20449 = vmatpush1.bf16.msra.mxu1 %v20448_v27  ;;  %v8013_v27 = vld [vmem:[%s26559_s13 + $0x10] sm:$0xff] }
 0xc40   : > { %7563 = vmatprep.subr.mxu1 %v7562_v61  ;;  %v8073_v61 = vand.u32 4294901760, %v8021_v2 }
 0xc43   : > { %7569 = vmatpush1.msra.mxu1 %v7568_v30  ;;  %v8076_v30 = vand.u32 4294901760, %v8022_v29 }
 0xc44   : > { %7626 = vmatmul.mubr.f32.vlgmr.msra.gmra.mrb[22].mxu1 %v23979_v50  ;;  %20451 = vmatprep.subr.bf16.mxu1 %v20450_v19  ;;  %v8014_v19 = vld [vmem:[%s26559_s13 + $0x18] sm:$0xff] }
 0xc45   : > { %20453 = vmatpush1.bf16.msra.mxu1 %v20452_v55  ;;  %7716 = vmatprep.mubr.f32.mxu1 %v26511_v26  ;;  %v24005_v55 = vsub.f32 %v8011_v24, %v8043_v53  ;;  %v24064_v24 = vpack.c.bf16 %v8064_v43, %v8061_v11  ;;  %v8094_v43 = vand.u32 4294901760, %v8028_v22 }
 0xc46   : > { %20455 = vmatprep.subr.bf16.mxu1 %v20454_v51  ;;  %v24007_v51 = vsub.f32 %v8012_v38, %v8046_v20  ;;  %v24066_v38 = vsub.f32 %v8021_v2, %v8073_v61  ;;  %v24097_v2 = vpack.c.bf16 %v8076_v30, %v8073_v61 }
 0xc49   : > { %20457 = vmatpush1.bf16.msra.mxu1 %v20456_v46  ;;  %v8049_v46 = vand.u32 4294901760, %v8013_v27 }
 0xc4a   : > { %7658 = vmatprep.subr.mxu1 %v7559_v54  ;;  %v8020_v54 = vld [vmem:[%s26559_s13 + $0x48] sm:$0xff] }
 0xc4d   : > { %7661 = vmatpush1.msra.mxu1 %v7565_v58 }
 0xc4e   : > { %7719 = vmatmul.mubr.f32.vlgmr.msra.gmra.mrb[22].mxu1 %v7500_v15  ;;  %20459 = vmatprep.subr.bf16.mxu1 %v23912_v60  ;;  %v20552_v15 = vpack.c.bf16 %v24042_v34, %v24040_v1 }
 0xc4f   : > { %20461 = vmatpush1.bf16.msra.mxu1 %v23918_v16  ;;  %7799 = vmatprep.mubr.f32.mxu1 %v26511_v26 }
 0xc50   : > { %20463 = vmatprep.subr.bf16.mxu1 %v23930_v41 }
 0xc53   : > { %20465 = vmatpush1.bf16.msra.mxu1 %v23938_v36 }
 0xc54   : > { %7742 = vmatprep.subr.mxu1 %v23945_v44 }
 0xc57   : > { %7744 = vmatpush1.msra.mxu1 %v23953_v45 }
 0xc58   : > { %7803 = vmatmul.mubr.f32.vlgmr.msra.gmra.mrb[22].mxu1 %v7501_v21  ;;  %20467 = vmatprep.subr.bf16.mxu1 %v20466_v35  ;;  %v8052_v35 = vand.u32 4294901760, %v8014_v19  ;;  %v8070_v21 = vand.u32 4294901760, %v8020_v54 }
 0xc59   : > { %20469 = vmatpush1.bf16.msra.mxu1 %v20468_v57  ;;  %7903 = vmatprep.mubr.f32.mxu1 %v26511_v26 }
 0xc5a   : > { %20471 = vmatprep.subr.bf16.mxu1 %v20470_v28  ;;  %v24015_v57 = vsub.f32 %v8014_v19, %v8052_v35  ;;  %v24038_v5 = vpack.c.bf16 %v8052_v35, %v8049_v46 }
 0xc5d   : > { %20473 = vmatpush1.bf16.msra.mxu1 %v20472_v56 }
 0xc5e   : > { %7844 = vmatprep.subr.mxu1 %v7560_v14 }
 0xc61   : > { %7848 = vmatpush1.msra.mxu1 %v7566_v9  ;;  %v24055_v9 = vsub.f32 %v8020_v54, %v8070_v21 }
 0xc62   : > { %7905 = vmatmul.mubr.f32.vlgmr.msra.gmra.mrb[22].mxu1 %v23979_v50  ;;  %20475 = vmatprep.subr.bf16.mxu1 %v23912_v60  ;;  %v20543_v60 = vpack.c.bf16 %v24007_v51, %v24005_v55 }
 0xc63   : > { %20477 = vmatpush1.bf16.msra.mxu1 %v23918_v16  ;;  %7985 = vmatprep.mubr.f32.mxu1 %v26511_v26  ;;  %v24013_v16 = vsub.f32 %v8013_v27, %v8049_v46  ;;  %v8024_v27 = vld [vmem:[%s26559_s13 + $0x68] sm:$0xff] }
 0xc64   : > { %20479 = vmatprep.subr.bf16.mxu1 %v23930_v41 }
 0xc65   : > { %v20546_v41 = vpack.c.bf16 %v24015_v57, %v24013_v16 }
 0xc67   : > { %20481 = vmatpush1.bf16.msra.mxu1 %v23938_v36  ;;  %v8015_v36 = vld [vmem:[%s26559_s13 + $0x20] sm:$0xff] }
 0xc68   : > { %7928 = vmatprep.subr.mxu1 %v23945_v44  ;;  %v8016_v44 = vld [vmem:[%s26559_s13 + $0x28] sm:$0xff]  ;;  %v8055_v28 = vand.u32 4294901760, %v8015_v36 }
 0xc69   : > { %v8058_v56 = vand.u32 4294901760, %v8016_v44 }
 0xc6a   : > { %v24028_v7 = vsub.f32 %v8015_v36, %v8055_v28  ;;  %v8026_v36 = vld [vmem:[%s26559_s13 + $0x78] sm:$0xff] }
 0xc6b   : > { %7930 = vmatpush1.msra.mxu1 %v23953_v45  ;;  %v24026_v45 = vpack.c.bf16 %v8046_v20, %v8043_v53  ;;  %v24030_v23 = vsub.f32 %v8016_v44, %v8058_v56  ;;  %v24051_v14 = vpack.c.bf16 %v8058_v56, %v8055_v28  ;;  %v24068_v53 = vsub.f32 %v8022_v29, %v8076_v30  ;;  %v8023_v20 = vld [vmem:[%s26559_s13 + $0x60] sm:$0xff] }
 0xc6c   : > { %7987 = vmatmul.mubr.f32.vlgmr.msra.gmra.mrb[22].mxu1 %v23979_v50  ;;  %20542 = vmatprep.subr.bf16.mxu1 %v26398_v3  ;;  %v8019_v50 = vld [vmem:[%s26559_s13 + $0x40] sm:$0xff]  ;;  %v8079_v35 = vand.u32 4294901760, %v8023_v20  ;;  %v8088_v56 = vand.u32 4294901760, %v8026_v36 }
 0xc6d   : > { %20544 = vmatpush1.bf16.msra.mxu1 %v20543_v60  ;;  %20484 = vmatpush1.bf16.msra.mxu0 %v24026_v45  ;;  %v20549_v4 = vpack.c.bf16 %v24030_v23, %v24028_v7  ;;  %v8067_v58 = vand.u32 4294901760, %v8019_v50  ;;  %v20558_v19 = vpack.c.bf16 %v24068_v53, %v24066_v38  ;;  %v8082_v60 = vand.u32 4294901760, %v8024_v27  ;;  %v8027_v44 = vld [vmem:[%s26559_s13 + $0x80] sm:$0xff] }
 0xc6e   : > { %20545 = vmatprep.subr.bf16.mxu1 %v26398_v3  ;;  %20485 = vmatprep.subr.bf16.mxu0 %v26398_v3  ;;  %v8091_v42 = vand.u32 4294901760, %v8027_v44  ;;  %v24090_v54 = vsub.f32 %v8026_v36, %v8088_v56 }
 0xc6f   : > { %v24053_v48 = vsub.f32 %v8019_v50, %v8067_v58  ;;  %v24076_v46 = vpack.c.bf16 %v8070_v21, %v8067_v58  ;;  %v24085_v11 = vsub.f32 %v8024_v27, %v8082_v60  ;;  %v8030_v58 = vld [vmem:[%s26559_s13 + $0x98] sm:$0xff] }
 0xc70   : > { %v24100_v29 = vsub.f32 %v8027_v44, %v8091_v42 }
 0xc71   : > { %20547 = vmatpush1.bf16.msra.mxu1 %v20546_v41  ;;  %20487 = vmatpush1.bf16.msra.mxu0 %v24038_v5  ;;  %v20555_v8 = vpack.c.bf16 %v24055_v9, %v24053_v48  ;;  %v8025_v41 = vld [vmem:[%s26559_s13 + $0x70] sm:$0xff] }
 0xc72   : > { %20548 = vmatprep.subr.bf16.mxu1 %v26398_v3  ;;  %20488 = vmatprep.subr.bf16.mxu0 %v26398_v3  ;;  %v8085_v28 = vand.u32 4294901760, %v8025_v41 }
 0xc74   : > { %v24088_v50 = vsub.f32 %v8025_v41, %v8085_v28  ;;  %v24108_v41 = vpack.c.bf16 %v8082_v60, %v8079_v35  ;;  %v24119_v44 = vpack.c.bf16 %v8088_v56, %v8085_v28  ;;  %v24126_v60 = vpack.c.bf16 %v8094_v43, %v8091_v42 }
 0xc75   : > { %20550 = vmatpush1.bf16.msra.mxu1 %v20549_v4  ;;  %20490 = vmatpush1.bf16.msra.mxu0 %v24051_v14  ;;  %v24083_v4 = vsub.f32 %v8023_v20, %v8079_v35  ;;  %v24104_v20 = vsub.f32 %v8028_v22, %v8094_v43  ;;  %v8173_v56 = vand.u32 4294901760, %v24028_v7  ;;  %v8180_v22 = vand.u32 4294901760, %v24030_v23 }
 0xc76   : > { %20551 = vmatprep.subr.bf16.mxu1 %v26398_v3  ;;  %20491 = vmatprep.subr.bf16.mxu0 %v26398_v3  ;;  %v8187_v43 = vand.u32 4294901760, %v24040_v1 }
 0xc77   : > { %v20561_v21 = vpack.c.bf16 %v24085_v11, %v24083_v4  ;;  %v20567_v61 = vpack.c.bf16 %v24104_v20, %v24100_v29  ;;  %v24138_v42 = vpack.c.bf16 %v8180_v22, %v8173_v56 }
 0xc79   : > { %20553 = vmatpush1.bf16.msra.mxu1 %v20552_v15  ;;  %20493 = vmatpush1.bf16.msra.mxu0 %v24064_v24  ;;  %v8029_v15 = vld [vmem:[%s26559_s13 + $0x90] sm:$0xff] }
 0xc7a   : > { %20554 = vmatprep.subr.bf16.mxu1 %v26398_v3  ;;  %20494 = vmatprep.subr.bf16.mxu0 %v26398_v3  ;;  %v8097_v27 = vand.u32 4294901760, %v8029_v15 }
 0xc7c   : > { %v24113_v30 = vsub.f32 %v8029_v15, %v8097_v27  ;;  %v8194_v15 = vand.u32 4294901760, %v24042_v34 }
 0xc7d   : > { %20556 = vmatpush1.bf16.msra.mxu1 %v20555_v8  ;;  %20496 = vmatpush1.bf16.msra.mxu0 %v24076_v46  ;;  %v20564_v8 = vpack.c.bf16 %v24090_v54, %v24088_v50 }
 0xc7e   : > { %20557 = vmatprep.subr.bf16.mxu1 %v26398_v3  ;;  %20497 = vmatprep.subr.bf16.mxu0 %v26398_v3  ;;  %v8195_v12 = vsub.f32 %v24042_v34, %v8194_v15 }
 0xc81   : > { %20559 = vmatpush1.bf16.msra.mxu1 %v20558_v19  ;;  %v8100_v19 = vand.u32 4294901760, %v8030_v58  ;;  %20499 = vmatpush1.bf16.msra.mxu0 %v24097_v2 }
 0xc82   : > { %20560 = vmatprep.subr.bf16.mxu1 %v26398_v3  ;;  %20500 = vmatprep.subr.bf16.mxu0 %v26398_v3 }
 0xc83   : > { %v24115_v36 = vsub.f32 %v8030_v58, %v8100_v19  ;;  %v24132_v28 = vpack.c.bf16 %v8100_v19, %v8097_v27  ;;  %v8174_v58 = vsub.f32 %v24028_v7, %v8173_v56  ;;  %v8196_v7 = vand.u32 4294901760, %v8195_v12 }
 0xc85   : > { %20562 = vmatpush1.bf16.msra.mxu1 %v20561_v21  ;;  %20502 = vmatpush1.bf16.msra.mxu0 %v24108_v41  ;;  %v20570_v35 = vpack.c.bf16 %v24115_v36, %v24113_v30  ;;  %v8181_v21 = vsub.f32 %v24030_v23, %v8180_v22  ;;  %v8175_v27 = vand.u32 4294901760, %v8174_v58  ;;  %v8215_v23 = vand.u32 4294901760, %v24066_v38 }
 0xc86   : > { %20563 = vmatprep.subr.bf16.mxu1 %v26398_v3  ;;  %20503 = vmatprep.subr.bf16.mxu0 %v26398_v3  ;;  %v8222_v22 = vand.u32 4294901760, %v24068_v53 }
 0xc87   : > { %v8182_v19 = vand.u32 4294901760, %v8181_v21 }
 0xc88   : > { %v24160_v49 = vpack.c.bf16 %v8222_v22, %v8215_v23  ;;  %v8223_v12 = vsub.f32 %v24068_v53, %v8222_v22  ;;  %v8264_v22 = vand.u32 4294901760, %v24104_v20 }
 0xc89   : > { %20565 = vmatpush1.bf16.msra.mxu1 %v20564_v8  ;;  %20505 = vmatpush1.bf16.msra.mxu0 %v24119_v44  ;;  %v24144_v8 = vpack.c.bf16 %v8194_v15, %v8187_v43  ;;  %v24150_v63 = vpack.c.bf16 %v8182_v19, %v8175_v27  ;;  %v8236_v15 = vand.u32 4294901760, %v24085_v11 }
 0xc8a   : > { %20566 = vmatprep.subr.bf16.mxu1 %v26398_v3  ;;  %20506 = vmatprep.subr.bf16.mxu0 %v26398_v3 }
 0xc8d   : > { %20568 = vmatpush1.bf16.msra.mxu1 %v20567_v61  ;;  %20508 = vmatpush1.bf16.msra.mxu0 %v24126_v60  ;;  %v8201_v61 = vand.u32 4294901760, %v24053_v48 }
 0xc8e   : > { %20569 = vmatprep.subr.bf16.mxu1 %v26398_v3  ;;  %20509 = vmatprep.subr.bf16.mxu0 %v26398_v3 }
 0xc8f   : > { %v8202_v58 = vsub.f32 %v24053_v48, %v8201_v61  ;;  %v8224_v48 = vand.u32 4294901760, %v8223_v12 }
 0xc91   : > { %20571 = vmatpush1.bf16.msra.mxu1 %v20570_v35  ;;  %20511 = vmatpush1.bf16.msra.mxu0 %v24132_v28  ;;  %v8208_v35 = vand.u32 4294901760, %v24055_v9 }
 0xc92   : > { %20602 = vmatprep.subr.bf16.mxu1 %v26398_v3  ;;  %20512 = vmatprep.subr.bf16.mxu0 %v26398_v3  ;;  %v8188_v3 = vsub.f32 %v24040_v1, %v8187_v43  ;;  %v8203_v1 = vand.u32 4294901760, %v8202_v58  ;;  %v8229_v43 = vand.u32 4294901760, %v24083_v4  ;;  %v8237_v58 = vsub.f32 %v24085_v11, %v8236_v15 }
 0xc93   : > { %v24152_v52 = vpack.c.bf16 %v8208_v35, %v8201_v61  ;;  %v8209_v21 = vsub.f32 %v24055_v9, %v8208_v35  ;;  %v8243_v9 = vand.u32 4294901760, %v24088_v50  ;;  %v8250_v35 = vand.u32 4294901760, %v24090_v54 }
 0xc94   : > { %v8189_v18 = vand.u32 4294901760, %v8188_v3  ;;  %v8216_v3 = vsub.f32 %v24066_v38, %v8215_v23  ;;  %v24168_v27 = vpack.c.bf16 %v8236_v15, %v8229_v43  ;;  %v8238_v53 = vand.u32 4294901760, %v8237_v58 }
 0xc95   : > { %v8210_v34 = vand.u32 4294901760, %v8209_v21  ;;  %v24176_v21 = vpack.c.bf16 %v8250_v35, %v8243_v9  ;;  %v8257_v23 = vand.u32 4294901760, %v24100_v29  ;;  %v8278_v15 = vand.u32 4294901760, %v24115_v36 }
 0xc96   : > { %v24154_v56 = vpack.c.bf16 %v8196_v7, %v8189_v18  ;;  %v8217_v19 = vand.u32 4294901760, %v8216_v3  ;;  %v8230_v7 = vsub.f32 %v24083_v4, %v8229_v43  ;;  %v8271_v43 = vand.u32 4294901760, %v24113_v30 }
 0xc97   : > { %v24166_v18 = vpack.c.bf16 %v8210_v34, %v8203_v1  ;;  %v8244_v1 = vsub.f32 %v24088_v50, %v8243_v9  ;;  %v8251_v34 = vsub.f32 %v24090_v54, %v8250_v35  ;;  %v24184_v12 = vpack.c.bf16 %v8264_v22, %v8257_v23 }
 0xc98   : > { %v24170_v61 = vpack.c.bf16 %v8224_v48, %v8217_v19  ;;  %v8231_v38 = vand.u32 4294901760, %v8230_v7  ;;  %v8258_v48 = vsub.f32 %v24100_v29, %v8257_v23  ;;  %v8265_v7 = vsub.f32 %v24104_v20, %v8264_v22 }
 0xc99   : > { %v8245_v19 = vand.u32 4294901760, %v8244_v1  ;;  %v8252_v4 = vand.u32 4294901760, %v8251_v34  ;;  %v24192_v50 = vpack.c.bf16 %v8278_v15, %v8271_v43  ;;  %v8272_v35 = vsub.f32 %v24113_v30, %v8271_v43 }
 0xc9a   : > { %v24182_v3 = vpack.c.bf16 %v8238_v53, %v8231_v38  ;;  %v8259_v54 = vand.u32 4294901760, %v8258_v48  ;;  %v8266_v9 = vand.u32 4294901760, %v8265_v7  ;;  %v8279_v58 = vsub.f32 %v24115_v36, %v8278_v15 }
 0xc9b   : > { %v24186_v11 = vpack.c.bf16 %v8252_v4, %v8245_v19  ;;  %v8273_v53 = vand.u32 4294901760, %v8272_v35  ;;  %v7409_v19 = vld [vmem:[%s26560_s17] sm:$0x3] }
 0xc9c   : > { %v24196_v38 = vpack.c.bf16 %v8266_v9, %v8259_v54  ;;  %v8280_v1 = vand.u32 4294901760, %v8279_v58  ;;  %v7414_v4 = vrot.slane %v7409_v19, %v23653_v40  ;;  %v7418_v29 = vrot.slane %v7409_v19, %v23656_v37 }
 0xc9e   : > { %v24198_v34 = vpack.c.bf16 %v8280_v1, %v8273_v53 }
 0xd3f   : > { %v7988_v20 = vpop.f32.mrb[22].mxu1 }
 0xd40   : > { %v21484_v23 = vadd.f32 %v7988_v20, %v7414_v4  ;;  %v7990_v22 = vpop.f32.mrb[23].mxu1 }
 0xd41   : > { %v21485_v48 = vadd.f32 %v7990_v22, %v7418_v29  ;;  %v8145_v22 = vand.u32 4294901760, %v24005_v55 }
 0xd42   : > { %v7995_v7 = vmul.f32 0.044715, %v21484_v23  ;;  %v7993_v10 = vmul.f32 0.5, %v21484_v23 }
 0xd43   : > { %v7996_v32 = vmul.f32 0.044715, %v21485_v48  ;;  %v7994_v47 = vmul.f32 0.5, %v21485_v48 }
 0xd44   : > { %v7997_v30 = vmul.f32 %v21484_v23, %v7995_v7 }
 0xd45   : > { %v7998_v43 = vmul.f32 %v21485_v48, %v7996_v32  ;;  %v8152_v32 = vand.u32 4294901760, %v24007_v51 }
 0xd46   : > { %v7999_v36 = vmul.f32 %v21484_v23, %v7997_v30 }
 0xd47   : > { %v8000_v15 = vmul.f32 %v21485_v48, %v7998_v43  ;;  %v8146_v43 = vsub.f32 %v24005_v55, %v8145_v22 }
 0xd48   : > { %v8001_v54 = vadd.f32 %v21484_v23, %v7999_v36 }
 0xd49   : > { %v8002_v9 = vadd.f32 %v21485_v48, %v8000_v15  ;;  %v8153_v48 = vsub.f32 %v24007_v51, %v8152_v32  ;;  %v20603_v15 = vpack.c.bf16 %v8152_v32, %v8145_v22 }
 0xd4a   : > { %v8003_v35 = vmul.f32 0.7978846, %v8001_v54  ;;  %v8166_v54 = vand.u32 4294901760, %v24015_v57 }
 0xd4b   : > { %v8004_v58 = vmul.f32 0.7978846, %v8002_v9 }
 0xd4c   : > { %21939 = vtanh.f32 %v8003_v35  ;;  %v8147_v35 = vand.u32 4294901760, %v8146_v43  ;;  %v8167_v51 = vsub.f32 %v24015_v57, %v8166_v54  ;;  %v16945_v43 = vld [vmem:[%s22132_s30 + $0x28] sm:$0xff] }
 0xd4d   : > { %21941 = vtanh.f32 %v8004_v58  ;;  %v8154_v58 = vand.u32 4294901760, %v8153_v48  ;;  %v16946_v48 = vld [vmem:[%s22132_s30 + $0x30] sm:$0xff] }
 0xd4f   : > { %v20513_v22 = vpack.c.bf16 %v8154_v58, %v8147_v35  ;;  %v16941_v35 = vld [vmem:[%s22122_s19 + $0x40] sm:$0xff] }
 0xd56   : > { %v21940_v53 = vpop.eup %21939 }
 0xd57   : > { %v21942_v1 = vpop.eup %21941  ;;  %v8007_v19 = vadd.f32 1.0, %v21940_v53 }
 0xd58   : > { %v8008_v4 = vadd.f32 1.0, %v21942_v1 }
 0xd59   : > { %v8009_v29 = vmul.f32 %v8007_v19, %v7993_v10  ;;  %v8159_v10 = vand.u32 4294901760, %v24013_v16 }
 0xd5a   : > { %v8010_v20 = vmul.f32 %v8008_v4, %v7994_v47 }
 0xd5b   : > { %v24205_v7 = vand.u32 4294901760, %v8009_v29  ;;  %v8160_v53 = vsub.f32 %v24013_v16, %v8159_v10  ;;  %v20606_v19 = vpack.c.bf16 %v8166_v54, %v8159_v10  ;;  %v8168_v16 = vand.u32 4294901760, %v8167_v51 }
 0xd5c   : > { %v8040_v30 = vsel %vm8038_vm4, %v8010_v20, 0 }
 0xd5d   : > { %v24209_v36 = vand.u32 4294901760, %v8040_v30  ;;  %v24212_v23 = vsub.f32 %v8009_v29, %v24205_v7  ;;  %v26561_v29 = vmov 0.0|0.0   ;;  %v8161_v32 = vand.u32 4294901760, %v8160_v53 }
 0xd5f   : > { %v24216_v47 = vsub.f32 %v8040_v30, %v24209_v36  ;;  %v8134_v9 = vand.u32 4294901760, %v24212_v23  ;;  %v20516_v57 = vpack.c.bf16 %v8168_v16, %v8161_v32  ;;  %v24355_v16 = vld [vmem:[%s22122_s19 + $0x48] sm:$0xff] }
 0xd61   : > { %8420 = vmatprep.mubr.f32.mxu1 %v24216_v47  ;;  %v8128_v55 = vand.u32 4294901760, %v24216_v47  ;;  %v8135_v1 = vsub.f32 %v24212_v23, %v8134_v9 }
 0xd62   : > { %8423 = vmatmul.mubr.f32.vlgmr.msra.gmra.mrb[24].mxu1 %v24212_v23 }
 0xd63   : > { %20604 = vmatpush1.bf16.msra.mxu1 %v20603_v15  ;;  %8649 = vmatprep.mubr.f32.mxu1 %v24209_v36  ;;  %v8129_v4 = vsub.f32 %v24216_v47, %v8128_v55  ;;  %v8136_v30 = vand.u32 4294901760, %v8135_v1  ;;  %v9310_v15 = vand.u32 4294901760, %v16945_v43  ;;  %v9313_v47 = vand.u32 4294901760, %v16946_v48 }
 0xd64   : > { %20605 = vmatprep.subr.bf16.mxu1 %v26561_v29 }
 0xd65   : > { %v8130_v20 = vand.u32 4294901760, %v8129_v4  ;;  %v24336_v54 = vpack.c.bf16 %v9313_v47, %v9310_v15  ;;  %v24346_v51 = vsub.f32 %v16945_v43, %v9310_v15  ;;  %v24348_v1 = vsub.f32 %v16946_v48, %v9313_v47 }
 0xd67   : > { %20607 = vmatpush1.bf16.msra.mxu1 %v20606_v19  ;;  %8131 = vmatprep.mubr.f32.mxu0 %v8130_v20  ;;  %v16948_v19 = vld [vmem:[%s22132_s30 + $0x40] sm:$0xff]  ;;  %v8807_v20 = vand.u32 4294901760, %v16941_v35 }
 0xd68   : > { %8137 = vmatmul.mubr.f32.vlgmr.msra.gmra.mrb[36].mxu0 %v8136_v30  ;;  %20608 = vmatprep.subr.bf16.mxu1 %v26561_v29  ;;  %v9319_v32 = vand.u32 4294901760, %v16948_v19  ;;  %v24358_v30 = vld [vmem:[%s22132_s30 + $0x48] sm:$0xff] }
 0xd69   : > { %20514 = vmatpush1.bf16.msra.mxu0 %v20513_v22  ;;  %8307 = vmatprep.mubr.f32.mxu0 %v24209_v36 }
 0xd6a   : > { %20515 = vmatprep.subr.bf16.mxu0 %v26561_v29 }
 0xd6b   : > { %20610 = vmatpush1.bf16.msra.mxu1 %v24138_v42 }
 0xd6c   : > { %20611 = vmatprep.subr.bf16.mxu1 %v26561_v29 }
 0xd6d   : > { %20517 = vmatpush1.bf16.msra.mxu0 %v20516_v57 }
 0xd6e   : > { %20518 = vmatprep.subr.bf16.mxu0 %v26561_v29 }
 0xd6f   : > { %20613 = vmatpush1.bf16.msra.mxu1 %v24144_v8 }
 0xd70   : > { %20614 = vmatprep.subr.bf16.mxu1 %v26561_v29 }
 0xd71   : > { %20520 = vmatpush1.bf16.msra.mxu0 %v24150_v63 }
 0xd72   : > { %20521 = vmatprep.subr.bf16.mxu0 %v26561_v29 }
 0xd73   : > { %20616 = vmatpush1.bf16.msra.mxu1 %v24152_v52 }
 0xd74   : > { %20617 = vmatprep.subr.bf16.mxu1 %v26561_v29 }
 0xd75   : > { %20523 = vmatpush1.bf16.msra.mxu0 %v24154_v56 }
 0xd76   : > { %20524 = vmatprep.subr.bf16.mxu0 %v26561_v29 }
 0xd77   : > { %20619 = vmatpush1.bf16.msra.mxu1 %v24160_v49 }
 0xd78   : > { %20620 = vmatprep.subr.bf16.mxu1 %v26561_v29 }
 0xd79   : > { %20526 = vmatpush1.bf16.msra.mxu0 %v24166_v18 }
 0xd7a   : > { %20527 = vmatprep.subr.bf16.mxu0 %v26561_v29 }
 0xd7b   : > { %20622 = vmatpush1.bf16.msra.mxu1 %v24168_v27 }
 0xd7c   : > { %20623 = vmatprep.subr.bf16.mxu1 %v26561_v29 }
 0xd7d   : > { %20529 = vmatpush1.bf16.msra.mxu0 %v24170_v61 }
 0xd7e   : > { %20530 = vmatprep.subr.bf16.mxu0 %v26561_v29 }
 0xd7f   : > { %20625 = vmatpush1.bf16.msra.mxu1 %v24176_v21 }
 0xd80   : > { %20626 = vmatprep.subr.bf16.mxu1 %v26561_v29 }
 0xd81   : > { %20532 = vmatpush1.bf16.msra.mxu0 %v24182_v3 }
 0xd82   : > { %20533 = vmatprep.subr.bf16.mxu0 %v26561_v29 }
 0xd83   : > { %20628 = vmatpush1.bf16.msra.mxu1 %v24184_v12 }
 0xd84   : > { %20629 = vmatprep.subr.bf16.mxu1 %v26561_v29 }
 0xd85   : > { %20535 = vmatpush1.bf16.msra.mxu0 %v24186_v11 }
 0xd86   : > { %20536 = vmatprep.subr.bf16.mxu0 %v26561_v29 }
 0xd87   : > { %20631 = vmatpush1.bf16.msra.mxu1 %v24192_v50 }
 0xd88   : > { %20662 = vmatprep.subr.bf16.mxu1 %v26561_v29 }
 0xd89   : > { %20538 = vmatpush1.bf16.msra.mxu0 %v24196_v38 }
 0xd8a   : > { %8651 = vmatmul.mubr.f32.vlgmr.msra.gmra.mrb[26].mxu1 %v24205_v7  ;;  %20539 = vmatprep.subr.bf16.mxu0 %v26561_v29 }
 0xd8b   : > { %19286 = vmatprep.mubr.msk.f32.mxu1 %vm22060_vm0, %v26511_v26 }
 0xd8d   : > { %20541 = vmatpush1.bf16.msra.mxu0 %v24198_v34 }
 0xd8e   : > { %20572 = vmatprep.subr.bf16.mxu0 %v26561_v29 }
 0xd90   : > { %8309 = vmatmul.mubr.f32.vlgmr.msra.gmra.mrb[38].mxu0 %v24205_v7 }
 0xd91   : > { %20574 = vmatpush1.bf16.msra.mxu0 %v24026_v45  ;;  %8515 = vmatprep.mubr.f32.mxu0 %v8128_v55  ;;  %v16947_v55 = vld [vmem:[%s22132_s30 + $0x38] sm:$0xff] }
 0xd92   : > { %20575 = vmatprep.subr.bf16.mxu0 %v26561_v29  ;;  %v9316_v22 = vand.u32 4294901760, %v16947_v55 }
 0xd95   : > { %20577 = vmatpush1.bf16.msra.mxu0 %v24038_v5 }
 0xd96   : > { %20578 = vmatprep.subr.bf16.mxu0 %v26561_v29 }
 0xd99   : > { %20580 = vmatpush1.bf16.msra.mxu0 %v24051_v14 }
 0xd9a   : > { %20581 = vmatprep.subr.bf16.mxu0 %v26561_v29 }
 0xd9d   : > { %20583 = vmatpush1.bf16.msra.mxu0 %v24064_v24 }
 0xd9e   : > { %20584 = vmatprep.subr.bf16.mxu0 %v26561_v29 }
 0xda1   : > { %20586 = vmatpush1.bf16.msra.mxu0 %v24076_v46 }
 0xda2   : > { %20587 = vmatprep.subr.bf16.mxu0 %v26561_v29 }
 0xda5   : > { %20589 = vmatpush1.bf16.msra.mxu0 %v24097_v2 }
 0xda6   : > { %20590 = vmatprep.subr.bf16.mxu0 %v26561_v29 }
 0xda9   : > { %20592 = vmatpush1.bf16.msra.mxu0 %v24108_v41 }
 0xdaa   : > { %20593 = vmatprep.subr.bf16.mxu0 %v26561_v29 }
 0xdad   : > { %20595 = vmatpush1.bf16.msra.mxu0 %v24119_v44 }
 0xdae   : > { %20596 = vmatprep.subr.bf16.mxu0 %v26561_v29 }
 0xdb1   : > { %20598 = vmatpush1.bf16.msra.mxu0 %v24126_v60 }
 0xdb2   : > { %20599 = vmatprep.subr.bf16.mxu0 %v26561_v29 }
 0xdb5   : > { %20601 = vmatpush1.bf16.msra.mxu0 %v24132_v28 }
 0xdb6   : > { %20632 = vmatprep.subr.bf16.mxu0 %v26561_v29 }
 0xdb8   : > { %8519 = vmatmul.mubr.f32.vlgmr.msra.gmra.mrb[40].mxu0 %v8134_v9  ;;  %v16940_v9 = vld [vmem:[%s22122_s19 + $0x38] sm:$0xff] }
 0xdb9   : > { %20634 = vmatpush1.bf16.msra.mxu0 %v24026_v45  ;;  %8741 = vmatprep.mubr.f32.mxu0 %v24209_v36  ;;  %v8804_v4 = vand.u32 4294901760, %v16940_v9 }
 0xdba   : > { %20635 = vmatprep.subr.bf16.mxu0 %v26561_v29 }
 0xdbd   : > { %20637 = vmatpush1.bf16.msra.mxu0 %v24038_v5 }
 0xdbe   : > { %20638 = vmatprep.subr.bf16.mxu0 %v26561_v29 }
 0xdc1   : > { %20640 = vmatpush1.bf16.msra.mxu0 %v24051_v14 }
 0xdc2   : > { %20641 = vmatprep.subr.bf16.mxu0 %v26561_v29 }
 0xdc5   : > { %20643 = vmatpush1.bf16.msra.mxu0 %v24064_v24  ;;  %v16933_v24 = vld [vmem:[%s26562_s21] ss:$0 sm:$0xff] }
 0xdc6   : > { %20644 = vmatprep.subr.bf16.mxu0 %v26561_v29 }
 0xdc9   : > { %20646 = vmatpush1.bf16.msra.mxu0 %v24076_v46 }
 0xdca   : > { %20647 = vmatprep.subr.bf16.mxu0 %v26561_v29 }
 0xdcd   : > { %20649 = vmatpush1.bf16.msra.mxu0 %v24097_v2 }
 0xdce   : > { %20650 = vmatprep.subr.bf16.mxu0 %v26561_v29 }
 0xdd1   : > { %20652 = vmatpush1.bf16.msra.mxu0 %v24108_v41 }
 0xdd2   : > { %20653 = vmatprep.subr.bf16.mxu0 %v26561_v29 }
 0xdd5   : > { %20655 = vmatpush1.bf16.msra.mxu0 %v24119_v44 }
 0xdd6   : > { %20656 = vmatprep.subr.bf16.mxu0 %v26561_v29 }
 0xdd9   : > { %20658 = vmatpush1.bf16.msra.mxu0 %v24126_v60 }
 0xdda   : > { %20659 = vmatprep.subr.bf16.mxu0 %v26561_v29 }
 0xddd   : > { %20661 = vmatpush1.bf16.msra.mxu0 %v24132_v28 }
 0xdde   : > { %20698 = vmatprep.subr.bf16.mxu0 %v26561_v29 }
 0xde0   : > { %8743 = vmatmul.mubr.f32.vlgmr.msra.gmra.mrb[42].mxu0 %v24205_v7  ;;  %v16939_v7 = vld [vmem:[%s22122_s19 + $0x30] sm:$0xff] }
 0xde1   : > { %19364 = vmatprep.mubr.msk.f32.mxu0 %vm22060_vm0, %v26511_v26  ;;  %v8801_v23 = vand.u32 4294901760, %v16939_v7  ;;  %20700 = vmatpush3.bf16.msra.mxu0 %v24336_v54 }
 0xde2   : > { %20701 = vmatprep.subr.bf16.mxu0 %v26561_v29 }
 0xde3   : > { %v24344_v53 = vsub.f32 %v16939_v7, %v8801_v23 }
 0xe35   : > { %v8424_v49 = vpop.f32.mrb[24].mxu1 }
 0xe36   : > { %v8426_v52 = vpop.f32.mrb[25].mxu1 }
 0xe37   : > { %v24362_v52 = vpack.c.bf16 %v8807_v20, %v8804_v4 }
 0xe3b   : > { %v8138_v63 = vpop.f32.mrb[36].mxu0 }
 0xe3c   : > { %v8140_v45 = vpop.f32.mrb[37].mxu0  ;;  %v8139_v46 = vadd.f32 %v16933_v24, %v8138_v63  ;;  %v24364_v63 = vsub.f32 %v16940_v9, %v8804_v4  ;;  %v24372_v24 = vsub.f32 %v16948_v19, %v9319_v32  ;;  %v20711_v4 = vpack.c.bf16 %v24348_v1, %v24346_v51 }
 0xe3d   : > { %v24366_v45 = vsub.f32 %v16941_v35, %v8807_v20 }
 0xe3f   : > { %v20678_v20 = vpack.c.bf16 %v24366_v45, %v24364_v63 }
 0xe5d   : > { %v8652_v5 = vpop.f32.mrb[26].mxu1 }
 0xe5e   : > { %v8654_v14 = vpop.f32.mrb[27].mxu1 }
 0xe5f   : > { %v24370_v14 = vsub.f32 %v16947_v55, %v9316_v22 }
 0xe63   : > { %v8310_v2 = vpop.f32.mrb[38].mxu0 }
 0xe64   : > { %v8311_v41 = vadd.f32 %v8310_v2, %v8139_v46  ;;  %v8312_v44 = vpop.f32.mrb[39].mxu0  ;;  %v24375_v46 = vand.u32 4294901760, %v24355_v16  ;;  %v24378_v2 = vand.u32 4294901760, %v24358_v30 }
 0xe66   : > { %v8425_v60 = vadd.f32 %v8424_v49, %v8311_v41  ;;  %v8887_v49 = vand.u32 4294901760, %v24344_v53 }
 0xe68   : > { %v8888_v44 = vsub.f32 %v24344_v53, %v8887_v49 }
 0xe8b   : > { %v8520_v28 = vpop.f32.mrb[40].mxu0 }
 0xe8c   : > { %v8521_v42 = vadd.f32 %v8520_v28, %v8425_v60  ;;  %v8522_v8 = vpop.f32.mrb[41].mxu0  ;;  %v9392_v60 = vand.u32 4294901760, %v24346_v51  ;;  %v9399_v28 = vand.u32 4294901760, %v24348_v1 }
 0xe8d   : > { %v8889_v8 = vand.u32 4294901760, %v8888_v44 }
 0xe8e   : > { %v8653_v56 = vadd.f32 %v8652_v5, %v8521_v42  ;;  %v24368_v5 = vpack.c.bf16 %v9319_v32, %v9316_v22  ;;  %v20714_v22 = vpack.c.bf16 %v24372_v24, %v24370_v14 }
 0xe90   : > { %20703 = vmatpush3.bf16.msra.mxu0 %v24368_v5 }
 0xe91   : > { %19362 = vmatprep.subr.mxu0 %v26511_v26 }
 0xe94   : > { %19363 = vmatpush3.msra.mxu0 %v24378_v2 }
 0xe95   : > { %20704 = vmatprep.subr.bf16.mxu0 %v26561_v29 }
 0xeb3   : > { %v8744_v18 = vpop.f32.mrb[42].mxu0 }
 0xeb4   : > { %v8745_v27 = vadd.f32 %v8744_v18, %v8653_v56  ;;  %v8746_v61 = vpop.f32.mrb[43].mxu0  ;;  %v9393_v56 = vsub.f32 %v24346_v51, %v9392_v60  ;;  %v9400_v18 = vsub.f32 %v24348_v1, %v9399_v28  ;;  %v16936_v51 = vld [vmem:[%s26504_s8 + $0x1] ss:$0 sm:$0xff] }
 0xeb5   : > { %v8901_v61 = vand.u32 4294901760, %v24366_v45 }
 0xeb6   : > { %v24320_v21 = vadd.f32 %v8745_v27, %v23894_v39  ;;  %v16938_v39 = vld [vmem:[%s22122_s19 + $0x28] sm:$0xff]  ;;  %v8894_v27 = vand.u32 4294901760, %v24364_v63 }
 0xeb7   : > { %v8798_v36 = vand.u32 4294901760, %v16938_v39  ;;  %v8902_v7 = vsub.f32 %v24366_v45, %v8901_v61 }
 0xeb8   : > { %v8753_v3 = vsel %vm3329_vm1, %v24320_v21, 0.0  ;;  %v24414_v44 = vpack.c.bf16 %v8901_v61, %v8894_v27 }
 0xeb9   : > { %8754 = vadd.xlane.f32.xlu0 %v8753_v3  ;;  %v24334_v10 = vpack.c.bf16 %v8801_v23, %v8798_v36  ;;  %v24342_v58 = vsub.f32 %v16938_v39, %v8798_v36  ;;  %v9406_v3 = vand.u32 4294901760, %v24370_v14  ;;  %v8895_v39 = vsub.f32 %v24364_v63, %v8894_v27  ;;  %v16937_v63 = vld [vmem:[%s22117_s14 + $0x1] ss:$0 sm:$0xff] }
 0xeba   : > { %v8903_v15 = vand.u32 4294901760, %v8902_v7 }
 0xebb   : > { %20664 = vmatpush3.bf16.msra.mxu1 %v24334_v10  ;;  %v8880_v57 = vand.u32 4294901760, %v24342_v58  ;;  %v9407_v43 = vsub.f32 %v24370_v14, %v9406_v3  ;;  %v8896_v48 = vand.u32 4294901760, %v8895_v39  ;;  %v20675_v19 = vpack.c.bf16 %v24344_v53, %v24342_v58 }
 0xebc   : > { %20665 = vmatprep.subr.bf16.mxu1 %v26561_v29 }
 0xebd   : > { %v8881_v41 = vsub.f32 %v24342_v58, %v8880_v57  ;;  %v9408_v47 = vand.u32 4294901760, %v9407_v43  ;;  %v20672_v35 = vpack.c.bf16 %v8903_v15, %v8896_v48  ;;  %v24410_v32 = vpack.c.bf16 %v8887_v49, %v8880_v57 }
 0xebf   : > { %20667 = vmatpush3.bf16.msra.mxu1 %v24362_v52  ;;  %v8882_v42 = vand.u32 4294901760, %v8881_v41  ;;  %v24412_v41 = vpack.c.bf16 %v9399_v28, %v9392_v60  ;;  %v24433_v60 = vsub.f32 %v24358_v30, %v24378_v2 }
 0xec0   : > { %19284 = vmatprep.subr.mxu1 %v26511_v26 }
 0xec1   : > { %v9420_v61 = vand.u32 4294901760, %v24433_v60 }
 0xec3   : > { %19285 = vmatpush3.msra.mxu1 %v24375_v46  ;;  %v9421_v30 = vsub.f32 %v24433_v60, %v9420_v61 }
 0xec4   : > { %20668 = vmatprep.subr.bf16.mxu1 %v26561_v29 }
 0xf46   : > { %v8755_v12 = vpop.xlane.xlu0 %8754 }
 0xf47   : > { %v8756_v11 = vmul.f32 0.025, %v8755_v12  ;;  %v9413_v12 = vand.u32 4294901760, %v24372_v24 }
 0xf49   : > { %v24325_v50 = vsub.f32 %v24320_v21, %v8756_v11  ;;  %v20669_v11 = vpack.c.bf16 %v8889_v8, %v8882_v42  ;;  %v9414_v23 = vsub.f32 %v24372_v24, %v9413_v12  ;;  %v24416_v42 = vpack.c.bf16 %v9413_v12, %v9406_v3 }
 0xf4a   : > { %v24429_v24 = vsub.f32 %v24355_v16, %v24375_v46 }
 0xf4b   : > { %v8758_v38 = vmul.f32 %v24325_v50, %v24325_v50  ;;  %v9415_v9 = vand.u32 4294901760, %v9414_v23  ;;  %v16955_v23 = vld [vmem:[%s26503_s12 + $0x40] sm:$0xff] }
 0xf4c   : > { %v8908_v27 = vand.u32 4294901760, %v24429_v24  ;;  %v9831_v15 = vand.u32 4294901760, %v16955_v23 }
 0xf4d   : > { %v8759_v34 = vsel %vm3329_vm1, %v8758_v38, 0.0  ;;  %v9394_v38 = vand.u32 4294901760, %v9393_v56  ;;  %v20708_v55 = vpack.c.bf16 %v9415_v9, %v9408_v47 }
 0xf4e   : > { %8760 = vadd.xlane.f32.xlu1 %v8759_v34  ;;  %v9401_v34 = vand.u32 4294901760, %v9400_v18  ;;  %v8909_v16 = vsub.f32 %v24429_v24, %v8908_v27  ;;  %v24539_v9 = vsub.f32 %v16955_v23, %v9831_v15 }
 0xf50   : > { %v20705_v36 = vpack.c.bf16 %v9401_v34, %v9394_v38  ;;  %v8910_v12 = vand.u32 4294901760, %v8909_v16  ;;  %v16952_v38 = vld [vmem:[%s26503_s12 + $0x28] sm:$0xff]  ;;  %v16953_v34 = vld [vmem:[%s26503_s12 + $0x30] sm:$0xff] }
 0xf51   : > { %v9822_v39 = vand.u32 4294901760, %v16952_v38  ;;  %v9825_v7 = vand.u32 4294901760, %v16953_v34 }
 0xf53   : > { %v24520_v43 = vsub.f32 %v16952_v38, %v9822_v39  ;;  %v24526_v48 = vsub.f32 %v16953_v34, %v9825_v7 }
 0xfdb   : > { %v8761_v8 = vpop.xlane.xlu1 %8760 }
 0xfdc   : > { %v8762_v56 = vmul.f32 0.025, %v8761_v8 }
 0xfde   : > { %v8763_v58 = vadd.f32 1e-05, %v8762_v56 }
 0xfe0   : > { %21943 = vrsqrt.f32 %v8763_v58 }
 0xfea   : > { %v21944_v53 = vpop.eup %21943 }
 0xfeb   : > { %v8765_v1 = vmul.f32 %v21944_v53, %v24325_v50 }
 0xfed   : > { %v8772_v45 = vmul.f32 %v16936_v51, %v8765_v1 }
 0xfef   : > { %v8779_v18 = vadd.f32 %v16937_v63, %v8772_v45  ;;  %v20747_v45 = vpack.c.bf16 %v24526_v48, %v24520_v43 }
 0xff1   : > { %v8795_v57 = vsel %vm2818_vm15, %v8779_v18, 0 }
 0xff2   : > { %v24422_v49 = vand.u32 4294901760, %v8795_v57 }
 0xff4   : > { %v24425_v14 = vsub.f32 %v8795_v57, %v24422_v49 }
 0xff6   : > { %v24436_v50 = vand.u32 4294901760, %v24425_v14 }
 0xff8   : > { %v8870_v28 = vsub.f32 %v24425_v14, %v24436_v50 }
 0xffa   : > { %v24442_v3 = vand.u32 4294901760, %v8870_v28 }
 0xffc   : > { %19287 = vmatmul.mubr.f32.vlgmr.msra.gmra.mrb[28].mxu1 %v24442_v3  ;;  %19365 = vmatmul.mubr.f32.vlgmr.msra.gmra.mrb[44].mxu0 %v24442_v3 }
 0xffd   : > { %20670 = vmatpush3.bf16.msra.mxu1 %v20669_v11  ;;  %20706 = vmatpush3.bf16.msra.mxu0 %v20705_v36  ;;  %v9422_v11 = vand.u32 4294901760, %v9421_v30  ;;  %v16954_v36 = vld [vmem:[%s26503_s12 + $0x38] sm:$0xff] }
 0xffe   : > { %20671 = vmatprep.subr.bf16.mxu1 %v26561_v29  ;;  %20707 = vmatprep.subr.bf16.mxu0 %v26561_v29 }
 0xfff   : > { %19299 = vmatprep.mubr.msk.f32.mxu1 %vm22060_vm0, %v26511_v26  ;;  %19377 = vmatprep.mubr.msk.f32.mxu0 %vm22060_vm0, %v26511_v26 }
0x1001   : > { %20673 = vmatpush3.bf16.msra.mxu1 %v20672_v35  ;;  %20709 = vmatpush3.bf16.msra.mxu0 %v20708_v55  ;;  %v9911_v35 = vand.u32 4294901760, %v24526_v48  ;;  %v24542_v55 = vpack.c.bf16 %v9825_v7, %v9822_v39 }
0x1002   : > { %19297 = vmatprep.subr.mxu1 %v26511_v26  ;;  %19375 = vmatprep.subr.mxu0 %v26511_v26 }
0x1005   : > { %19298 = vmatpush3.msra.mxu1 %v8910_v12  ;;  %19376 = vmatpush3.msra.mxu0 %v9422_v11 }
0x1006   : > { %19300 = vmatmul.mubr.f32.vlgmr.msra.gmra.mrb[28].mxu1 %v24422_v49  ;;  %20674 = vmatprep.subr.bf16.mxu1 %v26561_v29 }
0x1007   : > { %19378 = vmatmul.mubr.f32.vlgmr.msra.gmra.mrb[44].mxu0 %v24422_v49  ;;  %20710 = vmatprep.subr.bf16.mxu0 %v26561_v29 }
0x1008   : > { %20676 = vmatpush3.bf16.msra.mxu1 %v20675_v19  ;;  %20712 = vmatpush3.bf16.msra.mxu0 %v20711_v4  ;;  %v9912_v19 = vsub.f32 %v24526_v48, %v9911_v35 }
0x1009   : > { %20677 = vmatprep.subr.bf16.mxu1 %v26561_v29  ;;  %20713 = vmatprep.subr.bf16.mxu0 %v26561_v29 }
0x100a   : > { %19312 = vmatprep.mubr.msk.f32.mxu1 %vm22060_vm0, %v26511_v26  ;;  %19390 = vmatprep.mubr.msk.f32.mxu0 %vm22060_vm0, %v26511_v26 }
0x100c   : > { %20679 = vmatpush3.bf16.msra.mxu1 %v20678_v20  ;;  %20715 = vmatpush3.bf16.msra.mxu0 %v20714_v22  ;;  %v9925_v20 = vand.u32 4294901760, %v24539_v9 }
0x100d   : > { %19310 = vmatprep.subr.mxu1 %v26511_v26  ;;  %19388 = vmatprep.subr.mxu0 %v26511_v26 }
0x1010   : > { %19311 = vmatpush3.msra.mxu1 %v24429_v24  ;;  %19389 = vmatpush3.msra.mxu0 %v24433_v60  ;;  %v16951_v24 = vld [vmem:[%s26505_s6 + $0x1] ss:$0 sm:$0xff] }
0x1011   : > { %19313 = vmatmul.mubr.f32.vlgmr.msra.gmra.mrb[28].mxu1 %v24425_v14  ;;  %20680 = vmatprep.subr.bf16.mxu1 %v26561_v29  ;;  %v16944_v60 = vld [vmem:[%s22127_s24 + $0x1] ss:$0 sm:$0xff] }
0x1012   : > { %19391 = vmatmul.mubr.f32.vlgmr.msra.gmra.mrb[44].mxu0 %v24425_v14  ;;  %20716 = vmatprep.subr.bf16.mxu0 %v26561_v29 }
0x1013   : > { %20682 = vmatpush3.bf16.msra.mxu1 %v24334_v10  ;;  %20718 = vmatpush3.bf16.msra.mxu0 %v24336_v54 }
0x1014   : > { %20683 = vmatprep.subr.bf16.mxu1 %v26561_v29  ;;  %20719 = vmatprep.subr.bf16.mxu0 %v26561_v29 }
0x1015   : > { %19325 = vmatprep.mubr.msk.f32.mxu1 %vm22060_vm0, %v26511_v26  ;;  %19403 = vmatprep.mubr.msk.f32.mxu0 %vm22060_vm0, %v26511_v26 }
0x1017   : > { %20685 = vmatpush3.bf16.msra.mxu1 %v24362_v52  ;;  %20721 = vmatpush3.bf16.msra.mxu0 %v24368_v5 }
0x1018   : > { %19323 = vmatprep.subr.mxu1 %v26511_v26  ;;  %19401 = vmatprep.subr.mxu0 %v26511_v26 }
0x101b   : > { %19324 = vmatpush3.msra.mxu1 %v24375_v46  ;;  %19402 = vmatpush3.msra.mxu0 %v24378_v2 }
0x101c   : > { %19326 = vmatmul.mubr.f32.vlgmr.msra.gmra.mrb[28].mxu1 %v24436_v50  ;;  %20686 = vmatprep.subr.bf16.mxu1 %v26561_v29 }
0x101d   : > { %19404 = vmatmul.mubr.f32.vlgmr.msra.gmra.mrb[44].mxu0 %v24436_v50  ;;  %20722 = vmatprep.subr.bf16.mxu0 %v26561_v29 }
0x101e   : > { %20688 = vmatpush3.bf16.msra.mxu1 %v24410_v32  ;;  %20724 = vmatpush3.bf16.msra.mxu0 %v24412_v41  ;;  %v9913_v41 = vand.u32 4294901760, %v9912_v19 }
0x101f   : > { %20689 = vmatprep.subr.bf16.mxu1 %v26561_v29  ;;  %20725 = vmatprep.subr.bf16.mxu0 %v26561_v29 }
0x1020   : > { %19338 = vmatprep.mubr.msk.f32.mxu1 %vm22060_vm0, %v26511_v26  ;;  %19416 = vmatprep.mubr.msk.f32.mxu0 %vm22060_vm0, %v26511_v26 }
0x1022   : > { %20691 = vmatpush3.bf16.msra.mxu1 %v24414_v44  ;;  %20727 = vmatpush3.bf16.msra.mxu0 %v24416_v42  ;;  %v9926_v42 = vsub.f32 %v24539_v9, %v9925_v20 }
0x1023   : > { %19336 = vmatprep.subr.mxu1 %v26511_v26  ;;  %19414 = vmatprep.subr.mxu0 %v26511_v26 }
0x1024   : > { %v9927_v58 = vand.u32 4294901760, %v9926_v42 }
0x1026   : > { %19337 = vmatpush3.msra.mxu1 %v8908_v27  ;;  %19415 = vmatpush3.msra.mxu0 %v9420_v61 }
0x1027   : > { %19339 = vmatmul.mubr.f32.vlgmr.msra.gmra.mrb[28].mxu1 %v24422_v49  ;;  %20692 = vmatprep.subr.bf16.mxu1 %v26561_v29 }
0x1028   : > { %19417 = vmatmul.mubr.f32.vlgmr.msra.gmra.mrb[44].mxu0 %v24422_v49  ;;  %20728 = vmatprep.subr.bf16.mxu0 %v26561_v29 }
0x1029   : > { %20694 = vmatpush3.bf16.msra.mxu1 %v24334_v10  ;;  %20730 = vmatpush3.bf16.msra.mxu0 %v24336_v54  ;;  %v9828_v10 = vand.u32 4294901760, %v16954_v36  ;;  %v9904_v54 = vand.u32 4294901760, %v24520_v43 }
0x102a   : > { %20695 = vmatprep.subr.bf16.mxu1 %v26561_v29  ;;  %20731 = vmatprep.subr.bf16.mxu0 %v26561_v29 }
0x102b   : > { %19351 = vmatprep.mubr.msk.f32.mxu1 %vm22060_vm0, %v26511_v26  ;;  %19429 = vmatprep.mubr.msk.f32.mxu0 %vm22060_vm0, %v26511_v26  ;;  %v24537_v47 = vsub.f32 %v16954_v36, %v9828_v10  ;;  %v20759_v57 = vpack.c.bf16 %v9911_v35, %v9904_v54 }
0x102d   : > { %20697 = vmatpush3.bf16.msra.mxu1 %v24362_v52  ;;  %20733 = vmatpush3.bf16.msra.mxu0 %v24368_v5  ;;  %v16956_v52 = vld [vmem:[%s26503_s12 + $0x48] sm:$0xff]  ;;  %v9905_v5 = vsub.f32 %v24520_v43, %v9904_v54  ;;  %v9918_v4 = vand.u32 4294901760, %v24537_v47  ;;  %v20750_v18 = vpack.c.bf16 %v24539_v9, %v24537_v47 }
0x102e   : > { %19349 = vmatprep.subr.mxu1 %v26511_v26  ;;  %19427 = vmatprep.subr.mxu0 %v26511_v26 }
0x102f   : > { %v9906_v22 = vand.u32 4294901760, %v9905_v5  ;;  %v9919_v44 = vsub.f32 %v24537_v47, %v9918_v4 }
0x1031   : > { %19350 = vmatpush3.msra.mxu1 %v24375_v46  ;;  %19428 = vmatpush3.msra.mxu0 %v24378_v2  ;;  %v24561_v46 = vpack.c.bf16 %v9831_v15, %v9828_v10  ;;  %v24563_v2 = vand.u32 4294901760, %v16956_v52  ;;  %v20741_v8 = vpack.c.bf16 %v9913_v41, %v9906_v22  ;;  %v9920_v56 = vand.u32 4294901760, %v9919_v44 }
0x1032   : > { %19352 = vmatmul.mubr.f32.vlgmr.msra.gmra.mrb[28].mxu1 %v24422_v49  ;;  %19430 = vmatmul.mubr.f32.vlgmr.msra.gmra.mrb[44].mxu0 %v24422_v49 }
0x1033   : > { %20734 = vmatprep.subr.bf16.mxu1 %v26561_v29  ;;  %19442 = vmatprep.mubr.msk.f32.mxu1 %vm22060_vm0, %v26511_v26  ;;  %v9931_v32 = vsub.f32 %v16956_v52, %v24563_v2  ;;  %v20744_v51 = vpack.c.bf16 %v9927_v58, %v9920_v56  ;;  %v26568_v56 = vld [vmem:[#allocation35_spill] sm:$0xff] }
0x1034   : > { %20736 = vmatpush3.bf16.msra.mxu1 %v24542_v55  ;;  %20770 = vmatprep.subr.bf16.mxu0 %v26561_v29 }
0x1035   : > { %20737 = vmatprep.subr.bf16.mxu1 %v26561_v29  ;;  %20772 = vmatpush3.bf16.msra.mxu0 %v23616_v31  ;;  %v9932_v53 = vand.u32 4294901760, %v9931_v32 }
0x1036   : > { %20773 = vmatprep.subr.bf16.mxu0 %v26561_v29  ;;  %19520 = vmatprep.mubr.msk.f32.mxu0 %vm22060_vm0, %v26511_v26 }
0x1037   : > { %v9933_v1 = vsub.f32 %v9931_v32, %v9932_v53 }
0x1038   : > { %20739 = vmatpush3.bf16.msra.mxu1 %v24561_v46 }
0x1039   : > { %19440 = vmatprep.subr.mxu1 %v26511_v26  ;;  %20775 = vmatpush3.bf16.msra.mxu0 %v23624_v6  ;;  %v9934_v63 = vand.u32 4294901760, %v9933_v1 }
0x103a   : > { %19518 = vmatprep.subr.mxu0 %v26511_v26 }
0x103c   : > { %19441 = vmatpush3.msra.mxu1 %v24563_v2 }
0x103d   : > { %19443 = vmatmul.mubr.f32.vlgmr.msra.gmra.mrb[30].mxu1 %v24442_v3  ;;  %20740 = vmatprep.subr.bf16.mxu1 %v26561_v29 }
0x103e   : > { %20742 = vmatpush3.bf16.msra.mxu1 %v20741_v8  ;;  %19455 = vmatprep.mubr.msk.f32.mxu1 %vm22060_vm0, %v26511_v26 }
0x103f   : > { %20743 = vmatprep.subr.bf16.mxu1 %v26561_v29  ;;  %19519 = vmatpush3.msra.mxu0 %v23631_v17 }
0x1040   : > { %20776 = vmatprep.subr.bf16.mxu0 %v26561_v29 }
0x1042   : > { %20745 = vmatpush3.bf16.msra.mxu1 %v20744_v51 }
0x1043   : > { %19453 = vmatprep.subr.mxu1 %v26511_v26 }
0x1046   : > { %19454 = vmatpush3.msra.mxu1 %v9934_v63  ;;  %v26569_v63 = vld [vmem:[#allocation36_spill] sm:$0xff] }
0x1047   : > { %19456 = vmatmul.mubr.f32.vlgmr.msra.gmra.mrb[30].mxu1 %v24422_v49  ;;  %20746 = vmatprep.subr.bf16.mxu1 %v26561_v29 }
0x1048   : > { %20748 = vmatpush3.bf16.msra.mxu1 %v20747_v45  ;;  %19468 = vmatprep.mubr.msk.f32.mxu1 %vm22060_vm0, %v26511_v26 }
0x1049   : > { %20749 = vmatprep.subr.bf16.mxu1 %v26561_v29 }
0x104c   : > { %20751 = vmatpush3.bf16.msra.mxu1 %v20750_v18 }
0x104d   : > { %19466 = vmatprep.subr.mxu1 %v26511_v26 }
0x1050   : > { %19467 = vmatpush3.msra.mxu1 %v9931_v32 }
0x1051   : > { %19469 = vmatmul.mubr.f32.vlgmr.msra.gmra.mrb[30].mxu1 %v24425_v14  ;;  %20752 = vmatprep.subr.bf16.mxu1 %v26561_v29  ;;  %v20762_v14 = vpack.c.bf16 %v9925_v20, %v9918_v4 }
0x1052   : > { %20754 = vmatpush3.bf16.msra.mxu1 %v24542_v55  ;;  %19481 = vmatprep.mubr.msk.f32.mxu1 %vm22060_vm0, %v26511_v26 }
0x1053   : > { %20755 = vmatprep.subr.bf16.mxu1 %v26561_v29 }
0x1056   : > { %20757 = vmatpush3.bf16.msra.mxu1 %v24561_v46 }
0x1057   : > { %19479 = vmatprep.subr.mxu1 %v26511_v26 }
0x105a   : > { %19480 = vmatpush3.msra.mxu1 %v24563_v2 }
0x105b   : > { %19482 = vmatmul.mubr.f32.vlgmr.msra.gmra.mrb[30].mxu1 %v24436_v50  ;;  %20758 = vmatprep.subr.bf16.mxu1 %v26561_v29 }
0x105c   : > { %20760 = vmatpush3.bf16.msra.mxu1 %v20759_v57  ;;  %19494 = vmatprep.mubr.msk.f32.mxu1 %vm22060_vm0, %v26511_v26 }
0x105d   : > { %20761 = vmatprep.subr.bf16.mxu1 %v26561_v29 }
0x1060   : > { %20763 = vmatpush3.bf16.msra.mxu1 %v20762_v14 }
0x1061   : > { %19492 = vmatprep.subr.mxu1 %v26511_v26 }
0x1064   : > { %19493 = vmatpush3.msra.mxu1 %v9932_v53 }
0x1065   : > { %19495 = vmatmul.mubr.f32.vlgmr.msra.gmra.mrb[30].mxu1 %v24422_v49  ;;  %20764 = vmatprep.subr.bf16.mxu1 %v26561_v29 }
0x1066   : > { %20766 = vmatpush3.bf16.msra.mxu1 %v24542_v55  ;;  %19507 = vmatprep.mubr.msk.f32.mxu1 %vm22060_vm0, %v26511_v26 }
0x1067   : > { %20767 = vmatprep.subr.bf16.mxu1 %v26561_v29 }
0x106a   : > { %20769 = vmatpush3.bf16.msra.mxu1 %v24561_v46 }
0x106b   : > { %19505 = vmatprep.subr.mxu1 %v26511_v26 }
0x106e   : > { %19506 = vmatpush3.msra.mxu1 %v24563_v2 }
0x106f   : > { %19508 = vmatmul.mubr.f32.vlgmr.msra.gmra.mrb[30].mxu1 %v24422_v49  ;;  %20806 = vmatprep.subr.bf16.mxu1 %v26561_v29 }
0x1070   : > { %20808 = vmatpush3.bf16.msra.mxu1 %v23616_v31  ;;  %19598 = vmatprep.mubr.msk.f32.mxu1 %vm22060_vm0, %v26511_v26 }
0x1071   : > { %20809 = vmatprep.subr.bf16.mxu1 %v26561_v29 }
0x1074   : > { %20811 = vmatpush3.bf16.msra.mxu1 %v23624_v6 }
0x1075   : > { %19596 = vmatprep.subr.mxu1 %v26511_v26 }
0x1078   : > { %19597 = vmatpush3.msra.mxu1 %v23631_v17 }
0x1079   : > { %20812 = vmatprep.subr.bf16.mxu1 %v26561_v29 }
0x1105   : > { %v9291_v49 = vpop.f32.mrb[28].mxu1  ;;  %v9803_v50 = vpop.f32.mrb[44].mxu0 }
0x1106   : > { %v21487_v28 = vadd.f32 %v16951_v24, %v9803_v50  ;;  %v19353_v27 = vpop.f32.mrb[29].mxu1  ;;  %v19431_v61 = vpop.f32.mrb[45].mxu0  ;;  %v21486_v3 = vadd.f32 %v16944_v60, %v9291_v49  ;;  %v16959_v60 = vld [vmem:[%s26554_s23 + $0x28] sm:$0xff]  ;;  %v16960_v49 = vld [vmem:[%s26554_s23 + $0x30] sm:$0xff] }
0x1107   : > { %v12297_v50 = vand.u32 4294901760, %v16959_v60 }
0x1108   : > { %v10322_v16 = vrot.slane %v21487_v28, %v23653_v40  ;;  %v10828_v30 = vrot.slane %v21487_v28, %v23656_v37  ;;  %v12300_v28 = vand.u32 4294901760, %v16960_v49 }
0x1109   : > { %v12378_v27 = vsub.f32 %v16959_v60, %v12297_v50 }
0x110a   : > { %v10323_v12 = vmul.f32 %v21486_v3, %v10322_v16  ;;  %v10829_v11 = vmul.f32 %v21486_v3, %v10828_v30  ;;  %v12385_v61 = vsub.f32 %v16960_v49, %v12300_v28  ;;  %v16961_v3 = vld [vmem:[%s26554_s23 + $0x38] sm:$0xff]  ;;  %v16962_v16 = vld [vmem:[%s26554_s23 + $0x40] sm:$0xff] }
0x110c   : > { %v10325_v38 = vsel %vm2818_vm15, %v10323_v12, 0  ;;  %v10831_v34 = vsel %vm2818_vm15, %v10829_v11, 0  ;;  %v20891_v30 = vpack.c.bf16 %v12385_v61, %v12378_v27  ;;  %v12303_v12 = vand.u32 4294901760, %v16961_v3 }
0x110d   : > { %v24641_v39 = vand.u32 4294901760, %v10325_v38  ;;  %v24643_v7 = vand.u32 4294901760, %v10831_v34  ;;  %v12306_v11 = vand.u32 4294901760, %v16962_v16 }
0x110f   : > { %v10398_v43 = vsub.f32 %v10325_v38, %v24641_v39  ;;  %v10904_v36 = vsub.f32 %v10831_v34, %v24643_v7  ;;  %v12392_v38 = vsub.f32 %v16961_v3, %v12303_v12  ;;  %v12399_v34 = vsub.f32 %v16962_v16, %v12306_v11 }
0x1111   : > { %v10399_v23 = vand.u32 4294901760, %v10398_v43  ;;  %v10905_v48 = vand.u32 4294901760, %v10904_v36 }
0x1113   : > { %v10400_v10 = vsub.f32 %v10398_v43, %v10399_v23  ;;  %v10906_v15 = vsub.f32 %v10904_v36, %v10905_v48 }
0x1115   : > { %v10401_v54 = vand.u32 4294901760, %v10400_v10  ;;  %v10907_v47 = vand.u32 4294901760, %v10906_v15  ;;  %v12386_v10 = vand.u32 4294901760, %v12385_v61  ;;  %v24803_v15 = vpack.c.bf16 %v12306_v11, %v12303_v12 }
0x1117   : > { %19521 = vmatmul.mubr.f32.vlgmr.msra.gmra.mrb[46].mxu0 %v10401_v54  ;;  %19599 = vmatmul.mubr.f32.vlgmr.msra.gmra.mrb[32].mxu1 %v10907_v47  ;;  %v12393_v47 = vand.u32 4294901760, %v12392_v38 }
0x1118   : > { %20778 = vmatpush3.bf16.msra.mxu0 %v23635_v13  ;;  %20814 = vmatpush3.bf16.msra.mxu1 %v23635_v13  ;;  %v26563_v13 = vld [vmem:[#allocation27_spill] sm:$0xff] }
0x1119   : > { %20779 = vmatprep.subr.bf16.mxu0 %v26561_v29  ;;  %20815 = vmatprep.subr.bf16.mxu1 %v26561_v29 }
0x111a   : > { %19533 = vmatprep.mubr.msk.f32.mxu0 %vm22060_vm0, %v26511_v26  ;;  %19611 = vmatprep.mubr.msk.f32.mxu1 %vm22060_vm0, %v26511_v26 }
0x111c   : > { %20781 = vmatpush3.bf16.msra.mxu0 %v23639_v25  ;;  %20817 = vmatpush3.bf16.msra.mxu1 %v23639_v25  ;;  %v26564_v25 = vld [vmem:[#allocation28_spill] sm:$0xff] }
0x111d   : > { %19531 = vmatprep.subr.mxu0 %v26511_v26  ;;  %19609 = vmatprep.subr.mxu1 %v26511_v26 }
0x1120   : > { %19532 = vmatpush3.msra.mxu0 %v23694_v0  ;;  %19610 = vmatpush3.msra.mxu1 %v23694_v0 }
0x1121   : > { %19534 = vmatmul.mubr.f32.vlgmr.msra.gmra.mrb[46].mxu0 %v24641_v39  ;;  %20782 = vmatprep.subr.bf16.mxu0 %v26561_v29 }
0x1122   : > { %19612 = vmatmul.mubr.f32.vlgmr.msra.gmra.mrb[32].mxu1 %v24643_v7  ;;  %20818 = vmatprep.subr.bf16.mxu1 %v26561_v29 }
0x1123   : > { %20784 = vmatpush3.bf16.msra.mxu0 %v23641_v33  ;;  %20820 = vmatpush3.bf16.msra.mxu1 %v23641_v33  ;;  %v26565_v33 = vld [vmem:[#allocation32_spill] sm:$0xff] }
0x1124   : > { %20785 = vmatprep.subr.bf16.mxu0 %v26561_v29  ;;  %20821 = vmatprep.subr.bf16.mxu1 %v26561_v29 }
0x1125   : > { %19546 = vmatprep.mubr.msk.f32.mxu0 %vm22060_vm0, %v26511_v26  ;;  %19624 = vmatprep.mubr.msk.f32.mxu1 %vm22060_vm0, %v26511_v26 }
0x1127   : > { %20787 = vmatpush3.bf16.msra.mxu0 %v23643_v59  ;;  %20823 = vmatpush3.bf16.msra.mxu1 %v23643_v59 }
0x1128   : > { %19544 = vmatprep.subr.mxu0 %v26511_v26  ;;  %19622 = vmatprep.subr.mxu1 %v26511_v26 }
0x112b   : > { %19545 = vmatpush3.msra.mxu0 %v23673_v62  ;;  %19623 = vmatpush3.msra.mxu1 %v23673_v62 }
0x112c   : > { %19547 = vmatmul.mubr.f32.vlgmr.msra.gmra.mrb[46].mxu0 %v10398_v43  ;;  %20788 = vmatprep.subr.bf16.mxu0 %v26561_v29  ;;  %v24795_v43 = vpack.c.bf16 %v12300_v28, %v12297_v50 }
0x112d   : > { %19625 = vmatmul.mubr.f32.vlgmr.msra.gmra.mrb[32].mxu1 %v10904_v36  ;;  %20824 = vmatprep.subr.bf16.mxu1 %v26561_v29 }
0x112e   : > { %20790 = vmatpush3.bf16.msra.mxu0 %v23616_v31  ;;  %20826 = vmatpush3.bf16.msra.mxu1 %v23616_v31 }
0x112f   : > { %20791 = vmatprep.subr.bf16.mxu0 %v26561_v29  ;;  %20827 = vmatprep.subr.bf16.mxu1 %v26561_v29 }
0x1130   : > { %19559 = vmatprep.mubr.msk.f32.mxu0 %vm22060_vm0, %v26511_v26  ;;  %19637 = vmatprep.mubr.msk.f32.mxu1 %vm22060_vm0, %v26511_v26 }
0x1132   : > { %20793 = vmatpush3.bf16.msra.mxu0 %v23624_v6  ;;  %20829 = vmatpush3.bf16.msra.mxu1 %v23624_v6 }
0x1133   : > { %19557 = vmatprep.subr.mxu0 %v26511_v26  ;;  %19635 = vmatprep.subr.mxu1 %v26511_v26 }
0x1136   : > { %19558 = vmatpush3.msra.mxu0 %v23631_v17  ;;  %19636 = vmatpush3.msra.mxu1 %v23631_v17 }
0x1137   : > { %19560 = vmatmul.mubr.f32.vlgmr.msra.gmra.mrb[46].mxu0 %v10399_v23  ;;  %20794 = vmatprep.subr.bf16.mxu0 %v26561_v29 }
0x1138   : > { %19638 = vmatmul.mubr.f32.vlgmr.msra.gmra.mrb[32].mxu1 %v10905_v48  ;;  %20830 = vmatprep.subr.bf16.mxu1 %v26561_v29  ;;  %v12379_v48 = vand.u32 4294901760, %v12378_v27 }
0x1139   : > { %20796 = vmatpush3.bf16.msra.mxu0 %v26563_v13  ;;  %20832 = vmatpush3.bf16.msra.mxu1 %v26563_v13  ;;  %v12400_v13 = vand.u32 4294901760, %v12399_v34 }
0x113a   : > { %20797 = vmatprep.subr.bf16.mxu0 %v26561_v29  ;;  %20833 = vmatprep.subr.bf16.mxu1 %v26561_v29  ;;  %v20903_v54 = vpack.c.bf16 %v12386_v10, %v12379_v48 }
0x113b   : > { %19572 = vmatprep.mubr.msk.f32.mxu0 %vm22060_vm0, %v26511_v26  ;;  %19650 = vmatprep.mubr.msk.f32.mxu1 %vm22060_vm0, %v26511_v26 }
0x113d   : > { %20799 = vmatpush3.bf16.msra.mxu0 %v26564_v25  ;;  %20835 = vmatpush3.bf16.msra.mxu1 %v26564_v25  ;;  %v12380_v25 = vsub.f32 %v12378_v27, %v12379_v48 }
0x113e   : > { %19570 = vmatprep.subr.mxu0 %v26511_v26  ;;  %19648 = vmatprep.subr.mxu1 %v26511_v26 }
0x1141   : > { %19571 = vmatpush3.msra.mxu0 %v26565_v33  ;;  %19649 = vmatpush3.msra.mxu1 %v26565_v33  ;;  %v12387_v33 = vsub.f32 %v12385_v61, %v12386_v10  ;;  %v16965_v61 = vld [vmem:[%s26555_s28 + $0x1] ss:$0 sm:$0xff] }
0x1142   : > { %19573 = vmatmul.mubr.f32.vlgmr.msra.gmra.mrb[46].mxu0 %v24641_v39  ;;  %20800 = vmatprep.subr.bf16.mxu0 %v26561_v29  ;;  %v24713_v59 = vpop.f32.mrb[30].mxu1 }
0x1143   : > { %19651 = vmatmul.mubr.f32.vlgmr.msra.gmra.mrb[32].mxu1 %v24643_v7  ;;  %20836 = vmatprep.subr.bf16.mxu1 %v26561_v29  ;;  %v19509_v62 = vpop.f32.mrb[31].mxu1 }
0x1144   : > { %20802 = vmatpush3.bf16.msra.mxu0 %v23616_v31  ;;  %20838 = vmatpush3.bf16.msra.mxu1 %v23616_v31  ;;  %v26566_v31 = vld [vmem:[#allocation34_spill] sm:$0xff]  ;;  %v20906_v62 = vpack.c.bf16 %v12400_v13, %v12393_v47 }
0x1145   : > { %20803 = vmatprep.subr.bf16.mxu0 %v26561_v29  ;;  %20839 = vmatprep.subr.bf16.mxu1 %v26561_v29 }
0x1146   : > { %19585 = vmatprep.mubr.msk.f32.mxu0 %vm22060_vm0, %v26511_v26  ;;  %19663 = vmatprep.mubr.msk.f32.mxu1 %vm22060_vm0, %v26511_v26 }
0x1148   : > { %20805 = vmatpush3.bf16.msra.mxu0 %v23624_v6  ;;  %20841 = vmatpush3.bf16.msra.mxu1 %v23624_v6  ;;  %v26567_v6 = vld [vmem:[#allocation33_spill] sm:$0xff] }
0x1149   : > { %19583 = vmatprep.subr.mxu0 %v26511_v26  ;;  %19661 = vmatprep.subr.mxu1 %v26511_v26 }
0x114c   : > { %19584 = vmatpush3.msra.mxu0 %v23631_v17  ;;  %19662 = vmatpush3.msra.mxu1 %v23631_v17 }
0x114d   : > { %19586 = vmatmul.mubr.f32.vlgmr.msra.gmra.mrb[46].mxu0 %v24641_v39  ;;  %19664 = vmatmul.mubr.f32.vlgmr.msra.gmra.mrb[32].mxu1 %v24643_v7  ;;  %v20894_v39 = vpack.c.bf16 %v12399_v34, %v12392_v38  ;;  %v16963_v7 = vld [vmem:[%s26554_s23 + $0x48] sm:$0xff] }
0x114e   : > { %20845 = vmatprep.subr.bf16.mxu0 %v26561_v29  ;;  %19677 = vmatprep.mubr.msk.f32.mxu0 %vm22060_vm0, %v26511_v26  ;;  %v24797_v36 = vand.u32 4294901760, %v16963_v7 }
0x114f   : > { %20847 = vmatpush3.bf16.msra.mxu0 %v26566_v31  ;;  %20842 = vmatprep.subr.bf16.mxu1 %v26561_v29 }
0x1150   : > { %20848 = vmatprep.subr.bf16.mxu0 %v26561_v29  ;;  %20844 = vmatpush3.bf16.msra.mxu1 %v26567_v6  ;;  %v12406_v23 = vsub.f32 %v16963_v7, %v24797_v36 }
0x1151   : > { %19670 = vmatprep.mubr.msk.f32.mxu1 %vm22060_vm0, %v26511_v26  ;;  %20878 = vmatprep.subr.bf16.mxu1 %v26561_v29 }
0x1220   : > { %v10821_v17 = vpop.f32.mrb[46].mxu0  ;;  %v11327_v0 = vpop.f32.mrb[32].mxu1 }
0x1221   : > { %v11331_v9 = vmax.f32 %v10821_v17, %v11327_v0  ;;  %v19587_v35 = vpop.f32.mrb[47].mxu0  ;;  %v19665_v55 = vpop.f32.mrb[33].mxu1 }
0x1223   : > { %v11332_v52 = vsub.f32 %v10821_v17, %v11331_v9  ;;  %v11335_v5 = vsub.f32 %v11327_v0, %v11331_v9  ;;  %v12394_v0 = vsub.f32 %v12392_v38, %v12393_v47  ;;  %v12401_v9 = vsub.f32 %v12399_v34, %v12400_v13 }
0x1225   : > { %v11333_v19 = vmul.f32 1.442695, %v11332_v52  ;;  %v11336_v4 = vmul.f32 1.442695, %v11335_v5  ;;  %v12395_v35 = vand.u32 4294901760, %v12394_v0  ;;  %v12402_v55 = vand.u32 4294901760, %v12401_v9 }
0x1226   : > { %v16975_v0 = vld [vmem:[%s26556_s5 + $0x78] sm:$0xff] }
0x1227   : > { %21945 = vpow2.f32 %v11333_v19  ;;  %v20888_v52 = vpack.c.bf16 %v12402_v55, %v12395_v35  ;;  %v16977_v55 = vld [vmem:[%s26556_s5 + $0x88] sm:$0xff] }
0x1228   : > { %21947 = vpow2.f32 %v11336_v4  ;;  %v16958_v4 = vld [vmem:[%s26545_s1 + $0x1] ss:$0 sm:$0xff]  ;;  %s26570_s1 = sld [smem:[#allocation23_spill]] }
0x1231   : > { %v21946_v20 = vpop.eup %21945 }
0x1232   : > { %v21948_v46 = vpop.eup %21947 }
0x1233   : > { %v11338_v2 = vadd.f32 %v21948_v46, %v21946_v20 }
0x1235   : > { %21949 = vrcp.f32 %v11338_v2 }
0x123f   : > { %v21950_v22 = vpop.eup %21949 }
0x1240   : > { %v11810_v32 = vmul.f32 %v21950_v22, %v21948_v46  ;;  %v11341_v41 = vmul.f32 %v21950_v22, %v21946_v20  ;;  %v21488_v20 = vadd.f32 %v16958_v4, %v24713_v59 }
0x1242   : > { %v11343_v44 = vsel %vm5914_vm3, %v11341_v41, 0  ;;  %v11812_v1 = vsel %vm5914_vm3, %v11810_v32, 0  ;;  %v11807_v2 = vrot.slane %v21488_v20, %v23653_v40 }
0x1243   : > { %v11412_v42 = vand.u32 4294901760, %v11343_v44  ;;  %v11881_v45 = vand.u32 4294901760, %v11812_v1 }
0x1245   : > { %v11413_v8 = vsub.f32 %v11343_v44, %v11412_v42  ;;  %19678 = vmatmul.mubr.f32.vlgmr.msra.gmra.mrb[48].mxu0 %v11412_v42  ;;  %v11882_v18 = vsub.f32 %v11812_v1, %v11881_v45  ;;  %v12276_v44 = vrot.slane %v21488_v20, %v23656_v37 }
0x1246   : > { %20850 = vmatpush3.bf16.msra.mxu0 %v26568_v56  ;;  %19684 = vmatprep.mubr.msk.f32.mxu0 %vm22060_vm0, %v26511_v26 }
0x1247   : > { %v11414_v58 = vand.u32 4294901760, %v11413_v8  ;;  %20851 = vmatprep.subr.bf16.mxu0 %v26561_v29  ;;  %v11883_v57 = vand.u32 4294901760, %v11882_v18 }
0x1249   : > { %v11415_v53 = vsub.f32 %v11413_v8, %v11414_v58  ;;  %v11884_v14 = vsub.f32 %v11882_v18, %v11883_v57 }
0x124b   : > { %v11416_v51 = vand.u32 4294901760, %v11415_v53  ;;  %v11885_v24 = vand.u32 4294901760, %v11884_v14 }
0x124d   : > { %19671 = vmatmul.mubr.f32.vlgmr.msra.gmra.mrb[34].mxu1 %v11416_v51  ;;  %19685 = vmatmul.mubr.f32.vlgmr.msra.gmra.mrb[48].mxu0 %v11413_v8 }
0x124e   : > { %20853 = vmatpush3.bf16.msra.mxu0 %v26567_v6  ;;  %19691 = vmatprep.mubr.msk.f32.mxu0 %vm22060_vm0, %v26511_v26 }
0x124f   : > { %20854 = vmatprep.subr.bf16.mxu0 %v26561_v29  ;;  %19760 = vmatprep.mubr.msk.f32.mxu1 %vm22060_vm0, %v26511_v26 }
0x1250   : > { %20880 = vmatpush3.bf16.msra.mxu1 %v24795_v43 }
0x1251   : > { %20881 = vmatprep.subr.bf16.mxu1 %v26561_v29 }
0x1254   : > { %20883 = vmatpush3.bf16.msra.mxu1 %v24803_v15 }
0x1255   : > { %19692 = vmatmul.mubr.f32.vlgmr.msra.gmra.mrb[48].mxu0 %v11414_v58  ;;  %19758 = vmatprep.subr.mxu1 %v26511_v26 }
0x1256   : > { %20856 = vmatpush3.bf16.msra.mxu0 %v26569_v63  ;;  %19698 = vmatprep.mubr.msk.f32.mxu0 %vm22060_vm0, %v26511_v26 }
0x1257   : > { %20857 = vmatprep.subr.bf16.mxu0 %v26561_v29 }
0x1258   : > { %19759 = vmatpush3.msra.mxu1 %v24797_v36 }
0x1259   : > { %20884 = vmatprep.subr.bf16.mxu1 %v26561_v29 }
0x125d   : > { %19699 = vmatmul.mubr.f32.vlgmr.msra.gmra.mrb[48].mxu0 %v11412_v42 }
0x125e   : > { %20859 = vmatpush3.bf16.msra.mxu0 %v26567_v6  ;;  %19705 = vmatprep.mubr.msk.f32.mxu0 %vm22060_vm0, %v26511_v26 }
0x125f   : > { %20860 = vmatprep.subr.bf16.mxu0 %v26561_v29 }
0x1265   : > { %19706 = vmatmul.mubr.f32.vlgmr.msra.gmra.mrb[48].mxu0 %v11412_v42 }
0x1266   : > { %20862 = vmatpush3.bf16.msra.mxu0 %v26567_v6  ;;  %19712 = vmatprep.mubr.msk.f32.mxu0 %vm22060_vm0, %v26511_v26 }
0x1267   : > { %20863 = vmatprep.subr.bf16.mxu0 %v26561_v29 }
0x1269   : > { %19713 = vmatmul.mubr.f32.vlgmr.msra.gmra.mrb[50].mxu0 %v11885_v24 }
0x126a   : > { %20865 = vmatpush3.bf16.msra.mxu0 %v26566_v31  ;;  %19719 = vmatprep.mubr.msk.f32.mxu0 %vm22060_vm0, %v26511_v26  ;;  %v12381_v31 = vand.u32 4294901760, %v12380_v25 }
0x126b   : > { %20866 = vmatprep.subr.bf16.mxu0 %v26561_v29 }
0x1271   : > { %19720 = vmatmul.mubr.f32.vlgmr.msra.gmra.mrb[50].mxu0 %v11881_v45 }
0x1272   : > { %20868 = vmatpush3.bf16.msra.mxu0 %v26568_v56  ;;  %19726 = vmatprep.mubr.msk.f32.mxu0 %vm22060_vm0, %v26511_v26 }
0x1273   : > { %20869 = vmatprep.subr.bf16.mxu0 %v26561_v29 }
0x1279   : > { %19727 = vmatmul.mubr.f32.vlgmr.msra.gmra.mrb[50].mxu0 %v11882_v18  ;;  %v12407_v18 = vand.u32 4294901760, %v12406_v23 }
0x127a   : > { %20871 = vmatpush3.bf16.msra.mxu0 %v26567_v6  ;;  %19733 = vmatprep.mubr.msk.f32.mxu0 %vm22060_vm0, %v26511_v26 }
0x127b   : > { %20872 = vmatprep.subr.bf16.mxu0 %v26561_v29 }
0x1281   : > { %19734 = vmatmul.mubr.f32.vlgmr.msra.gmra.mrb[50].mxu0 %v11883_v57  ;;  %v12408_v57 = vsub.f32 %v12406_v23, %v12407_v18 }
0x1282   : > { %20874 = vmatpush3.bf16.msra.mxu0 %v26569_v63  ;;  %19740 = vmatprep.mubr.msk.f32.mxu0 %vm22060_vm0, %v26511_v26 }
0x1283   : > { %20875 = vmatprep.subr.bf16.mxu0 %v26561_v29  ;;  %v12409_v14 = vand.u32 4294901760, %v12408_v57  ;;  %v16978_v57 = vld [vmem:[%s26556_s5 + $0x90] sm:$0xff] }
0x1289   : > { %19741 = vmatmul.mubr.f32.vlgmr.msra.gmra.mrb[50].mxu0 %v11881_v45 }
0x128a   : > { %20877 = vmatpush3.bf16.msra.mxu0 %v26567_v6  ;;  %19747 = vmatprep.mubr.msk.f32.mxu0 %vm22060_vm0, %v26511_v26  ;;  %v12388_v6 = vand.u32 4294901760, %v12387_v33  ;;  %v16973_v33 = vld [vmem:[%s26556_s5 + $0x68] sm:$0xff] }
0x128b   : > { %20890 = vmatprep.subr.bf16.mxu0 %v26561_v29 }
0x128c   : > { %v20885_v17 = vpack.c.bf16 %v12388_v6, %v12381_v31  ;;  %v12857_v31 = vand.u32 4294901760, %v16973_v33  ;;  %v16970_v6 = vld [vmem:[%s26556_s5 + $0x50] sm:$0xff] }
0x128d   : > { %v12855_v9 = vand.u32 4294901760, %v16970_v6 }
0x1291   : > { %19748 = vmatmul.mubr.f32.vlgmr.msra.gmra.mrb[50].mxu0 %v11881_v45 }
0x1292   : > { %19786 = vmatprep.mubr.msk.f32.mxu0 %vm22060_vm0, %v26511_v26  ;;  %20892 = vmatpush3.bf16.msra.mxu0 %v20891_v30 }
0x1293   : > { %20893 = vmatprep.subr.bf16.mxu0 %v26561_v29 }
0x1296   : > { %20895 = vmatpush3.bf16.msra.mxu0 %v20894_v39 }
0x1297   : > { %19784 = vmatprep.subr.mxu0 %v26511_v26 }
0x129a   : > { %19785 = vmatpush3.msra.mxu0 %v12406_v23 }
0x129b   : > { %20902 = vmatprep.subr.bf16.mxu0 %v26561_v29 }
0x1320   : > { %v11418_v5 = vpop.f32.mrb[34].mxu1 }
0x1321   : > { %v19672_v19 = vpop.f32.mrb[35].mxu1 }
0x1322   : > { %v16976_v19 = vld [vmem:[%s26556_s5 + $0x80] sm:$0xff] }
0x1338   : > { %v11800_v46 = vpop.f32.mrb[48].mxu0 }
0x1339   : > { %v21489_v22 = vadd.f32 %v11800_v46, %v11418_v5  ;;  %v19707_v32 = vpop.f32.mrb[49].mxu0  ;;  %v16974_v5 = vld [vmem:[%s26556_s5 + $0x70] sm:$0xff]  ;;  %v24865_v46 = vsub.f32 %v16973_v33, %v12857_v31 }
0x133a   : > { %v24869_v32 = vsub.f32 %v16970_v6, %v12855_v9 }
0x133b   : > { %v11808_v41 = vmul.f32 %v21489_v22, %v11807_v2  ;;  %v12865_v2 = vand.u32 4294901760, %v16977_v55 }
0x1364   : > { %v12269_v42 = vpop.f32.mrb[50].mxu0 }
0x1365   : > { %v12277_v8 = vmul.f32 %v12276_v44, %v12269_v42  ;;  %v19749_v56 = vpop.f32.mrb[51].mxu0  ;;  %v24876_v42 = vld [vmem:[%s26556_s5 + $0x98] sm:$0xff] }
0x1366   : > { %v24881_v56 = vsub.f32 %v16977_v55, %v12865_v2 }
0x1367   : > { %v12278_v58 = vadd.f32 %v12277_v8, %v11808_v41 }
0x1369   : > { %v12294_v53 = vsel %vm2818_vm15, %v12278_v58, 0  ;;  %v12863_v58 = vand.u32 4294901760, %v16974_v5 }
0x136a   : > { %v12366_v51 = vand.u32 4294901760, %v12294_v53 }
0x136c   : > { %v12367_v1 = vsub.f32 %v12294_v53, %v12366_v51  ;;  %v12867_v53 = vand.u32 4294901760, %v16976_v19 }
0x136e   : > { %19787 = vmatmul.mubr.f32.vlgmr.msra.gmra.mrb[52].mxu0 %v12367_v1  ;;  %v12368_v63 = vand.u32 4294901760, %v12367_v1 }
0x136f   : > { %20904 = vmatpush3.bf16.msra.mxu0 %v20903_v54  ;;  %19812 = vmatprep.mubr.msk.f32.mxu0 %vm22060_vm0, %v26511_v26 }
0x1370   : > { %20905 = vmatprep.subr.bf16.mxu0 %v26561_v29  ;;  %v12369_v59 = vsub.f32 %v12367_v1, %v12368_v63  ;;  %v12953_v1 = vand.u32 4294901760, %v24865_v46 }
0x1372   : > { %v12370_v45 = vand.u32 4294901760, %v12369_v59  ;;  %v24889_v59 = vsub.f32 %v16974_v5, %v12863_v58 }
0x1373   : > { %20907 = vmatpush3.bf16.msra.mxu0 %v20906_v62 }
0x1374   : > { %19761 = vmatmul.mubr.f32.vlgmr.msra.gmra.mrb[36].mxu1 %v12370_v45  ;;  %19810 = vmatprep.subr.mxu0 %v26511_v26  ;;  %v24891_v45 = vsub.f32 %v16976_v19, %v12867_v53 }
0x1375   : > { %20886 = vmatpush3.bf16.msra.mxu1 %v20885_v17  ;;  %19773 = vmatprep.mubr.msk.f32.mxu1 %vm22060_vm0, %v26511_v26  ;;  %v16972_v17 = vld [vmem:[%s26556_s5 + $0x60] sm:$0xff] }
0x1376   : > { %20887 = vmatprep.subr.bf16.mxu1 %v26561_v29  ;;  %v12859_v35 = vand.u32 4294901760, %v16972_v17 }
0x1377   : > { %19811 = vmatpush3.msra.mxu0 %v12407_v18  ;;  %v24894_v18 = vand.u32 4294901760, %v24876_v42 }
0x1378   : > { %19813 = vmatmul.mubr.f32.vlgmr.msra.gmra.mrb[54].mxu0 %v12366_v51  ;;  %v24867_v22 = vpack.c.bf16 %v12859_v35, %v12855_v9  ;;  %v24871_v41 = vsub.f32 %v16972_v17, %v12859_v35  ;;  %v20936_v17 = vpack.c.bf16 %v24891_v45, %v24889_v59 }
0x1379   : > { %20889 = vmatpush3.bf16.msra.mxu1 %v20888_v52  ;;  %12927 = vmatprep.mubr.f32.mxu0 %v26511_v26  ;;  %v12861_v52 = vand.u32 4294901760, %v16975_v0 }
0x137a   : > { %19771 = vmatprep.subr.mxu1 %v26511_v26 }
0x137b   : > { %v24873_v44 = vsub.f32 %v16975_v0, %v12861_v52  ;;  %v24879_v8 = vpack.c.bf16 %v12865_v2, %v12861_v52 }
0x137d   : > { %19772 = vmatpush3.msra.mxu1 %v12409_v14  ;;  %v20934_v6 = vpack.c.bf16 %v24881_v56, %v24873_v44 }
0x137e   : > { %19774 = vmatmul.mubr.f32.vlgmr.msra.gmra.mrb[38].mxu1 %v12366_v51  ;;  %20896 = vmatprep.subr.bf16.mxu1 %v26561_v29 }
0x137f   : > { %20898 = vmatpush3.bf16.msra.mxu1 %v24795_v43  ;;  %19799 = vmatprep.mubr.msk.f32.mxu1 %vm22060_vm0, %v26511_v26 }
0x1380   : > { %20899 = vmatprep.subr.bf16.mxu1 %v26561_v29 }
0x1383   : > { %20901 = vmatpush3.bf16.msra.mxu1 %v24803_v15 }
0x1384   : > { %19797 = vmatprep.subr.mxu1 %v26511_v26 }
0x1387   : > { %19798 = vmatpush3.msra.mxu1 %v24797_v36 }
0x1388   : > { %19800 = vmatmul.mubr.f32.vlgmr.msra.gmra.mrb[40].mxu1 %v12368_v63  ;;  %20908 = vmatprep.subr.bf16.mxu1 %v26561_v29  ;;  %v24887_v63 = vpack.c.bf16 %v12867_v53, %v12863_v58  ;;  %v16968_v58 = vld [vmem:[%s26557_s9 + $0x1] ss:$0 sm:$0xff]  ;;  %v12988_v53 = vsub.f32 %v24876_v42, %v24894_v18 }
0x1389   : > { %20910 = vmatpush3.bf16.msra.mxu1 %v24795_v43  ;;  %19825 = vmatprep.mubr.msk.f32.mxu1 %vm22060_vm0, %v26511_v26  ;;  %v16981_v42 = vld [vmem:[%s26559_s13 + $0xa0] sm:$0xff] }
0x138a   : > { %20911 = vmatprep.subr.bf16.mxu1 %v26561_v29 }
0x138d   : > { %20913 = vmatpush3.bf16.msra.mxu1 %v24803_v15 }
0x138e   : > { %19823 = vmatprep.subr.mxu1 %v26511_v26 }
0x1391   : > { %19824 = vmatpush3.msra.mxu1 %v24797_v36 }
0x1392   : > { %19826 = vmatmul.mubr.f32.vlgmr.msra.gmra.mrb[42].mxu1 %v12366_v51  ;;  %20962 = vmatprep.subr.bf16.mxu1 %v26561_v29 }
0x1441   : > { %v12550_v24 = vpop.f32.mrb[52].mxu0 }
0x1442   : > { %v19788_v60 = vpop.f32.mrb[53].mxu0 }
0x1443   : > { %v12947_v60 = vand.u32 4294901760, %v24869_v32 }
0x1447   : > { %v12372_v49 = vpop.f32.mrb[36].mxu1 }
0x1448   : > { %v19762_v50 = vpop.f32.mrb[37].mxu1  ;;  %v12373_v3 = vadd.f32 %v16965_v61, %v12372_v49  ;;  %v12959_v49 = vand.u32 4294901760, %v24871_v41  ;;  %v12948_v61 = vsub.f32 %v24869_v32, %v12947_v60 }
0x1449   : > { %v24902_v50 = vand.u32 4294901760, %v16978_v57 }
0x144a   : > { %v20948_v9 = vpack.c.bf16 %v12959_v49, %v12947_v60 }
0x144b   : > { %v12714_v28 = vpop.f32.mrb[54].mxu0 }
0x144c   : > { %v19814_v27 = vpop.f32.mrb[55].mxu0 }
0x1451   : > { %v12468_v16 = vpop.f32.mrb[38].mxu1 }
0x1452   : > { %v12469_v30 = vadd.f32 %v12468_v16, %v12373_v3  ;;  %v19775_v12 = vpop.f32.mrb[39].mxu1  ;;  %v12960_v3 = vsub.f32 %v24871_v41, %v12959_v49 }
0x1453   : > { %v12965_v12 = vand.u32 4294901760, %v24873_v44 }
0x1454   : > { %v12551_v11 = vadd.f32 %v12550_v24, %v12469_v30  ;;  %v12954_v24 = vsub.f32 %v24865_v46, %v12953_v1  ;;  %v12949_v30 = vand.u32 4294901760, %v12948_v61  ;;  %v13473_v61 = vand.u32 4294901760, %v16981_v42 }
0x1456   : > { %v12955_v27 = vand.u32 4294901760, %v12954_v24 }
0x145b   : > { %v12628_v38 = vpop.f32.mrb[40].mxu1 }
0x145c   : > { %v12629_v34 = vadd.f32 %v12628_v38, %v12551_v11  ;;  %v19801_v39 = vpop.f32.mrb[41].mxu1  ;;  %v12977_v11 = vand.u32 4294901760, %v24881_v56  ;;  %v12961_v38 = vand.u32 4294901760, %v12960_v3 }
0x145d   : > { %v12983_v39 = vand.u32 4294901760, %v24891_v45 }
0x145e   : > { %v12715_v7 = vadd.f32 %v12714_v28, %v12629_v34  ;;  %v12971_v34 = vand.u32 4294901760, %v24889_v59  ;;  %v20950_v35 = vpack.c.bf16 %v12977_v11, %v12965_v12 }
0x1460   : > { %v20952_v55 = vpack.c.bf16 %v12983_v39, %v12971_v34 }
0x1465   : > { %v12790_v43 = vpop.f32.mrb[42].mxu1 }
0x1466   : > { %v12791_v36 = vadd.f32 %v12790_v43, %v12715_v7  ;;  %v19827_v23 = vpop.f32.mrb[43].mxu1  ;;  %v12966_v7 = vsub.f32 %v24873_v44, %v12965_v12  ;;  %v12978_v43 = vsub.f32 %v24881_v56, %v12977_v11  ;;  %v24954_v12 = vsub.f32 %v16981_v42, %v13473_v61 }
0x1467   : > { %v12972_v23 = vsub.f32 %v24889_v59, %v12971_v34 }
0x1468   : > { %v24843_v48 = vadd.f32 %v12791_v36, %v24320_v21  ;;  %v16971_v21 = vld [vmem:[%s26556_s5 + $0x58] sm:$0xff]  ;;  %v20924_v36 = vpack.c.bf16 %v12961_v38, %v12949_v30 }
0x1469   : > { %v12853_v62 = vand.u32 4294901760, %v16971_v21  ;;  %v16984_v30 = vld [vmem:[%s26559_s13 + $0xb8] sm:$0xff] }
0x146a   : > { %v12799_v10 = vsel %vm3329_vm1, %v24843_v48, 0.0  ;;  %v13482_v34 = vand.u32 4294901760, %v16984_v30 }
0x146b   : > { %12800 = vadd.xlane.f32.xlu0 %v12799_v10  ;;  %v24861_v4 = vpack.c.bf16 %v12857_v31, %v12853_v62  ;;  %v24863_v20 = vsub.f32 %v16971_v21, %v12853_v62  ;;  %v12984_v10 = vsub.f32 %v24891_v45, %v12983_v39  ;;  %v20932_v31 = vpack.c.bf16 %v24871_v41, %v24869_v32 }
0x146c   : > { %v12989_v45 = vand.u32 4294901760, %v12988_v53  ;;  %v24964_v39 = vsub.f32 %v16984_v30, %v13482_v34  ;;  %v17000_v30 = vld [vmem:[%s26559_s13 + $0x138] sm:$0xff] }
0x146d   : > { %20915 = vmatprep.subr.bf16.mxu0 %v24861_v4  ;;  %v12941_v51 = vand.u32 4294901760, %v24863_v20  ;;  %v20930_v62 = vpack.c.bf16 %v24865_v46, %v24863_v20  ;;  %v16969_v46 = vld [vmem:[%s26558_s11 + $0x1] ss:$0 sm:$0xff] }
0x146e   : > { %20917 = vmatpush1.bf16.msra.mxu0 %v24867_v22 }
0x146f   : > { %20919 = vmatprep.subr.bf16.mxu0 %v24879_v8  ;;  %v12942_v14 = vsub.f32 %v24863_v20, %v12941_v51  ;;  %v20946_v0 = vpack.c.bf16 %v12953_v1, %v12941_v51  ;;  %v12994_v1 = vsub.f32 %v16978_v57, %v24902_v50  ;;  %v16982_v57 = vld [vmem:[%s26559_s13 + $0xa8] sm:$0xff] }
0x1470   : > { %v13476_v3 = vand.u32 4294901760, %v16982_v57 }
0x1471   : > { %v12943_v28 = vand.u32 4294901760, %v12942_v14  ;;  %v12995_v24 = vand.u32 4294901760, %v12994_v1 }
0x1472   : > { %20921 = vmatpush1.bf16.msra.mxu0 %v24887_v63  ;;  %v24956_v11 = vsub.f32 %v16982_v57, %v13476_v3 }
0x1473   : > { %12870 = vmatprep.subr.mxu0 %v24894_v18  ;;  %v20922_v16 = vpack.c.bf16 %v12955_v27, %v12943_v28  ;;  %v12996_v49 = vsub.f32 %v12994_v1, %v12995_v24 }
0x1475   : > { %v12997_v27 = vand.u32 4294901760, %v12996_v49  ;;  %v16998_v49 = vld [vmem:[%s26559_s13 + $0x128] sm:$0xff] }
0x1476   : > { %12872 = vmatpush1.msra.mxu0 %v24902_v50  ;;  %v13524_v57 = vand.u32 4294901760, %v16998_v49 }
0x1477   : > { %20923 = vmatprep.subr.bf16.mxu0 %v20922_v16  ;;  %v16983_v16 = vld [vmem:[%s26559_s13 + $0xb0] sm:$0xff] }
0x1478   : > { %v13479_v38 = vand.u32 4294901760, %v16983_v16 }
0x14f8   : > { %v12801_v15 = vpop.xlane.xlu0 %12800 }
0x14f9   : > { %v12802_v54 = vmul.f32 0.025, %v12801_v15  ;;  %v12967_v15 = vand.u32 4294901760, %v12966_v7 }
0x14fb   : > { %v24848_v47 = vsub.f32 %v24843_v48, %v12802_v54  ;;  %v12979_v54 = vand.u32 4294901760, %v12978_v43 }
0x14fd   : > { %v12804_v13 = vmul.f32 %v24848_v47, %v24848_v47  ;;  %v20926_v21 = vpack.c.bf16 %v12979_v54, %v12967_v15  ;;  %v16988_v15 = vld [vmem:[%s26559_s13 + $0xd8] sm:$0xff] }
0x14ff   : > { %v12805_v25 = vsel %vm3329_vm1, %v12804_v13, 0.0  ;;  %v12973_v13 = vand.u32 4294901760, %v12972_v23 }
0x1500   : > { %12806 = vadd.xlane.f32.xlu1 %v12805_v25  ;;  %v12985_v25 = vand.u32 4294901760, %v12984_v10  ;;  %v16987_v10 = vld [vmem:[%s26559_s13 + $0xd0] sm:$0xff] }
0x1502   : > { %v20928_v33 = vpack.c.bf16 %v12985_v25, %v12973_v13  ;;  %v13491_v13 = vand.u32 4294901760, %v16987_v10  ;;  %v13494_v25 = vand.u32 4294901760, %v16988_v15 }
0x158d   : > { %v12807_v52 = vpop.xlane.xlu1 %12806 }
0x158e   : > { %v12808_v5 = vmul.f32 0.025, %v12807_v52 }
0x1590   : > { %v12809_v19 = vadd.f32 1e-05, %v12808_v5  ;;  %v16991_v5 = vld [vmem:[%s26559_s13 + $0xf0] sm:$0xff] }
0x1592   : > { %21951 = vrsqrt.f32 %v12809_v19  ;;  %v16992_v19 = vld [vmem:[%s26559_s13 + $0xf8] sm:$0xff] }
0x159c   : > { %v21952_v2 = vpop.eup %21951 }
0x159d   : > { %v12811_v20 = vmul.f32 %v21952_v2, %v24848_v47  ;;  %v12990_v47 = vsub.f32 %v12988_v53, %v12989_v45 }
0x159f   : > { %v12818_v32 = vmul.f32 %v16968_v58, %v12811_v20  ;;  %v12991_v28 = vand.u32 4294901760, %v12990_v47  ;;  %v13503_v58 = vand.u32 4294901760, %v16991_v5  ;;  %v13506_v20 = vand.u32 4294901760, %v16992_v19 }
0x15a1   : > { %v12825_v41 = vadd.f32 %v16969_v46, %v12818_v32  ;;  %v25013_v46 = vpack.c.bf16 %v13494_v25, %v13491_v13  ;;  %v25015_v32 = vsub.f32 %v16991_v5, %v13503_v58 }
0x15a3   : > { %v12851_v44 = vsel %vm2818_vm15, %v12825_v41, 0  ;;  %v25017_v41 = vsub.f32 %v16992_v19, %v13506_v20 }
0x15a4   : > { %v24928_v56 = vand.u32 4294901760, %v12851_v44 }
0x15a6   : > { %v12929_v51 = vsub.f32 %v12851_v44, %v24928_v56  ;;  %v16993_v44 = vld [vmem:[%s26559_s13 + $0x100] sm:$0xff] }
0x15a8   : > { %v12930_v59 = vand.u32 4294901760, %v12929_v51 }
0x15aa   : > { %v12931_v14 = vsub.f32 %v12929_v51, %v12930_v59 }
0x15ac   : > { %v12932_v60 = vand.u32 4294901760, %v12931_v14  ;;  %v16996_v14 = vld [vmem:[%s26559_s13 + $0x118] sm:$0xff] }
0x15ad   : > { %v13518_v47 = vand.u32 4294901760, %v16996_v14 }
0x15ae   : > { %12933 = vmatmul.mubr.f32.vlgmr.msra.gmra.mrb[56].mxu0 %v12932_v60 }
0x15af   : > { %20925 = vmatpush1.bf16.msra.mxu0 %v20924_v36  ;;  %13053 = vmatprep.mubr.f32.mxu0 %v26511_v26 }
0x15b0   : > { %20927 = vmatprep.subr.bf16.mxu0 %v20926_v21  ;;  %v24987_v21 = vpack.c.bf16 %v13482_v34, %v13479_v38  ;;  %v25046_v34 = vpack.c.bf16 %v13506_v20, %v13503_v58 }
0x15b3   : > { %20929 = vmatpush1.bf16.msra.mxu0 %v20928_v33  ;;  %v24989_v33 = vsub.f32 %v16987_v10, %v13491_v13 }
0x15b4   : > { %12992 = vmatprep.subr.mxu0 %v12991_v28 }
0x15b5   : > { %v13617_v5 = vand.u32 4294901760, %v24989_v33 }
0x15b7   : > { %12998 = vmatpush1.msra.mxu0 %v12997_v27 }
0x15b8   : > { %13055 = vmatmul.mubr.f32.vlgmr.msra.gmra.mrb[56].mxu0 %v24928_v56  ;;  %20931 = vmatprep.subr.bf16.mxu0 %v20930_v62  ;;  %v24991_v62 = vsub.f32 %v16988_v15, %v13494_v25 }
0x15b9   : > { %20933 = vmatpush1.bf16.msra.mxu0 %v20932_v31  ;;  %13145 = vmatprep.mubr.f32.mxu0 %v26511_v26  ;;  %v16989_v31 = vld [vmem:[%s26559_s13 + $0xe0] sm:$0xff] }
0x15ba   : > { %20935 = vmatprep.subr.bf16.mxu0 %v20934_v6  ;;  %v16990_v6 = vld [vmem:[%s26559_s13 + $0xe8] sm:$0xff]  ;;  %v13624_v19 = vand.u32 4294901760, %v24991_v62 }
0x15bc   : > { %v25093_v20 = vpack.c.bf16 %v13624_v19, %v13617_v5 }
0x15bd   : > { %20937 = vmatpush1.bf16.msra.mxu0 %v20936_v17  ;;  %v21032_v17 = vpack.c.bf16 %v24991_v62, %v24989_v33 }
0x15be   : > { %13087 = vmatprep.subr.mxu0 %v12988_v53  ;;  %v21038_v53 = vpack.c.bf16 %v25017_v41, %v25015_v32 }
0x15c1   : > { %13090 = vmatpush1.msra.mxu0 %v12994_v1  ;;  %v13509_v1 = vand.u32 4294901760, %v16993_v44 }
0x15c2   : > { %13148 = vmatmul.mubr.f32.vlgmr.msra.gmra.mrb[56].mxu0 %v12929_v51  ;;  %20939 = vmatprep.subr.bf16.mxu0 %v24861_v4 }
0x15c3   : > { %20941 = vmatpush1.bf16.msra.mxu0 %v24867_v22  ;;  %13228 = vmatprep.mubr.f32.mxu0 %v26511_v26  ;;  %v25032_v27 = vsub.f32 %v16993_v44, %v13509_v1 }
0x15c4   : > { %20943 = vmatprep.subr.bf16.mxu0 %v24879_v8 }
0x15c7   : > { %20945 = vmatpush1.bf16.msra.mxu0 %v24887_v63 }
0x15c8   : > { %13171 = vmatprep.subr.mxu0 %v24894_v18 }
0x15cb   : > { %13173 = vmatpush1.msra.mxu0 %v24902_v50 }
0x15cc   : > { %13232 = vmatmul.mubr.f32.vlgmr.msra.gmra.mrb[56].mxu0 %v12930_v59  ;;  %20947 = vmatprep.subr.bf16.mxu0 %v20946_v0  ;;  %v13497_v0 = vand.u32 4294901760, %v16989_v31 }
0x15cd   : > { %20949 = vmatpush1.bf16.msra.mxu0 %v20948_v9  ;;  %13332 = vmatprep.mubr.f32.mxu0 %v26511_v26  ;;  %v13500_v9 = vand.u32 4294901760, %v16990_v6 }
0x15ce   : > { %20951 = vmatprep.subr.bf16.mxu0 %v20950_v35 }
0x15cf   : > { %v25004_v52 = vsub.f32 %v16990_v6, %v13500_v9  ;;  %v25025_v51 = vpack.c.bf16 %v13500_v9, %v13497_v0 }
0x15d1   : > { %20953 = vmatpush1.bf16.msra.mxu0 %v20952_v55  ;;  %v25002_v55 = vsub.f32 %v16989_v31, %v13497_v0 }
0x15d2   : > { %13273 = vmatprep.subr.mxu0 %v12989_v45  ;;  %v16995_v45 = vld [vmem:[%s26559_s13 + $0x110] sm:$0xff] }
0x15d3   : > { %v21035_v2 = vpack.c.bf16 %v25004_v52, %v25002_v55  ;;  %v13515_v60 = vand.u32 4294901760, %v16995_v45 }
0x15d5   : > { %13277 = vmatpush1.msra.mxu0 %v12995_v24  ;;  %v16997_v24 = vld [vmem:[%s26559_s13 + $0x120] sm:$0xff]  ;;  %v25068_v13 = vpack.c.bf16 %v13518_v47, %v13515_v60 }
0x15d6   : > { %13334 = vmatmul.mubr.f32.vlgmr.msra.gmra.mrb[56].mxu0 %v24928_v56  ;;  %20955 = vmatprep.subr.bf16.mxu0 %v24861_v4  ;;  %v21023_v4 = vpack.c.bf16 %v24956_v11, %v24954_v12  ;;  %v13521_v28 = vand.u32 4294901760, %v16997_v24 }
0x15d7   : > { %20957 = vmatpush1.bf16.msra.mxu0 %v24867_v22  ;;  %13414 = vmatprep.mubr.f32.mxu0 %v26511_v26  ;;  %v24962_v22 = vsub.f32 %v16983_v16, %v13479_v38  ;;  %v16999_v16 = vld [vmem:[%s26559_s13 + $0x130] sm:$0xff] }
0x15d8   : > { %20959 = vmatprep.subr.bf16.mxu0 %v24879_v8  ;;  %v25075_v31 = vpack.c.bf16 %v13524_v57, %v13521_v28 }
0x15d9   : > { %v21026_v8 = vpack.c.bf16 %v24964_v39, %v24962_v22 }
0x15db   : > { %20961 = vmatpush1.bf16.msra.mxu0 %v24887_v63  ;;  %v16985_v63 = vld [vmem:[%s26559_s13 + $0xc0] sm:$0xff] }
0x15dc   : > { %13357 = vmatprep.subr.mxu0 %v24894_v18  ;;  %v16986_v18 = vld [vmem:[%s26559_s13 + $0xc8] sm:$0xff]  ;;  %v13485_v7 = vand.u32 4294901760, %v16985_v63 }
0x15dd   : > { %v13488_v43 = vand.u32 4294901760, %v16986_v18 }
0x15de   : > { %v24977_v36 = vsub.f32 %v16985_v63, %v13485_v7  ;;  %v25053_v63 = vsub.f32 %v16998_v49, %v13524_v57  ;;  %v13652_v49 = vand.u32 4294901760, %v25017_v41 }
0x15df   : > { %13359 = vmatpush1.msra.mxu0 %v24902_v50  ;;  %v24975_v50 = vpack.c.bf16 %v13476_v3, %v13473_v61  ;;  %v24979_v23 = vsub.f32 %v16986_v18, %v13488_v43  ;;  %v25000_v35 = vpack.c.bf16 %v13488_v43, %v13485_v7  ;;  %v25037_v61 = vsub.f32 %v16995_v45, %v13515_v60 }
0x15e0   : > { %13416 = vmatmul.mubr.f32.vlgmr.msra.gmra.mrb[56].mxu0 %v24928_v56  ;;  %21022 = vmatprep.subr.bf16.mxu0 %v26561_v29  ;;  %v16994_v56 = vld [vmem:[%s26559_s13 + $0x108] sm:$0xff]  ;;  %v25039_v3 = vsub.f32 %v16996_v14, %v13518_v47  ;;  %v13527_v18 = vand.u32 4294901760, %v16999_v16  ;;  %v13530_v7 = vand.u32 4294901760, %v17000_v30  ;;  %v13625_v45 = vsub.f32 %v24991_v62, %v13624_v19 }
0x15e1   : > { %21024 = vmatpush1.bf16.msra.mxu0 %v21023_v4  ;;  %20964 = vmatpush1.bf16.msra.mxu1 %v24975_v50  ;;  %v21029_v54 = vpack.c.bf16 %v24979_v23, %v24977_v36  ;;  %v13512_v59 = vand.u32 4294901760, %v16994_v56  ;;  %v25049_v4 = vsub.f32 %v16997_v24, %v13521_v28  ;;  %v13610_v0 = vand.u32 4294901760, %v24979_v23 }
0x15e2   : > { %21025 = vmatprep.subr.bf16.mxu0 %v26561_v29  ;;  %20965 = vmatprep.subr.bf16.mxu1 %v26561_v29  ;;  %v25062_v15 = vsub.f32 %v16999_v16, %v13527_v18  ;;  %v25081_v6 = vpack.c.bf16 %v13530_v7, %v13527_v18  ;;  %v13653_v18 = vsub.f32 %v25017_v41, %v13652_v49 }
0x15e3   : > { %v25034_v42 = vsub.f32 %v16994_v56, %v13512_v59  ;;  %v25057_v43 = vpack.c.bf16 %v13512_v59, %v13509_v1  ;;  %v21047_v10 = vpack.c.bf16 %v25053_v63, %v25049_v4  ;;  %v13611_v58 = vsub.f32 %v24979_v23, %v13610_v0 }
0x15e4   : > { %v13638_v1 = vand.u32 4294901760, %v25004_v52  ;;  %v13618_v59 = vsub.f32 %v24989_v33, %v13617_v5  ;;  %v13645_v23 = vand.u32 4294901760, %v25015_v32 }
0x15e5   : > { %21027 = vmatpush1.bf16.msra.mxu0 %v21026_v8  ;;  %20967 = vmatpush1.bf16.msra.mxu1 %v24987_v21  ;;  %v21041_v38 = vpack.c.bf16 %v25034_v42, %v25032_v27  ;;  %v21044_v8 = vpack.c.bf16 %v25039_v3, %v25037_v61  ;;  %v13612_v56 = vand.u32 4294901760, %v13611_v58  ;;  %v13687_v58 = vand.u32 4294901760, %v25049_v4 }
0x15e6   : > { %21028 = vmatprep.subr.bf16.mxu0 %v26561_v29  ;;  %20968 = vmatprep.subr.bf16.mxu1 %v26561_v29  ;;  %v13619_v60 = vand.u32 4294901760, %v13618_v59  ;;  %v13639_v57 = vsub.f32 %v25004_v52, %v13638_v1  ;;  %v25109_v16 = vpack.c.bf16 %v13652_v49, %v13645_v23  ;;  %v13673_v52 = vand.u32 4294901760, %v25037_v61 }
0x15e8   : > { %v13640_v62 = vand.u32 4294901760, %v13639_v57 }
0x15e9   : > { %21030 = vmatpush1.bf16.msra.mxu0 %v21029_v54  ;;  %20970 = vmatpush1.bf16.msra.mxu1 %v25000_v35  ;;  %v25064_v54 = vsub.f32 %v17000_v30, %v13530_v7  ;;  %v13659_v30 = vand.u32 4294901760, %v25032_v27 }
0x15ea   : > { %21031 = vmatprep.subr.bf16.mxu0 %v26561_v29  ;;  %20971 = vmatprep.subr.bf16.mxu1 %v26561_v29 }
0x15eb   : > { %v21050_v25 = vpack.c.bf16 %v25064_v54, %v25062_v15  ;;  %v13660_v5 = vsub.f32 %v25032_v27, %v13659_v30 }
0x15ed   : > { %21033 = vmatpush1.bf16.msra.mxu0 %v21032_v17  ;;  %20973 = vmatpush1.bf16.msra.mxu1 %v25013_v46  ;;  %v13603_v17 = vand.u32 4294901760, %v24977_v36 }
0x15ee   : > { %21034 = vmatprep.subr.bf16.mxu0 %v26561_v29  ;;  %20974 = vmatprep.subr.bf16.mxu1 %v26561_v29 }
0x15ef   : > { %v25087_v9 = vpack.c.bf16 %v13610_v0, %v13603_v17  ;;  %v13680_v0 = vand.u32 4294901760, %v25039_v3 }
0x15f1   : > { %21036 = vmatpush1.bf16.msra.mxu0 %v21035_v2  ;;  %20976 = vmatpush1.bf16.msra.mxu1 %v25025_v51  ;;  %v13604_v2 = vsub.f32 %v24977_v36, %v13603_v17  ;;  %v13626_v36 = vand.u32 4294901760, %v13625_v45 }
0x15f2   : > { %21037 = vmatprep.subr.bf16.mxu0 %v26561_v29  ;;  %20977 = vmatprep.subr.bf16.mxu1 %v26561_v29 }
0x15f3   : > { %v13605_v44 = vand.u32 4294901760, %v13604_v2  ;;  %v25103_v47 = vpack.c.bf16 %v13626_v36, %v13619_v60  ;;  %v25125_v2 = vpack.c.bf16 %v13680_v0, %v13673_v52  ;;  %v13701_v60 = vand.u32 4294901760, %v25062_v15 }
0x15f4   : > { %v13708_v36 = vand.u32 4294901760, %v25064_v54 }
0x15f5   : > { %21039 = vmatpush1.bf16.msra.mxu0 %v21038_v53  ;;  %20979 = vmatpush1.bf16.msra.mxu1 %v25046_v34  ;;  %v13631_v53 = vand.u32 4294901760, %v25002_v55  ;;  %v25099_v14 = vpack.c.bf16 %v13612_v56, %v13605_v44  ;;  %v13694_v44 = vand.u32 4294901760, %v25053_v63  ;;  %v13674_v56 = vsub.f32 %v25037_v61, %v13673_v52 }
0x15f6   : > { %21040 = vmatprep.subr.bf16.mxu0 %v26561_v29  ;;  %20980 = vmatprep.subr.bf16.mxu1 %v26561_v29  ;;  %v25141_v61 = vpack.c.bf16 %v13708_v36, %v13701_v60  ;;  %v13702_v57 = vsub.f32 %v25062_v15, %v13701_v60 }
0x15f7   : > { %v25101_v24 = vpack.c.bf16 %v13638_v1, %v13631_v53  ;;  %v13632_v28 = vsub.f32 %v25002_v55, %v13631_v53  ;;  %v13654_v55 = vand.u32 4294901760, %v13653_v18  ;;  %v13681_v53 = vsub.f32 %v25039_v3, %v13680_v0  ;;  %v16980_v18 = vld [vmem:[%s26560_s17 + $0x2] sm:$0x3] }
0x15f8   : > { %v25133_v59 = vpack.c.bf16 %v13694_v44, %v13687_v58  ;;  %v13675_v45 = vand.u32 4294901760, %v13674_v56  ;;  %v13695_v49 = vsub.f32 %v25053_v63, %v13694_v44 }
0x15f9   : > { %21042 = vmatpush1.bf16.msra.mxu0 %v21041_v38  ;;  %20982 = vmatpush1.bf16.msra.mxu1 %v25057_v43  ;;  %v13633_v33 = vand.u32 4294901760, %v13632_v28  ;;  %v13666_v38 = vand.u32 4294901760, %v25034_v42  ;;  %v13682_v27 = vand.u32 4294901760, %v13681_v53 }
0x15fa   : > { %21043 = vmatprep.subr.bf16.mxu0 %v26561_v29  ;;  %20983 = vmatprep.subr.bf16.mxu1 %v26561_v29  ;;  %v13696_v28 = vand.u32 4294901760, %v13695_v49 }
0x15fb   : > { %v25115_v7 = vpack.c.bf16 %v13640_v62, %v13633_v33  ;;  %v13667_v19 = vsub.f32 %v25034_v42, %v13666_v38  ;;  %v25135_v42 = vpack.c.bf16 %v13682_v27, %v13675_v45  ;;  %v13709_v33 = vsub.f32 %v25064_v54, %v13708_v36 }
0x15fd   : > { %21045 = vmatpush1.bf16.msra.mxu0 %v21044_v8  ;;  %20985 = vmatpush1.bf16.msra.mxu1 %v25068_v13  ;;  %v13646_v8 = vsub.f32 %v25015_v32, %v13645_v23  ;;  %v13661_v32 = vand.u32 4294901760, %v13660_v5  ;;  %v13668_v41 = vand.u32 4294901760, %v13667_v19  ;;  %v13688_v23 = vsub.f32 %v25049_v4, %v13687_v58 }
0x15fe   : > { %21046 = vmatprep.subr.bf16.mxu0 %v26561_v29  ;;  %20986 = vmatprep.subr.bf16.mxu1 %v26561_v29  ;;  %v12847_v4 = vrot.slane %v16980_v18, %v23656_v37 }
0x15ff   : > { %v25131_v1 = vpack.c.bf16 %v13668_v41, %v13661_v32  ;;  %v13689_v3 = vand.u32 4294901760, %v13688_v23 }
0x1601   : > { %21048 = vmatpush1.bf16.msra.mxu0 %v21047_v10  ;;  %20988 = vmatpush1.bf16.msra.mxu1 %v25075_v31  ;;  %v25117_v10 = vpack.c.bf16 %v13666_v38, %v13659_v30  ;;  %v25145_v62 = vpack.c.bf16 %v13696_v28, %v13689_v3  ;;  %v13703_v30 = vand.u32 4294901760, %v13702_v57  ;;  %v13710_v38 = vand.u32 4294901760, %v13709_v33 }
0x1602   : > { %21049 = vmatprep.subr.bf16.mxu0 %v26561_v29  ;;  %20989 = vmatprep.subr.bf16.mxu1 %v26561_v29  ;;  %v13575_v57 = vand.u32 4294901760, %v24954_v12  ;;  %v13582_v33 = vand.u32 4294901760, %v24956_v11 }
0x1605   : > { %21051 = vmatpush1.bf16.msra.mxu0 %v21050_v25  ;;  %20991 = vmatpush1.bf16.msra.mxu1 %v25081_v6  ;;  %v13647_v25 = vand.u32 4294901760, %v13646_v8  ;;  %v25147_v8 = vpack.c.bf16 %v13710_v38, %v13703_v30 }
0x1606   : > { %21082 = vmatprep.subr.bf16.mxu0 %v26561_v29  ;;  %20992 = vmatprep.subr.bf16.mxu1 %v26561_v29 }
0x1607   : > { %v25119_v17 = vpack.c.bf16 %v13654_v55, %v13647_v25  ;;  %v12843_v25 = vrot.slane %v16980_v18, %v23653_v40  ;;  %v13576_v18 = vsub.f32 %v24954_v12, %v13575_v57 }
0x16b3   : > { %v13417_v63 = vpop.f32.mrb[56].mxu0 }
0x16b4   : > { %v21490_v55 = vadd.f32 %v13417_v63, %v12843_v25  ;;  %v13419_v52 = vpop.f32.mrb[57].mxu0  ;;  %v13583_v63 = vsub.f32 %v24956_v11, %v13582_v33 }
0x16b5   : > { %v21491_v0 = vadd.f32 %v13419_v52, %v12847_v4 }
0x16b6   : > { %v13424_v5 = vmul.f32 0.044715, %v21490_v55  ;;  %v13422_v60 = vmul.f32 0.5, %v21490_v55 }
0x16b7   : > { %v13425_v19 = vmul.f32 0.044715, %v21491_v0  ;;  %v13423_v23 = vmul.f32 0.5, %v21491_v0 }
0x16b8   : > { %v13426_v15 = vmul.f32 %v21490_v55, %v13424_v5  ;;  %v13596_v5 = vand.u32 4294901760, %v24964_v39 }
0x16b9   : > { %v13427_v32 = vmul.f32 %v21491_v0, %v13425_v19 }
0x16ba   : > { %v13428_v54 = vmul.f32 %v21490_v55, %v13426_v15  ;;  %v13577_v15 = vand.u32 4294901760, %v13576_v18  ;;  %v13597_v11 = vsub.f32 %v24964_v39, %v13596_v5  ;;  %v14788_v18 = vld [vmem:[%s26570_s1 + $0x88] sm:$0xff] }
0x16bb   : > { %v13429_v41 = vmul.f32 %v21491_v0, %v13427_v32  ;;  %v13584_v32 = vand.u32 4294901760, %v13583_v63 }
0x16bc   : > { %v13430_v58 = vadd.f32 %v21490_v55, %v13428_v54  ;;  %v21083_v55 = vpack.c.bf16 %v13582_v33, %v13575_v57 }
0x16bd   : > { %v13431_v44 = vadd.f32 %v21491_v0, %v13429_v41  ;;  %v13589_v0 = vand.u32 4294901760, %v24962_v22 }
0x16be   : > { %v13432_v56 = vmul.f32 0.7978846, %v13430_v58 }
0x16bf   : > { %v13433_v53 = vmul.f32 0.7978846, %v13431_v44  ;;  %v13590_v54 = vsub.f32 %v24962_v22, %v13589_v0  ;;  %v21086_v58 = vpack.c.bf16 %v13596_v5, %v13589_v0  ;;  %v13598_v22 = vand.u32 4294901760, %v13597_v11  ;;  %v14785_v0 = vld [vmem:[%s26570_s1 + $0x70] sm:$0xff]  ;;  %v14787_v5 = vld [vmem:[%s26570_s1 + $0x80] sm:$0xff] }
0x16c0   : > { %21953 = vtanh.f32 %v13432_v56 }
0x16c1   : > { %21955 = vtanh.f32 %v13433_v53  ;;  %v20993_v53 = vpack.c.bf16 %v13584_v32, %v13577_v15 }
0x16ca   : > { %v21954_v45 = vpop.eup %21953 }
0x16cb   : > { %v21956_v27 = vpop.eup %21955  ;;  %v13436_v36 = vadd.f32 1.0, %v21954_v45  ;;  %v13591_v45 = vand.u32 4294901760, %v13590_v54 }
0x16cc   : > { %v13437_v49 = vadd.f32 1.0, %v21956_v27 }
0x16cd   : > { %v13438_v3 = vmul.f32 %v13436_v36, %v13422_v60  ;;  %v20996_v39 = vpack.c.bf16 %v13598_v22, %v13591_v45  ;;  %v14186_v60 = vld [vmem:[%s26570_s1 + $0x30] sm:$0xff]  ;;  %v14804_v45 = vand.u32 4294901760, %v14785_v0  ;;  %v14808_v22 = vand.u32 4294901760, %v14787_v5 }
0x16ce   : > { %v13439_v28 = vmul.f32 %v13437_v49, %v13423_v23 }
0x16cf   : > { %v25154_v30 = vand.u32 4294901760, %v13438_v3 }
0x16d0   : > { %v13470_v38 = vsel %vm8038_vm4, %v13439_v28, 0  ;;  %v14786_v28 = vld [vmem:[%s26570_s1 + $0x78] sm:$0xff] }
0x16d1   : > { %v25158_v25 = vand.u32 4294901760, %v13470_v38  ;;  %v25161_v4 = vsub.f32 %v13438_v3, %v25154_v30 }
0x16d3   : > { %v25165_v52 = vsub.f32 %v13470_v38, %v25158_v25  ;;  %v13564_v19 = vand.u32 4294901760, %v25161_v4  ;;  %v14207_v38 = vand.u32 4294901760, %v14186_v60 }
0x16d5   : > { %13850 = vmatprep.mubr.f32.mxu0 %v25165_v52  ;;  %v13558_v12 = vand.u32 4294901760, %v25165_v52  ;;  %v13565_v41 = vsub.f32 %v25161_v4, %v13564_v19 }
0x16d6   : > { %13853 = vmatmul.mubr.f32.vlgmr.msra.gmra.mrb[58].mxu0 %v25161_v4 }
0x16d7   : > { %21084 = vmatpush1.bf16.msra.mxu0 %v21083_v55  ;;  %14079 = vmatprep.mubr.f32.mxu0 %v25158_v25  ;;  %v13559_v44 = vsub.f32 %v25165_v52, %v13558_v12  ;;  %v13566_v27 = vand.u32 4294901760, %v13565_v41  ;;  %v14802_v52 = vand.u32 4294901760, %v14786_v28  ;;  %v25322_v41 = vsub.f32 %v14186_v60, %v14207_v38 }
0x16d8   : > { %21085 = vmatprep.subr.bf16.mxu0 %v26561_v29 }
0x16d9   : > { %v13560_v56 = vand.u32 4294901760, %v13559_v44  ;;  %v25324_v44 = vsub.f32 %v14786_v28, %v14802_v52 }
0x16db   : > { %21087 = vmatpush1.bf16.msra.mxu0 %v21086_v58  ;;  %13561 = vmatprep.mubr.f32.mxu1 %v13560_v56  ;;  %v14806_v58 = vand.u32 4294901760, %v14788_v18  ;;  %v25327_v56 = vld [vmem:[%s26570_s1 + $0x48] sm:$0xff] }
0x16dc   : > { %13567 = vmatmul.mubr.f32.vlgmr.msra.gmra.mrb[44].mxu1 %v13566_v27  ;;  %21088 = vmatprep.subr.bf16.mxu0 %v26561_v29  ;;  %v25334_v27 = vand.u32 4294901760, %v25327_v56 }
0x16dd   : > { %20994 = vmatpush1.bf16.msra.mxu1 %v20993_v53  ;;  %13737 = vmatprep.mubr.f32.mxu1 %v25158_v25  ;;  %v25330_v53 = vld [vmem:[%s26570_s1 + $0x40] sm:$0xff] }
0x16de   : > { %20995 = vmatprep.subr.bf16.mxu1 %v26561_v29 }
0x16df   : > { %21090 = vmatpush1.bf16.msra.mxu0 %v25087_v9  ;;  %v14782_v9 = vld [vmem:[%s26570_s1 + $0x58] sm:$0xff] }
0x16e0   : > { %21091 = vmatprep.subr.bf16.mxu0 %v26561_v29 }
0x16e1   : > { %20997 = vmatpush1.bf16.msra.mxu1 %v20996_v39  ;;  %v25337_v39 = vand.u32 4294901760, %v25330_v53 }
0x16e2   : > { %20998 = vmatprep.subr.bf16.mxu1 %v26561_v29 }
0x16e3   : > { %21093 = vmatpush1.bf16.msra.mxu0 %v25093_v20 }
0x16e4   : > { %21094 = vmatprep.subr.bf16.mxu0 %v26561_v29 }
0x16e5   : > { %21000 = vmatpush1.bf16.msra.mxu1 %v25099_v14 }
0x16e6   : > { %21001 = vmatprep.subr.bf16.mxu1 %v26561_v29 }
0x16e7   : > { %21096 = vmatpush1.bf16.msra.mxu0 %v25101_v24  ;;  %v14794_v24 = vand.u32 4294901760, %v14782_v9 }
0x16e8   : > { %21097 = vmatprep.subr.bf16.mxu0 %v26561_v29 }
0x16e9   : > { %21003 = vmatpush1.bf16.msra.mxu1 %v25103_v47  ;;  %v25297_v33 = vsub.f32 %v14782_v9, %v14794_v24 }
0x16ea   : > { %21004 = vmatprep.subr.bf16.mxu1 %v26561_v29 }
0x16eb   : > { %21099 = vmatpush1.bf16.msra.mxu0 %v25109_v16  ;;  %v14781_v16 = vld [vmem:[%s26570_s1 + $0x50] sm:$0xff] }
0x16ec   : > { %21100 = vmatprep.subr.bf16.mxu0 %v26561_v29 }
0x16ed   : > { %21006 = vmatpush1.bf16.msra.mxu1 %v25115_v7  ;;  %v14783_v7 = vld [vmem:[%s26570_s1 + $0x60] sm:$0xff] }
0x16ee   : > { %21007 = vmatprep.subr.bf16.mxu1 %v26561_v29 }
0x16ef   : > { %21102 = vmatpush1.bf16.msra.mxu0 %v25117_v10 }
0x16f0   : > { %21103 = vmatprep.subr.bf16.mxu0 %v26561_v29 }
0x16f1   : > { %21009 = vmatpush1.bf16.msra.mxu1 %v25119_v17  ;;  %v14796_v17 = vand.u32 4294901760, %v14781_v16 }
0x16f2   : > { %21010 = vmatprep.subr.bf16.mxu1 %v26561_v29 }
0x16f3   : > { %21105 = vmatpush1.bf16.msra.mxu0 %v25125_v2  ;;  %v14800_v2 = vand.u32 4294901760, %v14783_v7  ;;  %v25303_v4 = vsub.f32 %v14781_v16, %v14796_v17 }
0x16f4   : > { %21106 = vmatprep.subr.bf16.mxu0 %v26561_v29 }
0x16f5   : > { %21012 = vmatpush1.bf16.msra.mxu1 %v25131_v1  ;;  %v14185_v1 = vld [vmem:[%s26570_s1 + $0x28] sm:$0xff]  ;;  %v25291_v49 = vpack.c.bf16 %v14800_v2, %v14796_v17  ;;  %v25305_v63 = vsub.f32 %v14783_v7, %v14800_v2  ;;  %v26419_v17 = vand.u32 4294901760, %v25297_v33 }
0x16f6   : > { %21013 = vmatprep.subr.bf16.mxu1 %v26561_v29 }
0x16f7   : > { %21108 = vmatpush1.bf16.msra.mxu0 %v25133_v59  ;;  %v14187_v59 = vld [vmem:[%s26570_s1 + $0x38] sm:$0xff] }
0x16f8   : > { %21109 = vmatprep.subr.bf16.mxu0 %v26561_v29  ;;  %v14205_v3 = vand.u32 4294901760, %v14187_v59 }
0x16f9   : > { %21015 = vmatpush1.bf16.msra.mxu1 %v25135_v42 }
0x16fa   : > { %21016 = vmatprep.subr.bf16.mxu1 %v26561_v29  ;;  %v25315_v32 = vsub.f32 %v14187_v59, %v14205_v3 }
0x16fb   : > { %21111 = vmatpush1.bf16.msra.mxu0 %v25141_v61 }
0x16fd   : > { %21018 = vmatpush1.bf16.msra.mxu1 %v25145_v62  ;;  %v14201_v62 = vand.u32 4294901760, %v14185_v1 }
0x16fe   : > { %14081 = vmatmul.mubr.f32.vlgmr.msra.gmra.mrb[60].mxu0 %v25154_v30  ;;  %21019 = vmatprep.subr.bf16.mxu1 %v26561_v29 }
0x16ff   : > { %14267 = vmatprep.mubr.f32.mxu0 %v26511_v26  ;;  %v25307_v55 = vpack.c.bf16 %v14205_v3, %v14201_v62  ;;  %v14883_v3 = vsub.f32 %v25297_v33, %v26419_v17 }
0x1701   : > { %21021 = vmatpush1.bf16.msra.mxu1 %v25147_v8  ;;  %v14184_v8 = vld [vmem:[%s26570_s1 + $0x20] sm:$0xff] }
0x1702   : > { %21052 = vmatprep.subr.bf16.mxu1 %v26561_v29 }
0x1704   : > { %13739 = vmatmul.mubr.f32.vlgmr.msra.gmra.mrb[46].mxu1 %v25154_v30 }
0x1705   : > { %21054 = vmatpush1.bf16.msra.mxu1 %v24975_v50  ;;  %13945 = vmatprep.mubr.f32.mxu1 %v13558_v12  ;;  %v25313_v12 = vsub.f32 %v14185_v1, %v14201_v62 }
0x1706   : > { %21055 = vmatprep.subr.bf16.mxu1 %v26561_v29 }
0x1709   : > { %21057 = vmatpush1.bf16.msra.mxu1 %v24987_v21 }
0x170a   : > { %21058 = vmatprep.subr.bf16.mxu1 %v26561_v29 }
0x170d   : > { %21060 = vmatpush1.bf16.msra.mxu1 %v25000_v35 }
0x170e   : > { %21061 = vmatprep.subr.bf16.mxu1 %v26561_v29 }
0x1711   : > { %21063 = vmatpush1.bf16.msra.mxu1 %v25013_v46 }
0x1712   : > { %21064 = vmatprep.subr.bf16.mxu1 %v26561_v29 }
0x1715   : > { %21066 = vmatpush1.bf16.msra.mxu1 %v25025_v51 }
0x1716   : > { %21067 = vmatprep.subr.bf16.mxu1 %v26561_v29 }
0x1719   : > { %21069 = vmatpush1.bf16.msra.mxu1 %v25046_v34 }
0x171a   : > { %21070 = vmatprep.subr.bf16.mxu1 %v26561_v29 }
0x171d   : > { %21072 = vmatpush1.bf16.msra.mxu1 %v25057_v43 }
0x171e   : > { %21073 = vmatprep.subr.bf16.mxu1 %v26561_v29 }
0x1721   : > { %21075 = vmatpush1.bf16.msra.mxu1 %v25068_v13 }
0x1722   : > { %21076 = vmatprep.subr.bf16.mxu1 %v26561_v29 }
0x1725   : > { %21078 = vmatpush1.bf16.msra.mxu1 %v25075_v31 }
0x1726   : > { %21079 = vmatprep.subr.bf16.mxu1 %v26561_v29 }
0x1729   : > { %21081 = vmatpush1.bf16.msra.mxu1 %v25081_v6 }
0x172a   : > { %21112 = vmatprep.subr.bf16.mxu1 %v26561_v29 }
0x172c   : > { %13949 = vmatmul.mubr.f32.vlgmr.msra.gmra.mrb[48].mxu1 %v13564_v19 }
0x172d   : > { %21114 = vmatpush1.bf16.msra.mxu1 %v24975_v50  ;;  %14171 = vmatprep.mubr.f32.mxu1 %v25158_v25  ;;  %v14181_v50 = vld [vmem:[%s26570_s1 + $0x8] sm:$0xff] }
0x172e   : > { %21115 = vmatprep.subr.bf16.mxu1 %v26561_v29 }
0x1731   : > { %21117 = vmatpush1.bf16.msra.mxu1 %v24987_v21  ;;  %v14183_v21 = vld [vmem:[%s26570_s1 + $0x18] sm:$0xff] }
0x1732   : > { %21118 = vmatprep.subr.bf16.mxu1 %v26561_v29 }
0x1735   : > { %21120 = vmatpush1.bf16.msra.mxu1 %v25000_v35  ;;  %v14193_v35 = vand.u32 4294901760, %v14181_v50 }
0x1736   : > { %21121 = vmatprep.subr.bf16.mxu1 %v26561_v29 }
0x1737   : > { %v25280_v42 = vsub.f32 %v14181_v50, %v14193_v35  ;;  %v25340_v50 = vld [vmem:[%s26570_s1 + $0x98] sm:$0xff] }
0x1739   : > { %21123 = vmatpush1.bf16.msra.mxu1 %v25013_v46  ;;  %v14197_v46 = vand.u32 4294901760, %v14183_v21 }
0x173a   : > { %21124 = vmatprep.subr.bf16.mxu1 %v26561_v29 }
0x173b   : > { %v25271_v14 = vpack.c.bf16 %v14197_v46, %v14193_v35  ;;  %v25294_v57 = vsub.f32 %v14183_v21, %v14197_v46  ;;  %v25342_v21 = vpack.c.bf16 %v14806_v58, %v14802_v52  ;;  %v25344_v35 = vsub.f32 %v14788_v18, %v14806_v58 }
0x173c   : > { %v26423_v46 = vand.u32 4294901760, %v25280_v42  ;;  %v14900_v52 = vand.u32 4294901760, %v25305_v63  ;;  %v14305_v58 = vand.u32 4294901760, %v25313_v12 }
0x173d   : > { %21126 = vmatpush1.bf16.msra.mxu1 %v25025_v51  ;;  %v14180_v51 = vld [vmem:[%s26570_s1] sm:$0xff]  ;;  %21143 = vmatprep.subr.bf16.mxu0 %v25271_v14  ;;  %26572 = vst [vmem:[#allocation28_spill] sm:$0xff] %v25342_v21  ;;  %v14918_v17 = vand.u32 4294901760, %v25344_v35 }
0x173e   : > { %21127 = vmatprep.subr.bf16.mxu1 %v26561_v29  ;;  %v14282_v9 = vsub.f32 %v25280_v42, %v26423_v46 }
0x1740   : > { %v14283_v1 = vand.u32 4294901760, %v14282_v9  ;;  %v14317_v9 = vand.u32 4294901760, %v25315_v32 }
0x1741   : > { %21129 = vmatpush1.bf16.msra.mxu1 %v25046_v34  ;;  %v14182_v34 = vld [vmem:[%s26570_s1 + $0x10] sm:$0xff] }
0x1742   : > { %21130 = vmatprep.subr.bf16.mxu1 %v26561_v29 }
0x1745   : > { %21132 = vmatpush1.bf16.msra.mxu1 %v25057_v43 }
0x1746   : > { %21133 = vmatprep.subr.bf16.mxu1 %v26561_v29 }
0x1749   : > { %21135 = vmatpush1.bf16.msra.mxu1 %v25068_v13  ;;  %v14195_v13 = vand.u32 4294901760, %v14180_v51 }
0x174a   : > { %21136 = vmatprep.subr.bf16.mxu1 %v26561_v29 }
0x174b   : > { %v25287_v36 = vsub.f32 %v14180_v51, %v14195_v13  ;;  %v26422_v51 = vand.u32 4294901760, %v25294_v57 }
0x174d   : > { %21138 = vmatpush1.bf16.msra.mxu1 %v25075_v31  ;;  %v14199_v31 = vand.u32 4294901760, %v14182_v34 }
0x174e   : > { %21139 = vmatprep.subr.bf16.mxu1 %v26561_v29 }
0x174f   : > { %v25275_v10 = vpack.c.bf16 %v14199_v31, %v14195_v13  ;;  %v25289_v23 = vsub.f32 %v14182_v34, %v14199_v31  ;;  %v25348_v34 = vpack.c.bf16 %v14808_v22, %v14804_v45  ;;  %v25350_v13 = vsub.f32 %v14785_v0, %v14804_v45 }
0x1750   : > { %v25352_v31 = vsub.f32 %v14787_v5, %v14808_v22  ;;  %v14884_v5 = vand.u32 4294901760, %v14883_v3  ;;  %v14901_v22 = vsub.f32 %v25305_v63, %v14900_v52  ;;  %v14318_v3 = vsub.f32 %v25315_v32, %v14317_v9 }
0x1751   : > { %21141 = vmatpush1.bf16.msra.mxu1 %v25081_v6  ;;  %v14784_v6 = vld [vmem:[%s26570_s1 + $0x68] sm:$0xff]  ;;  %21145 = vmatpush1.bf16.msra.mxu0 %v25275_v10  ;;  %26573 = vst [vmem:[#allocation32_spill] sm:$0xff] %v25348_v34  ;;  %v26420_v16 = vand.u32 4294901760, %v25289_v23 }
0x1752   : > { %v14798_v47 = vand.u32 4294901760, %v14784_v6  ;;  %21147 = vmatprep.subr.bf16.mxu0 %v25307_v55 }
0x1753   : > { %v14300_v60 = vsub.f32 %v25289_v23, %v26420_v16 }
0x1754   : > { %14173 = vmatmul.mubr.f32.vlgmr.msra.gmra.mrb[50].mxu1 %v25154_v30  ;;  %v25282_v61 = vpack.c.bf16 %v14798_v47, %v14794_v24  ;;  %v14203_v30 = vand.u32 4294901760, %v14184_v8  ;;  %v25311_v15 = vsub.f32 %v14784_v6, %v14798_v47  ;;  %v14294_v6 = vsub.f32 %v25294_v57, %v26422_v51  ;;  %v25367_v47 = vld [vmem:[%s26570_s1 + $0x90] sm:$0xff]  ;;  %s26598_s1 = sld [smem:[#allocation25_spill]] }
0x1755   : > { %14868 = vmatprep.mubr.f32.mxu1 %v26511_v26  ;;  %v26421_v24 = vand.u32 4294901760, %v25287_v36  ;;  %v25373_v7 = vand.u32 4294901760, %v25367_v47  ;;  %v14301_v0 = vand.u32 4294901760, %v14300_v60  ;;  %v14323_v60 = vand.u32 4294901760, %v25322_v41 }
0x1756   : > { %21191 = vmatprep.subr.bf16.mxu1 %v25282_v61  ;;  %v25317_v54 = vpack.c.bf16 %v14207_v38, %v14203_v30  ;;  %v25320_v11 = vsub.f32 %v14184_v8, %v14203_v30  ;;  %v26418_v2 = vand.u32 4294901760, %v25311_v15  ;;  %v14295_v59 = vand.u32 4294901760, %v14294_v6 }
0x1757   : > { %21193 = vmatpush1.bf16.msra.mxu1 %v25291_v49  ;;  %v14288_v62 = vsub.f32 %v25287_v36, %v26421_v24  ;;  %v26417_v8 = vand.u32 4294901760, %v25303_v4  ;;  %v14919_v24 = vsub.f32 %v25344_v35, %v14918_v17  ;;  %v26581_v37 = vand.u32 4294901760, %v25311_v15 }
0x1758   : > { %26571 = vst [vmem:[#allocation27_spill] sm:$0xff] %v25317_v54  ;;  %21149 = vmatpush1.bf16.msra.mxu0 %v25317_v54  ;;  %21195 = vmatprep.subr.bf16.mxu1 %v25342_v21  ;;  %v14895_v28 = vsub.f32 %v25311_v15, %v26418_v2  ;;  %v21150_v30 = vpack.c.bf16 %v14295_v59, %v14283_v1  ;;  %v14311_v6 = vand.u32 4294901760, %v25320_v11 }
0x1759   : > { %14210 = vmatprep.subr.mxu0 %v25334_v27  ;;  %v14289_v38 = vand.u32 4294901760, %v14288_v62  ;;  %v14889_v18 = vsub.f32 %v25303_v4, %v26417_v8  ;;  %v14306_v62 = vsub.f32 %v25313_v12, %v14305_v58  ;;  %v14902_v8 = vand.u32 4294901760, %v14901_v22 }
0x175a   : > { %v14324_v2 = vsub.f32 %v25322_v41, %v14323_v60  ;;  %v14920_v40 = vand.u32 4294901760, %v14919_v24  ;;  %v25467_v21 = vpack.c.bf16 %v14323_v60, %v14311_v6 }
0x175b   : > { %21197 = vmatpush1.bf16.msra.mxu1 %v25348_v34  ;;  %v14890_v45 = vand.u32 4294901760, %v14889_v18  ;;  %v25400_v1 = vpack.c.bf16 %v14301_v0, %v14289_v38  ;;  %v14307_v18 = vand.u32 4294901760, %v14306_v62  ;;  %v14912_v38 = vand.u32 4294901760, %v25350_v13 }
0x175c   : > { %14212 = vmatpush1.msra.mxu0 %v25337_v39  ;;  %v14325_v16 = vand.u32 4294901760, %v14324_v2 }
0x175d   : > { %21151 = vmatprep.subr.bf16.mxu0 %v21150_v30  ;;  %v14906_v30 = vand.u32 4294901760, %v25324_v44  ;;  %v25410_v0 = vpack.c.bf16 %v14902_v8, %v14890_v45  ;;  %v14913_v51 = vsub.f32 %v25350_v13, %v14912_v38 }
0x175f   : > { %v14907_v22 = vsub.f32 %v25324_v44, %v14906_v30  ;;  %v14914_v8 = vand.u32 4294901760, %v14913_v51  ;;  %v26577_v51 = vand.u32 4294901760, %v25287_v36 }
0x1761   : > { %v14908_v46 = vand.u32 4294901760, %v14907_v22 }
0x1763   : > { %v25423_v2 = vpack.c.bf16 %v14920_v40, %v14908_v46  ;;  %v26580_v40 = vand.u32 4294901760, %v25297_v33 }
0x1765   : > { %v25458_v46 = vpack.c.bf16 %v26581_v37, %v26580_v40 }
0x1767   : > { %26582 = vst [vmem:[#allocation35_spill] sm:$0xff] %v25458_v46 }
0x17a9   : > { %v25267_v43 = vpop.f32.mrb[58].mxu0 }
0x17aa   : > { %v13856_v20 = vpop.f32.mrb[59].mxu0 }
0x17ab   : > { %v25363_v20 = vand.u32 4294901760, %v25340_v50 }
0x17ad   : > { %14811 = vmatprep.subr.mxu1 %v25363_v20 }
0x17ae   : > { %14813 = vmatpush1.msra.mxu1 %v25373_v7 }
0x17af   : > { %v25300_v25 = vpop.f32.mrb[44].mxu1 }
0x17b0   : > { %v13570_v19 = vpop.f32.mrb[45].mxu1 }
0x17b1   : > { %v14896_v19 = vand.u32 4294901760, %v14895_v28  ;;  %v14312_v28 = vsub.f32 %v25320_v11, %v14311_v6 }
0x17b3   : > { %v21198_v59 = vpack.c.bf16 %v14896_v19, %v14884_v5  ;;  %v14319_v5 = vand.u32 4294901760, %v14318_v3  ;;  %v14313_v19 = vand.u32 4294901760, %v14312_v28  ;;  %v26583_v3 = vand.u32 4294901760, %v25303_v4 }
0x17b5   : > { %21199 = vmatprep.subr.bf16.mxu1 %v21198_v59  ;;  %v14924_v59 = vand.u32 4294901760, %v25352_v31  ;;  %v25416_v62 = vpack.c.bf16 %v14319_v5, %v14307_v18  ;;  %v25418_v29 = vpack.c.bf16 %v14325_v16, %v14313_v19  ;;  %v26578_v18 = vand.u32 4294901760, %v25289_v23 }
0x17b6   : > { %v25463_v34 = vpack.c.bf16 %v14900_v52, %v26583_v3 }
0x17b7   : > { %v14925_v45 = vsub.f32 %v25352_v31, %v14924_v59  ;;  %v25452_v16 = vpack.c.bf16 %v26578_v18, %v26577_v51  ;;  %v25469_v18 = vpack.c.bf16 %v14918_v17, %v14906_v30  ;;  %v25480_v17 = vsub.f32 %v25327_v56, %v25334_v27 }
0x17b9   : > { %v14926_v28 = vand.u32 4294901760, %v14925_v45  ;;  %v17002_v45 = vld [vmem:[%s26562_s21 + $0x1] ss:$0 sm:$0xff]  ;;  %26579 = vst [vmem:[#allocation33_spill] sm:$0xff] %v25452_v16  ;;  %v25472_v16 = vpack.c.bf16 %v14924_v59, %v14912_v38  ;;  %v25490_v38 = vsub.f32 %v25340_v50, %v25363_v20 }
0x17bb   : > { %v25429_v5 = vpack.c.bf16 %v14926_v28, %v14914_v8  ;;  %v26574_v8 = vand.u32 4294901760, %v25280_v42  ;;  %v26575_v28 = vand.u32 4294901760, %v25294_v57 }
0x17bd   : > { %v25446_v24 = vpack.c.bf16 %v26575_v28, %v26574_v8  ;;  %v25465_v28 = vpack.c.bf16 %v14317_v9, %v14305_v58 }
0x17bf   : > { %26576 = vst [vmem:[#allocation34_spill] sm:$0xff] %v25446_v24 }
0x17d1   : > { %v14082_v19 = vpop.f32.mrb[60].mxu0 }
0x17d2   : > { %v14084_v22 = vpop.f32.mrb[61].mxu0 }
0x17d3   : > { %v13569_v22 = vadd.f32 %v17002_v45, %v25300_v25 }
0x17d7   : > { %v13740_v8 = vpop.f32.mrb[46].mxu1 }
0x17d8   : > { %v13741_v24 = vadd.f32 %v13740_v8, %v13569_v22  ;;  %v13742_v54 = vpop.f32.mrb[47].mxu1 }
0x17da   : > { %v13855_v51 = vadd.f32 %v25267_v43, %v13741_v24  ;;  %v14329_v24 = vand.u32 4294901760, %v25480_v17 }
0x17ff   : > { %v13950_v37 = vpop.f32.mrb[48].mxu1 }
0x1800   : > { %v13951_v40 = vadd.f32 %v13950_v37, %v13855_v51  ;;  %v13952_v25 = vpop.f32.mrb[49].mxu1 }
0x1802   : > { %v14083_v45 = vadd.f32 %v14082_v19, %v13951_v40 }
0x1827   : > { %v14174_v46 = vpop.f32.mrb[50].mxu1 }
0x1828   : > { %v14175_v52 = vadd.f32 %v14174_v46, %v14083_v45  ;;  %v14176_v3 = vpop.f32.mrb[51].mxu1  ;;  %v25503_v46 = vsub.f32 %v25367_v47, %v25373_v7  ;;  %v14330_v47 = vsub.f32 %v25480_v17, %v14329_v24 }
0x182a   : > { %v14178_v58 = vadd.f32 %v14175_v52, %v24843_v48  ;;  %v25494_v48 = vsub.f32 %v25330_v53, %v25337_v39  ;;  %v14930_v53 = vand.u32 4294901760, %v25490_v38  ;;  %v14936_v37 = vand.u32 4294901760, %v25503_v46 }
0x182b   : > { %v14331_v52 = vand.u32 4294901760, %v14330_v47  ;;  %v25713_v47 = vld [vmem:[%s26598_s1 + $0xa8] sm:$0xff] }
0x182c   : > { %v14191_v9 = vsel %vm2818_vm15, %v14178_v58, 0  ;;  %v14791_v54 = vrot.slane %v14178_v58, 1  ;;  %v14335_v22 = vand.u32 4294901760, %v25494_v48  ;;  %v14931_v25 = vsub.f32 %v25490_v38, %v14930_v53 }
0x182d   : > { %v25476_v6 = vand.u32 4294901760, %v14191_v9  ;;  %v14937_v3 = vsub.f32 %v25503_v46, %v14936_v37 }
0x182e   : > { %v14792_v43 = vsel %vm2818_vm15, %v14791_v54, 0  ;;  %v14336_v45 = vsub.f32 %v25494_v48, %v14335_v22 }
0x182f   : > { %v25484_v60 = vsub.f32 %v14191_v9, %v25476_v6  ;;  %v25486_v30 = vand.u32 4294901760, %v14792_v43  ;;  %v14938_v9 = vand.u32 4294901760, %v14937_v3 }
0x1830   : > { %v14337_v58 = vand.u32 4294901760, %v14336_v45  ;;  %v25724_v45 = vld [vmem:[%s26598_s1 + $0x20] sm:$0xff] }
0x1831   : > { %v25497_v59 = vsub.f32 %v14792_v43, %v25486_v30  ;;  %v14270_v56 = vand.u32 4294901760, %v25484_v60 }
0x1833   : > { %v14271_v50 = vsub.f32 %v25484_v60, %v14270_v56  ;;  %v14871_v19 = vand.u32 4294901760, %v25497_v59 }
0x1835   : > { %v14272_v8 = vand.u32 4294901760, %v14271_v50  ;;  %v14872_v51 = vsub.f32 %v25497_v59, %v14871_v19 }
0x1837   : > { %14273 = vmatmul.mubr.f32.vlgmr.msra.gmra.mrb[62].mxu0 %v14272_v8  ;;  %v14873_v40 = vand.u32 4294901760, %v14872_v51 }
0x1838   : > { %21153 = vmatpush1.bf16.msra.mxu0 %v25400_v1  ;;  %14393 = vmatprep.mubr.f32.mxu0 %v26511_v26  ;;  %v14932_v1 = vand.u32 4294901760, %v14931_v25 }
0x1839   : > { %14874 = vmatmul.mubr.f32.vlgmr.msra.gmra.mrb[52].mxu1 %v14873_v40  ;;  %21155 = vmatprep.subr.bf16.mxu0 %v25416_v62  ;;  %v26585_v62 = vpack.c.bf16 %v25289_v23, %v25287_v36  ;;  %v26590_v36 = vpack.c.bf16 %v25322_v41, %v25320_v11  ;;  %v26591_v23 = vpack.c.bf16 %v25352_v31, %v25350_v13 }
0x183a   : > { %21201 = vmatpush1.bf16.msra.mxu1 %v25410_v0  ;;  %14994 = vmatprep.mubr.f32.mxu1 %v26511_v26  ;;  %v26584_v0 = vpack.c.bf16 %v25294_v57, %v25280_v42  ;;  %v26589_v42 = vpack.c.bf16 %v25344_v35, %v25324_v44  ;;  %v26592_v57 = vld [vmem:[#allocation28_spill] sm:$0xff] }
0x183b   : > { %21203 = vmatprep.subr.bf16.mxu1 %v25423_v2  ;;  %v26587_v2 = vpack.c.bf16 %v25305_v63, %v25303_v4  ;;  %v26594_v4 = vld [vmem:[#allocation32_spill] sm:$0xff]  ;;  %v26595_v63 = vld [vmem:[#allocation34_spill] sm:$0xff] }
0x183c   : > { %21157 = vmatpush1.bf16.msra.mxu0 %v25418_v29  ;;  %v26586_v29 = vpack.c.bf16 %v25311_v15, %v25297_v33  ;;  %v26593_v33 = vld [vmem:[#allocation27_spill] sm:$0xff]  ;;  %v26596_v15 = vld [vmem:[#allocation33_spill] sm:$0xff] }
0x183d   : > { %14332 = vmatprep.subr.mxu0 %v14331_v52  ;;  %v25660_v35 = vld [vmem:[%s26598_s1 + $0x90] sm:$0xff] }
0x183e   : > { %21205 = vmatpush1.bf16.msra.mxu1 %v25429_v5  ;;  %v26588_v5 = vpack.c.bf16 %v25315_v32, %v25313_v12  ;;  %v26597_v12 = vld [vmem:[#allocation35_spill] sm:$0xff] }
0x183f   : > { %14933 = vmatprep.subr.mxu1 %v14932_v1  ;;  %v25635_v32 = vld [vmem:[%s26598_s1 + $0x8] sm:$0xff] }
0x1840   : > { %14338 = vmatpush1.msra.mxu0 %v14337_v58  ;;  %v15436_v41 = vand.u32 4294901760, %v25635_v32 }
0x1841   : > { %14395 = vmatmul.mubr.f32.vlgmr.msra.gmra.mrb[62].mxu0 %v25476_v6  ;;  %21159 = vmatprep.subr.bf16.mxu0 %v26584_v0  ;;  %v25737_v0 = vld [vmem:[%s26598_s1 + $0xb0] sm:$0xff] }
0x1842   : > { %21161 = vmatpush1.bf16.msra.mxu0 %v26585_v62  ;;  %14939 = vmatpush1.msra.mxu1 %v14938_v9  ;;  %v25734_v9 = vld [vmem:[%s26598_s1 + $0x28] sm:$0xff] }
0x1843   : > { %14996 = vmatmul.mubr.f32.vlgmr.msra.gmra.mrb[52].mxu1 %v25486_v30  ;;  %21207 = vmatprep.subr.bf16.mxu1 %v26586_v29 }
0x1844   : > { %21209 = vmatpush1.bf16.msra.mxu1 %v26587_v2  ;;  %21163 = vmatprep.subr.bf16.mxu0 %v26588_v5  ;;  %v15496_v2 = vand.u32 4294901760, %v25713_v47  ;;  %v25742_v5 = vld [vmem:[%s26598_s1 + $0xb8] sm:$0xff] }
0x1845   : > { %21211 = vmatprep.subr.bf16.mxu1 %v26589_v42  ;;  %14485 = vmatprep.mubr.f32.mxu0 %v26511_v26 }
0x1846   : > { %21165 = vmatpush1.bf16.msra.mxu0 %v26590_v36  ;;  %15086 = vmatprep.mubr.f32.mxu1 %v26511_v26 }
0x1847   : > { %14427 = vmatprep.subr.mxu0 %v25480_v17 }
0x1848   : > { %21213 = vmatpush1.bf16.msra.mxu1 %v26591_v23 }
0x1849   : > { %15028 = vmatprep.subr.mxu1 %v25490_v38 }
0x184a   : > { %14430 = vmatpush1.msra.mxu0 %v25494_v48 }
0x184b   : > { %14488 = vmatmul.mubr.f32.vlgmr.msra.gmra.mrb[62].mxu0 %v25484_v60  ;;  %21167 = vmatprep.subr.bf16.mxu0 %v25271_v14 }
0x184c   : > { %21169 = vmatpush1.bf16.msra.mxu0 %v25275_v10  ;;  %15031 = vmatpush1.msra.mxu1 %v25503_v46 }
0x184d   : > { %15089 = vmatmul.mubr.f32.vlgmr.msra.gmra.mrb[52].mxu1 %v25497_v59  ;;  %21215 = vmatprep.subr.bf16.mxu1 %v25282_v61 }
0x184e   : > { %21217 = vmatpush1.bf16.msra.mxu1 %v25291_v49  ;;  %21171 = vmatprep.subr.bf16.mxu0 %v25307_v55 }
0x184f   : > { %21219 = vmatprep.subr.bf16.mxu1 %v26592_v57  ;;  %14568 = vmatprep.mubr.f32.mxu0 %v26511_v26 }
0x1850   : > { %21173 = vmatpush1.bf16.msra.mxu0 %v26593_v33  ;;  %15169 = vmatprep.mubr.f32.mxu1 %v26511_v26 }
0x1851   : > { %14511 = vmatprep.subr.mxu0 %v25334_v27 }
0x1852   : > { %21221 = vmatpush1.bf16.msra.mxu1 %v26594_v4 }
0x1853   : > { %15112 = vmatprep.subr.mxu1 %v25363_v20 }
0x1854   : > { %14513 = vmatpush1.msra.mxu0 %v25337_v39 }
0x1855   : > { %14572 = vmatmul.mubr.f32.vlgmr.msra.gmra.mrb[62].mxu0 %v14270_v56  ;;  %21175 = vmatprep.subr.bf16.mxu0 %v26595_v63  ;;  %v15448_v63 = vand.u32 4294901760, %v25734_v9 }
0x1856   : > { %21177 = vmatpush1.bf16.msra.mxu0 %v26596_v15  ;;  %15114 = vmatpush1.msra.mxu1 %v25373_v7  ;;  %v15499_v15 = vand.u32 4294901760, %v25737_v0 }
0x1857   : > { %15173 = vmatmul.mubr.f32.vlgmr.msra.gmra.mrb[52].mxu1 %v14871_v19  ;;  %21223 = vmatprep.subr.bf16.mxu1 %v26597_v12  ;;  %v25708_v19 = vld [vmem:[%s26598_s1 + $0xa0] sm:$0xff]  ;;  %v25761_v12 = vld [vmem:[%s26598_s1 + $0x30] sm:$0xff] }
0x1858   : > { %21225 = vmatpush1.bf16.msra.mxu1 %v25463_v34  ;;  %21179 = vmatprep.subr.bf16.mxu0 %v25465_v28  ;;  %v25663_v34 = vld [vmem:[%s26598_s1 + $0x98] sm:$0xff]  ;;  %v15493_v58 = vand.u32 4294901760, %v25708_v19 }
0x1859   : > { %21227 = vmatprep.subr.bf16.mxu1 %v25469_v18  ;;  %14672 = vmatprep.mubr.f32.mxu0 %v26511_v26  ;;  %v25673_v28 = vld [vmem:[%s26598_s1 + $0x18] sm:$0xff] }
0x185a   : > { %21181 = vmatpush1.bf16.msra.mxu0 %v25467_v21  ;;  %15273 = vmatprep.mubr.f32.mxu1 %v26511_v26  ;;  %v25657_v21 = vsub.f32 %v25635_v32, %v15436_v41  ;;  %v15442_v17 = vand.u32 4294901760, %v25673_v28  ;;  %v25747_v23 = vsub.f32 %v25708_v19, %v15493_v58 }
0x185b   : > { %14613 = vmatprep.subr.mxu0 %v14329_v24 }
0x185c   : > { %21229 = vmatpush1.bf16.msra.mxu1 %v25472_v16  ;;  %v25670_v16 = vld [vmem:[%s26598_s1 + $0x10] sm:$0xff]  ;;  %v26453_v54 = vand.u32 4294901760, %v25657_v21  ;;  %v25721_v25 = vsub.f32 %v25673_v28, %v15442_v17 }
0x185d   : > { %15214 = vmatprep.subr.mxu1 %v14930_v53 }
0x185e   : > { %14617 = vmatpush1.msra.mxu0 %v14335_v22  ;;  %v15555_v59 = vsub.f32 %v25657_v21, %v26453_v54  ;;  %v26435_v29 = vand.u32 4294901760, %v25721_v25 }
0x185f   : > { %14674 = vmatmul.mubr.f32.vlgmr.msra.gmra.mrb[62].mxu0 %v25476_v6  ;;  %21183 = vmatprep.subr.bf16.mxu0 %v25271_v14  ;;  %v25624_v14 = vld [vmem:[%s26598_s1 + $0x80] sm:$0xff] }
0x1860   : > { %21185 = vmatpush1.bf16.msra.mxu0 %v25275_v10  ;;  %15218 = vmatpush1.msra.mxu1 %v14936_v37  ;;  %v25627_v10 = vld [vmem:[%s26598_s1 + $0x88] sm:$0xff]  ;;  %v15556_v22 = vand.u32 4294901760, %v15555_v59  ;;  %v15502_v59 = vand.u32 4294901760, %v25742_v5 }
0x1861   : > { %15275 = vmatmul.mubr.f32.vlgmr.msra.gmra.mrb[52].mxu1 %v25486_v30  ;;  %21231 = vmatprep.subr.bf16.mxu1 %v25282_v61  ;;  %v15481_v61 = vand.u32 4294901760, %v25624_v14 }
0x1862   : > { %21233 = vmatpush1.bf16.msra.mxu1 %v25291_v49  ;;  %21187 = vmatprep.subr.bf16.mxu0 %v25307_v55  ;;  %v15484_v49 = vand.u32 4294901760, %v25627_v10  ;;  %v25632_v55 = vld [vmem:[%s26598_s1] sm:$0xff] }
0x1863   : > { %21235 = vmatprep.subr.bf16.mxu1 %v26592_v57  ;;  %14754 = vmatprep.mubr.f32.mxu0 %v26511_v26  ;;  %v15433_v11 = vand.u32 4294901760, %v25632_v55  ;;  %v25642_v44 = vsub.f32 %v25624_v14, %v15481_v61  ;;  %v15445_v57 = vand.u32 4294901760, %v25724_v45 }
0x1864   : > { %21189 = vmatpush1.bf16.msra.mxu0 %v26593_v33  ;;  %15355 = vmatprep.mubr.f32.mxu1 %v26511_v26  ;;  %v15569_v33 = vsub.f32 %v25721_v25, %v26435_v29 }
0x1865   : > { %14697 = vmatprep.subr.mxu0 %v25334_v27  ;;  %26599 = vst [vmem:[#allocation36_spill] sm:$0xff] %v25642_v44  ;;  %v25647_v27 = vsub.f32 %v25627_v10, %v15484_v49  ;;  %v26457_v13 = vand.u32 4294901760, %v25642_v44  ;;  %v25903_v19 = vpack.c.bf16 %v15448_v63, %v15445_v57 }
0x1866   : > { %21237 = vmatpush1.bf16.msra.mxu1 %v26594_v4  ;;  %v25756_v4 = vsub.f32 %v25713_v47, %v15496_v2 }
0x1867   : > { %15298 = vmatprep.subr.mxu1 %v25363_v20  ;;  %26600 = vst [vmem:[#allocation28_spill] sm:$0xff] %v25647_v27  ;;  %v26456_v31 = vand.u32 4294901760, %v25647_v27  ;;  %v15487_v20 = vand.u32 4294901760, %v25660_v35  ;;  %v15660_v43 = vsub.f32 %v25642_v44, %v26457_v13 }
0x1868   : > { %14699 = vmatpush1.msra.mxu0 %v25337_v39  ;;  %v25652_v39 = vsub.f32 %v25632_v55, %v15433_v11 }
0x1869   : > { %14756 = vmatmul.mubr.f32.vlgmr.msra.gmra.mrb[62].mxu0 %v25476_v6  ;;  %v15439_v6 = vand.u32 4294901760, %v25670_v16  ;;  %v15667_v60 = vsub.f32 %v25647_v27, %v26456_v31  ;;  %v15661_v24 = vand.u32 4294901760, %v15660_v43  ;;  %v15402_v31 = vld [vmem:[%s26598_s1 + $0x70] sm:$0xff] }
0x186a   : > { %15300 = vmatpush1.msra.mxu1 %v25373_v7  ;;  %v15490_v7 = vand.u32 4294901760, %v25663_v34  ;;  %v26455_v18 = vand.u32 4294901760, %v25652_v39 }
0x186b   : > { %15357 = vmatmul.mubr.f32.vlgmr.msra.gmra.mrb[52].mxu1 %v25486_v30  ;;  %v25688_v30 = vsub.f32 %v25660_v35, %v15487_v20  ;;  %v25704_v56 = vsub.f32 %v25670_v16, %v15439_v6  ;;  %v15668_v46 = vand.u32 4294901760, %v15667_v60  ;;  %v26434_v60 = vand.u32 4294901760, %v25747_v23 }
0x186c   : > { %v25693_v38 = vsub.f32 %v25663_v34, %v15490_v7  ;;  %v15548_v48 = vsub.f32 %v25652_v39, %v26455_v18 }
0x186d   : > { %v26451_v50 = vand.u32 4294901760, %v25688_v30  ;;  %v26440_v51 = vand.u32 4294901760, %v25704_v56  ;;  %v21270_v37 = vpack.c.bf16 %v15668_v46, %v15661_v24  ;;  %v15570_v24 = vand.u32 4294901760, %v15569_v33 }
0x186e   : > { %v15549_v53 = vand.u32 4294901760, %v15548_v48  ;;  %v26443_v8 = vand.u32 4294901760, %v25693_v38  ;;  %v25767_v48 = vsub.f32 %v25724_v45, %v15445_v57  ;;  %v26439_v46 = vand.u32 4294901760, %v25756_v4 }
0x186f   : > { %v15674_v40 = vsub.f32 %v25688_v30, %v26451_v50  ;;  %v15562_v1 = vsub.f32 %v25704_v56, %v26440_v51  ;;  %21271 = vmatprep.subr.bf16.mxu1 %v21270_v37  ;;  %v15688_v37 = vsub.f32 %v25747_v23, %v26434_v60  ;;  %v25805_v60 = vld [vmem:[%s26598_s1 + $0xc0] sm:$0xff] }
0x1870   : > { %v21272_v52 = vpack.c.bf16 %v15556_v22, %v15549_v53  ;;  %v15681_v3 = vsub.f32 %v25693_v38, %v26443_v8  ;;  %v25774_v53 = vsub.f32 %v25734_v9, %v15448_v63  ;;  %v25779_v22 = vsub.f32 %v25737_v0, %v15499_v15 }
0x1871   : > { %v15675_v62 = vand.u32 4294901760, %v15674_v40  ;;  %v15563_v36 = vand.u32 4294901760, %v15562_v1  ;;  %v26438_v40 = vand.u32 4294901760, %v25767_v48  ;;  %v15451_v1 = vand.u32 4294901760, %v25761_v12 }
0x1872   : > { %21273 = vmatpush3.bf16.msra.mxu1 %v21272_v52  ;;  %v15682_v42 = vand.u32 4294901760, %v15681_v3  ;;  %v25788_v52 = vsub.f32 %v25742_v5, %v15502_v59  ;;  %v25791_v3 = vld [vmem:[%s26598_s1 + $0x38] sm:$0xff]  ;;  %v15695_v33 = vsub.f32 %v25756_v4, %v26439_v46  ;;  %v15689_v29 = vand.u32 4294901760, %v15688_v37  ;;  %v25833_v37 = vld [vmem:[%s26598_s1 + $0xc8] sm:$0xff] }
0x1873   : > { %v15576_v14 = vsub.f32 %v25767_v48, %v26438_v40  ;;  %v26437_v10 = vand.u32 4294901760, %v25779_v22  ;;  %v15454_v32 = vand.u32 4294901760, %v25791_v3  ;;  %v25846_v40 = vld [vmem:[%s26598_s1 + $0x40] sm:$0xff]  ;;  %v25849_v46 = vld [vmem:[%s26598_s1 + $0x48] sm:$0xff]  ;;  %v15508_v16 = vand.u32 4294901760, %v25833_v37 }
0x1874   : > { %v21274_v43 = vpack.c.bf16 %v15682_v42, %v15675_v62  ;;  %v21276_v62 = vpack.c.bf16 %v15570_v24, %v15563_v36  ;;  %v25798_v42 = vpack.c.bf16 %v15484_v49, %v15481_v61  ;;  %v25811_v36 = vpack.c.bf16 %v15436_v41, %v15433_v11 }
0x1875   : > { %v15696_v61 = vand.u32 4294901760, %v15695_v33  ;;  %v26442_v55 = vand.u32 4294901760, %v25788_v52  ;;  %v15577_v11 = vand.u32 4294901760, %v15576_v14  ;;  %v15702_v41 = vsub.f32 %v25779_v22, %v26437_v10 }
0x1876   : > { %21275 = vmatprep.subr.bf16.mxu1 %v21274_v43  ;;  %v26436_v43 = vand.u32 4294901760, %v25774_v53  ;;  %21239 = vmatprep.subr.bf16.mxu0 %v25798_v42  ;;  %v25830_v24 = vsub.f32 %v25761_v12, %v15451_v1  ;;  %v25840_v14 = vpack.c.bf16 %v15490_v7, %v15487_v20  ;;  %v25861_v34 = vsub.f32 %v25791_v3, %v15454_v32  ;;  %v25965_v3 = vld [vmem:[%s26598_s1 + $0xe8] sm:$0xff] }
0x1877   : > { %21277 = vmatpush3.bf16.msra.mxu1 %v21276_v62  ;;  %21241 = vmatpush3.bf16.msra.mxu0 %v25811_v36  ;;  %v15505_v62 = vand.u32 4294901760, %v25805_v60  ;;  %v21278_v33 = vpack.c.bf16 %v15696_v61, %v15689_v29  ;;  %v15709_v10 = vsub.f32 %v25788_v52, %v26442_v55  ;;  %v15703_v51 = vand.u32 4294901760, %v15702_v41  ;;  %v25894_v55 = vld [vmem:[%s26598_s1 + $0x50] sm:$0xff] }
0x1878   : > { %v15583_v49 = vsub.f32 %v25774_v53, %v26436_v43  ;;  %v25855_v29 = vpack.c.bf16 %v15442_v17, %v15439_v6  ;;  %v26441_v35 = vand.u32 4294901760, %v25830_v24  ;;  %21243 = vmatprep.subr.bf16.mxu0 %v25840_v14  ;;  %v26445_v17 = vand.u32 4294901760, %v25861_v34 }
0x1879   : > { %21279 = vmatprep.subr.bf16.mxu1 %v21278_v33  ;;  %v15710_v7 = vand.u32 4294901760, %v15709_v10  ;;  %v25868_v28 = vsub.f32 %v25805_v60, %v15505_v62  ;;  %v15460_v61 = vand.u32 4294901760, %v25849_v46  ;;  %v25878_v10 = vld [vmem:[%s26598_s1 + $0xd0] sm:$0xff]  ;;  %v25888_v33 = vsub.f32 %v25833_v37, %v15508_v16 }
0x187a   : > { %v15584_v43 = vand.u32 4294901760, %v15583_v49  ;;  %v15590_v6 = vsub.f32 %v25830_v24, %v26441_v35  ;;  %v25891_v35 = vld [vmem:[%s26598_s1 + $0xd8] sm:$0xff]  ;;  %v15511_v45 = vand.u32 4294901760, %v25878_v10 }
0x187b   : > { %21245 = vmatpush3.bf16.msra.mxu0 %v25855_v29  ;;  %v21282_v49 = vpack.c.bf16 %v15710_v7, %v15703_v51  ;;  %v26444_v41 = vand.u32 4294901760, %v25868_v28  ;;  %v15597_v51 = vsub.f32 %v25861_v34, %v26445_v17  ;;  %v25914_v37 = vsub.f32 %v25849_v46, %v15460_v61 }
0x187c   : > { %v21280_v20 = vpack.c.bf16 %v15584_v43, %v15577_v11  ;;  %v15457_v43 = vand.u32 4294901760, %v25846_v40  ;;  %v25884_v11 = vpack.c.bf16 %v15496_v2, %v15493_v58  ;;  %v15591_v8 = vand.u32 4294901760, %v15590_v6 }
0x187d   : > { %v15716_v58 = vsub.f32 %v25868_v28, %v26444_v41  ;;  %v26446_v2 = vand.u32 4294901760, %v25888_v33  ;;  %v15598_v9 = vand.u32 4294901760, %v15597_v51  ;;  %v15514_v63 = vand.u32 4294901760, %v25891_v35 }
0x187e   : > { %21281 = vmatpush3.bf16.msra.mxu1 %v21280_v20  ;;  %v25906_v47 = vsub.f32 %v25846_v40, %v15457_v43  ;;  %21247 = vmatprep.subr.bf16.mxu0 %v25884_v11  ;;  %v25921_v40 = vld [vmem:[%s26598_s1 + $0x58] sm:$0xff]  ;;  %v15463_v20 = vand.u32 4294901760, %v25894_v55  ;;  %v26449_v6 = vand.u32 4294901760, %v25914_v37 }
0x187f   : > { %21283 = vmatprep.subr.bf16.mxu1 %v21282_v49  ;;  %21249 = vmatpush3.bf16.msra.mxu0 %v25903_v19  ;;  %v15717_v7 = vand.u32 4294901760, %v15716_v58  ;;  %v15723_v46 = vsub.f32 %v25888_v33, %v26446_v2  ;;  %v25932_v49 = vpack.c.bf16 %v15502_v59, %v15499_v15  ;;  %v21284_v51 = vpack.c.bf16 %v15598_v9, %v15591_v8  ;;  %v25955_v15 = vld [vmem:[%s26598_s1 + $0xe0] sm:$0xff] }
0x1880   : > { %v26450_v57 = vand.u32 4294901760, %v25906_v47  ;;  %v25938_v58 = vsub.f32 %v25878_v10, %v15511_v45  ;;  %v25941_v17 = vsub.f32 %v25891_v35, %v15514_v63  ;;  %v15611_v0 = vsub.f32 %v25914_v37, %v26449_v6 }
0x1881   : > { %v15724_v2 = vand.u32 4294901760, %v15723_v46  ;;  %21251 = vmatprep.subr.bf16.mxu0 %v25932_v49  ;;  %v25951_v8 = vpack.c.bf16 %v15454_v32, %v15451_v1  ;;  %v15466_v5 = vand.u32 4294901760, %v25921_v40  ;;  %v25962_v12 = vsub.f32 %v25894_v55, %v15463_v20 }
0x1882   : > { %v15604_v41 = vsub.f32 %v25906_v47, %v26450_v57  ;;  %21285 = vmatpush3.bf16.msra.mxu1 %v21284_v51  ;;  %v26447_v35 = vand.u32 4294901760, %v25938_v58  ;;  %v26448_v10 = vand.u32 4294901760, %v25941_v17  ;;  %v15612_v32 = vand.u32 4294901760, %v15611_v0  ;;  %v25984_v0 = vld [vmem:[%s26598_s1 + $0x60] sm:$0xff] }
0x1883   : > { %v21286_v1 = vpack.c.bf16 %v15724_v2, %v15717_v7  ;;  %21253 = vmatpush3.bf16.msra.mxu0 %v25951_v8  ;;  %v25969_v9 = vsub.f32 %v25921_v40, %v15466_v5  ;;  %v26452_v2 = vand.u32 4294901760, %v25962_v12  ;;  %v15517_v7 = vand.u32 4294901760, %v25955_v15  ;;  %v15401_v40 = vld [vmem:[%s26598_s1 + $0x68] sm:$0xff] }
0x1884   : > { %v15605_v59 = vand.u32 4294901760, %v15604_v41  ;;  %v25973_v41 = vpack.c.bf16 %v15508_v16, %v15505_v62  ;;  %v15730_v46 = vsub.f32 %v25938_v58, %v26447_v35  ;;  %v15737_v51 = vsub.f32 %v25941_v17, %v26448_v10 }
0x1885   : > { %21287 = vmatprep.subr.bf16.mxu1 %v21286_v1  ;;  %v26454_v62 = vand.u32 4294901760, %v25969_v9  ;;  %v15520_v16 = vand.u32 4294901760, %v25965_v3  ;;  %v25990_v35 = vpack.c.bf16 %v15460_v61, %v15457_v43  ;;  %v15618_v57 = vsub.f32 %v25962_v12, %v26452_v2 }
0x1886   : > { %26601 = vst [vmem:[#allocation27_spill] sm:$0xff] %v25973_v41  ;;  %v21288_v60 = vpack.c.bf16 %v15612_v32, %v15605_v59  ;;  %21255 = vmatprep.subr.bf16.mxu0 %v25973_v41  ;;  %v15731_v10 = vand.u32 4294901760, %v15730_v46  ;;  %v15738_v6 = vand.u32 4294901760, %v15737_v51  ;;  %v25996_v50 = vsub.f32 %v25955_v15, %v15517_v7  ;;  %v15418_v32 = vld [vmem:[%s26598_s1 + $0xf0] sm:$0xff]  ;;  %v15419_v46 = vld [vmem:[%s26598_s1 + $0xf8] sm:$0xff] }
0x1887   : > { %26602 = vst [vmem:[#allocation32_spill] sm:$0xff] %v25990_v35  ;;  %v15625_v59 = vsub.f32 %v25969_v9, %v26454_v62  ;;  %v26002_v1 = vsub.f32 %v25965_v3, %v15520_v16  ;;  %21257 = vmatpush3.bf16.msra.mxu0 %v25990_v35  ;;  %v15469_v43 = vand.u32 4294901760, %v25984_v0  ;;  %v15472_v61 = vand.u32 4294901760, %v15401_v40 }
0x1888   : > { %21289 = vmatpush3.bf16.msra.mxu1 %v21288_v60  ;;  %v21290_v51 = vpack.c.bf16 %v15738_v6, %v15731_v10  ;;  %v15619_v15 = vand.u32 4294901760, %v15618_v57  ;;  %v26458_v60 = vand.u32 4294901760, %v25996_v50  ;;  %v26009_v2 = vpack.c.bf16 %v15514_v63, %v15511_v45  ;;  %v15403_v63 = vld [vmem:[%s26598_s1 + $0x78] sm:$0xff]  ;;  %s26605_s1 = sld [smem:[#allocation24_spill]] }
0x1889   : > { %v15626_v54 = vand.u32 4294901760, %v15625_v59  ;;  %v26460_v62 = vand.u32 4294901760, %v26002_v1  ;;  %v26013_v3 = vsub.f32 %v25984_v0, %v15469_v43  ;;  %v26015_v18 = vsub.f32 %v15401_v40, %v15472_v61 }
0x188a   : > { %26603 = vst [vmem:[#allocation34_spill] sm:$0xff] %v26009_v2  ;;  %21291 = vmatprep.subr.bf16.mxu1 %v21290_v51  ;;  %v15744_v13 = vsub.f32 %v25996_v50, %v26458_v60  ;;  %21259 = vmatprep.subr.bf16.mxu0 %v26009_v2  ;;  %v15523_v57 = vand.u32 4294901760, %v15418_v32  ;;  %v15526_v6 = vand.u32 4294901760, %v15419_v46  ;;  %v26024_v45 = vpack.c.bf16 %v15466_v5, %v15463_v20 }
0x188b   : > { %v21292_v10 = vpack.c.bf16 %v15626_v54, %v15619_v15  ;;  %v15751_v0 = vsub.f32 %v26002_v1, %v26460_v62  ;;  %v26465_v40 = vand.u32 4294901760, %v26013_v3  ;;  %v26468_v59 = vand.u32 4294901760, %v26015_v18 }
0x188c   : > { %26604 = vst [vmem:[#allocation33_spill] sm:$0xff] %v26024_v45  ;;  %v15745_v51 = vand.u32 4294901760, %v15744_v13  ;;  %v26032_v60 = vsub.f32 %v15418_v32, %v15523_v57  ;;  %v26034_v26 = vsub.f32 %v15419_v46, %v15526_v6  ;;  %21261 = vmatpush3.bf16.msra.mxu0 %v26024_v45  ;;  %v15475_v55 = vand.u32 4294901760, %v15402_v31 }
0x188d   : > { %21293 = vmatpush3.bf16.msra.mxu1 %v21292_v10  ;;  %v15752_v20 = vand.u32 4294901760, %v15751_v0  ;;  %v15632_v54 = vsub.f32 %v26013_v3, %v26465_v40  ;;  %v15639_v5 = vsub.f32 %v26015_v18, %v26468_v59  ;;  %v15478_v15 = vand.u32 4294901760, %v15403_v63 }
0x188e   : > { %v15757_v13 = vand.u32 4294901760, %v26032_v60  ;;  %v15764_v32 = vand.u32 4294901760, %v26034_v26  ;;  %v26045_v46 = vsub.f32 %v15402_v31, %v15475_v55  ;;  %v26047_v62 = vpack.c.bf16 %v15520_v16, %v15517_v7 }
0x188f   : > { %v21294_v45 = vpack.c.bf16 %v15752_v20, %v15745_v51  ;;  %v15633_v10 = vand.u32 4294901760, %v15632_v54  ;;  %v15640_v0 = vand.u32 4294901760, %v15639_v5  ;;  %v26049_v2 = vsub.f32 %v15403_v63, %v15478_v15 }
0x1890   : > { %v15758_v40 = vsub.f32 %v26032_v60, %v15757_v13  ;;  %v15765_v35 = vsub.f32 %v26034_v26, %v15764_v32  ;;  %v15645_v59 = vand.u32 4294901760, %v26045_v46  ;;  %21263 = vmatprep.subr.bf16.mxu0 %v26047_v62  ;;  %v26055_v41 = vpack.c.bf16 %v15472_v61, %v15469_v43 }
0x1891   : > { %21295 = vmatprep.subr.bf16.mxu1 %v21294_v45  ;;  %v21296_v31 = vpack.c.bf16 %v15640_v0, %v15633_v10  ;;  %v15652_v7 = vand.u32 4294901760, %v26049_v2  ;;  %v26058_v16 = vpack.c.bf16 %v15526_v6, %v15523_v57  ;;  %v26062_v54 = vpack.c.bf16 %v15478_v15, %v15475_v55  ;;  %v26608_v0 = vld [vmem:[#allocation29_spill] sm:$0xff] }
0x1892   : > { %v15759_v51 = vand.u32 4294901760, %v15758_v40  ;;  %v15766_v20 = vand.u32 4294901760, %v15765_v35  ;;  %v15646_v63 = vsub.f32 %v26045_v46, %v15645_v59  ;;  %21265 = vmatpush3.bf16.msra.mxu0 %v26055_v41  ;;  %v21302_v45 = vpack.c.bf16 %v25647_v27, %v25642_v44 }
0x1893   : > { %21297 = vmatpush3.bf16.msra.mxu1 %v21296_v31  ;;  %v15653_v5 = vsub.f32 %v26049_v2, %v15652_v7  ;;  %21267 = vmatprep.subr.bf16.mxu0 %v26058_v16 }
0x1894   : > { %v21298_v43 = vpack.c.bf16 %v15766_v20, %v15759_v51  ;;  %v15647_v61 = vand.u32 4294901760, %v15646_v63  ;;  %v26102_v20 = vpack.c.bf16 %v15652_v7, %v15645_v59  ;;  %v22062_v63 = vmov 1966171168  }
0x1895   : > { %v15654_v57 = vand.u32 4294901760, %v15653_v5  ;;  %v14766_v51 = vunpack.c.l.s4 %v22062_v63 }
0x1896   : > { %21299 = vmatprep.subr.bf16.mxu1 %v21298_v43  ;;  %21269 = vmatpush3.bf16.msra.mxu0 %v26062_v54  ;;  %26607 = vst [vmem:[#allocation37_spill] sm:$0xff] %v26102_v20 }
0x1897   : > { %v21300_v6 = vpack.c.bf16 %v15654_v57, %v15647_v61  ;;  %21303 = vmatprep.subr.bf16.mxu0 %v21302_v45  ;;  %v14767_v5 = vunpack.c.0.s8 %v14766_v51  ;;  %v14179_v45 = vld [vmem:[%s26605_s1] sm:$0x3]  ;;  %s921_s1 = sand.u32 1, %s22019_s16  }
0x1898   : > { %s922_s5 = scalar_lea.vmem [#allocation2], %s921_s1  ;;  %s16808_s9 = scalar_lea.sflag [#allocation3], %s921_s1 }
0x1899   : > { %21301 = vmatpush3.bf16.msra.mxu1 %v21300_v6  ;;  %v26100_v6 = vpack.c.bf16 %v15764_v32, %v15757_v13  ;;  %v14770_v43 = vsub.s32 %v14767_v5, %v26608_v0  ;;  %v26609_v0 = vld [vmem:[#allocation31_spill] sm:$0xff]  ;;  %s16820_s6 = sshll.u32 %s922_s5, 4  ;;  %s26316_s6 = int_to_ptr.vmem [resolvable:$true] %s16820_s6 }
0x189a   : > { %21335 = vmatprep.subr.bf16.mxu1 %v25798_v42  ;;  %s21965_s11 = scalar_lea.vmem %s26316_s6, 16 }
0x189b   : > { %26606 = vst [vmem:[#allocation35_spill] sm:$0xff] %v26100_v6  ;;  %p21966_p11 = scmp.ne.s32.totalorder %s26316_s6, %s21965_s11 }
0x189d   : > { %p21967_p12 = pnand %p21966_p11, %p22262_p5 }
0x189f   : > { %p21968_p13 = pneg %p21967_p12 }
0x193c   : > { %v14757_v31 = vpop.f32.mrb[62].mxu0 }
0x193d   : > { %v14759_v10 = vpop.f32.mrb[63].mxu0 }
0x193e   : > { %v14764_v15 = vcombine.low %v14757_v31, %v14759_v10  ;;  %v15358_v61 = vpop.f32.mrb[52].mxu1  ;;  %v26610_v10 = vld [vmem:[#allocation30_spill] sm:$0xff] }
0x193f   : > { %v15360_v55 = vpop.f32.mrb[53].mxu1 }
0x1940   : > { %v14771_v40 = vrot.slane %v14764_v15, %v14770_v43  ;;  %v15365_v35 = vcombine.low %v15358_v61, %v15360_v55 }
0x1942   : > { %v14778_v27 = vrot.slane %v14771_v40, %v14770_v43  ;;  %v15372_v44 = vrot.slane %v15365_v35, %v14770_v43 }
0x1944   : > { %v14780_v57 = vadd.f32 %v14778_v27, %v14179_v45  ;;  %v15379_v13 = vrot.slane %v15372_v44, %v14770_v43  ;;  %v26611_v45 = vpack.c.bf16 %v25657_v21, %v25652_v39 }
0x1946   : > { %v15381_v32 = vadd.f32 %v15379_v13, %v14780_v57  ;;  %v26612_v57 = vpack.c.bf16 %v25693_v38, %v25688_v30  ;;  %v26613_v13 = vpack.c.bf16 %v25721_v25, %v25704_v56 }
0x1948   : > { %v15383_v59 = vmin.f32 %v15381_v32, 0.0  ;;  %vm15382_vm5 = vcmp.gt.f32.partialorder %v15381_v32, 0.0 }
0x194a   : > { %v15384_v7 = vmul.f32 1.442695, %v15383_v59  ;;  %v26615_v59 = vld [vmem:[#allocation27_spill] sm:$0xff] }
0x194c   : > { %21957 = vpow2.f32 %v15384_v7  ;;  %v26616_v7 = vpack.c.bf16 %v25774_v53, %v25767_v48 }
0x1956   : > { %v21958_v63 = vpop.eup %21957 }
0x1957   : > { %v17003_v51 = vadd.f32 -1.0, %v21958_v63  ;;  %v26617_v63 = vld [vmem:[#allocation32_spill] sm:$0xff] }
0x1959   : > { %v15387_v20 = vsel %vm15382_vm5, %v15381_v32, %v17003_v51  ;;  %v26614_v32 = vpack.c.bf16 %v25756_v4, %v25747_v23  ;;  %v26618_v51 = vpack.c.bf16 %v25788_v52, %v25779_v22 }
0x195a   : > { %v15429_v5 = vrot.slane %v15387_v20, %v26609_v0  ;;  %v15425_v31 = vrot.slane %v15387_v20, %v26610_v10  ;;  %v26619_v0 = vld [vmem:[#allocation34_spill] sm:$0xff]  ;;  %v26621_v10 = vld [vmem:[#allocation33_spill] sm:$0xff] }
0x195c   : > { %v15528_v6 = vand.u32 4294901760, %v15429_v5  ;;  %v26108_v15 = vand.u32 4294901760, %v15425_v31 }
0x195e   : > { %15769 = vmatprep.mubr.f32.mxu1 %v15528_v6  ;;  %v15535_v35 = vsub.f32 %v15425_v31, %v26108_v15  ;;  %v15529_v27 = vsub.f32 %v15429_v5, %v15528_v6  ;;  %v26620_v5 = vpack.c.bf16 %v25861_v34, %v25830_v24  ;;  %v26622_v31 = vpack.c.bf16 %v25888_v33, %v25868_v28 }
0x195f   : > { %15771 = vmatmul.mubr.f32.vlgmr.msra.gmra.mrb[54].mxu1 %v26108_v15 }
0x1960   : > { %21337 = vmatpush3.bf16.msra.mxu1 %v25811_v36  ;;  %v15530_v44 = vand.u32 4294901760, %v15529_v27  ;;  %v15536_v40 = vand.u32 4294901760, %v15535_v35 }
0x1961   : > { %21339 = vmatprep.subr.bf16.mxu1 %v25840_v14 }
0x1962   : > { %16013 = vmatprep.mubr.f32.mxu1 %v15530_v44  ;;  %v15531_v55 = vsub.f32 %v15529_v27, %v15530_v44  ;;  %v15537_v43 = vsub.f32 %v15535_v35, %v15536_v40  ;;  %v26624_v44 = vpack.c.bf16 %v25941_v17, %v25938_v58 }
0x1964   : > { %21341 = vmatpush3.bf16.msra.mxu1 %v25855_v29  ;;  %v15532_v20 = vand.u32 4294901760, %v15531_v55  ;;  %v15538_v61 = vand.u32 4294901760, %v15537_v43  ;;  %v26625_v55 = vpack.c.bf16 %v25969_v9, %v25962_v12  ;;  %v26626_v43 = vpack.c.bf16 %v26002_v1, %v25996_v50 }
0x1965   : > { %21343 = vmatprep.subr.bf16.mxu1 %v25884_v11 }
0x1966   : > { %15533 = vmatprep.mubr.f32.mxu0 %v15532_v20  ;;  %v26627_v20 = vpack.c.bf16 %v26015_v18, %v26013_v3 }
0x1967   : > { %15539 = vmatmul.mubr.f32.vlgmr.msra.gmra.mrb[64].mxu0 %v15538_v61  ;;  %v26628_v61 = vpack.c.bf16 %v26034_v26, %v26032_v60  ;;  %v26636_v26 = vand.u32 4294901760, %v25688_v30  ;;  %v26637_v60 = vand.u32 4294901760, %v25693_v38  ;;  %v26642_v30 = vand.u32 4294901760, %v25767_v48 }
0x1968   : > { %21305 = vmatpush3.bf16.msra.mxu0 %v26611_v45  ;;  %21345 = vmatpush3.bf16.msra.mxu1 %v25903_v19  ;;  %v26629_v45 = vld [vmem:[#allocation36_spill] sm:$0xff]  ;;  %v26643_v38 = vand.u32 4294901760, %v25774_v53  ;;  %v26648_v48 = vand.u32 4294901760, %v25868_v28  ;;  %v26649_v53 = vand.u32 4294901760, %v25888_v33  ;;  %v26654_v28 = vand.u32 4294901760, %v25962_v12 }
0x1969   : > { %15906 = vmatprep.mubr.f32.mxu0 %v15529_v27  ;;  %21307 = vmatprep.subr.bf16.mxu0 %v26612_v57  ;;  %v26623_v27 = vpack.c.bf16 %v25914_v37, %v25906_v47  ;;  %v26630_v57 = vand.u32 4294901760, %v26629_v45  ;;  %v26655_v33 = vand.u32 4294901760, %v25969_v9  ;;  %v26659_v12 = vand.u32 4294901760, %v26015_v18  ;;  %v26661_v9 = vld [vmem:[#allocation37_spill] sm:$0xff]  ;;  %v16300_v18 = vld [vmem:[%s22212_s27] sm:$0xff] }
0x196a   : > { %21347 = vmatprep.subr.bf16.mxu1 %v25932_v49 }
0x196c   : > { %21309 = vmatpush3.bf16.msra.mxu0 %v26613_v13  ;;  %21349 = vmatpush3.bf16.msra.mxu1 %v25951_v8  ;;  %v26631_v13 = vld [vmem:[#allocation28_spill] sm:$0xff] }
0x196d   : > { %21311 = vmatprep.subr.bf16.mxu0 %v26614_v32  ;;  %21351 = vmatprep.subr.bf16.mxu1 %v26615_v59  ;;  %v26632_v32 = vand.u32 4294901760, %v26631_v13 }
0x1970   : > { %21313 = vmatpush3.bf16.msra.mxu0 %v26616_v7  ;;  %21353 = vmatpush3.bf16.msra.mxu1 %v26617_v63  ;;  %v21366_v7 = vpack.c.bf16 %v26632_v32, %v26630_v57 }
0x1971   : > { %21315 = vmatprep.subr.bf16.mxu0 %v26618_v51  ;;  %21355 = vmatprep.subr.bf16.mxu1 %v26619_v0 }
0x1974   : > { %21317 = vmatpush3.bf16.msra.mxu0 %v26620_v5  ;;  %21357 = vmatpush3.bf16.msra.mxu1 %v26621_v10  ;;  %v21370_v5 = vpack.c.bf16 %v26637_v60, %v26636_v26 }
0x1975   : > { %21319 = vmatprep.subr.bf16.mxu0 %v26622_v31  ;;  %21359 = vmatprep.subr.bf16.mxu1 %v26047_v62  ;;  %v16302_v31 = vld [vmem:[%s22212_s27 + $0x10] sm:$0xff] }
0x1978   : > { %21321 = vmatpush3.bf16.msra.mxu0 %v26623_v27  ;;  %21361 = vmatpush3.bf16.msra.mxu1 %v26055_v41  ;;  %v16303_v27 = vld [vmem:[%s22212_s27 + $0x18] sm:$0xff] }
0x1979   : > { %21323 = vmatprep.subr.bf16.mxu0 %v26624_v44  ;;  %21363 = vmatprep.subr.bf16.mxu1 %v26058_v16  ;;  %v16315_v44 = vand.u32 4294901760, %v16302_v31 }
0x197c   : > { %21325 = vmatpush3.bf16.msra.mxu0 %v26625_v55  ;;  %21365 = vmatpush3.bf16.msra.mxu1 %v26062_v54  ;;  %v16318_v55 = vand.u32 4294901760, %v16303_v27 }
0x197d   : > { %21327 = vmatprep.subr.bf16.mxu0 %v26626_v43  ;;  %21399 = vmatprep.subr.bf16.mxu1 %v25798_v42  ;;  %v26633_v42 = vpack.c.bf16 %v26049_v2, %v26045_v46  ;;  %v21376_v46 = vpack.c.bf16 %v26643_v38, %v26642_v30 }
0x197e   : > { %v26269_v45 = vsub.f32 %v16303_v27, %v16318_v55 }
0x197f   : > { %16017 = vmatmul.mubr.f32.vlgmr.msra.gmra.mrb[56].mxu1 %v15536_v40  ;;  %v26635_v40 = vand.u32 4294901760, %v25657_v21  ;;  %v26641_v21 = vand.u32 4294901760, %v25756_v4  ;;  %v26647_v4 = vand.u32 4294901760, %v25861_v34  ;;  %v26653_v34 = vand.u32 4294901760, %v25941_v17 }
0x1980   : > { %21329 = vmatpush3.bf16.msra.mxu0 %v26627_v20  ;;  %21401 = vmatpush3.bf16.msra.mxu1 %v25811_v36  ;;  %v26634_v36 = vand.u32 4294901760, %v25652_v39  ;;  %v26640_v39 = vand.u32 4294901760, %v25747_v23  ;;  %v26646_v23 = vand.u32 4294901760, %v25830_v24  ;;  %v26652_v24 = vand.u32 4294901760, %v25938_v58 }
0x1981   : > { %16287 = vmatprep.mubr.f32.mxu1 %v15528_v6  ;;  %21331 = vmatprep.subr.bf16.mxu0 %v26628_v61  ;;  %v26658_v17 = vand.u32 4294901760, %v26013_v3  ;;  %v16301_v3 = vld [vmem:[%s22212_s27 + $0x8] sm:$0xff]  ;;  %v26265_v20 = vpack.c.bf16 %v16318_v55, %v16315_v44  ;;  %v26267_v61 = vsub.f32 %v16302_v31, %v16315_v44  ;;  %v16304_v31 = vld [vmem:[%s26664_s4] sm:$0x1]  ;;  %s17005_s4 = sshll.u32 %s22245_s0, 4  ;;  %s22063_s0 = smov [#allocation2]  }
0x1982   : > { %21403 = vmatprep.subr.bf16.mxu1 %v25840_v14  ;;  %v21368_v51 = vpack.c.bf16 %v26635_v40, %v26634_v36  ;;  %v26638_v14 = vand.u32 4294901760, %v25704_v56  ;;  %v26644_v56 = vand.u32 4294901760, %v25779_v22  ;;  %v26650_v22 = vand.u32 4294901760, %v25906_v47  ;;  %s26314_s8 = scalar_lea.hbm %s22222_s3, %s17005_s4  ;;  %s21969_s12 = sshll.u32 %s22063_s0, 4  ;;  %s21970_s12 = int_to_ptr.vmem [resolvable:$false] %s21969_s12 }
0x1983   : > { %v26656_v47 = vand.u32 4294901760, %v25996_v50  ;;  %v26660_v50 = vld [vmem:[#allocation35_spill] sm:$0xff]  ;;  %v16411_v36 = vand.u32 4294901760, %v26269_v45  ;;  %s21971_s13 = scalar_lea.vmem %s21970_s12, 32  ;;  %p21972_p0 = scmp.lt.s32.totalorder %s26316_s6, %s21970_s12 }
0x1984   : > { %21333 = vmatpush3.bf16.msra.mxu0 %v26633_v42  ;;  %21405 = vmatpush3.bf16.msra.mxu1 %v25855_v29  ;;  %v26639_v29 = vand.u32 4294901760, %v25721_v25  ;;  %v26645_v25 = vand.u32 4294901760, %v25788_v52  ;;  %v26651_v52 = vand.u32 4294901760, %v25914_v37  ;;  %v26657_v37 = vand.u32 4294901760, %v26002_v1  ;;  %p21973_p1 = scmp.lt.s32.totalorder %s21971_s13, %s21965_s11 }
0x1985   : > { %21367 = vmatprep.subr.bf16.mxu0 %v21366_v7  ;;  %21407 = vmatprep.subr.bf16.mxu1 %v25884_v11  ;;  %v21374_v11 = vpack.c.bf16 %v26641_v21, %v26640_v39  ;;  %v26663_v1 = vmov 0.0   ;;  %v16404_v42 = vand.u32 4294901760, %v26267_v61  ;;  %v16412_v26 = vsub.f32 %v26269_v45, %v16411_v36 }
0x1986   : > { %v21372_v2 = vpack.c.bf16 %v26639_v29, %v26638_v14  ;;  %v21390_v58 = vpack.c.bf16 %v26657_v37, %v26656_v47  ;;  %p21974_p2 = por %p21973_p1, %p21972_p0 }
0x1987   : > { %15909 = vmatmul.mubr.f32.vlgmr.msra.gmra.mrb[66].mxu0 %v15535_v35  ;;  %v21386_v35 = vpack.c.bf16 %v26653_v34, %v26652_v24  ;;  %v21458_v38 = vpack.c.bf16 %v16411_v36, %v16404_v42 }
0x1988   : > { %21369 = vmatpush3.bf16.msra.mxu0 %v21368_v51  ;;  %16183 = vmatprep.mubr.f32.mxu0 %v15528_v6  ;;  %v21384_v6 = vpack.c.bf16 %v26651_v52, %v26650_v22  ;;  %v16405_v51 = vsub.f32 %v26267_v61, %v16404_v42  ;;  %p21975_p3 = pnand %p21974_p2, %p21968_p13 }
0x1989   : > { %21409 = vmatpush3.bf16.msra.mxu1 %v25903_v19  ;;  %21371 = vmatprep.subr.bf16.mxu0 %v21370_v5  ;;  %v21378_v19 = vpack.c.bf16 %v26645_v25, %v26644_v56  ;;  %v16413_v5 = vand.u32 4294901760, %v16412_v26  ;;  %v15420_v56 = vld [vmem:[%s22207_s20] sm:$0x1] }
0x198a   : > { %21411 = vmatprep.subr.bf16.mxu1 %v25932_v49  ;;  %v21380_v49 = vpack.c.bf16 %v26647_v4, %v26646_v23  ;;  %v16406_v60 = vand.u32 4294901760, %v16405_v51 }
0x198c   : > { %21373 = vmatpush3.bf16.msra.mxu0 %v21372_v2  ;;  %v21440_v14 = vpack.c.bf16 %v16413_v5, %v16406_v60  ;;  %v21446_v2 = vpack.c.bf16 %v26269_v45, %v26267_v61 }
0x198d   : > { %21413 = vmatpush3.bf16.msra.mxu1 %v25951_v8  ;;  %21375 = vmatprep.subr.bf16.mxu0 %v21374_v11  ;;  %v21382_v8 = vpack.c.bf16 %v26649_v53, %v26648_v48 }
0x198e   : > { %21415 = vmatprep.subr.bf16.mxu1 %v26615_v59  ;;  %v21388_v59 = vpack.c.bf16 %v26655_v33, %v26654_v28 }
0x1990   : > { %21377 = vmatpush3.bf16.msra.mxu0 %v21376_v46 }
0x1991   : > { %21417 = vmatpush3.bf16.msra.mxu1 %v26617_v63  ;;  %21379 = vmatprep.subr.bf16.mxu0 %v21378_v19 }
0x1992   : > { %21419 = vmatprep.subr.bf16.mxu1 %v26619_v0 }
0x1994   : > { %21381 = vmatpush3.bf16.msra.mxu0 %v21380_v49 }
0x1995   : > { %21421 = vmatpush3.bf16.msra.mxu1 %v26621_v10  ;;  %21383 = vmatprep.subr.bf16.mxu0 %v21382_v8 }
0x1996   : > { %21423 = vmatprep.subr.bf16.mxu1 %v26047_v62  ;;  %v21392_v62 = vpack.c.bf16 %v26659_v12, %v26658_v17 }
0x1998   : > { %21385 = vmatpush3.bf16.msra.mxu0 %v21384_v6 }
0x1999   : > { %21425 = vmatpush3.bf16.msra.mxu1 %v26055_v41  ;;  %21387 = vmatprep.subr.bf16.mxu0 %v21386_v35  ;;  %v26662_v41 = vmov 0.0|0.0  }
0x199a   : > { %21427 = vmatprep.subr.bf16.mxu1 %v26058_v16  ;;  %v16309_v16 = vand.u32 4294901760, %v16300_v18 }
0x199c   : > { %21389 = vmatpush3.bf16.msra.mxu0 %v21388_v59  ;;  %v26255_v0 = vsub.f32 %v16300_v18, %v16309_v16 }
0x199d   : > { %21429 = vmatpush3.bf16.msra.mxu1 %v26062_v54  ;;  %21391 = vmatprep.subr.bf16.mxu0 %v21390_v58  ;;  %v16312_v54 = vand.u32 4294901760, %v16301_v3 }
0x199f   : > { %v26253_v63 = vpack.c.bf16 %v16312_v54, %v16309_v16  ;;  %v26257_v10 = vsub.f32 %v16301_v3, %v16312_v54 }
0x19a0   : > { %16289 = vmatmul.mubr.f32.vlgmr.msra.gmra.mrb[58].mxu1 %v26108_v15  ;;  %21393 = vmatpush3.bf16.msra.mxu0 %v21392_v62 }
0x19a1   : > { %21395 = vmatprep.subr.bf16.mxu0 %v26660_v50  ;;  %v16397_v43 = vand.u32 4294901760, %v26257_v10  ;;  %v21443_v29 = vpack.c.bf16 %v26257_v10, %v26255_v0 }
0x19a3   : > { %v16398_v13 = vsub.f32 %v26257_v10, %v16397_v43 }
0x19a4   : > { %21397 = vmatpush3.bf16.msra.mxu0 %v26661_v9 }
0x19a5   : > { %21430 = vmatprep.subr.bf16.mxu0 %v26662_v41  ;;  %v16399_v7 = vand.u32 4294901760, %v16398_v13 }
0x19a7   : > { %16185 = vmatmul.mubr.f32.vlgmr.msra.gmra.mrb[68].mxu0 %v26108_v15  ;;  %v16390_v15 = vand.u32 4294901760, %v26255_v0 }
0x19a8   : > { %19836 = vmatprep.mubr.msk.f32.mxu0 %vm22060_vm0, %v26663_v1  ;;  %21432 = vmatpush3.bf16.msra.mxu0 %v26253_v63 }
0x19a9   : > { %21433 = vmatprep.subr.bf16.mxu0 %v26662_v41  ;;  %v16391_v57 = vsub.f32 %v26255_v0, %v16390_v15  ;;  %v21455_v30 = vpack.c.bf16 %v16397_v43, %v16390_v15 }
0x19ab   : > { %v16392_v32 = vand.u32 4294901760, %v16391_v57 }
0x19ac   : > { %21435 = vmatpush3.bf16.msra.mxu0 %v26265_v20 }
0x19ad   : > { %21436 = vmatprep.subr.bf16.mxu0 %v26662_v41  ;;  %v21437_v40 = vpack.c.bf16 %v16399_v7, %v16392_v32 }
0x1a32   : > { %v17873_v39 = vpop.f32.mrb[54].mxu1 }
0x1a33   : > { %v17874_v21 = vpop.f32.mrb[55].mxu1 }
0x1a34   : > { %v17875_v11 = vadd.f32 %v17874_v21, %v17873_v39 }
0x1a3a   : > { %v17838_v46 = vpop.f32.mrb[64].mxu0 }
0x1a3b   : > { %v17839_v25 = vpop.f32.mrb[65].mxu0 }
0x1a3c   : > { %v17840_v19 = vadd.f32 %v17839_v25, %v17838_v46 }
0x1a3e   : > { %v15541_v23 = vadd.f32 %v17840_v19, %v15420_v56 }
0x1a40   : > { %v15773_v4 = vadd.f32 %v17875_v11, %v15541_v23 }
0x1a52   : > { %v17943_v49 = vpop.f32.mrb[56].mxu1 }
0x1a53   : > { %v17944_v48 = vpop.f32.mrb[57].mxu1 }
0x1a54   : > { %v17945_v53 = vadd.f32 %v17944_v48, %v17943_v49 }
0x1a5a   : > { %v17908_v8 = vpop.f32.mrb[66].mxu0 }
0x1a5b   : > { %v17909_v22 = vpop.f32.mrb[67].mxu0 }
0x1a5c   : > { %v17910_v52 = vadd.f32 %v17909_v22, %v17908_v8 }
0x1a5e   : > { %v15911_v6 = vadd.f32 %v17910_v52, %v15773_v4 }
0x1a60   : > { %v16019_v24 = vadd.f32 %v17945_v53, %v15911_v6 }
0x1a73   : > { %v18013_v34 = vpop.f32.mrb[58].mxu1 }
0x1a74   : > { %v18014_v35 = vpop.f32.mrb[59].mxu1 }
0x1a75   : > { %v18015_v28 = vadd.f32 %v18014_v35, %v18013_v34 }
0x1a7a   : > { %v17978_v33 = vpop.f32.mrb[68].mxu0 }
0x1a7b   : > { %v17979_v59 = vpop.f32.mrb[69].mxu0 }
0x1a7c   : > { %v17980_v47 = vadd.f32 %v17979_v59, %v17978_v33 }
0x1a7e   : > { %v16187_v37 = vadd.f32 %v17980_v47, %v16019_v24 }
0x1a80   : > { %v16291_v58 = vadd.f32 %v18015_v28, %v16187_v37 }
0x1a82   : > { %v16295_v17 = vmin.f32 %v16291_v58, 0.0  ;;  %vm16294_vm6 = vcmp.gt.f32.partialorder %v16291_v58, 0.0 }
0x1a84   : > { %v16296_v12 = vmul.f32 1.442695, %v16295_v17 }
0x1a86   : > { %21959 = vpow2.f32 %v16296_v12 }
0x1a90   : > { %v21960_v62 = vpop.eup %21959 }
0x1a91   : > { %v17004_v50 = vadd.f32 -1.0, %v21960_v62 }
0x1a93   : > { %v16299_v9 = vsel %vm16294_vm6, %v16291_v58, %v17004_v50 }
0x1a94   : > { %v16306_v18 = vsel %vm8038_vm4, %v16299_v9, 0 }
0x1a95   : > { %v16377_v3 = vand.u32 4294901760, %v16306_v18 }
0x1a97   : > { %v16378_v16 = vsub.f32 %v16306_v18, %v16377_v3 }
0x1a99   : > { %v16379_v54 = vand.u32 4294901760, %v16378_v16 }
0x1a9b   : > { %v16380_v0 = vsub.f32 %v16378_v16, %v16379_v54 }
0x1a9d   : > { %v16381_v10 = vand.u32 4294901760, %v16380_v0 }
0x1a9f   : > { %19837 = vmatmul.mubr.f32.vlgmr.msra.gmra.mrb[70].mxu0 %v16381_v10 }
0x1aa0   : > { %21438 = vmatpush3.bf16.msra.mxu0 %v21437_v40  ;;  %19847 = vmatprep.mubr.msk.f32.mxu0 %vm22060_vm0, %v26663_v1 }
0x1aa1   : > { %21439 = vmatprep.subr.bf16.mxu0 %v26662_v41 }
0x1aa4   : > { %21441 = vmatpush3.bf16.msra.mxu0 %v21440_v14 }
0x1aa5   : > { %21442 = vmatprep.subr.bf16.mxu0 %v26662_v41 }
0x1aa7   : > { %19848 = vmatmul.mubr.f32.vlgmr.msra.gmra.mrb[70].mxu0 %v16377_v3 }
0x1aa8   : > { %21444 = vmatpush3.bf16.msra.mxu0 %v21443_v29  ;;  %19858 = vmatprep.mubr.msk.f32.mxu0 %vm22060_vm0, %v26663_v1 }
0x1aa9   : > { %21445 = vmatprep.subr.bf16.mxu0 %v26662_v41 }
0x1aac   : > { %21447 = vmatpush3.bf16.msra.mxu0 %v21446_v2 }
0x1aad   : > { %21448 = vmatprep.subr.bf16.mxu0 %v26662_v41 }
0x1aaf   : > { %19859 = vmatmul.mubr.f32.vlgmr.msra.gmra.mrb[70].mxu0 %v16378_v16 }
0x1ab0   : > { %21450 = vmatpush3.bf16.msra.mxu0 %v26253_v63  ;;  %19869 = vmatprep.mubr.msk.f32.mxu0 %vm22060_vm0, %v26663_v1 }
0x1ab1   : > { %21451 = vmatprep.subr.bf16.mxu0 %v26662_v41 }
0x1ab4   : > { %21453 = vmatpush3.bf16.msra.mxu0 %v26265_v20 }
0x1ab5   : > { %21454 = vmatprep.subr.bf16.mxu0 %v26662_v41 }
0x1ab7   : > { %19870 = vmatmul.mubr.f32.vlgmr.msra.gmra.mrb[70].mxu0 %v16379_v54 }
0x1ab8   : > { %21456 = vmatpush3.bf16.msra.mxu0 %v21455_v30  ;;  %19880 = vmatprep.mubr.msk.f32.mxu0 %vm22060_vm0, %v26663_v1 }
0x1ab9   : > { %21457 = vmatprep.subr.bf16.mxu0 %v26662_v41 }
0x1abc   : > { %21459 = vmatpush3.bf16.msra.mxu0 %v21458_v38 }
0x1abd   : > { %21460 = vmatprep.subr.bf16.mxu0 %v26662_v41 }
0x1abf   : > { %19881 = vmatmul.mubr.f32.vlgmr.msra.gmra.mrb[70].mxu0 %v16377_v3 }
0x1ac0   : > { %21462 = vmatpush3.bf16.msra.mxu0 %v26253_v63  ;;  %19891 = vmatprep.mubr.msk.f32.mxu0 %vm22060_vm0, %v26663_v1 }
0x1ac1   : > { %21463 = vmatprep.subr.bf16.mxu0 %v26662_v41 }
0x1ac4   : > { %21465 = vmatpush3.bf16.msra.mxu0 %v26265_v20 }
0x1ac7   : > { %19892 = vmatmul.mubr.f32.vlgmr.msra.gmra.mrb[70].mxu0 %v16377_v3 }
0x1b9a   : > { %v16789_v27 = vpop.f32.mrb[70].mxu0 }
0x1b9b   : > { %v21492_v44 = vadd.f32 %v16789_v27, %v16304_v31  ;;  %v19893_v55 = vpop.f32.mrb[71].mxu0 }
0x1b9d   : > { %v16794_v15 = vsel %vm16793_vm7, %v21492_v44, -inf }
0x1b9e   : > { %16795 = vmax.xlane.f32.xlu0 %v16794_v15 }
0x1c2b   : > { %v16796_v43 = vpop.xlane.xlu0 %16795 }
0x1c2c   : > { %v16797_v63 = vsub.f32 %v21492_v44, %v16796_v43 }
0x1c2e   : > { %v16798_v61 = vmul.f32 1.442695, %v16797_v63 }
0x1c30   : > { %21961 = vpow2.f32 %v16798_v61 }
0x1c3a   : > { %v21962_v1 = vpop.eup %21961 }
0x1c3b   : > { %v16800_v41 = vsel %vm16793_vm7, %v21962_v1, 0.0 }
0x1c3c   : > { %16801 = vadd.xlane.f32.xlu1 %v16800_v41 }
0x1cc9   : > { %v16802_v20 = vpop.xlane.xlu1 %16801 }
0x1cca   : > { %21963 = vlog2.f32 %v16802_v20 }
0x1cd4   : > { %v21964_v45 = vpop.eup %21963 }
0x1cd5   : > { %v16804_v57 = vmul.f32 0.6931472, %v21964_v45 }
0x1cd7   : > { %v16805_v13 = vsub.f32 %v16797_v63, %v16804_v57 }
0x1cd9   : > { %16806 = vst.msk [vmem:[%s922_s5] sm:$0x1] %vm16793_vm7, %v16805_v13 }
0x1cda   : > { %21978 = shalt.err (!%p21975_p3)
}
0x1cdb   : > { %s21979_s5 = scalar_lea.hbm %s26314_s8, 16  ;;  %s21983_s4 = scalar_lea.hbm %s22222_s3, 32 }
0x1cdc   : > { %p21980_p4 = scmp.ne.s32.totalorder %s26314_s8, %s21979_s5  ;;  %p21984_p9 = scmp.lt.u32.totalorder %s26314_s8, %s22222_s3 }
0x1cdd   : > { %p21985_p10 = scmp.lt.u32.totalorder %s21983_s4, %s21979_s5  ;;  %p21987_p12 = scmp.lt.u32.totalorder %s21979_s5, %s26314_s8 }
0x1cde   : > { %p21981_p7 = pnand %p21980_p4, %p22262_p5 }
0x1cdf   : > { %p21986_p11 = por %p21985_p10, %p21984_p9 }
0x1ce0   : > { %p21982_p8 = pneg %p21981_p7 }
0x1ce1   : > { %p21988_p0 = por %p21987_p12, %p21986_p11 }
0x1ce3   : > { %p21989_p13 = pnand %p21988_p0, %p21982_p8 }
0x1ce5   : > { %21992 = shalt.err (!%p21989_p13)
}
0x1ce6   : > { %21830 = dma.vmem_to_hbm [thread:$0]  (%p22262_p5), %s26316_s6, 16, %s26314_s8, %s16808_s9  }
0x1ce7 PF: > { %p21836_p1 = scmp.ge.s32.totalorder %s22027_s22, 2  ;;  %s16832_s13 = sand.u32 1, %s22015_s15  }
0x1ce8   : > { %s16833_s12 = scalar_lea.sflag [#allocation3], %s16832_s13 }
0x1ce9   : > { %p21833_p2 = pnand %p21836_p1, %p22266_p6 }
0x1ceb   : > { %22010 = dma.done.wait (!%p21833_p2), %s16833_s12, 16  }
0x1cec   : > { %22012 = vsyncadd (!%p21833_p2), %s16833_s12, 4294967280  ;;  %p71_p3 = scmp.ge.s32.totalorder %s22249_s26, 4   ;;  %s26665_s15 = smov %s22019_s16 }
0x1ced   : > { %s26666_s16 = smov %s22023_s18  ;;  %s26667_s18 = smov %s22260_s2 }
0x1cee   : > { %s26668_s22 = smov %s22249_s26  ;;  %73 = sbr.rel (!%p71_p3) target bundleno = 65 (0x41), region = 221 }
0x1cf5   :  { %16837 = vsyncpa [#allocation3], 1 }
0x1cf6   :  { %16839 = vsyncpa [#allocation3 + $0x1], 1 }

</bundles_post_ra>
